<compile_context>
chip_gen: v6e
topology: v6e:2x2x1
jax: 0.10.0
libtpu: 0.0.40
codegen_flags: <defaults>
</compile_context>

<pallas_src>
import jax
import jax.numpy as jnp
from jax.experimental import pallas as pl
from jax.experimental.pallas import tpu as pltpu

# ----------------------------- model config ---------------------------------
VOCAB = 100
VOCAB_PAD = 128          # pad vocab to a lane-aligned contraction dim
HIDDEN = 32
NUM_HEADS = 4
HEAD_DIM = HIDDEN // NUM_HEADS
FFN = 64
NUM_LAYERS = 2
NUM_LABELS = 3
LN_EPS = 1e-7            # DeBERTa layer-norm eps
MAX_BATCH_BLOCK = 32     # B_BLK*S = 256 -> fills v6e/v7x MXU M dim


# ------------------------------ shared math ----------------------------------
def _layernorm(x, g, b, eps=LN_EPS):
    mu = jnp.mean(x, axis=-1, keepdims=True)
    var = jnp.mean((x - mu) ** 2, axis=-1, keepdims=True)
    return (x - mu) * jax.lax.rsqrt(var + eps) * g + b


# ------------------------------ fused kernel ---------------------------------
def fused_forward_kernel(ids_ref, mask_ref,
                         embed_ref, emb_ln_ref, wqkv_ref, bqkv_ref, wo_ref,
                         w1_ref, b1_ref, w2_ref, lnb_ref, fcw_ref, fcb_ref,
                         o_ref):
    b_blk, seq = ids_ref.shape
    vocab_pad, hidden = embed_ref.shape
    num_layers = wqkv_ref.shape[0]
    num_heads = NUM_HEADS
    dh = hidden // num_heads
    m = b_blk * seq

    # ---- embedding: exact f32 gather via one-hot matmul (vocab padded) -----
    ids = ids_ref[...]                                            # [Bb, S] i32
    iota = jax.lax.broadcasted_iota(jnp.int32, (b_blk, seq, vocab_pad), 2)
    onehot = jnp.where(ids[:, :, None] == iota, 1.0, 0.0)         # f32
    onehot = onehot.reshape(m, vocab_pad)                         # [M, 128]
    emb_ln = emb_ln_ref[...]
    x = jnp.dot(onehot, embed_ref[...], preferred_element_type=jnp.float32)
    x = _layernorm(x, emb_ln[0:1], emb_ln[1:2])                   # [M, H] f32

    # ---- additive key bias, computed once and shared by all layers ---------
    keep = mask_ref[...]                                          # [Bb, S] f32
    bias = ((1.0 - keep) * (-1e9))[:, None, :]                    # [Bb, 1, S]

    for l in range(num_layers):                 # static unrolled layer loop
        ln = lnb_ref[l]                                           # [6, H]
        ln1g, ln1b = ln[0:1], ln[1:2]
        ln2g, ln2b = ln[2:3], ln[3:4]
        bo, b2 = ln[4:5], ln[5:6]

        # fused QKV: single [M,H]@[H,3H] matmul; 1/sqrt(dh) folded into Q.
        qkv = jnp.dot(x.astype(jnp.bfloat16), wqkv_ref[l],
                      preferred_element_type=jnp.float32) + bqkv_ref[l]

        # per-head attention (tiny by construction; examples batched in einsum)
        ctx_heads = []
        for h in range(num_heads):
            q = qkv[:, h * dh:(h + 1) * dh]
            k = qkv[:, hidden + h * dh:hidden + (h + 1) * dh]
            v = qkv[:, 2 * hidden + h * dh:2 * hidden + (h + 1) * dh]
            q = q.reshape(b_blk, seq, dh).astype(jnp.bfloat16)
            k = k.reshape(b_blk, seq, dh).astype(jnp.bfloat16)
            v = v.reshape(b_blk, seq, dh).astype(jnp.bfloat16)

            s = jnp.einsum('bqd,bkd->bqk', q, k,
                           preferred_element_type=jnp.float32) + bias
            s = s - jnp.max(s, axis=-1, keepdims=True)
            p = jnp.exp(s)
            p = p * pl.reciprocal(jnp.sum(p, axis=-1, keepdims=True),
                                  approx=True)
            c = jnp.einsum('bqk,bkd->bqd', p.astype(jnp.bfloat16), v,
                           preferred_element_type=jnp.float32)    # [Bb, S, dh]
            ctx_heads.append(c.reshape(m, dh))
        ctx = jnp.concatenate(ctx_heads, axis=-1)                 # [M, H]

        # output projection: one lane-dense [M,H]@[H,H] matmul
        attn = jnp.dot(ctx.astype(jnp.bfloat16), wo_ref[l],
                       preferred_element_type=jnp.float32) + bo
        h1 = _layernorm(attn + x, ln1g, ln1b)

        # FFN
        f = jnp.dot(h1.astype(jnp.bfloat16), w1_ref[l],
                    preferred_element_type=jnp.float32) + b1_ref[l]
        # TODO(synk): HF DeBERTa uses exact erf GELU; tanh approximation used.
        f = jax.nn.gelu(f, approximate=True)
        f = jnp.dot(f.astype(jnp.bfloat16), w2_ref[l],
                    preferred_element_type=jnp.float32) + b2
        x = _layernorm(f + h1, ln2g, ln2b)

    # ---- classifier on all CLS rows of the block; exact softmax in f32 -----
    cls = x.reshape(b_blk, seq, hidden)[:, 0, :]                  # [Bb, H]
    logits = jnp.dot(cls, fcw_ref[...],
                     preferred_element_type=jnp.float32) + fcb_ref[...]
    logits = logits - jnp.max(logits, axis=-1, keepdims=True)
    e = jnp.exp(logits)
    o_ref[...] = e / jnp.sum(e, axis=-1, keepdims=True)           # [Bb, L]


# ------------------------------ pallas wrapper -------------------------------
_PACKED_ORDER = ('embed', 'emb_ln', 'wqkv', 'bqkv', 'wo', 'w1', 'b1', 'w2',
                 'lnb', 'fc_w', 'fc_b')


@jax.jit
def quality_model_forward(packed, input_ids, attention_mask):
    B, S = input_ids.shape
    b_blk = B if B <= MAX_BATCH_BLOCK else MAX_BATCH_BLOCK   # multiple of 8 when < B
    b_pad = pl.cdiv(B, b_blk) * b_blk

    ids = input_ids.astype(jnp.int32)
    mask = attention_mask.astype(jnp.float32)
    if b_pad != B:
        ids = jnp.pad(ids, ((0, b_pad - B), (0, 0)))
        mask = jnp.pad(mask, ((0, b_pad - B), (0, 0)))        # pad rows: all-masked

    def resident(a):                         # weights: DMA'd once, stay in VMEM
        nd = a.ndim
        return pl.BlockSpec(a.shape, lambda i, _nd=nd: (0,) * _nd)

    weights = [packed[k] for k in _PACKED_ORDER]
    in_specs = ([pl.BlockSpec((b_blk, S), lambda i: (i, 0)),      # ids block
                 pl.BlockSpec((b_blk, S), lambda i: (i, 0))]      # mask block
                + [resident(w) for w in weights])

    out = pl.pallas_call(
        fused_forward_kernel,
        grid=(b_pad // b_blk,),
        in_specs=in_specs,
        out_specs=pl.BlockSpec((b_blk, NUM_LABELS), lambda i: (i, 0)),
        out_shape=jax.ShapeDtypeStruct((b_pad, NUM_LABELS), jnp.float32),
        compiler_params=pltpu.CompilerParams(
            dimension_semantics=("parallel",)),   # v7x: shard blocks over TCs
    )(ids, mask, *weights)
    return out[:B]


# ------------------------------ parameter init -------------------------------
def init_params(key):
    """Standard (PyTorch-like) parameter layout, f32."""
    ks = jax.random.split(key, 2 + NUM_LAYERS)
    params = {
        'embed': 0.02 * jax.random.normal(ks[0], (VOCAB, HIDDEN), jnp.float32),
        'emb_ln_g': jnp.ones((HIDDEN,), jnp.float32),
        'emb_ln_b': jnp.zeros((HIDDEN,), jnp.float32),
        'fc_w': 0.02 * jax.random.normal(ks[1], (HIDDEN, NUM_LABELS), jnp.float32),
        'fc_b': jnp.zeros((NUM_LABELS,), jnp.float32),
        'layers': [],
    }
    for i in range(NUM_LAYERS):
        lk = jax.random.split(ks[2 + i], 6)
        params['layers'].append({
            'wq': 0.02 * jax.random.normal(lk[0], (HIDDEN, HIDDEN), jnp.float32),
            'bq': jnp.zeros((HIDDEN,), jnp.float32),
            'wk': 0.02 * jax.random.normal(lk[1], (HIDDEN, HIDDEN), jnp.float32),
            'bk': jnp.zeros((HIDDEN,), jnp.float32),
            'wv': 0.02 * jax.random.normal(lk[2], (HIDDEN, HIDDEN), jnp.float32),
            'bv': jnp.zeros((HIDDEN,), jnp.float32),
            'wo': 0.02 * jax.random.normal(lk[3], (HIDDEN, HIDDEN), jnp.float32),
            'bo': jnp.zeros((HIDDEN,), jnp.float32),
            'ln1_g': jnp.ones((HIDDEN,), jnp.float32),
            'ln1_b': jnp.zeros((HIDDEN,), jnp.float32),
            'w1': 0.02 * jax.random.normal(lk[4], (HIDDEN, FFN), jnp.float32),
            'b1': jnp.zeros((FFN,), jnp.float32),
            'w2': 0.02 * jax.random.normal(lk[5], (FFN, HIDDEN), jnp.float32),
            'b2': jnp.zeros((HIDDEN,), jnp.float32),
            'ln2_g': jnp.ones((HIDDEN,), jnp.float32),
            'ln2_b': jnp.zeros((HIDDEN,), jnp.float32),
        })
    return params


def pack_params(params):
    """Repack standard weights into the kernel's fused layout."""
    L, H = NUM_LAYERS, HIDDEN
    scale = 1.0 / float(HEAD_DIM) ** 0.5

    def stack(name):
        return jnp.stack([lp[name] for lp in params['layers']])

    # fold 1/sqrt(dh) into the Q projection (weights + bias)
    wqkv = jnp.concatenate([stack('wq') * scale, stack('wk'), stack('wv')],
                           axis=-1)                                  # [L, H, 3H]
    bqkv = jnp.concatenate([stack('bq') * scale, stack('bk'), stack('bv')],
                           axis=-1).reshape(L, 1, 3 * H)             # [L, 1, 3H]

    # LN params + small per-layer biases packed into one [L, 6, H] array
    lnb = jnp.stack([stack('ln1_g'), stack('ln1_b'), stack('ln2_g'),
                     stack('ln2_b'), stack('bo'), stack('b2')], axis=1)

    embed_pad = jnp.zeros((VOCAB_PAD, H), jnp.float32)
    embed_pad = embed_pad.at[:VOCAB].set(params['embed'])

    return {
        'embed': embed_pad,                                          # f32 (exact gather)
        'emb_ln': jnp.stack([params['emb_ln_g'], params['emb_ln_b']]),   # [2, H]
        'wqkv': wqkv.astype(jnp.bfloat16),
        'bqkv': bqkv,
        'wo': stack('wo').astype(jnp.bfloat16),                      # [L, H, H]
        'w1': stack('w1').astype(jnp.bfloat16),                      # [L, H, FFN]
        'b1': stack('b1').reshape(L, 1, FFN),
        'w2': stack('w2').astype(jnp.bfloat16),                      # [L, FFN, H]
        'lnb': lnb,                                                  # [L, 6, H]
        'fc_w': params['fc_w'],                                      # f32
        'fc_b': params['fc_b'].reshape(1, NUM_LABELS),
    }


# ------------------------- pure-JAX reference (f32) --------------------------
def reference_forward(params, input_ids, attention_mask):
    B, S = input_ids.shape
    H, nH = HIDDEN, NUM_HEADS
    dh = H // nH
    x = jnp.take(params['embed'], input_ids, axis=0)
    x = _layernorm(x, params['emb_ln_g'], params['emb_ln_b'])
    bias = (1.0 - attention_mask.astype(jnp.float32))[:, None, None, :] * (-1e9)
    for lp in params['layers']:
        q = x @ lp['wq'] + lp['bq']
        k = x @ lp['wk'] + lp['bk']
        v = x @ lp['wv'] + lp['bv']

        def split(t):
            return t.reshape(B, S, nH, dh).transpose(0, 2, 1, 3)

        qh, kh, vh = split(q), split(k), split(v)
        s = jnp.einsum('bhqd,bhkd->bhqk', qh, kh) / dh ** 0.5 + bias
        p = jax.nn.softmax(s, axis=-1)
        ctx = jnp.einsum('bhqk,bhkd->bhqd', p, vh)
        ctx = ctx.transpose(0, 2, 1, 3).reshape(B, S, H)
        attn = ctx @ lp['wo'] + lp['bo']
        h1 = _layernorm(attn + x, lp['ln1_g'], lp['ln1_b'])
        f = jax.nn.gelu(h1 @ lp['w1'] + lp['b1'], approximate=True)
        f = f @ lp['w2'] + lp['b2']
        x = _layernorm(f + h1, lp['ln2_g'], lp['ln2_b'])
    logits = x[:, 0, :] @ params['fc_w'] + params['fc_b']
    return jax.nn.softmax(logits, axis=-1)


# ----------------------------------- main ------------------------------------
if __name__ == "__main__":
    B, S = 8, 8
    key = jax.random.PRNGKey(0)
    pkey, ikey = jax.random.split(key)

    params = init_params(pkey)
    packed = pack_params(params)

    input_ids = jax.random.randint(ikey, (B, S), 0, VOCAB, dtype=jnp.int32)
    lengths = jnp.array([8, 8, 7, 6, 5, 8, 4, 3], dtype=jnp.int32)
    attention_mask = (jnp.arange(S)[None, :] < lengths[:, None]).astype(jnp.int32)

    probs = quality_model_forward(packed, input_ids, attention_mask)
    probs = jax.block_until_ready(probs)

    assert probs.shape == (B, NUM_LABELS)
    assert bool(jnp.all(jnp.isfinite(probs)))
    assert bool(jnp.allclose(jnp.sum(probs, axis=-1), 1.0, atol=1e-3))

    expected = reference_forward(params, input_ids, attention_mask)
    assert bool(jnp.allclose(probs, expected, atol=2e-2)), (probs, expected)

    print("KERNEL_OK")
</pallas_src>

<mosaic_0001>
module attributes {stable_mosaic.version = 11 : i64} {
  func.func @fused_forward_kernel(%arg0: i32, %arg1: memref<8x8xi32, #tpu.memory_space<vmem>>, %arg2: memref<8x8xf32, #tpu.memory_space<vmem>>, %arg3: memref<128x32xf32, #tpu.memory_space<vmem>>, %arg4: memref<2x32xf32, #tpu.memory_space<vmem>>, %arg5: memref<2x32x96xbf16, #tpu.memory_space<vmem>>, %arg6: memref<2x1x96xf32, #tpu.memory_space<vmem>>, %arg7: memref<2x32x32xbf16, #tpu.memory_space<vmem>>, %arg8: memref<2x32x64xbf16, #tpu.memory_space<vmem>>, %arg9: memref<2x1x64xf32, #tpu.memory_space<vmem>>, %arg10: memref<2x64x32xbf16, #tpu.memory_space<vmem>>, %arg11: memref<2x6x32xf32, #tpu.memory_space<vmem>>, %arg12: memref<32x3xf32, #tpu.memory_space<vmem>>, %arg13: memref<1x3xf32, #tpu.memory_space<vmem>>, %arg14: memref<8x3xf32, #tpu.memory_space<vmem>>) attributes {dimension_semantics = [#tpu.dimension_semantics<parallel>], iteration_bounds = array<i64: 1>, scalar_prefetch = 0 : i64, scratch_operands = 0 : i64, tpu.core_type = #tpu.core_type<tc>, window_params = [{transform_indices = @transform_0, window_bounds = array<i64: 8, 8>}, {transform_indices = @transform_1, window_bounds = array<i64: 8, 8>}, {pipeline_mode = #tpu.pipeline_mode<synchronous>, transform_indices = @transform_2, window_bounds = array<i64: 128, 32>}, {pipeline_mode = #tpu.pipeline_mode<synchronous>, transform_indices = @transform_3, window_bounds = array<i64: 2, 32>}, {pipeline_mode = #tpu.pipeline_mode<synchronous>, transform_indices = @transform_4, window_bounds = array<i64: 2, 32, 96>}, {pipeline_mode = #tpu.pipeline_mode<synchronous>, transform_indices = @transform_5, window_bounds = array<i64: 2, 1, 96>}, {pipeline_mode = #tpu.pipeline_mode<synchronous>, transform_indices = @transform_6, window_bounds = array<i64: 2, 32, 32>}, {pipeline_mode = #tpu.pipeline_mode<synchronous>, transform_indices = @transform_7, window_bounds = array<i64: 2, 32, 64>}, {pipeline_mode = #tpu.pipeline_mode<synchronous>, transform_indices = @transform_8, window_bounds = array<i64: 2, 1, 64>}, {pipeline_mode = #tpu.pipeline_mode<synchronous>, transform_indices = @transform_9, window_bounds = array<i64: 2, 64, 32>}, {pipeline_mode = #tpu.pipeline_mode<synchronous>, transform_indices = @transform_10, window_bounds = array<i64: 2, 6, 32>}, {pipeline_mode = #tpu.pipeline_mode<synchronous>, transform_indices = @transform_11, window_bounds = array<i64: 32, 3>}, {pipeline_mode = #tpu.pipeline_mode<synchronous>, transform_indices = @transform_12, window_bounds = array<i64: 1, 3>}, {transform_indices = @transform_13, window_bounds = array<i64: 8, 3>}]} {
    %c0 = arith.constant 0 : index
    %c0_0 = arith.constant 0 : index
    %0 = vector.load %arg1[%c0, %c0_0] : memref<8x8xi32, #tpu.memory_space<vmem>>, vector<8x8xi32>
    %1 = tpu.iota {dimensions = array<i32: 2>} : vector<8x8x128xi32>
    %2 = vector.shape_cast %0 : vector<8x8xi32> to vector<8x8x1xi32>
    %3 = vector.broadcast %2 : vector<8x8x1xi32> to vector<8x8x128xi32>
    %4 = arith.cmpi eq, %3, %1 : vector<8x8x128xi32>
    %cst = arith.constant 1.000000e+00 : f32
    %cst_1 = arith.constant 0.000000e+00 : f32
    %5 = vector.broadcast %cst : f32 to vector<8x8x128xf32>
    %6 = vector.broadcast %cst_1 : f32 to vector<8x8x128xf32>
    %7 = arith.select %4, %5, %6 : vector<8x8x128xi1>, vector<8x8x128xf32>
    %8 = vector.shape_cast %7 : vector<8x8x128xf32> to vector<64x128xf32>
    %c0_2 = arith.constant 0 : index
    %c0_3 = arith.constant 0 : index
    %9 = vector.load %arg4[%c0_2, %c0_3] : memref<2x32xf32, #tpu.memory_space<vmem>>, vector<2x32xf32>
    %c0_4 = arith.constant 0 : index
    %c0_5 = arith.constant 0 : index
    %10 = vector.load %arg3[%c0_4, %c0_5] : memref<128x32xf32, #tpu.memory_space<vmem>>, vector<128x32xf32>
    %cst_6 = arith.constant dense<0.000000e+00> : vector<64x32xf32>
    %11 = tpu.matmul %8, %10, %cst_6 {dimension_numbers = #tpu.dot_dimension_numbers<[1], [0], [0], [1], [0, 0, 1, 1], [], []>} : vector<64x128xf32>, vector<128x32xf32>, vector<64x32xf32> -> vector<64x32xf32>
    %12 = vector.extract_strided_slice %9 {offsets = [0, 0], sizes = [1, 32], strides = [1, 1]} : vector<2x32xf32> to vector<1x32xf32>
    %13 = vector.extract_strided_slice %9 {offsets = [1, 0], sizes = [1, 32], strides = [1, 1]} : vector<2x32xf32> to vector<1x32xf32>
    %cst_7 = arith.constant dense<0.000000e+00> : vector<64xf32>
    %14 = vector.multi_reduction <add>, %11, %cst_7 [1] : vector<64x32xf32> to vector<64xf32>
    %15 = vector.shape_cast %14 : vector<64xf32> to vector<64x1xf32>
    %cst_8 = arith.constant 3.200000e+01 : f32
    %16 = vector.broadcast %cst_8 : f32 to vector<64x1xf32>
    %17 = arith.divf %15, %16 : vector<64x1xf32>
    %18 = vector.broadcast %17 : vector<64x1xf32> to vector<64x32xf32>
    %19 = arith.subf %11, %18 : vector<64x32xf32>
    %20 = arith.mulf %19, %19 : vector<64x32xf32>
    %cst_9 = arith.constant dense<0.000000e+00> : vector<64xf32>
    %21 = vector.multi_reduction <add>, %20, %cst_9 [1] : vector<64x32xf32> to vector<64xf32>
    %22 = vector.shape_cast %21 : vector<64xf32> to vector<64x1xf32>
    %cst_10 = arith.constant 3.200000e+01 : f32
    %23 = vector.broadcast %cst_10 : f32 to vector<64x1xf32>
    %24 = arith.divf %22, %23 : vector<64x1xf32>
    %25 = vector.broadcast %17 : vector<64x1xf32> to vector<64x32xf32>
    %26 = arith.subf %11, %25 : vector<64x32xf32>
    %cst_11 = arith.constant 1.000000e-07 : f32
    %27 = vector.broadcast %cst_11 : f32 to vector<64x1xf32>
    %28 = arith.addf %24, %27 : vector<64x1xf32>
    %29 = math.rsqrt %28 : vector<64x1xf32>
    %30 = vector.broadcast %29 : vector<64x1xf32> to vector<64x32xf32>
    %31 = arith.mulf %26, %30 : vector<64x32xf32>
    %32 = vector.broadcast %12 : vector<1x32xf32> to vector<64x32xf32>
    %33 = arith.mulf %31, %32 : vector<64x32xf32>
    %34 = vector.broadcast %13 : vector<1x32xf32> to vector<64x32xf32>
    %35 = arith.addf %33, %34 : vector<64x32xf32>
    %c0_12 = arith.constant 0 : index
    %c0_13 = arith.constant 0 : index
    %36 = vector.load %arg2[%c0_12, %c0_13] : memref<8x8xf32, #tpu.memory_space<vmem>>, vector<8x8xf32>
    %cst_14 = arith.constant 1.000000e+00 : f32
    %37 = vector.broadcast %cst_14 : f32 to vector<8x8xf32>
    %38 = arith.subf %37, %36 : vector<8x8xf32>
    %cst_15 = arith.constant -1.000000e+09 : f32
    %39 = vector.broadcast %cst_15 : f32 to vector<8x8xf32>
    %40 = arith.mulf %38, %39 : vector<8x8xf32>
    %41 = vector.shape_cast %40 : vector<8x8xf32> to vector<8x1x8xf32>
    %c0_16 = arith.constant 0 : index
    %c0_17 = arith.constant 0 : index
    %c0_18 = arith.constant 0 : index
    %42 = vector.load %arg11[%c0_16, %c0_17, %c0_18] : memref<2x6x32xf32, #tpu.memory_space<vmem>>, vector<1x6x32xf32>
    %43 = vector.shape_cast %42 : vector<1x6x32xf32> to vector<6x32xf32>
    %44 = vector.extract_strided_slice %43 {offsets = [0, 0], sizes = [1, 32], strides = [1, 1]} : vector<6x32xf32> to vector<1x32xf32>
    %45 = vector.extract_strided_slice %43 {offsets = [1, 0], sizes = [1, 32], strides = [1, 1]} : vector<6x32xf32> to vector<1x32xf32>
    %46 = vector.extract_strided_slice %43 {offsets = [2, 0], sizes = [1, 32], strides = [1, 1]} : vector<6x32xf32> to vector<1x32xf32>
    %47 = vector.extract_strided_slice %43 {offsets = [3, 0], sizes = [1, 32], strides = [1, 1]} : vector<6x32xf32> to vector<1x32xf32>
    %48 = vector.extract_strided_slice %43 {offsets = [4, 0], sizes = [1, 32], strides = [1, 1]} : vector<6x32xf32> to vector<1x32xf32>
    %49 = vector.extract_strided_slice %43 {offsets = [5, 0], sizes = [1, 32], strides = [1, 1]} : vector<6x32xf32> to vector<1x32xf32>
    %50 = arith.truncf %35 : vector<64x32xf32> to vector<64x32xbf16>
    %c0_19 = arith.constant 0 : index
    %c0_20 = arith.constant 0 : index
    %c0_21 = arith.constant 0 : index
    %51 = vector.load %arg5[%c0_19, %c0_20, %c0_21] : memref<2x32x96xbf16, #tpu.memory_space<vmem>>, vector<1x32x96xbf16>
    %52 = vector.shape_cast %51 : vector<1x32x96xbf16> to vector<32x96xbf16>
    %cst_22 = arith.constant dense<0.000000e+00> : vector<64x96xf32>
    %53 = tpu.matmul %50, %52, %cst_22 {dimension_numbers = #tpu.dot_dimension_numbers<[1], [0], [0], [1], [0, 0, 1, 1], [], []>} : vector<64x32xbf16>, vector<32x96xbf16>, vector<64x96xf32> -> vector<64x96xf32>
    %c0_23 = arith.constant 0 : index
    %c0_24 = arith.constant 0 : index
    %c0_25 = arith.constant 0 : index
    %54 = vector.load %arg6[%c0_23, %c0_24, %c0_25] : memref<2x1x96xf32, #tpu.memory_space<vmem>>, vector<1x1x96xf32>
    %55 = vector.shape_cast %54 : vector<1x1x96xf32> to vector<1x96xf32>
    %56 = vector.broadcast %55 : vector<1x96xf32> to vector<64x96xf32>
    %57 = arith.addf %53, %56 : vector<64x96xf32>
    %58 = vector.extract_strided_slice %57 {offsets = [0, 0], sizes = [64, 8], strides = [1, 1]} : vector<64x96xf32> to vector<64x8xf32>
    %59 = vector.extract_strided_slice %57 {offsets = [0, 32], sizes = [64, 8], strides = [1, 1]} : vector<64x96xf32> to vector<64x8xf32>
    %60 = vector.extract_strided_slice %57 {offsets = [0, 64], sizes = [64, 8], strides = [1, 1]} : vector<64x96xf32> to vector<64x8xf32>
    %61 = vector.shape_cast %58 : vector<64x8xf32> to vector<8x8x8xf32>
    %62 = arith.truncf %61 : vector<8x8x8xf32> to vector<8x8x8xbf16>
    %63 = vector.shape_cast %59 : vector<64x8xf32> to vector<8x8x8xf32>
    %64 = arith.truncf %63 : vector<8x8x8xf32> to vector<8x8x8xbf16>
    %65 = vector.shape_cast %60 : vector<64x8xf32> to vector<8x8x8xf32>
    %66 = arith.truncf %65 : vector<8x8x8xf32> to vector<8x8x8xbf16>
    "tpu.trace_start"() <{level = 10 : i32, message = "bqd,bkd->bqk"}> : () -> ()
    %cst_26 = arith.constant dense<0.000000e+00> : vector<8x8x8xf32>
    %67 = tpu.matmul %62, %64, %cst_26 {dimension_numbers = #tpu.dot_dimension_numbers<[2], [2], [1], [1], [0, 0, 0, 1, 1, 1], [0], [0]>} : vector<8x8x8xbf16>, vector<8x8x8xbf16>, vector<8x8x8xf32> -> vector<8x8x8xf32>
    "tpu.trace_stop"() : () -> ()
    %68 = vector.broadcast %41 : vector<8x1x8xf32> to vector<8x8x8xf32>
    %69 = arith.addf %67, %68 : vector<8x8x8xf32>
    %cst_27 = arith.constant dense<0xFF800000> : vector<8x8xf32>
    %70 = vector.multi_reduction <maximumf>, %69, %cst_27 [2] : vector<8x8x8xf32> to vector<8x8xf32>
    %71 = vector.shape_cast %70 : vector<8x8xf32> to vector<8x8x1xf32>
    %72 = vector.broadcast %71 : vector<8x8x1xf32> to vector<8x8x8xf32>
    %73 = arith.subf %69, %72 : vector<8x8x8xf32>
    %74 = math.exp %73 : vector<8x8x8xf32>
    %cst_28 = arith.constant dense<0.000000e+00> : vector<8x8xf32>
    %75 = vector.multi_reduction <add>, %74, %cst_28 [2] : vector<8x8x8xf32> to vector<8x8xf32>
    %76 = vector.shape_cast %75 : vector<8x8xf32> to vector<8x8x1xf32>
    %77 = tpu.reciprocal %76 {approx = true} : vector<8x8x1xf32> -> vector<8x8x1xf32>
    %78 = vector.broadcast %77 : vector<8x8x1xf32> to vector<8x8x8xf32>
    %79 = arith.mulf %74, %78 : vector<8x8x8xf32>
    %80 = arith.truncf %79 : vector<8x8x8xf32> to vector<8x8x8xbf16>
    "tpu.trace_start"() <{level = 10 : i32, message = "bqk,bkd->bqd"}> : () -> ()
    %cst_29 = arith.constant dense<0.000000e+00> : vector<8x8x8xf32>
    %81 = tpu.matmul %80, %66, %cst_29 {dimension_numbers = #tpu.dot_dimension_numbers<[2], [1], [1], [2], [0, 0, 0, 1, 1, 2], [0], [0]>} : vector<8x8x8xbf16>, vector<8x8x8xbf16>, vector<8x8x8xf32> -> vector<8x8x8xf32>
    "tpu.trace_stop"() : () -> ()
    %82 = vector.shape_cast %81 : vector<8x8x8xf32> to vector<64x8xf32>
    %83 = vector.extract_strided_slice %57 {offsets = [0, 8], sizes = [64, 8], strides = [1, 1]} : vector<64x96xf32> to vector<64x8xf32>
    %84 = vector.extract_strided_slice %57 {offsets = [0, 40], sizes = [64, 8], strides = [1, 1]} : vector<64x96xf32> to vector<64x8xf32>
    %85 = vector.extract_strided_slice %57 {offsets = [0, 72], sizes = [64, 8], strides = [1, 1]} : vector<64x96xf32> to vector<64x8xf32>
    %86 = vector.shape_cast %83 : vector<64x8xf32> to vector<8x8x8xf32>
    %87 = arith.truncf %86 : vector<8x8x8xf32> to vector<8x8x8xbf16>
    %88 = vector.shape_cast %84 : vector<64x8xf32> to vector<8x8x8xf32>
    %89 = arith.truncf %88 : vector<8x8x8xf32> to vector<8x8x8xbf16>
    %90 = vector.shape_cast %85 : vector<64x8xf32> to vector<8x8x8xf32>
    %91 = arith.truncf %90 : vector<8x8x8xf32> to vector<8x8x8xbf16>
    "tpu.trace_start"() <{level = 10 : i32, message = "bqd,bkd->bqk"}> : () -> ()
    %cst_30 = arith.constant dense<0.000000e+00> : vector<8x8x8xf32>
    %92 = tpu.matmul %87, %89, %cst_30 {dimension_numbers = #tpu.dot_dimension_numbers<[2], [2], [1], [1], [0, 0, 0, 1, 1, 1], [0], [0]>} : vector<8x8x8xbf16>, vector<8x8x8xbf16>, vector<8x8x8xf32> -> vector<8x8x8xf32>
    "tpu.trace_stop"() : () -> ()
    %93 = vector.broadcast %41 : vector<8x1x8xf32> to vector<8x8x8xf32>
    %94 = arith.addf %92, %93 : vector<8x8x8xf32>
    %cst_31 = arith.constant dense<0xFF800000> : vector<8x8xf32>
    %95 = vector.multi_reduction <maximumf>, %94, %cst_31 [2] : vector<8x8x8xf32> to vector<8x8xf32>
    %96 = vector.shape_cast %95 : vector<8x8xf32> to vector<8x8x1xf32>
    %97 = vector.broadcast %96 : vector<8x8x1xf32> to vector<8x8x8xf32>
    %98 = arith.subf %94, %97 : vector<8x8x8xf32>
    %99 = math.exp %98 : vector<8x8x8xf32>
    %cst_32 = arith.constant dense<0.000000e+00> : vector<8x8xf32>
    %100 = vector.multi_reduction <add>, %99, %cst_32 [2] : vector<8x8x8xf32> to vector<8x8xf32>
    %101 = vector.shape_cast %100 : vector<8x8xf32> to vector<8x8x1xf32>
    %102 = tpu.reciprocal %101 {approx = true} : vector<8x8x1xf32> -> vector<8x8x1xf32>
    %103 = vector.broadcast %102 : vector<8x8x1xf32> to vector<8x8x8xf32>
    %104 = arith.mulf %99, %103 : vector<8x8x8xf32>
    %105 = arith.truncf %104 : vector<8x8x8xf32> to vector<8x8x8xbf16>
    "tpu.trace_start"() <{level = 10 : i32, message = "bqk,bkd->bqd"}> : () -> ()
    %cst_33 = arith.constant dense<0.000000e+00> : vector<8x8x8xf32>
    %106 = tpu.matmul %105, %91, %cst_33 {dimension_numbers = #tpu.dot_dimension_numbers<[2], [1], [1], [2], [0, 0, 0, 1, 1, 2], [0], [0]>} : vector<8x8x8xbf16>, vector<8x8x8xbf16>, vector<8x8x8xf32> -> vector<8x8x8xf32>
    "tpu.trace_stop"() : () -> ()
    %107 = vector.shape_cast %106 : vector<8x8x8xf32> to vector<64x8xf32>
    %108 = vector.extract_strided_slice %57 {offsets = [0, 16], sizes = [64, 8], strides = [1, 1]} : vector<64x96xf32> to vector<64x8xf32>
    %109 = vector.extract_strided_slice %57 {offsets = [0, 48], sizes = [64, 8], strides = [1, 1]} : vector<64x96xf32> to vector<64x8xf32>
    %110 = vector.extract_strided_slice %57 {offsets = [0, 80], sizes = [64, 8], strides = [1, 1]} : vector<64x96xf32> to vector<64x8xf32>
    %111 = vector.shape_cast %108 : vector<64x8xf32> to vector<8x8x8xf32>
    %112 = arith.truncf %111 : vector<8x8x8xf32> to vector<8x8x8xbf16>
    %113 = vector.shape_cast %109 : vector<64x8xf32> to vector<8x8x8xf32>
    %114 = arith.truncf %113 : vector<8x8x8xf32> to vector<8x8x8xbf16>
    %115 = vector.shape_cast %110 : vector<64x8xf32> to vector<8x8x8xf32>
    %116 = arith.truncf %115 : vector<8x8x8xf32> to vector<8x8x8xbf16>
    "tpu.trace_start"() <{level = 10 : i32, message = "bqd,bkd->bqk"}> : () -> ()
    %cst_34 = arith.constant dense<0.000000e+00> : vector<8x8x8xf32>
    %117 = tpu.matmul %112, %114, %cst_34 {dimension_numbers = #tpu.dot_dimension_numbers<[2], [2], [1], [1], [0, 0, 0, 1, 1, 1], [0], [0]>} : vector<8x8x8xbf16>, vector<8x8x8xbf16>, vector<8x8x8xf32> -> vector<8x8x8xf32>
    "tpu.trace_stop"() : () -> ()
    %118 = vector.broadcast %41 : vector<8x1x8xf32> to vector<8x8x8xf32>
    %119 = arith.addf %117, %118 : vector<8x8x8xf32>
    %cst_35 = arith.constant dense<0xFF800000> : vector<8x8xf32>
    %120 = vector.multi_reduction <maximumf>, %119, %cst_35 [2] : vector<8x8x8xf32> to vector<8x8xf32>
    %121 = vector.shape_cast %120 : vector<8x8xf32> to vector<8x8x1xf32>
    %122 = vector.broadcast %121 : vector<8x8x1xf32> to vector<8x8x8xf32>
    %123 = arith.subf %119, %122 : vector<8x8x8xf32>
    %124 = math.exp %123 : vector<8x8x8xf32>
    %cst_36 = arith.constant dense<0.000000e+00> : vector<8x8xf32>
    %125 = vector.multi_reduction <add>, %124, %cst_36 [2] : vector<8x8x8xf32> to vector<8x8xf32>
    %126 = vector.shape_cast %125 : vector<8x8xf32> to vector<8x8x1xf32>
    %127 = tpu.reciprocal %126 {approx = true} : vector<8x8x1xf32> -> vector<8x8x1xf32>
    %128 = vector.broadcast %127 : vector<8x8x1xf32> to vector<8x8x8xf32>
    %129 = arith.mulf %124, %128 : vector<8x8x8xf32>
    %130 = arith.truncf %129 : vector<8x8x8xf32> to vector<8x8x8xbf16>
    "tpu.trace_start"() <{level = 10 : i32, message = "bqk,bkd->bqd"}> : () -> ()
    %cst_37 = arith.constant dense<0.000000e+00> : vector<8x8x8xf32>
    %131 = tpu.matmul %130, %116, %cst_37 {dimension_numbers = #tpu.dot_dimension_numbers<[2], [1], [1], [2], [0, 0, 0, 1, 1, 2], [0], [0]>} : vector<8x8x8xbf16>, vector<8x8x8xbf16>, vector<8x8x8xf32> -> vector<8x8x8xf32>
    "tpu.trace_stop"() : () -> ()
    %132 = vector.shape_cast %131 : vector<8x8x8xf32> to vector<64x8xf32>
    %133 = vector.extract_strided_slice %57 {offsets = [0, 24], sizes = [64, 8], strides = [1, 1]} : vector<64x96xf32> to vector<64x8xf32>
    %134 = vector.extract_strided_slice %57 {offsets = [0, 56], sizes = [64, 8], strides = [1, 1]} : vector<64x96xf32> to vector<64x8xf32>
    %135 = vector.extract_strided_slice %57 {offsets = [0, 88], sizes = [64, 8], strides = [1, 1]} : vector<64x96xf32> to vector<64x8xf32>
    %136 = vector.shape_cast %133 : vector<64x8xf32> to vector<8x8x8xf32>
    %137 = arith.truncf %136 : vector<8x8x8xf32> to vector<8x8x8xbf16>
    %138 = vector.shape_cast %134 : vector<64x8xf32> to vector<8x8x8xf32>
    %139 = arith.truncf %138 : vector<8x8x8xf32> to vector<8x8x8xbf16>
    %140 = vector.shape_cast %135 : vector<64x8xf32> to vector<8x8x8xf32>
    %141 = arith.truncf %140 : vector<8x8x8xf32> to vector<8x8x8xbf16>
    "tpu.trace_start"() <{level = 10 : i32, message = "bqd,bkd->bqk"}> : () -> ()
    %cst_38 = arith.constant dense<0.000000e+00> : vector<8x8x8xf32>
    %142 = tpu.matmul %137, %139, %cst_38 {dimension_numbers = #tpu.dot_dimension_numbers<[2], [2], [1], [1], [0, 0, 0, 1, 1, 1], [0], [0]>} : vector<8x8x8xbf16>, vector<8x8x8xbf16>, vector<8x8x8xf32> -> vector<8x8x8xf32>
    "tpu.trace_stop"() : () -> ()
    %143 = vector.broadcast %41 : vector<8x1x8xf32> to vector<8x8x8xf32>
    %144 = arith.addf %142, %143 : vector<8x8x8xf32>
    %cst_39 = arith.constant dense<0xFF800000> : vector<8x8xf32>
    %145 = vector.multi_reduction <maximumf>, %144, %cst_39 [2] : vector<8x8x8xf32> to vector<8x8xf32>
    %146 = vector.shape_cast %145 : vector<8x8xf32> to vector<8x8x1xf32>
    %147 = vector.broadcast %146 : vector<8x8x1xf32> to vector<8x8x8xf32>
    %148 = arith.subf %144, %147 : vector<8x8x8xf32>
    %149 = math.exp %148 : vector<8x8x8xf32>
    %cst_40 = arith.constant dense<0.000000e+00> : vector<8x8xf32>
    %150 = vector.multi_reduction <add>, %149, %cst_40 [2] : vector<8x8x8xf32> to vector<8x8xf32>
    %151 = vector.shape_cast %150 : vector<8x8xf32> to vector<8x8x1xf32>
    %152 = tpu.reciprocal %151 {approx = true} : vector<8x8x1xf32> -> vector<8x8x1xf32>
    %153 = vector.broadcast %152 : vector<8x8x1xf32> to vector<8x8x8xf32>
    %154 = arith.mulf %149, %153 : vector<8x8x8xf32>
    %155 = arith.truncf %154 : vector<8x8x8xf32> to vector<8x8x8xbf16>
    "tpu.trace_start"() <{level = 10 : i32, message = "bqk,bkd->bqd"}> : () -> ()
    %cst_41 = arith.constant dense<0.000000e+00> : vector<8x8x8xf32>
    %156 = tpu.matmul %155, %141, %cst_41 {dimension_numbers = #tpu.dot_dimension_numbers<[2], [1], [1], [2], [0, 0, 0, 1, 1, 2], [0], [0]>} : vector<8x8x8xbf16>, vector<8x8x8xbf16>, vector<8x8x8xf32> -> vector<8x8x8xf32>
    "tpu.trace_stop"() : () -> ()
    %157 = vector.shape_cast %156 : vector<8x8x8xf32> to vector<64x8xf32>
    %158 = tpu.concatenate %82, %107, %132, %157 in 1 : vector<64x8xf32>, vector<64x8xf32>, vector<64x8xf32>, vector<64x8xf32> -> vector<64x32xf32>
    %159 = arith.truncf %158 : vector<64x32xf32> to vector<64x32xbf16>
    %c0_42 = arith.constant 0 : index
    %c0_43 = arith.constant 0 : index
    %c0_44 = arith.constant 0 : index
    %160 = vector.load %arg7[%c0_42, %c0_43, %c0_44] : memref<2x32x32xbf16, #tpu.memory_space<vmem>>, vector<1x32x32xbf16>
    %161 = vector.shape_cast %160 : vector<1x32x32xbf16> to vector<32x32xbf16>
    %cst_45 = arith.constant dense<0.000000e+00> : vector<64x32xf32>
    %162 = tpu.matmul %159, %161, %cst_45 {dimension_numbers = #tpu.dot_dimension_numbers<[1], [0], [0], [1], [0, 0, 1, 1], [], []>} : vector<64x32xbf16>, vector<32x32xbf16>, vector<64x32xf32> -> vector<64x32xf32>
    %163 = vector.broadcast %48 : vector<1x32xf32> to vector<64x32xf32>
    %164 = arith.addf %162, %163 : vector<64x32xf32>
    %165 = arith.addf %164, %35 : vector<64x32xf32>
    %cst_46 = arith.constant dense<0.000000e+00> : vector<64xf32>
    %166 = vector.multi_reduction <add>, %165, %cst_46 [1] : vector<64x32xf32> to vector<64xf32>
    %167 = vector.shape_cast %166 : vector<64xf32> to vector<64x1xf32>
    %cst_47 = arith.constant 3.200000e+01 : f32
    %168 = vector.broadcast %cst_47 : f32 to vector<64x1xf32>
    %169 = arith.divf %167, %168 : vector<64x1xf32>
    %170 = vector.broadcast %169 : vector<64x1xf32> to vector<64x32xf32>
    %171 = arith.subf %165, %170 : vector<64x32xf32>
    %172 = arith.mulf %171, %171 : vector<64x32xf32>
    %cst_48 = arith.constant dense<0.000000e+00> : vector<64xf32>
    %173 = vector.multi_reduction <add>, %172, %cst_48 [1] : vector<64x32xf32> to vector<64xf32>
    %174 = vector.shape_cast %173 : vector<64xf32> to vector<64x1xf32>
    %cst_49 = arith.constant 3.200000e+01 : f32
    %175 = vector.broadcast %cst_49 : f32 to vector<64x1xf32>
    %176 = arith.divf %174, %175 : vector<64x1xf32>
    %177 = vector.broadcast %169 : vector<64x1xf32> to vector<64x32xf32>
    %178 = arith.subf %165, %177 : vector<64x32xf32>
    %cst_50 = arith.constant 1.000000e-07 : f32
    %179 = vector.broadcast %cst_50 : f32 to vector<64x1xf32>
    %180 = arith.addf %176, %179 : vector<64x1xf32>
    %181 = math.rsqrt %180 : vector<64x1xf32>
    %182 = vector.broadcast %181 : vector<64x1xf32> to vector<64x32xf32>
    %183 = arith.mulf %178, %182 : vector<64x32xf32>
    %184 = vector.broadcast %44 : vector<1x32xf32> to vector<64x32xf32>
    %185 = arith.mulf %183, %184 : vector<64x32xf32>
    %186 = vector.broadcast %45 : vector<1x32xf32> to vector<64x32xf32>
    %187 = arith.addf %185, %186 : vector<64x32xf32>
    %188 = arith.truncf %187 : vector<64x32xf32> to vector<64x32xbf16>
    %c0_51 = arith.constant 0 : index
    %c0_52 = arith.constant 0 : index
    %c0_53 = arith.constant 0 : index
    %189 = vector.load %arg8[%c0_51, %c0_52, %c0_53] : memref<2x32x64xbf16, #tpu.memory_space<vmem>>, vector<1x32x64xbf16>
    %190 = vector.shape_cast %189 : vector<1x32x64xbf16> to vector<32x64xbf16>
    %cst_54 = arith.constant dense<0.000000e+00> : vector<64x64xf32>
    %191 = tpu.matmul %188, %190, %cst_54 {dimension_numbers = #tpu.dot_dimension_numbers<[1], [0], [0], [1], [0, 0, 1, 1], [], []>} : vector<64x32xbf16>, vector<32x64xbf16>, vector<64x64xf32> -> vector<64x64xf32>
    %c0_55 = arith.constant 0 : index
    %c0_56 = arith.constant 0 : index
    %c0_57 = arith.constant 0 : index
    %192 = vector.load %arg9[%c0_55, %c0_56, %c0_57] : memref<2x1x64xf32, #tpu.memory_space<vmem>>, vector<1x1x64xf32>
    %193 = vector.shape_cast %192 : vector<1x1x64xf32> to vector<1x64xf32>
    %194 = vector.broadcast %193 : vector<1x64xf32> to vector<64x64xf32>
    %195 = arith.addf %191, %194 : vector<64x64xf32>
    %196 = arith.mulf %195, %195 : vector<64x64xf32>
    %197 = arith.mulf %195, %196 : vector<64x64xf32>
    %cst_58 = arith.constant 4.471500e-02 : f32
    %198 = vector.broadcast %cst_58 : f32 to vector<64x64xf32>
    %199 = arith.mulf %198, %197 : vector<64x64xf32>
    %200 = arith.addf %195, %199 : vector<64x64xf32>
    %cst_59 = arith.constant 0.797884583 : f32
    %201 = vector.broadcast %cst_59 : f32 to vector<64x64xf32>
    %202 = arith.mulf %201, %200 : vector<64x64xf32>
    %203 = math.tanh %202 : vector<64x64xf32>
    %cst_60 = arith.constant 1.000000e+00 : f32
    %204 = vector.broadcast %cst_60 : f32 to vector<64x64xf32>
    %205 = arith.addf %204, %203 : vector<64x64xf32>
    %cst_61 = arith.constant 5.000000e-01 : f32
    %206 = vector.broadcast %cst_61 : f32 to vector<64x64xf32>
    %207 = arith.mulf %206, %205 : vector<64x64xf32>
    %208 = arith.mulf %195, %207 : vector<64x64xf32>
    %209 = arith.truncf %208 : vector<64x64xf32> to vector<64x64xbf16>
    %c0_62 = arith.constant 0 : index
    %c0_63 = arith.constant 0 : index
    %c0_64 = arith.constant 0 : index
    %210 = vector.load %arg10[%c0_62, %c0_63, %c0_64] : memref<2x64x32xbf16, #tpu.memory_space<vmem>>, vector<1x64x32xbf16>
    %211 = vector.shape_cast %210 : vector<1x64x32xbf16> to vector<64x32xbf16>
    %cst_65 = arith.constant dense<0.000000e+00> : vector<64x32xf32>
    %212 = tpu.matmul %209, %211, %cst_65 {dimension_numbers = #tpu.dot_dimension_numbers<[1], [0], [0], [1], [0, 0, 1, 1], [], []>} : vector<64x64xbf16>, vector<64x32xbf16>, vector<64x32xf32> -> vector<64x32xf32>
    %213 = vector.broadcast %49 : vector<1x32xf32> to vector<64x32xf32>
    %214 = arith.addf %212, %213 : vector<64x32xf32>
    %215 = arith.addf %214, %187 : vector<64x32xf32>
    %cst_66 = arith.constant dense<0.000000e+00> : vector<64xf32>
    %216 = vector.multi_reduction <add>, %215, %cst_66 [1] : vector<64x32xf32> to vector<64xf32>
    %217 = vector.shape_cast %216 : vector<64xf32> to vector<64x1xf32>
    %cst_67 = arith.constant 3.200000e+01 : f32
    %218 = vector.broadcast %cst_67 : f32 to vector<64x1xf32>
    %219 = arith.divf %217, %218 : vector<64x1xf32>
    %220 = vector.broadcast %219 : vector<64x1xf32> to vector<64x32xf32>
    %221 = arith.subf %215, %220 : vector<64x32xf32>
    %222 = arith.mulf %221, %221 : vector<64x32xf32>
    %cst_68 = arith.constant dense<0.000000e+00> : vector<64xf32>
    %223 = vector.multi_reduction <add>, %222, %cst_68 [1] : vector<64x32xf32> to vector<64xf32>
    %224 = vector.shape_cast %223 : vector<64xf32> to vector<64x1xf32>
    %cst_69 = arith.constant 3.200000e+01 : f32
    %225 = vector.broadcast %cst_69 : f32 to vector<64x1xf32>
    %226 = arith.divf %224, %225 : vector<64x1xf32>
    %227 = vector.broadcast %219 : vector<64x1xf32> to vector<64x32xf32>
    %228 = arith.subf %215, %227 : vector<64x32xf32>
    %cst_70 = arith.constant 1.000000e-07 : f32
    %229 = vector.broadcast %cst_70 : f32 to vector<64x1xf32>
    %230 = arith.addf %226, %229 : vector<64x1xf32>
    %231 = math.rsqrt %230 : vector<64x1xf32>
    %232 = vector.broadcast %231 : vector<64x1xf32> to vector<64x32xf32>
    %233 = arith.mulf %228, %232 : vector<64x32xf32>
    %234 = vector.broadcast %46 : vector<1x32xf32> to vector<64x32xf32>
    %235 = arith.mulf %233, %234 : vector<64x32xf32>
    %236 = vector.broadcast %47 : vector<1x32xf32> to vector<64x32xf32>
    %237 = arith.addf %235, %236 : vector<64x32xf32>
    %c1 = arith.constant 1 : index
    %c0_71 = arith.constant 0 : index
    %c0_72 = arith.constant 0 : index
    %238 = vector.load %arg11[%c1, %c0_71, %c0_72] : memref<2x6x32xf32, #tpu.memory_space<vmem>>, vector<1x6x32xf32>
    %239 = vector.shape_cast %238 : vector<1x6x32xf32> to vector<6x32xf32>
    %240 = vector.extract_strided_slice %239 {offsets = [0, 0], sizes = [1, 32], strides = [1, 1]} : vector<6x32xf32> to vector<1x32xf32>
    %241 = vector.extract_strided_slice %239 {offsets = [1, 0], sizes = [1, 32], strides = [1, 1]} : vector<6x32xf32> to vector<1x32xf32>
    %242 = vector.extract_strided_slice %239 {offsets = [2, 0], sizes = [1, 32], strides = [1, 1]} : vector<6x32xf32> to vector<1x32xf32>
    %243 = vector.extract_strided_slice %239 {offsets = [3, 0], sizes = [1, 32], strides = [1, 1]} : vector<6x32xf32> to vector<1x32xf32>
    %244 = vector.extract_strided_slice %239 {offsets = [4, 0], sizes = [1, 32], strides = [1, 1]} : vector<6x32xf32> to vector<1x32xf32>
    %245 = vector.extract_strided_slice %239 {offsets = [5, 0], sizes = [1, 32], strides = [1, 1]} : vector<6x32xf32> to vector<1x32xf32>
    %246 = arith.truncf %237 : vector<64x32xf32> to vector<64x32xbf16>
    %c1_73 = arith.constant 1 : index
    %c0_74 = arith.constant 0 : index
    %c0_75 = arith.constant 0 : index
    %247 = vector.load %arg5[%c1_73, %c0_74, %c0_75] : memref<2x32x96xbf16, #tpu.memory_space<vmem>>, vector<1x32x96xbf16>
    %248 = vector.shape_cast %247 : vector<1x32x96xbf16> to vector<32x96xbf16>
    %cst_76 = arith.constant dense<0.000000e+00> : vector<64x96xf32>
    %249 = tpu.matmul %246, %248, %cst_76 {dimension_numbers = #tpu.dot_dimension_numbers<[1], [0], [0], [1], [0, 0, 1, 1], [], []>} : vector<64x32xbf16>, vector<32x96xbf16>, vector<64x96xf32> -> vector<64x96xf32>
    %c1_77 = arith.constant 1 : index
    %c0_78 = arith.constant 0 : index
    %c0_79 = arith.constant 0 : index
    %250 = vector.load %arg6[%c1_77, %c0_78, %c0_79] : memref<2x1x96xf32, #tpu.memory_space<vmem>>, vector<1x1x96xf32>
    %251 = vector.shape_cast %250 : vector<1x1x96xf32> to vector<1x96xf32>
    %252 = vector.broadcast %251 : vector<1x96xf32> to vector<64x96xf32>
    %253 = arith.addf %249, %252 : vector<64x96xf32>
    %254 = vector.extract_strided_slice %253 {offsets = [0, 0], sizes = [64, 8], strides = [1, 1]} : vector<64x96xf32> to vector<64x8xf32>
    %255 = vector.extract_strided_slice %253 {offsets = [0, 32], sizes = [64, 8], strides = [1, 1]} : vector<64x96xf32> to vector<64x8xf32>
    %256 = vector.extract_strided_slice %253 {offsets = [0, 64], sizes = [64, 8], strides = [1, 1]} : vector<64x96xf32> to vector<64x8xf32>
    %257 = vector.shape_cast %254 : vector<64x8xf32> to vector<8x8x8xf32>
    %258 = arith.truncf %257 : vector<8x8x8xf32> to vector<8x8x8xbf16>
    %259 = vector.shape_cast %255 : vector<64x8xf32> to vector<8x8x8xf32>
    %260 = arith.truncf %259 : vector<8x8x8xf32> to vector<8x8x8xbf16>
    %261 = vector.shape_cast %256 : vector<64x8xf32> to vector<8x8x8xf32>
    %262 = arith.truncf %261 : vector<8x8x8xf32> to vector<8x8x8xbf16>
    "tpu.trace_start"() <{level = 10 : i32, message = "bqd,bkd->bqk"}> : () -> ()
    %cst_80 = arith.constant dense<0.000000e+00> : vector<8x8x8xf32>
    %263 = tpu.matmul %258, %260, %cst_80 {dimension_numbers = #tpu.dot_dimension_numbers<[2], [2], [1], [1], [0, 0, 0, 1, 1, 1], [0], [0]>} : vector<8x8x8xbf16>, vector<8x8x8xbf16>, vector<8x8x8xf32> -> vector<8x8x8xf32>
    "tpu.trace_stop"() : () -> ()
    %264 = vector.broadcast %41 : vector<8x1x8xf32> to vector<8x8x8xf32>
    %265 = arith.addf %263, %264 : vector<8x8x8xf32>
    %cst_81 = arith.constant dense<0xFF800000> : vector<8x8xf32>
    %266 = vector.multi_reduction <maximumf>, %265, %cst_81 [2] : vector<8x8x8xf32> to vector<8x8xf32>
    %267 = vector.shape_cast %266 : vector<8x8xf32> to vector<8x8x1xf32>
    %268 = vector.broadcast %267 : vector<8x8x1xf32> to vector<8x8x8xf32>
    %269 = arith.subf %265, %268 : vector<8x8x8xf32>
    %270 = math.exp %269 : vector<8x8x8xf32>
    %cst_82 = arith.constant dense<0.000000e+00> : vector<8x8xf32>
    %271 = vector.multi_reduction <add>, %270, %cst_82 [2] : vector<8x8x8xf32> to vector<8x8xf32>
    %272 = vector.shape_cast %271 : vector<8x8xf32> to vector<8x8x1xf32>
    %273 = tpu.reciprocal %272 {approx = true} : vector<8x8x1xf32> -> vector<8x8x1xf32>
    %274 = vector.broadcast %273 : vector<8x8x1xf32> to vector<8x8x8xf32>
    %275 = arith.mulf %270, %274 : vector<8x8x8xf32>
    %276 = arith.truncf %275 : vector<8x8x8xf32> to vector<8x8x8xbf16>
    "tpu.trace_start"() <{level = 10 : i32, message = "bqk,bkd->bqd"}> : () -> ()
    %cst_83 = arith.constant dense<0.000000e+00> : vector<8x8x8xf32>
    %277 = tpu.matmul %276, %262, %cst_83 {dimension_numbers = #tpu.dot_dimension_numbers<[2], [1], [1], [2], [0, 0, 0, 1, 1, 2], [0], [0]>} : vector<8x8x8xbf16>, vector<8x8x8xbf16>, vector<8x8x8xf32> -> vector<8x8x8xf32>
    "tpu.trace_stop"() : () -> ()
    %278 = vector.shape_cast %277 : vector<8x8x8xf32> to vector<64x8xf32>
    %279 = vector.extract_strided_slice %253 {offsets = [0, 8], sizes = [64, 8], strides = [1, 1]} : vector<64x96xf32> to vector<64x8xf32>
    %280 = vector.extract_strided_slice %253 {offsets = [0, 40], sizes = [64, 8], strides = [1, 1]} : vector<64x96xf32> to vector<64x8xf32>
    %281 = vector.extract_strided_slice %253 {offsets = [0, 72], sizes = [64, 8], strides = [1, 1]} : vector<64x96xf32> to vector<64x8xf32>
    %282 = vector.shape_cast %279 : vector<64x8xf32> to vector<8x8x8xf32>
    %283 = arith.truncf %282 : vector<8x8x8xf32> to vector<8x8x8xbf16>
    %284 = vector.shape_cast %280 : vector<64x8xf32> to vector<8x8x8xf32>
    %285 = arith.truncf %284 : vector<8x8x8xf32> to vector<8x8x8xbf16>
    %286 = vector.shape_cast %281 : vector<64x8xf32> to vector<8x8x8xf32>
    %287 = arith.truncf %286 : vector<8x8x8xf32> to vector<8x8x8xbf16>
    "tpu.trace_start"() <{level = 10 : i32, message = "bqd,bkd->bqk"}> : () -> ()
    %cst_84 = arith.constant dense<0.000000e+00> : vector<8x8x8xf32>
    %288 = tpu.matmul %283, %285, %cst_84 {dimension_numbers = #tpu.dot_dimension_numbers<[2], [2], [1], [1], [0, 0, 0, 1, 1, 1], [0], [0]>} : vector<8x8x8xbf16>, vector<8x8x8xbf16>, vector<8x8x8xf32> -> vector<8x8x8xf32>
    "tpu.trace_stop"() : () -> ()
    %289 = vector.broadcast %41 : vector<8x1x8xf32> to vector<8x8x8xf32>
    %290 = arith.addf %288, %289 : vector<8x8x8xf32>
    %cst_85 = arith.constant dense<0xFF800000> : vector<8x8xf32>
    %291 = vector.multi_reduction <maximumf>, %290, %cst_85 [2] : vector<8x8x8xf32> to vector<8x8xf32>
    %292 = vector.shape_cast %291 : vector<8x8xf32> to vector<8x8x1xf32>
    %293 = vector.broadcast %292 : vector<8x8x1xf32> to vector<8x8x8xf32>
    %294 = arith.subf %290, %293 : vector<8x8x8xf32>
    %295 = math.exp %294 : vector<8x8x8xf32>
    %cst_86 = arith.constant dense<0.000000e+00> : vector<8x8xf32>
    %296 = vector.multi_reduction <add>, %295, %cst_86 [2] : vector<8x8x8xf32> to vector<8x8xf32>
    %297 = vector.shape_cast %296 : vector<8x8xf32> to vector<8x8x1xf32>
    %298 = tpu.reciprocal %297 {approx = true} : vector<8x8x1xf32> -> vector<8x8x1xf32>
    %299 = vector.broadcast %298 : vector<8x8x1xf32> to vector<8x8x8xf32>
    %300 = arith.mulf %295, %299 : vector<8x8x8xf32>
    %301 = arith.truncf %300 : vector<8x8x8xf32> to vector<8x8x8xbf16>
    "tpu.trace_start"() <{level = 10 : i32, message = "bqk,bkd->bqd"}> : () -> ()
    %cst_87 = arith.constant dense<0.000000e+00> : vector<8x8x8xf32>
    %302 = tpu.matmul %301, %287, %cst_87 {dimension_numbers = #tpu.dot_dimension_numbers<[2], [1], [1], [2], [0, 0, 0, 1, 1, 2], [0], [0]>} : vector<8x8x8xbf16>, vector<8x8x8xbf16>, vector<8x8x8xf32> -> vector<8x8x8xf32>
    "tpu.trace_stop"() : () -> ()
    %303 = vector.shape_cast %302 : vector<8x8x8xf32> to vector<64x8xf32>
    %304 = vector.extract_strided_slice %253 {offsets = [0, 16], sizes = [64, 8], strides = [1, 1]} : vector<64x96xf32> to vector<64x8xf32>
    %305 = vector.extract_strided_slice %253 {offsets = [0, 48], sizes = [64, 8], strides = [1, 1]} : vector<64x96xf32> to vector<64x8xf32>
    %306 = vector.extract_strided_slice %253 {offsets = [0, 80], sizes = [64, 8], strides = [1, 1]} : vector<64x96xf32> to vector<64x8xf32>
    %307 = vector.shape_cast %304 : vector<64x8xf32> to vector<8x8x8xf32>
    %308 = arith.truncf %307 : vector<8x8x8xf32> to vector<8x8x8xbf16>
    %309 = vector.shape_cast %305 : vector<64x8xf32> to vector<8x8x8xf32>
    %310 = arith.truncf %309 : vector<8x8x8xf32> to vector<8x8x8xbf16>
    %311 = vector.shape_cast %306 : vector<64x8xf32> to vector<8x8x8xf32>
    %312 = arith.truncf %311 : vector<8x8x8xf32> to vector<8x8x8xbf16>
    "tpu.trace_start"() <{level = 10 : i32, message = "bqd,bkd->bqk"}> : () -> ()
    %cst_88 = arith.constant dense<0.000000e+00> : vector<8x8x8xf32>
    %313 = tpu.matmul %308, %310, %cst_88 {dimension_numbers = #tpu.dot_dimension_numbers<[2], [2], [1], [1], [0, 0, 0, 1, 1, 1], [0], [0]>} : vector<8x8x8xbf16>, vector<8x8x8xbf16>, vector<8x8x8xf32> -> vector<8x8x8xf32>
    "tpu.trace_stop"() : () -> ()
    %314 = vector.broadcast %41 : vector<8x1x8xf32> to vector<8x8x8xf32>
    %315 = arith.addf %313, %314 : vector<8x8x8xf32>
    %cst_89 = arith.constant dense<0xFF800000> : vector<8x8xf32>
    %316 = vector.multi_reduction <maximumf>, %315, %cst_89 [2] : vector<8x8x8xf32> to vector<8x8xf32>
    %317 = vector.shape_cast %316 : vector<8x8xf32> to vector<8x8x1xf32>
    %318 = vector.broadcast %317 : vector<8x8x1xf32> to vector<8x8x8xf32>
    %319 = arith.subf %315, %318 : vector<8x8x8xf32>
    %320 = math.exp %319 : vector<8x8x8xf32>
    %cst_90 = arith.constant dense<0.000000e+00> : vector<8x8xf32>
    %321 = vector.multi_reduction <add>, %320, %cst_90 [2] : vector<8x8x8xf32> to vector<8x8xf32>
    %322 = vector.shape_cast %321 : vector<8x8xf32> to vector<8x8x1xf32>
    %323 = tpu.reciprocal %322 {approx = true} : vector<8x8x1xf32> -> vector<8x8x1xf32>
    %324 = vector.broadcast %323 : vector<8x8x1xf32> to vector<8x8x8xf32>
    %325 = arith.mulf %320, %324 : vector<8x8x8xf32>
    %326 = arith.truncf %325 : vector<8x8x8xf32> to vector<8x8x8xbf16>
    "tpu.trace_start"() <{level = 10 : i32, message = "bqk,bkd->bqd"}> : () -> ()
    %cst_91 = arith.constant dense<0.000000e+00> : vector<8x8x8xf32>
    %327 = tpu.matmul %326, %312, %cst_91 {dimension_numbers = #tpu.dot_dimension_numbers<[2], [1], [1], [2], [0, 0, 0, 1, 1, 2], [0], [0]>} : vector<8x8x8xbf16>, vector<8x8x8xbf16>, vector<8x8x8xf32> -> vector<8x8x8xf32>
    "tpu.trace_stop"() : () -> ()
    %328 = vector.shape_cast %327 : vector<8x8x8xf32> to vector<64x8xf32>
    %329 = vector.extract_strided_slice %253 {offsets = [0, 24], sizes = [64, 8], strides = [1, 1]} : vector<64x96xf32> to vector<64x8xf32>
    %330 = vector.extract_strided_slice %253 {offsets = [0, 56], sizes = [64, 8], strides = [1, 1]} : vector<64x96xf32> to vector<64x8xf32>
    %331 = vector.extract_strided_slice %253 {offsets = [0, 88], sizes = [64, 8], strides = [1, 1]} : vector<64x96xf32> to vector<64x8xf32>
    %332 = vector.shape_cast %329 : vector<64x8xf32> to vector<8x8x8xf32>
    %333 = arith.truncf %332 : vector<8x8x8xf32> to vector<8x8x8xbf16>
    %334 = vector.shape_cast %330 : vector<64x8xf32> to vector<8x8x8xf32>
    %335 = arith.truncf %334 : vector<8x8x8xf32> to vector<8x8x8xbf16>
    %336 = vector.shape_cast %331 : vector<64x8xf32> to vector<8x8x8xf32>
    %337 = arith.truncf %336 : vector<8x8x8xf32> to vector<8x8x8xbf16>
    "tpu.trace_start"() <{level = 10 : i32, message = "bqd,bkd->bqk"}> : () -> ()
    %cst_92 = arith.constant dense<0.000000e+00> : vector<8x8x8xf32>
    %338 = tpu.matmul %333, %335, %cst_92 {dimension_numbers = #tpu.dot_dimension_numbers<[2], [2], [1], [1], [0, 0, 0, 1, 1, 1], [0], [0]>} : vector<8x8x8xbf16>, vector<8x8x8xbf16>, vector<8x8x8xf32> -> vector<8x8x8xf32>
    "tpu.trace_stop"() : () -> ()
    %339 = vector.broadcast %41 : vector<8x1x8xf32> to vector<8x8x8xf32>
    %340 = arith.addf %338, %339 : vector<8x8x8xf32>
    %cst_93 = arith.constant dense<0xFF800000> : vector<8x8xf32>
    %341 = vector.multi_reduction <maximumf>, %340, %cst_93 [2] : vector<8x8x8xf32> to vector<8x8xf32>
    %342 = vector.shape_cast %341 : vector<8x8xf32> to vector<8x8x1xf32>
    %343 = vector.broadcast %342 : vector<8x8x1xf32> to vector<8x8x8xf32>
    %344 = arith.subf %340, %343 : vector<8x8x8xf32>
    %345 = math.exp %344 : vector<8x8x8xf32>
    %cst_94 = arith.constant dense<0.000000e+00> : vector<8x8xf32>
    %346 = vector.multi_reduction <add>, %345, %cst_94 [2] : vector<8x8x8xf32> to vector<8x8xf32>
    %347 = vector.shape_cast %346 : vector<8x8xf32> to vector<8x8x1xf32>
    %348 = tpu.reciprocal %347 {approx = true} : vector<8x8x1xf32> -> vector<8x8x1xf32>
    %349 = vector.broadcast %348 : vector<8x8x1xf32> to vector<8x8x8xf32>
    %350 = arith.mulf %345, %349 : vector<8x8x8xf32>
    %351 = arith.truncf %350 : vector<8x8x8xf32> to vector<8x8x8xbf16>
    "tpu.trace_start"() <{level = 10 : i32, message = "bqk,bkd->bqd"}> : () -> ()
    %cst_95 = arith.constant dense<0.000000e+00> : vector<8x8x8xf32>
    %352 = tpu.matmul %351, %337, %cst_95 {dimension_numbers = #tpu.dot_dimension_numbers<[2], [1], [1], [2], [0, 0, 0, 1, 1, 2], [0], [0]>} : vector<8x8x8xbf16>, vector<8x8x8xbf16>, vector<8x8x8xf32> -> vector<8x8x8xf32>
    "tpu.trace_stop"() : () -> ()
    %353 = vector.shape_cast %352 : vector<8x8x8xf32> to vector<64x8xf32>
    %354 = tpu.concatenate %278, %303, %328, %353 in 1 : vector<64x8xf32>, vector<64x8xf32>, vector<64x8xf32>, vector<64x8xf32> -> vector<64x32xf32>
    %355 = arith.truncf %354 : vector<64x32xf32> to vector<64x32xbf16>
    %c1_96 = arith.constant 1 : index
    %c0_97 = arith.constant 0 : index
    %c0_98 = arith.constant 0 : index
    %356 = vector.load %arg7[%c1_96, %c0_97, %c0_98] : memref<2x32x32xbf16, #tpu.memory_space<vmem>>, vector<1x32x32xbf16>
    %357 = vector.shape_cast %356 : vector<1x32x32xbf16> to vector<32x32xbf16>
    %cst_99 = arith.constant dense<0.000000e+00> : vector<64x32xf32>
    %358 = tpu.matmul %355, %357, %cst_99 {dimension_numbers = #tpu.dot_dimension_numbers<[1], [0], [0], [1], [0, 0, 1, 1], [], []>} : vector<64x32xbf16>, vector<32x32xbf16>, vector<64x32xf32> -> vector<64x32xf32>
    %359 = vector.broadcast %244 : vector<1x32xf32> to vector<64x32xf32>
    %360 = arith.addf %358, %359 : vector<64x32xf32>
    %361 = arith.addf %360, %237 : vector<64x32xf32>
    %cst_100 = arith.constant dense<0.000000e+00> : vector<64xf32>
    %362 = vector.multi_reduction <add>, %361, %cst_100 [1] : vector<64x32xf32> to vector<64xf32>
    %363 = vector.shape_cast %362 : vector<64xf32> to vector<64x1xf32>
    %cst_101 = arith.constant 3.200000e+01 : f32
    %364 = vector.broadcast %cst_101 : f32 to vector<64x1xf32>
    %365 = arith.divf %363, %364 : vector<64x1xf32>
    %366 = vector.broadcast %365 : vector<64x1xf32> to vector<64x32xf32>
    %367 = arith.subf %361, %366 : vector<64x32xf32>
    %368 = arith.mulf %367, %367 : vector<64x32xf32>
    %cst_102 = arith.constant dense<0.000000e+00> : vector<64xf32>
    %369 = vector.multi_reduction <add>, %368, %cst_102 [1] : vector<64x32xf32> to vector<64xf32>
    %370 = vector.shape_cast %369 : vector<64xf32> to vector<64x1xf32>
    %cst_103 = arith.constant 3.200000e+01 : f32
    %371 = vector.broadcast %cst_103 : f32 to vector<64x1xf32>
    %372 = arith.divf %370, %371 : vector<64x1xf32>
    %373 = vector.broadcast %365 : vector<64x1xf32> to vector<64x32xf32>
    %374 = arith.subf %361, %373 : vector<64x32xf32>
    %cst_104 = arith.constant 1.000000e-07 : f32
    %375 = vector.broadcast %cst_104 : f32 to vector<64x1xf32>
    %376 = arith.addf %372, %375 : vector<64x1xf32>
    %377 = math.rsqrt %376 : vector<64x1xf32>
    %378 = vector.broadcast %377 : vector<64x1xf32> to vector<64x32xf32>
    %379 = arith.mulf %374, %378 : vector<64x32xf32>
    %380 = vector.broadcast %240 : vector<1x32xf32> to vector<64x32xf32>
    %381 = arith.mulf %379, %380 : vector<64x32xf32>
    %382 = vector.broadcast %241 : vector<1x32xf32> to vector<64x32xf32>
    %383 = arith.addf %381, %382 : vector<64x32xf32>
    %384 = arith.truncf %383 : vector<64x32xf32> to vector<64x32xbf16>
    %c1_105 = arith.constant 1 : index
    %c0_106 = arith.constant 0 : index
    %c0_107 = arith.constant 0 : index
    %385 = vector.load %arg8[%c1_105, %c0_106, %c0_107] : memref<2x32x64xbf16, #tpu.memory_space<vmem>>, vector<1x32x64xbf16>
    %386 = vector.shape_cast %385 : vector<1x32x64xbf16> to vector<32x64xbf16>
    %cst_108 = arith.constant dense<0.000000e+00> : vector<64x64xf32>
    %387 = tpu.matmul %384, %386, %cst_108 {dimension_numbers = #tpu.dot_dimension_numbers<[1], [0], [0], [1], [0, 0, 1, 1], [], []>} : vector<64x32xbf16>, vector<32x64xbf16>, vector<64x64xf32> -> vector<64x64xf32>
    %c1_109 = arith.constant 1 : index
    %c0_110 = arith.constant 0 : index
    %c0_111 = arith.constant 0 : index
    %388 = vector.load %arg9[%c1_109, %c0_110, %c0_111] : memref<2x1x64xf32, #tpu.memory_space<vmem>>, vector<1x1x64xf32>
    %389 = vector.shape_cast %388 : vector<1x1x64xf32> to vector<1x64xf32>
    %390 = vector.broadcast %389 : vector<1x64xf32> to vector<64x64xf32>
    %391 = arith.addf %387, %390 : vector<64x64xf32>
    %392 = arith.mulf %391, %391 : vector<64x64xf32>
    %393 = arith.mulf %391, %392 : vector<64x64xf32>
    %cst_112 = arith.constant 4.471500e-02 : f32
    %394 = vector.broadcast %cst_112 : f32 to vector<64x64xf32>
    %395 = arith.mulf %394, %393 : vector<64x64xf32>
    %396 = arith.addf %391, %395 : vector<64x64xf32>
    %cst_113 = arith.constant 0.797884583 : f32
    %397 = vector.broadcast %cst_113 : f32 to vector<64x64xf32>
    %398 = arith.mulf %397, %396 : vector<64x64xf32>
    %399 = math.tanh %398 : vector<64x64xf32>
    %cst_114 = arith.constant 1.000000e+00 : f32
    %400 = vector.broadcast %cst_114 : f32 to vector<64x64xf32>
    %401 = arith.addf %400, %399 : vector<64x64xf32>
    %cst_115 = arith.constant 5.000000e-01 : f32
    %402 = vector.broadcast %cst_115 : f32 to vector<64x64xf32>
    %403 = arith.mulf %402, %401 : vector<64x64xf32>
    %404 = arith.mulf %391, %403 : vector<64x64xf32>
    %405 = arith.truncf %404 : vector<64x64xf32> to vector<64x64xbf16>
    %c1_116 = arith.constant 1 : index
    %c0_117 = arith.constant 0 : index
    %c0_118 = arith.constant 0 : index
    %406 = vector.load %arg10[%c1_116, %c0_117, %c0_118] : memref<2x64x32xbf16, #tpu.memory_space<vmem>>, vector<1x64x32xbf16>
    %407 = vector.shape_cast %406 : vector<1x64x32xbf16> to vector<64x32xbf16>
    %cst_119 = arith.constant dense<0.000000e+00> : vector<64x32xf32>
    %408 = tpu.matmul %405, %407, %cst_119 {dimension_numbers = #tpu.dot_dimension_numbers<[1], [0], [0], [1], [0, 0, 1, 1], [], []>} : vector<64x64xbf16>, vector<64x32xbf16>, vector<64x32xf32> -> vector<64x32xf32>
    %409 = vector.broadcast %245 : vector<1x32xf32> to vector<64x32xf32>
    %410 = arith.addf %408, %409 : vector<64x32xf32>
    %411 = arith.addf %410, %383 : vector<64x32xf32>
    %cst_120 = arith.constant dense<0.000000e+00> : vector<64xf32>
    %412 = vector.multi_reduction <add>, %411, %cst_120 [1] : vector<64x32xf32> to vector<64xf32>
    %413 = vector.shape_cast %412 : vector<64xf32> to vector<64x1xf32>
    %cst_121 = arith.constant 3.200000e+01 : f32
    %414 = vector.broadcast %cst_121 : f32 to vector<64x1xf32>
    %415 = arith.divf %413, %414 : vector<64x1xf32>
    %416 = vector.broadcast %415 : vector<64x1xf32> to vector<64x32xf32>
    %417 = arith.subf %411, %416 : vector<64x32xf32>
    %418 = arith.mulf %417, %417 : vector<64x32xf32>
    %cst_122 = arith.constant dense<0.000000e+00> : vector<64xf32>
    %419 = vector.multi_reduction <add>, %418, %cst_122 [1] : vector<64x32xf32> to vector<64xf32>
    %420 = vector.shape_cast %419 : vector<64xf32> to vector<64x1xf32>
    %cst_123 = arith.constant 3.200000e+01 : f32
    %421 = vector.broadcast %cst_123 : f32 to vector<64x1xf32>
    %422 = arith.divf %420, %421 : vector<64x1xf32>
    %423 = vector.broadcast %415 : vector<64x1xf32> to vector<64x32xf32>
    %424 = arith.subf %411, %423 : vector<64x32xf32>
    %cst_124 = arith.constant 1.000000e-07 : f32
    %425 = vector.broadcast %cst_124 : f32 to vector<64x1xf32>
    %426 = arith.addf %422, %425 : vector<64x1xf32>
    %427 = math.rsqrt %426 : vector<64x1xf32>
    %428 = vector.broadcast %427 : vector<64x1xf32> to vector<64x32xf32>
    %429 = arith.mulf %424, %428 : vector<64x32xf32>
    %430 = vector.broadcast %242 : vector<1x32xf32> to vector<64x32xf32>
    %431 = arith.mulf %429, %430 : vector<64x32xf32>
    %432 = vector.broadcast %243 : vector<1x32xf32> to vector<64x32xf32>
    %433 = arith.addf %431, %432 : vector<64x32xf32>
    %434 = vector.shape_cast %433 : vector<64x32xf32> to vector<8x8x32xf32>
    %435 = vector.extract_strided_slice %434 {offsets = [0, 0, 0], sizes = [8, 1, 32], strides = [1, 1, 1]} : vector<8x8x32xf32> to vector<8x1x32xf32>
    %436 = vector.shape_cast %435 : vector<8x1x32xf32> to vector<8x32xf32>
    %c0_125 = arith.constant 0 : index
    %c0_126 = arith.constant 0 : index
    %437 = vector.load %arg12[%c0_125, %c0_126] : memref<32x3xf32, #tpu.memory_space<vmem>>, vector<32x3xf32>
    %cst_127 = arith.constant dense<0.000000e+00> : vector<8x3xf32>
    %438 = tpu.matmul %436, %437, %cst_127 {dimension_numbers = #tpu.dot_dimension_numbers<[1], [0], [0], [1], [0, 0, 1, 1], [], []>} : vector<8x32xf32>, vector<32x3xf32>, vector<8x3xf32> -> vector<8x3xf32>
    %c0_128 = arith.constant 0 : index
    %c0_129 = arith.constant 0 : index
    %439 = vector.load %arg13[%c0_128, %c0_129] : memref<1x3xf32, #tpu.memory_space<vmem>>, vector<1x3xf32>
    %440 = vector.broadcast %439 : vector<1x3xf32> to vector<8x3xf32>
    %441 = arith.addf %438, %440 : vector<8x3xf32>
    %cst_130 = arith.constant dense<0xFF800000> : vector<8xf32>
    %442 = vector.multi_reduction <maximumf>, %441, %cst_130 [1] : vector<8x3xf32> to vector<8xf32>
    %443 = vector.shape_cast %442 : vector<8xf32> to vector<8x1xf32>
    %444 = vector.broadcast %443 : vector<8x1xf32> to vector<8x3xf32>
    %445 = arith.subf %441, %444 : vector<8x3xf32>
    %446 = math.exp %445 : vector<8x3xf32>
    %cst_131 = arith.constant dense<0.000000e+00> : vector<8xf32>
    %447 = vector.multi_reduction <add>, %446, %cst_131 [1] : vector<8x3xf32> to vector<8xf32>
    %448 = vector.shape_cast %447 : vector<8xf32> to vector<8x1xf32>
    %449 = vector.broadcast %448 : vector<8x1xf32> to vector<8x3xf32>
    %450 = arith.divf %446, %449 : vector<8x3xf32>
    %c0_132 = arith.constant 0 : index
    %c0_133 = arith.constant 0 : index
    %451 = vector.load %arg14[%c0_132, %c0_133] : memref<8x3xf32, #tpu.memory_space<vmem>>, vector<8x3xf32>
    tpu.vector_store %arg14[%c0_132, %c0_133], %450 {strides = array<i32>} : memref<8x3xf32, #tpu.memory_space<vmem>>, vector<8x3xf32>,
    return
  }
  func.func @transform_0(%arg0: i32) -> (i32, i32) {
    %c0_i32 = arith.constant 0 : i32
    %c0_i32_0 = arith.constant 0 : i32
    return %arg0, %c0_i32 : i32, i32
  }
  func.func @transform_1(%arg0: i32) -> (i32, i32) {
    %c0_i32 = arith.constant 0 : i32
    %c0_i32_0 = arith.constant 0 : i32
    return %arg0, %c0_i32 : i32, i32
  }
  func.func @transform_2(%arg0: i32) -> (i32, i32) {
    %c0_i32 = arith.constant 0 : i32
    %c0_i32_0 = arith.constant 0 : i32
    %c0_i32_1 = arith.constant 0 : i32
    return %c0_i32, %c0_i32_0 : i32, i32
  }
  func.func @transform_3(%arg0: i32) -> (i32, i32) {
    %c0_i32 = arith.constant 0 : i32
    %c0_i32_0 = arith.constant 0 : i32
    %c0_i32_1 = arith.constant 0 : i32
    return %c0_i32, %c0_i32_0 : i32, i32
  }
  func.func @transform_4(%arg0: i32) -> (i32, i32, i32) {
    %c0_i32 = arith.constant 0 : i32
    %c0_i32_0 = arith.constant 0 : i32
    %c0_i32_1 = arith.constant 0 : i32
    %c0_i32_2 = arith.constant 0 : i32
    return %c0_i32, %c0_i32_0, %c0_i32_1 : i32, i32, i32
  }
  func.func @transform_5(%arg0: i32) -> (i32, i32, i32) {
    %c0_i32 = arith.constant 0 : i32
    %c0_i32_0 = arith.constant 0 : i32
    %c0_i32_1 = arith.constant 0 : i32
    %c0_i32_2 = arith.constant 0 : i32
    return %c0_i32, %c0_i32_0, %c0_i32_1 : i32, i32, i32
  }
  func.func @transform_6(%arg0: i32) -> (i32, i32, i32) {
    %c0_i32 = arith.constant 0 : i32
    %c0_i32_0 = arith.constant 0 : i32
    %c0_i32_1 = arith.constant 0 : i32
    %c0_i32_2 = arith.constant 0 : i32
    return %c0_i32, %c0_i32_0, %c0_i32_1 : i32, i32, i32
  }
  func.func @transform_7(%arg0: i32) -> (i32, i32, i32) {
    %c0_i32 = arith.constant 0 : i32
    %c0_i32_0 = arith.constant 0 : i32
    %c0_i32_1 = arith.constant 0 : i32
    %c0_i32_2 = arith.constant 0 : i32
    return %c0_i32, %c0_i32_0, %c0_i32_1 : i32, i32, i32
  }
  func.func @transform_8(%arg0: i32) -> (i32, i32, i32) {
    %c0_i32 = arith.constant 0 : i32
    %c0_i32_0 = arith.constant 0 : i32
    %c0_i32_1 = arith.constant 0 : i32
    %c0_i32_2 = arith.constant 0 : i32
    return %c0_i32, %c0_i32_0, %c0_i32_1 : i32, i32, i32
  }
  func.func @transform_9(%arg0: i32) -> (i32, i32, i32) {
    %c0_i32 = arith.constant 0 : i32
    %c0_i32_0 = arith.constant 0 : i32
    %c0_i32_1 = arith.constant 0 : i32
    %c0_i32_2 = arith.constant 0 : i32
    return %c0_i32, %c0_i32_0, %c0_i32_1 : i32, i32, i32
  }
  func.func @transform_10(%arg0: i32) -> (i32, i32, i32) {
    %c0_i32 = arith.constant 0 : i32
    %c0_i32_0 = arith.constant 0 : i32
    %c0_i32_1 = arith.constant 0 : i32
    %c0_i32_2 = arith.constant 0 : i32
    return %c0_i32, %c0_i32_0, %c0_i32_1 : i32, i32, i32
  }
  func.func @transform_11(%arg0: i32) -> (i32, i32) {
    %c0_i32 = arith.constant 0 : i32
    %c0_i32_0 = arith.constant 0 : i32
    %c0_i32_1 = arith.constant 0 : i32
    return %c0_i32, %c0_i32_0 : i32, i32
  }
  func.func @transform_12(%arg0: i32) -> (i32, i32) {
    %c0_i32 = arith.constant 0 : i32
    %c0_i32_0 = arith.constant 0 : i32
    %c0_i32_1 = arith.constant 0 : i32
    return %c0_i32, %c0_i32_0 : i32, i32
  }
  func.func @transform_13(%arg0: i32) -> (i32, i32) {
    %c0_i32 = arith.constant 0 : i32
    %c0_i32_0 = arith.constant 0 : i32
    return %arg0, %c0_i32 : i32, i32
  }
}

</mosaic_0001>

<bundles_post_ra>
// kernel: quality_model_forward.1
= control target key start
LH: loop header
LB: loop body
LE: loop exit
PB: predicated region body
PF: predicated region fallthrough
CT: control target
= control target key end

     0   :  { %v46_v0 = vlaneseq  ;;  %v11441_v49 = vmov 1.0   ;;  %vm242_vm8 = vcmask 261120   ;;  %vm11443_vm9 = vmmov 0   ;;  %s11444_s16 = smov 96   ;;  %s11445_s17 = smov 64   ;;  %s14173_s0 = inlined_call_operand.vmem [shape: s32[8,8], index: 0, kind: input, shape index: {}]   ;;  %s14174_s2 = inlined_call_operand.vmem [shape: f32[128,32], index: 2, kind: input, shape index: {}]   ;;  %s14175_s10 = inlined_call_operand.vmem [shape: f32[2,6,32], index: 10, kind: input, shape index: {}]   ;;  %s14176_s4 = inlined_call_operand.vmem [shape: bf16[2,32,96], index: 4, kind: input, shape index: {}]   ;;  %s14177_s3 = inlined_call_operand.vmem [shape: f32[2,32], index: 3, kind: input, shape index: {}]   ;;  %s14178_s5 = inlined_call_operand.vmem [shape: f32[2,1,96], index: 5, kind: input, shape index: {}]   ;;  %s14179_s1 = inlined_call_operand.vmem [shape: f32[8,8], index: 1, kind: input, shape index: {}]   ;;  %s14180_s6 = inlined_call_operand.vmem [shape: bf16[2,32,32], index: 6, kind: input, shape index: {}]   ;;  %s14181_s7 = inlined_call_operand.vmem [shape: bf16[2,32,64], index: 7, kind: input, shape index: {}]   ;;  %s14182_s9 = inlined_call_operand.vmem [shape: bf16[2,64,32], index: 9, kind: input, shape index: {}]   ;;  %s14183_s8 = inlined_call_operand.vmem [shape: f32[2,1,64], index: 8, kind: input, shape index: {}]   ;;  %s14184_s11 = inlined_call_operand.vmem [shape: f32[32,3], index: 11, kind: input, shape index: {}]   ;;  %s14185_s12 = inlined_call_operand.vmem [shape: f32[1,3], index: 12, kind: input, shape index: {}]   ;;  %s14186_s13 = inlined_call_operand.vmem [shape: f32[8,3], index: 13, kind: output, shape index: {}]  }
   0x1   :  { %v136_v2 = vld [vmem:[%s14174_s2 + $0x78] sm:$0xff]  ;;  %v135_v3 = vld [vmem:[%s14174_s2 + $0x70] sm:$0xff]  ;;  %v45_v4 = vld [vmem:[%s14173_s0] sm:$0xff]  ;;  %vm581_vm10 = vcmask 64512   ;;  %vm1072_vm11 = vcmask 1043456   ;;  %s11448_s19 = smov 120  }
   0x2   :  { %v11530_v1 = vshrl.u32 %v46_v0, 7  ;;  %9982 = vmatprep.subr.mxu0 %v136_v2  ;;  %v134_v8 = vld [vmem:[%s14174_s2 + $0x68] sm:$0xff]  ;;  %v425_v9 = vld [vmem:[%s14175_s10] sm:$0x3f]  ;;  %v132_v27 = vld [vmem:[%s14174_s2 + $0x58] sm:$0xff]  ;;  %v47_v46 = vand.u32 127, %v46_v0 }
   0x3   :  { %9983 = vmatpush3.msra.mxu0 %v136_v2  ;;  %v9528_v14 = vld [vmem:[%s14175_s10 + $0x8] sm:$0x3f]  ;;  %v133_v17 = vld [vmem:[%s14174_s2 + $0x60] sm:$0xff]  ;;  %v131_v33 = vld [vmem:[%s14174_s2 + $0x50] sm:$0xff]  ;;  %s11449_s20 = smov 56   ;;  %s11450_s21 = smov 80  }
   0x4   :  { %v11542_v5 = vsub.s32 0, %v11530_v1  ;;  %v64_v6 = vsub.s32 2, %v11530_v1  ;;  %v11546_v7 = vsub.s32 1, %v11530_v1  ;;  %v71_v10 = vsub.s32 3, %v11530_v1  ;;  %9984 = vmatprep.subr.mxu0 %v135_v3  ;;  %v130_v34 = vld [vmem:[%s14174_s2 + $0x48] sm:$0xff]  ;;  %v129_v37 = vld [vmem:[%s14174_s2 + $0x40] sm:$0xff] }
   0x5   :  { %9985 = vmatpush3.msra.mxu0 %v135_v3  ;;  %v11564_v16 = vsub.s32 4, %v11530_v1  ;;  %v85_v21 = vsub.s32 5, %v11530_v1  ;;  %v92_v31 = vsub.s32 6, %v11530_v1  ;;  %v99_v32 = vsub.s32 7, %v11530_v1  ;;  %v128_v38 = vld [vmem:[%s14174_s2 + $0x38] sm:$0xff]  ;;  %v127_v39 = vld [vmem:[%s14174_s2 + $0x30] sm:$0xff] }
   0x6   :  { %14212 = vst [vmem:[#allocation2_spill] sm:$0xff] %v11542_v5  ;;  %v51_v11 = vrot.slane %v45_v4, %v11542_v5  ;;  %v65_v12 = vrot.slane %v45_v4, %v64_v6  ;;  %v11556_v13 = vrot.slane %v425_v9, %v64_v6  ;;  %v11561_v15 = vrot.slane %v9528_v14, %v64_v6  ;;  %v126_v40 = vld [vmem:[%s14174_s2 + $0x28] sm:$0xff]  ;;  %v125_v41 = vld [vmem:[%s14174_s2 + $0x20] sm:$0xff]  ;;  %v124_v42 = vld [vmem:[%s14174_s2 + $0x18] sm:$0xff]  ;;  %s11451_s22 = smov 112   ;;  %s11452_s23 = smov 48  }
   0x7   :  { %9986 = vmatprep.subr.mxu0 %v134_v8  ;;  %v58_v18 = vrot.slane %v45_v4, %v11546_v7  ;;  %v11571_v19 = vrot.slane %v425_v9, %v11546_v7  ;;  %v11574_v20 = vrot.slane %v9528_v14, %v11546_v7  ;;  %v72_v22 = vrot.slane %v45_v4, %v71_v10  ;;  %v123_v43 = vld [vmem:[%s14174_s2 + $0x10] sm:$0xff]  ;;  %v122_v44 = vld [vmem:[%s14174_s2 + $0x8] sm:$0xff]  ;;  %v121_v45 = vld [vmem:[%s14174_s2] sm:$0xff]  ;;  %s11453_s24 = smov 72   ;;  %s11454_s25 = smov 104  }
   0x8   :  { %14213 = vst [vmem:[#allocation3_spill] sm:$0xff] %v11556_v13  ;;  %14214 = vst [vmem:[#allocation4_spill] sm:$0xff] %v11561_v15  ;;  %53 = vbcast.lane.b32.xlu0 %v51_v11, 256  ;;  %67 = vbcast.lane.b32.xlu1 %v65_v12, 256  ;;  %v11577_v23 = vrot.slane %v425_v9, %v71_v10  ;;  %v11579_v24 = vrot.slane %v9528_v14, %v71_v10  ;;  %s11455_s26 = smov 40   ;;  %s11456_s2 = smov 8  }
   0x9   :  { %14215 = vst [vmem:[#allocation5_spill] sm:$0xff] %v11571_v19  ;;  %14216 = vst [vmem:[#allocation6_spill] sm:$0xff] %v11574_v20  ;;  %9987 = vmatpush3.msra.mxu0 %v134_v8  ;;  %v11582_v25 = vrot.slane %v9528_v14, %v11564_v16  ;;  %v11584_v26 = vrot.slane %v425_v9, %v85_v21  ;;  %v11589_v28 = vrot.slane %v9528_v14, %v85_v21  ;;  %s11457_s27 = smov 16   ;;  %vm4196_vm12 = vcmask 130048  }
   0xa   :  { %14217 = vst [vmem:[#allocation7_spill] sm:$0xff] %v11577_v23  ;;  %14218 = vst [vmem:[#allocation8_spill] sm:$0xff] %v11579_v24  ;;  %9988 = vmatprep.subr.mxu0 %v133_v17  ;;  %v79_v29 = vrot.slane %v45_v4, %v11564_v16  ;;  %v86_v30 = vrot.slane %v45_v4, %v85_v21  ;;  %v93_v35 = vrot.slane %v45_v4, %v92_v31  ;;  %vm4205_vm13 = vcmask 195584  }
   0xb   :  { %14219 = vst [vmem:[#allocation9_spill] sm:$0xff] %v11582_v25  ;;  %14220 = vst [vmem:[#allocation10_spill] sm:$0xff] %v11584_v26  ;;  %9989 = vmatpush3.msra.mxu0 %v133_v17  ;;  %v100_v36 = vrot.slane %v45_v4, %v99_v32  ;;  %vm4667_vm14 = vcmask 523264   ;;  %vm9319_vm15 = vcmask 1041409  }
   0xc   :  { %14221 = vst [vmem:[#allocation11_spill] sm:$0xff] %v11589_v28  ;;  %60 = vbcast.lane.b32.xlu0 %v58_v18, 256  ;;  %74 = vbcast.lane.b32.xlu1 %v72_v22, 256 }
   0xd   :  { %9990 = vmatprep.subr.mxu0 %v132_v27 }
   0xe   :  { %9991 = vmatpush3.msra.mxu0 %v132_v27 }
   0xf   :  { %9992 = vmatprep.subr.mxu0 %v131_v33 }
  0x10   :  { %81 = vbcast.lane.b32.xlu0 %v79_v29, 256  ;;  %88 = vbcast.lane.b32.xlu1 %v86_v30, 256 }
  0x11   :  { %9993 = vmatpush3.msra.mxu0 %v131_v33 }
  0x12   :  { %9994 = vmatprep.subr.mxu0 %v130_v34 }
  0x13   :  { %9995 = vmatpush3.msra.mxu0 %v130_v34 }
  0x14   :  { %95 = vbcast.lane.b32.xlu0 %v93_v35, 256  ;;  %102 = vbcast.lane.b32.xlu1 %v100_v36, 256 }
  0x15   :  { %9996 = vmatprep.subr.mxu0 %v129_v37 }
  0x16   :  { %9997 = vmatpush3.msra.mxu0 %v129_v37 }
  0x17   :  { %9998 = vmatprep.subr.mxu0 %v128_v38 }
  0x18   :  { %9999 = vmatpush3.msra.mxu0 %v128_v38 }
  0x19   :  { %10000 = vmatprep.subr.mxu0 %v127_v39 }
  0x1a   :  { %10001 = vmatpush3.msra.mxu0 %v127_v39 }
  0x1b   :  { %10002 = vmatprep.subr.mxu0 %v126_v40 }
  0x1c   :  { %10003 = vmatpush3.msra.mxu0 %v126_v40 }
  0x1d   :  { %10004 = vmatprep.subr.mxu0 %v125_v41 }
  0x1e   :  { %10005 = vmatpush3.msra.mxu0 %v125_v41 }
  0x1f   :  { %10006 = vmatprep.subr.mxu0 %v124_v42 }
  0x20   :  { %10007 = vmatpush3.msra.mxu0 %v124_v42 }
  0x21   :  { %10008 = vmatprep.subr.mxu0 %v123_v43 }
  0x22   :  { %10009 = vmatpush3.msra.mxu0 %v123_v43 }
  0x23   :  { %10010 = vmatprep.subr.mxu0 %v122_v44 }
  0x24   :  { %10011 = vmatpush3.msra.mxu0 %v122_v44 }
  0x25   :  { %10012 = vmatprep.subr.mxu0 %v121_v45 }
  0x26   :  { %10013 = vmatpush3.msra.mxu0 %v121_v45 }
  0x7a   :  { %v54_v47 = vpop.permute.xlu0 %53  ;;  %v68_v48 = vpop.permute.xlu1 %67 }
  0x7b   :  { %vm104_vm0 = vcmp.eq.s32.totalorder %v54_v47, %v47_v46  ;;  %vm106_vm1 = vcmp.eq.s32.totalorder %v68_v48, %v47_v46 }
  0x7c   :  { %10014 = vmatprep.mubr.msk.f32.mxu0 %vm104_vm0, %v11441_v49  ;;  %vm9322_vm0 = vcmask 1042434  }
  0x7e   :  { %v61_v50 = vpop.permute.xlu0 %60  ;;  %v75_v51 = vpop.permute.xlu1 %74 }
  0x7f   :  { %vm105_vm2 = vcmp.eq.s32.totalorder %v61_v50, %v47_v46  ;;  %vm107_vm3 = vcmp.eq.s32.totalorder %v75_v51, %v47_v46 }
  0x80   :  { %10015 = vmatmul.mubr.msk.f32.vlgmr.msra.gmra.mxu0 %vm105_vm2, %v11441_v49  ;;  %vm9328_vm2 = vcmask 1044484  }
  0x81   :  { %10017 = vmatprep.mubr.msk.f32.mxu0 %vm106_vm1, %v11441_v49  ;;  %vm9325_vm1 = vcmask 1043459  }
  0x82   :  { %v82_v52 = vpop.permute.xlu0 %81  ;;  %v89_v53 = vpop.permute.xlu1 %88 }
  0x83   :  { %vm108_vm4 = vcmp.eq.s32.totalorder %v82_v52, %v47_v46  ;;  %vm109_vm5 = vcmp.eq.s32.totalorder %v89_v53, %v47_v46 }
  0x84   :  { %10018 = vmatmul.mubr.msk.f32.gmra.mxu0 %vm107_vm3, %v11441_v49  ;;  %vm9331_vm3 = vcmask 1045509  }
  0x85   :  { %10020 = vmatprep.mubr.msk.f32.mxu0 %vm108_vm4, %v11441_v49  ;;  %vm9334_vm4 = vcmask 1046534  }
  0x86   :  { %v96_v54 = vpop.permute.xlu0 %95  ;;  %v103_v55 = vpop.permute.xlu1 %102 }
  0x87   :  { %vm110_vm6 = vcmp.eq.s32.totalorder %v96_v54, %v47_v46  ;;  %vm111_vm7 = vcmp.eq.s32.totalorder %v103_v55, %v47_v46 }
  0x88   :  { %10021 = vmatmul.mubr.msk.f32.gmra.mxu0 %vm109_vm5, %v11441_v49  ;;  %vm9337_vm5 = vcmask 1047559  }
  0x89   :  { %10023 = vmatprep.mubr.msk.f32.mxu0 %vm110_vm6, %v11441_v49  ;;  %vm9411_vm6 = vcmask 23552  }
  0x8c   :  { %10024 = vmatmul.mubr.msk.f32.gmra.mxu0 %vm111_vm7, %v11441_v49 }
 0x140   :  { %v10016_v56 = vpop.f32.mrf.mxu0 }
 0x141   :  { %v246_v57 = vsel %vm242_vm8, %v10016_v56, 0.0 }
 0x142   :  { %247 = vadd.xlane.f32.xlu1 %v246_v57  ;;  %v203_v58 = vpop.f32.mrf.mxu0 }
 0x143   :  { %v243_v59 = vsel %vm242_vm8, %v203_v58, 0.0 }
 0x144   :  { %244 = vadd.xlane.f32.xlu0 %v243_v59  ;;  %v10019_v60 = vpop.f32.mrf.mxu0 }
 0x145   :  { %v252_v2 = vsel %vm242_vm8, %v10019_v60, 0.0 }
 0x146   :  { %v213_v61 = vpop.f32.mrf.mxu0 }
 0x147   :  { %v249_v62 = vsel %vm242_vm8, %v213_v61, 0.0 }
 0x148   :  { %250 = vadd.xlane.f32.xlu0 %v249_v62  ;;  %v10022_v63 = vpop.f32.mrf.mxu0  ;;  %v11048_v62 = vld [vmem:[%s14176_s4] sm:$0xff]  }
 0x149   :  { %v258_v6 = vsel %vm242_vm8, %v10022_v63, 0.0 }
 0x14a   :  { %v223_v0 = vpop.f32.mrf.mxu0 }
 0x14b   :  { %v255_v3 = vsel %vm242_vm8, %v223_v0, 0.0 }
 0x14c   :  { %253 = vadd.xlane.f32.xlu0 %v252_v2  ;;  %256 = vadd.xlane.f32.xlu1 %v255_v3  ;;  %v10025_v4 = vpop.f32.mrf.mxu0 }
 0x14d   :  { %v264_v10 = vsel %vm242_vm8, %v10025_v4, 0.0 }
 0x14e   :  { %v233_v8 = vpop.f32.mrf.mxu0 }
 0x14f   :  { %v261_v9 = vsel %vm242_vm8, %v233_v8, 0.0 }
 0x150   :  { %259 = vadd.xlane.f32.xlu0 %v258_v6  ;;  %262 = vadd.xlane.f32.xlu1 %v261_v9 }
 0x154   :  { %265 = vadd.xlane.f32.xlu0 %v264_v10 }
 0x1cb   :  { %v248_v11 = vpop.xlane.xlu1 %247 }
 0x1cc   :  { %v269_v12 = vmul.f32 0.03125, %v248_v11 }
 0x1cd   :  { %v245_v14 = vpop.xlane.xlu0 %244 }
 0x1ce   :  { %v11636_v17 = vsub.f32 %v10016_v56, %v269_v12  ;;  %v268_v18 = vmul.f32 0.03125, %v245_v14 }
 0x1d0   :  { %v11638_v21 = vsub.f32 %v203_v58, %v268_v18  ;;  %v285_v22 = vmul.f32 %v11636_v17, %v11636_v17 }
 0x1d1   :  { %v251_v27 = vpop.xlane.xlu0 %250 }
 0x1d2   :  { %v270_v29 = vmul.f32 0.03125, %v251_v27  ;;  %v295_v30 = vsel %vm242_vm8, %v285_v22, 0.0  ;;  %v284_v31 = vmul.f32 %v11638_v21, %v11638_v21 }
 0x1d3   :  { %296 = vadd.xlane.f32.xlu0 %v295_v30 }
 0x1d4   :  { %v11645_v32 = vsub.f32 %v213_v61, %v270_v29  ;;  %v292_v33 = vsel %vm242_vm8, %v284_v31, 0.0  ;;  %v11047_v61 = vld [vmem:[%s14176_s4 + $0x8] sm:$0xff]   ;;  %v120_v29 = vld [vmem:[%s14177_s3] sm:$0x3]  ;;  %s14207_s3 = smov 24  }
 0x1d5   :  { %v257_v34 = vpop.xlane.xlu1 %256  ;;  %293 = vadd.xlane.f32.xlu1 %v292_v33  ;;  %v254_v35 = vpop.xlane.xlu0 %253  ;;  %10026 = vmatprep.subr.bf16.mxu1 %v11047_v61 }
 0x1d6   :  { %v272_v36 = vmul.f32 0.03125, %v257_v34  ;;  %v271_v37 = vmul.f32 0.03125, %v254_v35  ;;  %v286_v38 = vmul.f32 %v11645_v32, %v11645_v32  ;;  %10027 = vmatpush3.bf16.msra.mxu1 %v11047_v61  ;;  %v351_v35 = vrot.slane %v120_v29, %v11542_v5 }
 0x1d7   :  { %10028 = vmatprep.subr.bf16.mxu1 %v11048_v62 }
 0x1d8   :  { %v11650_v39 = vsub.f32 %v223_v0, %v272_v36  ;;  %v11652_v40 = vsub.f32 %v10019_v60, %v271_v37  ;;  %v298_v41 = vsel %vm242_vm8, %v286_v38, 0.0 }
 0x1d9   :  { %v263_v42 = vpop.xlane.xlu1 %262  ;;  %299 = vadd.xlane.f32.xlu1 %v298_v41  ;;  %v260_v43 = vpop.xlane.xlu0 %259 }
 0x1da   :  { %v274_v44 = vmul.f32 0.03125, %v263_v42  ;;  %v273_v45 = vmul.f32 0.03125, %v260_v43  ;;  %v288_v46 = vmul.f32 %v11650_v39, %v11650_v39  ;;  %v287_v47 = vmul.f32 %v11652_v40, %v11652_v40  ;;  %10029 = vmatpush3.bf16.msra.mxu1 %v11048_v62 }
 0x1dc   :  { %v11659_v48 = vsub.f32 %v233_v8, %v274_v44  ;;  %v11661_v49 = vsub.f32 %v10022_v63, %v273_v45  ;;  %v304_v50 = vsel %vm242_vm8, %v288_v46, 0.0  ;;  %v301_v51 = vsel %vm242_vm8, %v287_v47, 0.0 }
 0x1dd   :  { %305 = vadd.xlane.f32.xlu1 %v304_v50  ;;  %302 = vadd.xlane.f32.xlu0 %v301_v51  ;;  %v266_v52 = vpop.xlane.xlu0 %265  ;;  %v363_v45 = vrot.slane %v120_v29, %v11546_v7 }
 0x1de   :  { %v275_v53 = vmul.f32 0.03125, %v266_v52  ;;  %v290_v54 = vmul.f32 %v11659_v48, %v11659_v48  ;;  %v289_v55 = vmul.f32 %v11661_v49, %v11661_v49 }
 0x1e0   :  { %v11669_v56 = vsub.f32 %v10025_v4, %v275_v53  ;;  %v310_v57 = vsel %vm242_vm8, %v290_v54, 0.0  ;;  %v307_v58 = vsel %vm242_vm8, %v289_v55, 0.0 }
 0x1e1   :  { %311 = vadd.xlane.f32.xlu1 %v310_v57  ;;  %308 = vadd.xlane.f32.xlu0 %v307_v58 }
 0x1e2   :  { %v291_v59 = vmul.f32 %v11669_v56, %v11669_v56 }
 0x1e4   :  { %v313_v60 = vsel %vm242_vm8, %v291_v59, 0.0 }
 0x1e5   :  { %314 = vadd.xlane.f32.xlu0 %v313_v60 }
 0x25c   :  { %v297_v63 = vpop.xlane.xlu0 %296 }
 0x25d   :  { %v317_v0 = vmul.f32 0.03125, %v297_v63 }
 0x25e   :  { %v294_v2 = vpop.xlane.xlu1 %293 }
 0x25f   :  { %v325_v3 = vadd.f32 1e-07, %v317_v0  ;;  %v316_v4 = vmul.f32 0.03125, %v294_v2 }
 0x261   :  { %11067 = vrsqrt.f32 %v325_v3  ;;  %v324_v6 = vadd.f32 1e-07, %v316_v4 }
 0x262   :  { %v300_v8 = vpop.xlane.xlu1 %299 }
 0x263   :  { %11069 = vrsqrt.f32 %v324_v6  ;;  %v318_v9 = vmul.f32 0.03125, %v300_v8 }
 0x265   :  { %v326_v10 = vadd.f32 1e-07, %v318_v9 }
 0x266   :  { %v306_v11 = vpop.xlane.xlu1 %305  ;;  %v303_v12 = vpop.xlane.xlu0 %302 }
 0x267   :  { %11071 = vrsqrt.f32 %v326_v10  ;;  %v320_v14 = vmul.f32 0.03125, %v306_v11  ;;  %v319_v18 = vmul.f32 0.03125, %v303_v12 }
 0x269   :  { %v328_v22 = vadd.f32 1e-07, %v320_v14  ;;  %v327_v27 = vadd.f32 1e-07, %v319_v18  ;;  %v14187_v14 = vmov 0.0  }
 0x26a   :  { %v312_v30 = vpop.xlane.xlu1 %311  ;;  %v309_v31 = vpop.xlane.xlu0 %308  ;;  %10038 = vmatprep.subr.bf16.mxu1 %v14187_v14  ;;  %10056 = vmatprep.subr.bf16.mxu0 %v14187_v14 }
 0x26b   :  { %11073 = vrsqrt.f32 %v328_v22  ;;  %v322_v33 = vmul.f32 0.03125, %v312_v30  ;;  %v321_v34 = vmul.f32 0.03125, %v309_v31  ;;  %10058 = vmatprep.mubr.msk.bf16.mxu0 %vm11443_vm9, %v14187_v14  ;;  %v9436_v22 = vld [vmem:[%s14178_s5] ss:$0 sm:$0xff] }
 0x26c   :  { %11075 = vrsqrt.f32 %v327_v27 }
 0x26d   :  { %v330_v36 = vadd.f32 1e-07, %v322_v33  ;;  %v329_v37 = vadd.f32 1e-07, %v321_v34 }
 0x26e   :  { %v11068_v38 = vpop.eup %11067  ;;  %v315_v41 = vpop.xlane.xlu0 %314 }
 0x26f   :  { %11077 = vrsqrt.f32 %v330_v36  ;;  %v323_v42 = vmul.f32 0.03125, %v315_v41  ;;  %v341_v43 = vmul.f32 %v11068_v38, %v11636_v17 }
 0x270   :  { %v11070_v44 = vpop.eup %11069  ;;  %11079 = vrsqrt.f32 %v329_v37 }
 0x271   :  { %v331_v46 = vadd.f32 1e-07, %v323_v42  ;;  %v340_v47 = vmul.f32 %v11070_v44, %v11638_v21  ;;  %v353_v50 = vmul.f32 %v351_v35, %v341_v43 }
 0x273   :  { %11081 = vrsqrt.f32 %v331_v46  ;;  %v352_v51 = vmul.f32 %v351_v35, %v340_v47  ;;  %v11691_v54 = vadd.f32 %v363_v45, %v353_v50 }
 0x274   :  { %v11072_v52 = vpop.eup %11071 }
 0x275   :  { %v11689_v53 = vadd.f32 %v363_v45, %v352_v51  ;;  %v342_v55 = vmul.f32 %v11072_v52, %v11645_v32 }
 0x277   :  { %v426_v17 = vpack.c.bf16 %v11691_v54, %v11689_v53  ;;  %v354_v21 = vmul.f32 %v351_v35, %v342_v55 }
 0x278   :  { %v11074_v57 = vpop.eup %11073 }
 0x279   :  { %v11076_v58 = vpop.eup %11075  ;;  %10030 = vmatprep.mubr.msk.bf16.mxu1 %vm242_vm8, %v426_v17  ;;  %v344_v59 = vmul.f32 %v11074_v57, %v11650_v39  ;;  %v11700_v0 = vadd.f32 %v363_v45, %v354_v21 }
 0x27a   :  { %v343_v7 = vmul.f32 %v11076_v58, %v11652_v40 }
 0x27b   :  { %v356_v3 = vmul.f32 %v351_v35, %v344_v59 }
 0x27c   :  { %v11078_v60 = vpop.eup %11077  ;;  %v355_v61 = vmul.f32 %v351_v35, %v343_v7 }
 0x27d   :  { %v11080_v62 = vpop.eup %11079  ;;  %v346_v63 = vmul.f32 %v11078_v60, %v11659_v48  ;;  %v11709_v9 = vadd.f32 %v363_v45, %v356_v3 }
 0x27e   :  { %v11702_v32 = vadd.f32 %v363_v45, %v355_v61  ;;  %v345_v2 = vmul.f32 %v11080_v62, %v11661_v49 }
 0x27f   :  { %v358_v39 = vmul.f32 %v351_v35, %v346_v63  ;;  %14223 = vst [vmem:[#allocation13_spill] sm:$0xff] %v11709_v9 }
 0x280   :  { %14222 = vst [vmem:[#allocation12_spill] sm:$0xff] %v11702_v32  ;;  %v11082_v4 = vpop.eup %11081  ;;  %v427_v6 = vpack.c.bf16 %v11702_v32, %v11700_v0  ;;  %v357_v40 = vmul.f32 %v351_v35, %v345_v2 }
 0x281   :  { %v347_v8 = vmul.f32 %v11082_v4, %v11669_v56  ;;  %v11715_v49 = vadd.f32 %v363_v45, %v358_v39 }
 0x282   :  { %10031 = vmatmul.mubr.msk.bf16.vlgmr.msra.gmra.mxu1 %vm242_vm8, %v427_v6  ;;  %v11711_v48 = vadd.f32 %v363_v45, %v357_v40 }
 0x283   :  { %v359_v10 = vmul.f32 %v351_v35, %v347_v8  ;;  %14225 = vst [vmem:[#allocation15_spill] sm:$0xff] %v11715_v49 }
 0x284   :  { %14224 = vst [vmem:[#allocation14_spill] sm:$0xff] %v11711_v48  ;;  %v428_v11 = vpack.c.bf16 %v11711_v48, %v11709_v9 }
 0x285   :  { %v11717_v12 = vadd.f32 %v363_v45, %v359_v10 }
 0x286   :  { %10034 = vmatprep.mubr.msk.bf16.mxu1 %vm242_vm8, %v428_v11 }
 0x287   :  { %14226 = vst [vmem:[#allocation16_spill] sm:$0xff] %v11717_v12  ;;  %v429_v56 = vpack.c.bf16 %v11717_v12, %v11715_v49 }
 0x28a   :  { %10035 = vmatmul.mubr.msk.bf16.gmra.mxu1 %vm242_vm8, %v429_v56 }
 0x28b   :  { %10040 = vmatprep.mubr.msk.bf16.mxu1 %vm11443_vm9, %v14187_v14 }
 0x342   :  { %v10032_v18 = vpop.f32.mrf.mxu1 }
 0x343   :  { %v508_v31 = vadd.f32 %v10032_v18, %v9436_v22 }
 0x344   :  { %v499_v27 = vpop.f32.mrf.mxu1 }
 0x345   :  { %v500_v29 = vadd.f32 %v9436_v22, %v499_v27  ;;  %v11736_v37 = vpack.c.bf16 %v508_v31, %v508_v31  ;;  %v11446_v27 = vmov 1966171168  }
 0x346   :  { %v10033_v30 = vpop.f32.mrf.mxu1 }
 0x347   :  { %v11732_v33 = vpack.c.bf16 %v500_v29, %v500_v29  ;;  %v511_v38 = vadd.f32 %v10033_v30, %v9436_v22  ;;  %v378_v29 = vunpack.c.l.s4 %v11446_v27  ;;  %v372_v30 = vld [vmem:[%s14179_s1] sm:$0xff]  ;;  %s11447_s1 = smov 88  }
 0x348   :  { %v502_v34 = vpop.f32.mrf.mxu1  ;;  %v373_v31 = vsub.f32 1.0, %v372_v30 }
 0x349   :  { %v503_v35 = vadd.f32 %v9436_v22, %v502_v34  ;;  %579 = vrot.lane.b32.xlu1 %v11732_v33, %s11444_s16  ;;  %v11744_v45 = vpack.c.bf16 %v511_v38, %v511_v38  ;;  %v379_v34 = vunpack.c.0.s8 %v378_v29 }
 0x34a   :  { %v10036_v36 = vpop.f32.mrf.mxu1 }
 0x34b   :  { %v11738_v41 = vpack.c.bf16 %v503_v35, %v503_v35  ;;  %v524_v46 = vadd.f32 %v10036_v36, %v9436_v22  ;;  %v374_v35 = vmul.f32 -1e+09, %v373_v31  ;;  %v11828_v36 = vsub.s32 %v379_v34, %v11530_v1 }
 0x34c   :  { %v515_v42 = vpop.f32.mrf.mxu1 }
 0x34d   :  { %v516_v43 = vadd.f32 %v9436_v22, %v515_v42  ;;  %629 = vrot.lane.b32.xlu0 %v11738_v41, %s11444_s16  ;;  %678 = vrot.lane.b32.xlu1 %v11736_v37, %s11444_s16  ;;  %v11752_v52 = vpack.c.bf16 %v524_v46, %v524_v46  ;;  %v383_v38 = vrot.slane %v374_v35, %v11828_v36 }
 0x34e   :  { %v10037_v44 = vpop.f32.mrf.mxu1 }
 0x34f   :  { %v11746_v47 = vpack.c.bf16 %v516_v43, %v516_v43  ;;  %v527_v55 = vadd.f32 %v10037_v44, %v9436_v22  ;;  %v399_v42 = vrot.slane %v383_v38, %v11828_v36  ;;  %v391_v43 = vcombine.high %v383_v38, %v383_v38 }
 0x350   :  { %v518_v50 = vpop.f32.mrf.mxu1 }
 0x351   :  { %v519_v51 = vadd.f32 %v9436_v22, %v518_v50  ;;  %727 = vrot.lane.b32.xlu1 %v11744_v45, %s11444_s16  ;;  %776 = vrot.lane.b32.xlu0 %v11746_v47, %s11444_s16  ;;  %v11760_v57 = vpack.c.bf16 %v527_v55, %v527_v55  ;;  %v11833_v44 = vrot.slane %v399_v42, %v11542_v5 }
 0x352   :  { %v413_v46 = vrot.slane %v391_v43, %v11828_v36  ;;  %v376_v50 = vcombine.high %v374_v35, %v374_v35 }
 0x353   :  { %v11754_v17 = vpack.c.bf16 %v519_v51, %v519_v51 }
 0x355   :  { %825 = vrot.lane.b32.xlu1 %v11754_v17, %s11444_s16  ;;  %874 = vrot.lane.b32.xlu0 %v11752_v52, %s11444_s16 }
 0x359   :  { %923 = vrot.lane.b32.xlu1 %v11760_v57, %s11444_s16  ;;  %1116 = vrot.lane.b32.xlu0 %v11738_v41, %s11445_s17 }
 0x35d   :  { %1067 = vrot.lane.b32.xlu1 %v11732_v33, %s11445_s17 }
 0x361   :  { %1164 = vrot.lane.b32.xlu1 %v11736_v37, %s11445_s17 }
 0x365   :  { %1212 = vrot.lane.b32.xlu1 %v11744_v45, %s11445_s17 }
 0x3bb   :  { %v580_v58 = vpop.permute.xlu1 %579 }
 0x3bc   :  { %v586_v7 = vsel %vm581_vm10, %v580_v58, 0  ;;  %v423_v58 = vcombine.high %v413_v46, %v413_v46 }
 0x3bd   :  { %10039 = vmatpush3.bf16.xpose.msra.mxu1 %v586_v7  ;;  %v390_v7 = vrot.slane %v376_v50, %v11828_v36 }
 0x3be   :  { %10044 = vmatprep.subr.bf16.mxu1 %v14187_v14 }
 0x3bf   :  { %v679_v21 = vpop.permute.xlu1 %678  ;;  %v630_v59 = vpop.permute.xlu0 %629 }
 0x3c0   :  { %v635_v61 = vsel %vm581_vm10, %v630_v59, 0  ;;  %v684_v2 = vsel %vm581_vm10, %v679_v21, 0 }
 0x3c3   :  { %v728_v60 = vpop.permute.xlu1 %727  ;;  %v777_v4 = vpop.permute.xlu0 %776 }
 0x3c4   :  { %v733_v62 = vsel %vm581_vm10, %v728_v60, 0  ;;  %10041 = vmatmul.mubr.msk.bf16.vlgmr.msra.gmra.mxu1 %vm581_vm10, %v11732_v33  ;;  %v782_v8 = vsel %vm581_vm10, %v777_v4, 0  ;;  %v11843_v60 = vrot.slane %v413_v46, %v11542_v5 }
 0x3c5   :  { %10045 = vmatpush3.bf16.xpose.msra.mxu1 %v635_v61  ;;  %10057 = vmatpush3.bf16.xpose.msra.mxu0 %v733_v62  ;;  %v11846_v61 = vrot.slane %v423_v58, %v11542_v5  ;;  %v392_v62 = vcombine.high %v390_v7, %v390_v7 }
 0x3c6   :  { %10046 = vmatprep.mubr.msk.bf16.mxu1 %vm11443_vm9, %v14187_v14  ;;  %10050 = vmatprep.subr.bf16.mxu1 %v14187_v14 }
 0x3c7   :  { %10068 = vmatprep.subr.bf16.mxu0 %v14187_v14  ;;  %v826_v63 = vpop.permute.xlu1 %825  ;;  %v875_v40 = vpop.permute.xlu0 %874 }
 0x3c8   :  { %v831_v3 = vsel %vm581_vm10, %v826_v63, 0  ;;  %v880_v11 = vsel %vm581_vm10, %v875_v40, 0  ;;  %v420_v40 = vrot.slane %v392_v62, %v11828_v36 }
 0x3ca   :  { %v11860_v27 = vrot.slane %v420_v40, %v11542_v5  ;;  %v424_v43 = vcombine.high %v420_v40, %v420_v40 }
 0x3cb   :  { %v924_v6 = vpop.permute.xlu1 %923  ;;  %v1117_v10 = vpop.permute.xlu0 %1116 }
 0x3cc   :  { %10047 = vmatmul.mubr.msk.bf16.vlgmr.msra.gmra.mxu1 %vm581_vm10, %v11738_v41  ;;  %10059 = vmatmul.mubr.msk.bf16.vlgmr.msra.gmra.mxu0 %vm581_vm10, %v11744_v45  ;;  %v929_v39 = vsel %vm581_vm10, %v924_v6, 0  ;;  %v1122_v56 = vsel %vm1072_vm11, %v1117_v10, 0  ;;  %14227 = vst [vmem:[#allocation17_spill] sm:$0xff] %v11860_v27 }
 0x3cd   :  { %10051 = vmatpush3.bf16.xpose.msra.mxu1 %v684_v2  ;;  %10069 = vmatpush3.bf16.xpose.msra.mxu0 %v831_v3 }
 0x3ce   :  { %10070 = vmatprep.mubr.msk.bf16.mxu0 %vm11443_vm9, %v14187_v14  ;;  %10052 = vmatprep.mubr.msk.bf16.mxu1 %vm11443_vm9, %v14187_v14 }
 0x3cf   :  { %10062 = vmatprep.subr.bf16.mxu1 %v14187_v14  ;;  %10080 = vmatprep.subr.bf16.mxu0 %v14187_v14  ;;  %v1068_v18 = vpop.permute.xlu1 %1067 }
 0x3d0   :  { %v1074_v22 = vsel %vm1072_vm11, %v1068_v18, 0 }
 0x3d4   :  { %10053 = vmatmul.mubr.msk.bf16.vlgmr.msra.gmra.mxu1 %vm581_vm10, %v11736_v37  ;;  %10071 = vmatmul.mubr.msk.bf16.vlgmr.msra.gmra.mxu0 %vm581_vm10, %v11754_v17 }
 0x3d5   :  { %10063 = vmatpush3.bf16.xpose.msra.mxu1 %v782_v8  ;;  %10081 = vmatpush3.bf16.xpose.msra.mxu0 %v929_v39 }
 0x3d6   :  { %10064 = vmatprep.mubr.msk.bf16.mxu1 %vm11443_vm9, %v14187_v14  ;;  %10082 = vmatprep.mubr.msk.bf16.mxu0 %vm11443_vm9, %v14187_v14 }
 0x3d7   :  { %10074 = vmatprep.subr.bf16.mxu1 %v14187_v14  ;;  %10092 = vmatprep.subr.bf16.mxu0 %v14187_v14 }
 0x3dc   :  { %10065 = vmatmul.mubr.msk.bf16.vlgmr.msra.gmra.mxu1 %vm581_vm10, %v11746_v47  ;;  %10083 = vmatmul.mubr.msk.bf16.vlgmr.msra.gmra.mxu0 %vm581_vm10, %v11760_v57 }
 0x3dd   :  { %10075 = vmatpush3.bf16.xpose.msra.mxu1 %v880_v11  ;;  %10093 = vmatpush3.bf16.msra.mxu0 %v1122_v56  ;;  %v421_v56 = vcombine.high %v399_v42, %v399_v42 }
 0x3de   :  { %10076 = vmatprep.mubr.msk.bf16.mxu1 %vm11443_vm9, %v14187_v14  ;;  %10086 = vmatprep.subr.bf16.mxu1 %v14187_v14 }
 0x3df   :  { %10094 = vmatprep.mubr.msk.bf16.mxu0 %vm11443_vm9, %v14187_v14  ;;  %10104 = vmatprep.subr.bf16.mxu0 %v14187_v14  ;;  %v11863_v31 = vrot.slane %v421_v56, %v11542_v5 }
 0x3e4   :  { %10077 = vmatmul.mubr.msk.bf16.vlgmr.msra.gmra.mxu1 %vm581_vm10, %v11752_v52 }
 0x3e5   :  { %10087 = vmatpush3.bf16.msra.mxu1 %v1074_v22  ;;  %10088 = vmatprep.mubr.msk.bf16.mxu1 %vm11443_vm9, %v14187_v14 }
 0x3e6   :  { %10098 = vmatprep.subr.bf16.mxu1 %v14187_v14 }
 0x484   :  { %v622_v51 = vpop.f32.mrf.mxu1 }
 0x485   :  { %v11837_v55 = vadd.f32 %v622_v51, %v11833_v44 }
 0x486   :  { %v10042_v1 = vpop.f32.mrf.mxu1 }
 0x487   :  { %v971_v21 = vsel %vm581_vm10, %v11837_v55, -inf }
 0x488   :  { %v625_v59 = vpop.f32.mrf.mxu1  ;;  %972 = vmax.xlane.f32.xlu0 %v971_v21  ;;  %v11871_v21 = vrot.slane %v424_v43, %v11542_v5  ;;  %v406_v43 = vrot.slane %v390_v7, %v11828_v36  ;;  %v11898_v36 = vpop.permute.xlu1 %1164 }
 0x48a   :  { %v10043_v63 = vpop.f32.mrf.mxu1 }
 0x48c   :  { %v671_v2 = vpop.f32.mrf.mxu1  ;;  %v769_v3 = vpop.f32.mrf.mxu0 }
 0x48d   :  { %v11849_v4 = vadd.f32 %v671_v2, %v11843_v60  ;;  %v11852_v6 = vadd.f32 %v769_v3, %v11846_v61 }
 0x48e   :  { %v10048_v8 = vpop.f32.mrf.mxu1  ;;  %v10060_v39 = vpop.f32.mrf.mxu0 }
 0x48f   :  { %v980_v10 = vsel %vm581_vm10, %v11852_v6, -inf  ;;  %v974_v11 = vsel %vm581_vm10, %v11849_v4, -inf }
 0x490   :  { %v772_v18 = vpop.f32.mrf.mxu0  ;;  %981 = vmax.xlane.f32.xlu0 %v980_v10  ;;  %975 = vmax.xlane.f32.xlu1 %v974_v11  ;;  %v674_v22 = vpop.f32.mrf.mxu1 }
 0x492   :  { %v10049_v29 = vpop.f32.mrf.mxu1  ;;  %v10061_v30 = vpop.f32.mrf.mxu0 }
 0x494   :  { %v720_v34 = vpop.f32.mrf.mxu1  ;;  %v867_v35 = vpop.f32.mrf.mxu0 }
 0x495   :  { %v868_v38 = vadd.f32 %v867_v35, %v11860_v27  ;;  %v11867_v42 = vadd.f32 %v720_v34, %v11863_v31 }
 0x496   :  { %v10054_v46 = vpop.f32.mrf.mxu1  ;;  %v10072_v50 = vpop.f32.mrf.mxu0 }
 0x497   :  { %v986_v51 = vsel %vm581_vm10, %v868_v38, -inf  ;;  %v977_v63 = vsel %vm581_vm10, %v11867_v42, -inf  ;;  %v11886_v46 = vrot.slane %v406_v43, %v11542_v5  ;;  %v422_v50 = vcombine.high %v406_v43, %v406_v43 }
 0x498   :  { %v870_v58 = vpop.f32.mrf.mxu0  ;;  %987 = vmax.xlane.f32.xlu0 %v986_v51  ;;  %v723_v1 = vpop.f32.mrf.mxu1 }
 0x499   :  { %v11890_v58 = vrot.slane %v422_v50, %v11542_v5 }
 0x49a   :  { %v10055_v59 = vpop.f32.mrf.mxu1  ;;  %v10073_v62 = vpop.f32.mrf.mxu0 }
 0x49c   :  { %v965_v2 = vpop.f32.mrf.mxu0  ;;  %978 = vmax.xlane.f32.xlu0 %v977_v63  ;;  %v818_v3 = vpop.f32.mrf.mxu1 }
 0x49d   :  { %v11876_v40 = vadd.f32 %v965_v2, %v11871_v21  ;;  %v819_v51 = vadd.f32 %v818_v3, %v11886_v46  ;;  %v11901_v3 = vpop.permute.xlu1 %1212 }
 0x49e   :  { %v10066_v8 = vpop.f32.mrf.mxu1  ;;  %v10084_v39 = vpop.f32.mrf.mxu0 }
 0x49f   :  { %v992_v10 = vsel %vm581_vm10, %v11876_v40, -inf  ;;  %v983_v59 = vsel %vm581_vm10, %v819_v51, -inf }
 0x4a0   :  { %v968_v11 = vpop.f32.mrf.mxu0  ;;  %993 = vmax.xlane.f32.xlu0 %v992_v10  ;;  %v821_v56 = vpop.f32.mrf.mxu1 }
 0x4a1   :  { %1308 = vrot.lane.b32.xlu1 %v11754_v17, %s11445_s17 }
 0x4a2   :  { %v10067_v18 = vpop.f32.mrf.mxu1  ;;  %v10085_v22 = vpop.f32.mrf.mxu0 }
 0x4a4   :  { %v916_v29 = vpop.f32.mrf.mxu1 }
 0x4a5   :  { %v11893_v1 = vadd.f32 %v916_v29, %v11890_v58 }
 0x4a6   :  { %v10078_v30 = vpop.f32.mrf.mxu1 }
 0x4a7   :  { %v989_v62 = vsel %vm581_vm10, %v11893_v1, -inf }
 0x4a8   :  { %v919_v34 = vpop.f32.mrf.mxu1 }
 0x4aa   :  { %v10079_v35 = vpop.f32.mrf.mxu1 }
 0x4b6   :  { %1260 = vrot.lane.b32.xlu0 %v11746_v47, %s11445_s17 }
 0x4c5   :  { %984 = vmax.xlane.f32.xlu1 %v983_v59 }
 0x4c9   :  { %990 = vmax.xlane.f32.xlu1 %v989_v62 }
 0x511   :  { %v973_v7 = vpop.xlane.xlu0 %972 }
 0x512   :  { %v995_v63 = vsub.f32 %v11837_v55, %v973_v7 }
 0x514   :  { %v1003_v2 = vmul.f32 1.442695, %v995_v63 }
 0x516   :  { %11083 = vpow2.f32 %v1003_v2 }
 0x519   :  { %v976_v8 = vpop.xlane.xlu1 %975  ;;  %v982_v39 = vpop.xlane.xlu0 %981 }
 0x51a   :  { %v996_v10 = vsub.f32 %v11849_v4, %v976_v8  ;;  %v998_v11 = vsub.f32 %v11852_v6, %v982_v39 }
 0x51c   :  { %v1009_v56 = vmul.f32 1.442695, %v998_v11  ;;  %v1005_v18 = vmul.f32 1.442695, %v996_v10 }
 0x51d   :  { %v11924_v63 = vpop.permute.xlu1 %1308 }
 0x51e   :  { %11085 = vpow2.f32 %v1009_v56 }
 0x51f   :  { %11087 = vpow2.f32 %v1005_v18 }
 0x521   :  { %v988_v22 = vpop.xlane.xlu0 %987 }
 0x522   :  { %v1000_v29 = vsub.f32 %v868_v38, %v988_v22 }
 0x523   :  { %v11905_v30 = vpop.eup %11083 }
 0x524   :  { %v1013_v34 = vmul.f32 1.442695, %v1000_v29  ;;  %v1019_v55 = vsel %vm581_vm10, %v11905_v30, 0.0 }
 0x525   :  { %1020 = vadd.xlane.f32.xlu1 %v1019_v55  ;;  %v979_v59 = vpop.xlane.xlu0 %978 }
 0x526   :  { %11089 = vpow2.f32 %v1013_v34  ;;  %v997_v62 = vsub.f32 %v11867_v42, %v979_v59 }
 0x528   :  { %v1007_v7 = vmul.f32 1.442695, %v997_v62 }
 0x529   :  { %v994_v8 = vpop.xlane.xlu0 %993 }
 0x52a   :  { %11091 = vpow2.f32 %v1007_v7  ;;  %v1002_v11 = vsub.f32 %v11876_v40, %v994_v8 }
 0x52b   :  { %v11909_v35 = vpop.eup %11085 }
 0x52c   :  { %v1028_v4 = vsel %vm581_vm10, %v11909_v35, 0.0  ;;  %v11913_v6 = vpop.eup %11087  ;;  %v1017_v18 = vmul.f32 1.442695, %v1002_v11 }
 0x52d   :  { %1029 = vadd.xlane.f32.xlu0 %v1028_v4  ;;  %v1022_v43 = vsel %vm581_vm10, %v11913_v6, 0.0  ;;  %v1261_v59 = vpop.permute.xlu0 %1260 }
 0x531   :  { %1023 = vadd.xlane.f32.xlu0 %v1022_v43 }
 0x533   :  { %v11917_v38 = vpop.eup %11089 }
 0x534   :  { %v1034_v50 = vsel %vm581_vm10, %v11917_v38, 0.0 }
 0x535   :  { %1035 = vadd.xlane.f32.xlu0 %v1034_v50 }
 0x536   :  { %1404 = vrot.lane.b32.xlu1 %v11760_v57, %s11445_s17 }
 0x537   :  { %v11929_v56 = vpop.eup %11091 }
 0x538   :  { %v1025_v42 = vsel %vm581_vm10, %v11929_v56, 0.0 }
 0x54b   :  { %1356 = vrot.lane.b32.xlu0 %v11752_v52, %s11445_s17 }
 0x54e   :  { %v985_v2 = vpop.xlane.xlu1 %984 }
 0x54f   :  { %v999_v39 = vsub.f32 %v819_v51, %v985_v2 }
 0x551   :  { %v1011_v10 = vmul.f32 1.442695, %v999_v39 }
 0x552   :  { %v991_v51 = vpop.xlane.xlu1 %990 }
 0x553   :  { %11093 = vpow2.f32 %v1011_v10  ;;  %v1001_v55 = vsub.f32 %v11893_v1, %v991_v51  ;;  %v1170_v10 = vsel %vm1072_vm11, %v11898_v36, 0 }
 0x554   :  { %11095 = vpow2.f32 %v1017_v18 }
 0x555   :  { %v1015_v4 = vmul.f32 1.442695, %v1001_v55  ;;  %v1314_v55 = vsel %vm1072_vm11, %v11924_v63, 0 }
 0x557   :  { %11097 = vpow2.f32 %v1015_v4 }
 0x55a   :  { %1026 = vadd.xlane.f32.xlu1 %v1025_v42 }
 0x560   :  { %v11933_v22 = vpop.eup %11093 }
 0x561   :  { %v1031_v29 = vsel %vm581_vm10, %v11933_v22, 0.0  ;;  %v11937_v34 = vpop.eup %11095 }
 0x562   :  { %1032 = vadd.xlane.f32.xlu1 %v1031_v29  ;;  %v1040_v40 = vsel %vm581_vm10, %v11937_v34, 0.0  ;;  %v1218_v29 = vsel %vm1072_vm11, %v11901_v3, 0 }
 0x564   :  { %v11954_v43 = vpop.eup %11097 }
 0x565   :  { %v1037_v1 = vsel %vm581_vm10, %v11954_v43, 0.0 }
 0x56a   :  { %1041 = vadd.xlane.f32.xlu0 %v1040_v40 }
 0x573   :  { %1504 = vrot.lane.b32.xlu1 %v11738_v41, %s11447_s1 }
 0x580   :  { %1454 = vrot.lane.b32.xlu0 %v11732_v33, %s11447_s1 }
 0x584   :  { %1452 = vrot.lane.b32.xlu0 %v11732_v33, %s11448_s19 }
 0x588   :  { %1554 = vrot.lane.b32.xlu0 %v11736_v37, %s11447_s1 }
 0x58c   :  { %1552 = vrot.lane.b32.xlu0 %v11736_v37, %s11448_s19 }
 0x590   :  { %1654 = vrot.lane.b32.xlu0 %v11746_v47, %s11447_s1 }
 0x594   :  { %1652 = vrot.lane.b32.xlu0 %v11746_v47, %s11448_s19 }
 0x597   :  { %1038 = vadd.xlane.f32.xlu1 %v1037_v1 }
 0x598   :  { %1754 = vrot.lane.b32.xlu0 %v11752_v52, %s11447_s1 }
 0x59c   :  { %1752 = vrot.lane.b32.xlu0 %v11752_v52, %s11448_s19 }
 0x5a0   :  { %1996 = vrot.lane.b32.xlu0 %v11738_v41, %s11449_s20 }
 0x5a8   :  { %1502 = vrot.lane.b32.xlu1 %v11738_v41, %s11448_s19 }
 0x5ac   :  { %1604 = vrot.lane.b32.xlu1 %v11744_v45, %s11447_s1 }
 0x5ae   :  { %v1021_v50 = vpop.xlane.xlu1 %1020 }
 0x5af   :  { %11099 = vrcp.f32 %v1021_v50 }
 0x5b0   :  { %1602 = vrot.lane.b32.xlu1 %v11744_v45, %s11448_s19 }
 0x5b2   :  { %v1405_v4 = vpop.permute.xlu1 %1404 }
 0x5b3   :  { %v1410_v50 = vsel %vm1072_vm11, %v1405_v4, 0 }
 0x5b4   :  { %1704 = vrot.lane.b32.xlu1 %v11754_v17, %s11447_s1 }
 0x5b6   :  { %v1030_v62 = vpop.xlane.xlu0 %1029 }
 0x5b8   :  { %1702 = vrot.lane.b32.xlu1 %v11754_v17, %s11448_s19 }
 0x5ba   :  { %v1024_v7 = vpop.xlane.xlu0 %1023 }
 0x5bb   :  { %11101 = vrcp.f32 %v1024_v7 }
 0x5bc   :  { %v11100_v2 = vpop.eup %11099  ;;  %1804 = vrot.lane.b32.xlu1 %v11760_v57, %s11447_s1  ;;  %11103 = vrcp.f32 %v1030_v62 }
 0x5bd   :  { %v1051_v8 = vmul.f32 %v11100_v2, %v11905_v30 }
 0x5be   :  { %v1036_v30 = vpop.xlane.xlu0 %1035 }
 0x5bf   :  { %v1059_v39 = vpack.c.bf16 %v1051_v8, %v1051_v8  ;;  %11105 = vrcp.f32 %v1036_v30 }
 0x5c0   :  { %1802 = vrot.lane.b32.xlu1 %v11760_v57, %s11448_s19 }
 0x5c1   :  { %10089 = vmatmul.mubr.msk.bf16.vlgmr.msra.gmra.mxu1 %vm581_vm10, %v1059_v39  ;;  %v1266_v39 = vsel %vm1072_vm11, %v1261_v59, 0 }
 0x5c2   :  { %10099 = vmatpush3.bf16.msra.mxu1 %v1170_v10  ;;  %10100 = vmatprep.mubr.msk.bf16.mxu1 %vm11443_vm9, %v14187_v14  ;;  %v1357_v62 = vpop.permute.xlu0 %1356 }
 0x5c3   :  { %10110 = vmatprep.subr.bf16.mxu1 %v14187_v14 }
 0x5c4   :  { %1948 = vrot.lane.b32.xlu1 %v11732_v33, %s11449_s20 }
 0x5c8   :  { %2044 = vrot.lane.b32.xlu1 %v11736_v37, %s11449_s20  ;;  %v11102_v11 = vpop.eup %11101 }
 0x5c9   :  { %v1052_v18 = vmul.f32 %v11102_v11, %v11913_v6  ;;  %v11104_v42 = vpop.eup %11103 }
 0x5ca   :  { %v1054_v40 = vmul.f32 %v11104_v42, %v11909_v35 }
 0x5cb   :  { %v1060_v36 = vpack.c.bf16 %v1052_v18, %v1052_v18  ;;  %v1362_v18 = vsel %vm1072_vm11, %v1357_v62, 0 }
 0x5cc   :  { %2092 = vrot.lane.b32.xlu1 %v11744_v45, %s11449_s20  ;;  %v1062_v51 = vpack.c.bf16 %v1054_v40, %v1054_v40  ;;  %v11106_v6 = vpop.eup %11105 }
 0x5cd   :  { %10095 = vmatmul.mubr.msk.bf16.vlgmr.msra.gmra.mxu0 %vm581_vm10, %v1060_v36  ;;  %v1056_v3 = vmul.f32 %v11106_v6, %v11917_v38 }
 0x5ce   :  { %10105 = vmatpush3.bf16.msra.mxu0 %v1218_v29  ;;  %10106 = vmatprep.mubr.msk.bf16.mxu0 %vm11443_vm9, %v14187_v14 }
 0x5cf   :  { %10116 = vmatprep.subr.bf16.mxu0 %v14187_v14  ;;  %v1064_v1 = vpack.c.bf16 %v1056_v3, %v1056_v3 }
 0x5d5   :  { %10107 = vmatmul.mubr.msk.bf16.vlgmr.msra.gmra.mxu0 %vm581_vm10, %v1062_v51 }
 0x5d6   :  { %10117 = vmatpush3.bf16.msra.mxu0 %v1314_v55  ;;  %10118 = vmatprep.mubr.msk.bf16.mxu0 %vm11443_vm9, %v14187_v14 }
 0x5d7   :  { %10128 = vmatprep.subr.bf16.mxu0 %v14187_v14 }
 0x5dd   :  { %10119 = vmatmul.mubr.msk.bf16.vlgmr.msra.gmra.mxu0 %vm581_vm10, %v1064_v1 }
 0x5de   :  { %10129 = vmatpush3.bf16.msra.mxu0 %v1410_v50  ;;  %10130 = vmatprep.mubr.msk.bf16.mxu0 %vm11443_vm9, %v14187_v14 }
 0x5df   :  { %10140 = vmatprep.subr.bf16.mxu0 %v14187_v14 }
 0x5e3   :  { %v1027_v35 = vpop.xlane.xlu1 %1026 }
 0x5e4   :  { %11107 = vrcp.f32 %v1027_v35 }
 0x5eb   :  { %v1033_v63 = vpop.xlane.xlu1 %1032 }
 0x5ec   :  { %11109 = vrcp.f32 %v1033_v63 }
 0x5ef   :  { %v1505_v36 = vpop.permute.xlu1 %1504 }
 0x5f0   :  { %v1510_v29 = vsel %vm581_vm10, %v1505_v36, 0 }
 0x5f1   :  { %v11108_v7 = vpop.eup %11107 }
 0x5f2   :  { %v1053_v38 = vmul.f32 %v11108_v7, %v11929_v56 }
 0x5f3   :  { %v1042_v2 = vpop.xlane.xlu0 %1041 }
 0x5f4   :  { %v1061_v8 = vpack.c.bf16 %v1053_v38, %v1053_v38  ;;  %11111 = vrcp.f32 %v1042_v2 }
 0x5f6   :  { %10101 = vmatmul.mubr.msk.bf16.vlgmr.msra.gmra.mxu1 %vm581_vm10, %v1061_v8 }
 0x5f7   :  { %10111 = vmatpush3.bf16.msra.mxu1 %v1266_v39  ;;  %10112 = vmatprep.mubr.msk.bf16.mxu1 %vm11443_vm9, %v14187_v14 }
 0x5f8   :  { %10122 = vmatprep.subr.bf16.mxu1 %v14187_v14 }
 0x5f9   :  { %v11110_v10 = vpop.eup %11109 }
 0x5fa   :  { %v1055_v30 = vmul.f32 %v11110_v10, %v11933_v22  ;;  %v1455_v22 = vpop.permute.xlu0 %1454 }
 0x5fb   :  { %v1460_v39 = vsel %vm581_vm10, %v1455_v22, 0 }
 0x5fc   :  { %v1063_v11 = vpack.c.bf16 %v1055_v30, %v1055_v30 }
 0x5fe   :  { %10113 = vmatmul.mubr.msk.bf16.vlgmr.msra.gmra.mxu1 %vm581_vm10, %v1063_v11  ;;  %v1453_v40 = vpop.permute.xlu0 %1452 }
 0x5ff   :  { %10123 = vmatpush3.bf16.msra.mxu1 %v1362_v18  ;;  %10124 = vmatprep.mubr.msk.bf16.mxu1 %vm11443_vm9, %v14187_v14 }
 0x600   :  { %10134 = vmatprep.subr.bf16.mxu1 %v14187_v14 }
 0x601   :  { %v11112_v56 = vpop.eup %11111 }
 0x602   :  { %v1058_v59 = vmul.f32 %v11112_v56, %v11937_v34  ;;  %v1555_v51 = vpop.permute.xlu0 %1554 }
 0x603   :  { %v1560_v18 = vsel %vm581_vm10, %v1555_v51, 0 }
 0x604   :  { %v1066_v42 = vpack.c.bf16 %v1058_v59, %v1058_v59 }
 0x606   :  { %10131 = vmatmul.mubr.msk.bf16.vlgmr.msra.gmra.mxu0 %vm581_vm10, %v1066_v42  ;;  %v1553_v6 = vpop.permute.xlu0 %1552 }
 0x607   :  { %10141 = vmatpush3.bf16.xpose.msra.mxu0 %v1510_v29  ;;  %10142 = vmatprep.mubr.msk.bf16.mxu0 %vm11443_vm9, %v14187_v14 }
 0x608   :  { %10152 = vmatprep.subr.bf16.mxu0 %v14187_v14 }
 0x60a   :  { %v1655_v34 = vpop.permute.xlu0 %1654 }
 0x60b   :  { %v1660_v42 = vsel %vm581_vm10, %v1655_v34, 0 }
 0x60e   :  { %v1653_v50 = vpop.permute.xlu0 %1652 }
 0x612   :  { %v1755_v8 = vpop.permute.xlu0 %1754 }
 0x613   :  { %v1760_v29 = vsel %vm581_vm10, %v1755_v8, 0 }
 0x620   :  { %v1039_v55 = vpop.xlane.xlu1 %1038 }
 0x621   :  { %11113 = vrcp.f32 %v1039_v55 }
 0x624   :  { %v1503_v3 = vpop.permute.xlu1 %1502 }
 0x625   :  { %10143 = vmatmul.mubr.msk.bf16.vlgmr.msra.gmra.mxu0 %vm581_vm10, %v1503_v3 }
 0x626   :  { %10154 = vmatprep.mubr.msk.bf16.mxu0 %vm11443_vm9, %v14187_v14 }
 0x628   :  { %v1605_v4 = vpop.permute.xlu1 %1604 }
 0x629   :  { %v1610_v1 = vsel %vm581_vm10, %v1605_v4, 0 }
 0x62a   :  { %10153 = vmatpush3.bf16.xpose.msra.mxu0 %v1610_v1 }
 0x62b   :  { %10164 = vmatprep.subr.bf16.mxu0 %v14187_v14 }
 0x62c   :  { %v1603_v35 = vpop.permute.xlu1 %1602 }
 0x62e   :  { %v11114_v63 = vpop.eup %11113 }
 0x62f   :  { %v1057_v62 = vmul.f32 %v11114_v63, %v11954_v43  ;;  %v1753_v43 = vpop.permute.xlu0 %1752 }
 0x630   :  { %v1705_v7 = vpop.permute.xlu1 %1704 }
 0x631   :  { %v1710_v38 = vsel %vm581_vm10, %v1705_v7, 0  ;;  %10155 = vmatmul.mubr.msk.bf16.vlgmr.msra.gmra.mxu0 %vm581_vm10, %v1603_v35  ;;  %v1065_v2 = vpack.c.bf16 %v1057_v62, %v1057_v62 }
 0x632   :  { %10165 = vmatpush3.bf16.xpose.msra.mxu0 %v1710_v38  ;;  %10166 = vmatprep.mubr.msk.bf16.mxu0 %vm11443_vm9, %v14187_v14 }
 0x633   :  { %10125 = vmatmul.mubr.msk.bf16.vlgmr.msra.gmra.mxu1 %vm581_vm10, %v1065_v2  ;;  %10176 = vmatprep.subr.bf16.mxu0 %v14187_v14  ;;  %v1997_v56 = vpop.permute.xlu0 %1996 }
 0x634   :  { %10135 = vmatpush3.bf16.xpose.msra.mxu1 %v1460_v39  ;;  %v1703_v10 = vpop.permute.xlu1 %1702  ;;  %10136 = vmatprep.mubr.msk.bf16.mxu1 %vm11443_vm9, %v14187_v14  ;;  %v2002_v36 = vsel %vm1072_vm11, %v1997_v56, 0 }
 0x635   :  { %10146 = vmatprep.subr.bf16.mxu1 %v14187_v14 }
 0x638   :  { %v1805_v30 = vpop.permute.xlu1 %1804 }
 0x639   :  { %v1810_v11 = vsel %vm581_vm10, %v1805_v30, 0  ;;  %10167 = vmatmul.mubr.msk.bf16.vlgmr.msra.gmra.mxu0 %vm581_vm10, %v1703_v10 }
 0x63a   :  { %10177 = vmatpush3.bf16.xpose.msra.mxu0 %v1810_v11  ;;  %10178 = vmatprep.mubr.msk.bf16.mxu0 %vm11443_vm9, %v14187_v14 }
 0x63b   :  { %10137 = vmatmul.mubr.msk.bf16.vlgmr.msra.gmra.mxu1 %vm581_vm10, %v1453_v40  ;;  %10188 = vmatprep.subr.bf16.mxu0 %v14187_v14 }
 0x63c   :  { %10147 = vmatpush3.bf16.xpose.msra.mxu1 %v1560_v18  ;;  %10148 = vmatprep.mubr.msk.bf16.mxu1 %vm11443_vm9, %v14187_v14  ;;  %v1803_v59 = vpop.permute.xlu1 %1802 }
 0x63d   :  { %10158 = vmatprep.subr.bf16.mxu1 %v14187_v14 }
 0x640   :  { %v1949_v22 = vpop.permute.xlu1 %1948 }
 0x641   :  { %10179 = vmatmul.mubr.msk.bf16.vlgmr.msra.gmra.mxu0 %vm581_vm10, %v1803_v59  ;;  %v1954_v40 = vsel %vm1072_vm11, %v1949_v22, 0 }
 0x642   :  { %10189 = vmatpush3.bf16.msra.mxu0 %v2002_v36  ;;  %10190 = vmatprep.mubr.msk.bf16.mxu0 %vm11443_vm9, %v14187_v14 }
 0x643   :  { %10149 = vmatmul.mubr.msk.bf16.vlgmr.msra.gmra.mxu1 %vm581_vm10, %v1553_v6  ;;  %10200 = vmatprep.subr.bf16.mxu0 %v14187_v14 }
 0x644   :  { %10159 = vmatpush3.bf16.xpose.msra.mxu1 %v1660_v42  ;;  %10160 = vmatprep.mubr.msk.bf16.mxu1 %vm11443_vm9, %v14187_v14 }
 0x645   :  { %10170 = vmatprep.subr.bf16.mxu1 %v14187_v14 }
 0x64b   :  { %10161 = vmatmul.mubr.msk.bf16.vlgmr.msra.gmra.mxu1 %vm581_vm10, %v1653_v50 }
 0x64c   :  { %10171 = vmatpush3.bf16.xpose.msra.mxu1 %v1760_v29  ;;  %10172 = vmatprep.mubr.msk.bf16.mxu1 %vm11443_vm9, %v14187_v14 }
 0x64d   :  { %10182 = vmatprep.subr.bf16.mxu1 %v14187_v14 }
 0x653   :  { %10173 = vmatmul.mubr.msk.bf16.vlgmr.msra.gmra.mxu1 %vm581_vm10, %v1753_v43 }
 0x654   :  { %10183 = vmatpush3.bf16.msra.mxu1 %v1954_v40  ;;  %10184 = vmatprep.mubr.msk.bf16.mxu1 %vm11443_vm9, %v14187_v14 }
 0x655   :  { %10194 = vmatprep.subr.bf16.mxu1 %v14187_v14 }
 0x681   :  { %v12077_v51 = vpop.f32.mrf.mxu1 }
 0x683   :  { %v10090_v6 = vpop.f32.mrf.mxu1 }
 0x685   :  { %v1113_v55 = vpop.f32.mrf.mxu1 }
 0x687   :  { %v10091_v3 = vpop.f32.mrf.mxu1 }
 0x68d   :  { %v12079_v34 = vpop.f32.mrf.mxu0 }
 0x68f   :  { %v10096_v4 = vpop.f32.mrf.mxu0 }
 0x691   :  { %v1161_v1 = vpop.f32.mrf.mxu0 }
 0x693   :  { %v10097_v50 = vpop.f32.mrf.mxu0 }
 0x695   :  { %v12081_v35 = vpop.f32.mrf.mxu0 }
 0x697   :  { %v10108_v63 = vpop.f32.mrf.mxu0 }
 0x699   :  { %v1257_v62 = vpop.f32.mrf.mxu0 }
 0x69b   :  { %v10109_v7 = vpop.f32.mrf.mxu0 }
 0x69d   :  { %v12083_v38 = vpop.f32.mrf.mxu0 }
 0x69f   :  { %v10120_v2 = vpop.f32.mrf.mxu0 }
 0x6a1   :  { %v1353_v8 = vpop.f32.mrf.mxu0 }
 0x6a3   :  { %v10121_v39 = vpop.f32.mrf.mxu0 }
 0x6b6   :  { %v12085_v10 = vpop.f32.mrf.mxu1 }
 0x6b8   :  { %v10102_v43 = vpop.f32.mrf.mxu1 }
 0x6ba   :  { %v1209_v30 = vpop.f32.mrf.mxu1 }
 0x6bc   :  { %v10103_v11 = vpop.f32.mrf.mxu1 }
 0x6be   :  { %v12087_v18 = vpop.f32.mrf.mxu1 }
 0x6c0   :  { %v10114_v56 = vpop.f32.mrf.mxu1 }
 0x6c2   :  { %v1305_v59 = vpop.f32.mrf.mxu1 }
 0x6c4   :  { %v10115_v36 = vpop.f32.mrf.mxu1 }
 0x6c6   :  { %v12089_v42 = vpop.f32.mrf.mxu0 }
 0x6c8   :  { %v10132_v29 = vpop.f32.mrf.mxu0 }
 0x6ca   :  { %v1449_v22 = vpop.f32.mrf.mxu0 }
 0x6cc   :  { %v10133_v40 = vpop.f32.mrf.mxu0 }
 0x6e5   :  { %v1546_v6 = vpop.f32.mrf.mxu0 }
 0x6e6   :  { %v12092_v55 = vadd.f32 %v1546_v6, %v11843_v60 }
 0x6e7   :  { %v10144_v3 = vpop.f32.mrf.mxu0 }
 0x6e8   :  { %v1855_v4 = vsel %vm581_vm10, %v12092_v55, -inf }
 0x6e9   :  { %1856 = vmax.xlane.f32.xlu1 %v1855_v4  ;;  %v1549_v1 = vpop.f32.mrf.mxu0 }
 0x6eb   :  { %v10145_v50 = vpop.f32.mrf.mxu0 }
 0x6f1   :  { %v1646_v63 = vpop.f32.mrf.mxu0 }
 0x6f3   :  { %v12096_v62 = vpop.f32.mrf.mxu1  ;;  %v10156_v7 = vpop.f32.mrf.mxu0 }
 0x6f5   :  { %v10126_v2 = vpop.f32.mrf.mxu1  ;;  %v1649_v8 = vpop.f32.mrf.mxu0 }
 0x6f7   :  { %v1401_v39 = vpop.f32.mrf.mxu1  ;;  %v10157_v43 = vpop.f32.mrf.mxu0 }
 0x6f8   :  { %v1647_v43 = vadd.f32 %v1646_v63, %v11846_v61 }
 0x6f9   :  { %v10127_v30 = vpop.f32.mrf.mxu1  ;;  %v1746_v11 = vpop.f32.mrf.mxu0 }
 0x6fb   :  { %v1496_v56 = vpop.f32.mrf.mxu1  ;;  %v10168_v59 = vpop.f32.mrf.mxu0 }
 0x6fc   :  { %v1497_v36 = vadd.f32 %v1496_v56, %v11833_v44 }
 0x6fd   :  { %v10138_v29 = vpop.f32.mrf.mxu1  ;;  %v1749_v22 = vpop.f32.mrf.mxu0 }
 0x6fe   :  { %v1852_v40 = vsel %vm581_vm10, %v1497_v36, -inf  ;;  %v1747_v22 = vadd.f32 %v1746_v11, %v11860_v27 }
 0x6ff   :  { %v10169_v6 = vpop.f32.mrf.mxu0  ;;  %1853 = vmax.xlane.f32.xlu0 %v1852_v40  ;;  %v1499_v3 = vpop.f32.mrf.mxu1  ;;  %v1861_v40 = vsel %vm581_vm10, %v1647_v43, -inf }
 0x700   :  { %v1867_v63 = vsel %vm581_vm10, %v1747_v22, -inf }
 0x701   :  { %v10139_v4 = vpop.f32.mrf.mxu1  ;;  %v1846_v1 = vpop.f32.mrf.mxu0 }
 0x703   :  { %v1596_v50 = vpop.f32.mrf.mxu1  ;;  %v10180_v7 = vpop.f32.mrf.mxu0 }
 0x704   :  { %v1597_v2 = vadd.f32 %v1596_v50, %v11863_v31  ;;  %v12107_v50 = vadd.f32 %v1846_v1, %v11871_v21 }
 0x705   :  { %v10150_v8 = vpop.f32.mrf.mxu1  ;;  %v1849_v39 = vpop.f32.mrf.mxu0 }
 0x706   :  { %v1858_v30 = vsel %vm581_vm10, %v1597_v2, -inf  ;;  %v1873_v11 = vsel %vm581_vm10, %v12107_v50, -inf }
 0x707   :  { %v10181_v56 = vpop.f32.mrf.mxu0  ;;  %1859 = vmax.xlane.f32.xlu0 %v1858_v30  ;;  %v1599_v59 = vpop.f32.mrf.mxu1 }
 0x709   :  { %v10151_v29 = vpop.f32.mrf.mxu1 }
 0x70b   :  { %1862 = vmax.xlane.f32.xlu0 %v1861_v40  ;;  %v1696_v6 = vpop.f32.mrf.mxu1 }
 0x70c   :  { %v1697_v3 = vadd.f32 %v1696_v6, %v11886_v46  ;;  %v12119_v6 = vpop.permute.xlu1 %2044 }
 0x70d   :  { %v10162_v4 = vpop.f32.mrf.mxu1 }
 0x70e   :  { %v1864_v7 = vsel %vm581_vm10, %v1697_v3, -inf }
 0x70f   :  { %1868 = vmax.xlane.f32.xlu0 %v1867_v63  ;;  %1865 = vmax.xlane.f32.xlu1 %v1864_v7  ;;  %v1699_v8 = vpop.f32.mrf.mxu1 }
 0x710   :  { %v12121_v4 = vpop.permute.xlu1 %2092 }
 0x711   :  { %v10163_v39 = vpop.f32.mrf.mxu1 }
 0x713   :  { %1874 = vmax.xlane.f32.xlu0 %v1873_v11  ;;  %v1796_v30 = vpop.f32.mrf.mxu1 }
 0x714   :  { %v1797_v56 = vadd.f32 %v1796_v30, %v11890_v58 }
 0x715   :  { %v10174_v59 = vpop.f32.mrf.mxu1 }
 0x716   :  { %v1870_v29 = vsel %vm581_vm10, %v1797_v56, -inf }
 0x717   :  { %1871 = vmax.xlane.f32.xlu1 %v1870_v29  ;;  %v1799_v1 = vpop.f32.mrf.mxu1 }
 0x719   :  { %v10175_v40 = vpop.f32.mrf.mxu1 }
 0x728   :  { %2188 = vrot.lane.b32.xlu1 %v11754_v17, %s11449_s20 }
 0x729   :  { %2140 = vrot.lane.b32.xlu0 %v11746_v47, %s11449_s20 }
 0x772   :  { %v1857_v63 = vpop.xlane.xlu1 %1856 }
 0x773   :  { %v1877_v7 = vsub.f32 %v12092_v55, %v1857_v63 }
 0x775   :  { %v1886_v8 = vmul.f32 1.442695, %v1877_v7 }
 0x777   :  { %11115 = vpow2.f32 %v1886_v8 }
 0x784   :  { %v12124_v39 = vpop.eup %11115 }
 0x785   :  { %v1903_v11 = vsel %vm581_vm10, %v12124_v39, 0.0 }
 0x786   :  { %1904 = vadd.xlane.f32.xlu0 %v1903_v11 }
 0x788   :  { %v1854_v30 = vpop.xlane.xlu0 %1853 }
 0x789   :  { %v1876_v59 = vsub.f32 %v1497_v36, %v1854_v30 }
 0x78b   :  { %v1884_v29 = vmul.f32 1.442695, %v1876_v59 }
 0x78d   :  { %11117 = vpow2.f32 %v1884_v29 }
 0x790   :  { %v1860_v1 = vpop.xlane.xlu0 %1859 }
 0x791   :  { %v1878_v40 = vsub.f32 %v1597_v2, %v1860_v1 }
 0x793   :  { %v1888_v14 = vmul.f32 1.442695, %v1878_v40 }
 0x794   :  { %v1863_v24 = vpop.xlane.xlu0 %1862 }
 0x795   :  { %11119 = vpow2.f32 %v1888_v14  ;;  %v1879_v15 = vsub.f32 %v1647_v43, %v1863_v24 }
 0x797   :  { %v1890_v28 = vmul.f32 1.442695, %v1879_v15 }
 0x798   :  { %v1866_v55 = vpop.xlane.xlu1 %1865  ;;  %v1869_v63 = vpop.xlane.xlu0 %1868 }
 0x799   :  { %11121 = vpow2.f32 %v1890_v28  ;;  %v1880_v7 = vsub.f32 %v1697_v3, %v1866_v55  ;;  %v1881_v8 = vsub.f32 %v1747_v22, %v1869_v63 }
 0x79a   :  { %v12128_v20 = vpop.eup %11117 }
 0x79b   :  { %v1892_v25 = vmul.f32 1.442695, %v1880_v7  ;;  %v1894_v11 = vmul.f32 1.442695, %v1881_v8  ;;  %v1900_v36 = vsel %vm581_vm10, %v12128_v20, 0.0 }
 0x79c   :  { %1901 = vadd.xlane.f32.xlu1 %v1900_v36  ;;  %v1875_v30 = vpop.xlane.xlu0 %1874 }
 0x79d   :  { %11123 = vpow2.f32 %v1892_v25  ;;  %v1883_v29 = vsub.f32 %v12107_v50, %v1875_v30 }
 0x79e   :  { %11125 = vpow2.f32 %v1894_v11 }
 0x79f   :  { %v1898_v40 = vmul.f32 1.442695, %v1883_v29 }
 0x7a0   :  { %v1872_v3 = vpop.xlane.xlu1 %1871  ;;  %v2141_v50 = vpop.permute.xlu0 %2140 }
 0x7a1   :  { %v1882_v59 = vsub.f32 %v1797_v56, %v1872_v3 }
 0x7a2   :  { %v12132_v2 = vpop.eup %11119 }
 0x7a3   :  { %v1906_v15 = vsel %vm581_vm10, %v12132_v2, 0.0  ;;  %v1896_v1 = vmul.f32 1.442695, %v1882_v59 }
 0x7a4   :  { %1907 = vadd.xlane.f32.xlu1 %v1906_v15 }
 0x7a5   :  { %11127 = vpow2.f32 %v1896_v1 }
 0x7a6   :  { %v12136_v24 = vpop.eup %11121  ;;  %11129 = vpow2.f32 %v1898_v40 }
 0x7a7   :  { %v1909_v28 = vsel %vm581_vm10, %v12136_v24, 0.0 }
 0x7a8   :  { %1910 = vadd.xlane.f32.xlu0 %v1909_v28  ;;  %v2189_v28 = vpop.permute.xlu1 %2188 }
 0x7aa   :  { %v12140_v14 = vpop.eup %11123 }
 0x7ab   :  { %v12142_v43 = vpop.eup %11125  ;;  %v1912_v25 = vsel %vm581_vm10, %v12140_v14, 0.0 }
 0x7ac   :  { %1913 = vadd.xlane.f32.xlu1 %v1912_v25  ;;  %v1915_v22 = vsel %vm581_vm10, %v12142_v43, 0.0  ;;  %v2098_v25 = vsel %vm1072_vm11, %v12121_v4, 0 }
 0x7ad   :  { %1916 = vadd.xlane.f32.xlu0 %v1915_v22  ;;  %v14228_v22 = vmov 0.0  }
 0x7b2   :  { %v12153_v55 = vpop.eup %11127 }
 0x7b3   :  { %v12155_v63 = vpop.eup %11129  ;;  %v1918_v7 = vsel %vm581_vm10, %v12153_v55, 0.0 }
 0x7b4   :  { %v1921_v8 = vsel %vm581_vm10, %v12155_v63, 0.0 }
 0x7bd   :  { %2284 = vrot.lane.b32.xlu1 %v11760_v57, %s11449_s20 }
 0x7c3   :  { %2236 = vrot.lane.b32.xlu0 %v11752_v52, %s11449_s20 }
 0x7e1   :  { %1919 = vadd.xlane.f32.xlu1 %v1918_v7  ;;  %v2050_v7 = vsel %vm1072_vm11, %v12119_v6, 0 }
 0x7e2   :  { %1922 = vadd.xlane.f32.xlu0 %v1921_v8 }
 0x7f2   :  { %2384 = vrot.lane.b32.xlu1 %v11738_v41, %s11450_s21 }
 0x7f6   :  { %2382 = vrot.lane.b32.xlu1 %v11738_v41, %s11451_s22 }
 0x7f8   :  { %2334 = vrot.lane.b32.xlu0 %v11732_v33, %s11450_s21 }
 0x7fa   :  { %2484 = vrot.lane.b32.xlu1 %v11744_v45, %s11450_s21 }
 0x7fc   :  { %2332 = vrot.lane.b32.xlu0 %v11732_v33, %s11451_s22 }
 0x7fe   :  { %2482 = vrot.lane.b32.xlu1 %v11744_v45, %s11451_s22 }
 0x800   :  { %2434 = vrot.lane.b32.xlu0 %v11736_v37, %s11450_s21 }
 0x802   :  { %2584 = vrot.lane.b32.xlu1 %v11754_v17, %s11450_s21 }
 0x804   :  { %2432 = vrot.lane.b32.xlu0 %v11736_v37, %s11451_s22 }
 0x806   :  { %2582 = vrot.lane.b32.xlu1 %v11754_v17, %s11451_s22 }
 0x808   :  { %2534 = vrot.lane.b32.xlu0 %v11746_v47, %s11450_s21 }
 0x80a   :  { %2684 = vrot.lane.b32.xlu1 %v11760_v57, %s11450_s21 }
 0x80c   :  { %2532 = vrot.lane.b32.xlu0 %v11746_v47, %s11451_s22 }
 0x80e   :  { %2682 = vrot.lane.b32.xlu1 %v11760_v57, %s11451_s22 }
 0x80f   :  { %v1905_v56 = vpop.xlane.xlu0 %1904 }
 0x810   :  { %2634 = vrot.lane.b32.xlu0 %v11752_v52, %s11450_s21  ;;  %11131 = vrcp.f32 %v1905_v56 }
 0x812   :  { %2828 = vrot.lane.b32.xlu1 %v11732_v33, %s11452_s23 }
 0x814   :  { %2632 = vrot.lane.b32.xlu0 %v11752_v52, %s11451_s22 }
 0x816   :  { %2924 = vrot.lane.b32.xlu1 %v11736_v37, %s11452_s23 }
 0x818   :  { %2876 = vrot.lane.b32.xlu0 %v11738_v41, %s11452_s23 }
 0x81a   :  { %2972 = vrot.lane.b32.xlu1 %v11744_v45, %s11452_s23 }
 0x81d   :  { %v11132_v11 = vpop.eup %11131 }
 0x81e   :  { %v1933_v36 = vmul.f32 %v11132_v11, %v12124_v39 }
 0x820   :  { %v1941_v15 = vpack.c.bf16 %v1933_v36, %v1933_v36  ;;  %v2146_v36 = vsel %vm1072_vm11, %v2141_v50, 0 }
 0x822   :  { %10191 = vmatmul.mubr.msk.bf16.vlgmr.msra.gmra.mxu0 %vm581_vm10, %v1941_v15 }
 0x823   :  { %10201 = vmatpush3.bf16.msra.mxu0 %v2098_v25  ;;  %10202 = vmatprep.mubr.msk.bf16.mxu0 %vm11443_vm9, %v14228_v22 }
 0x824   :  { %10212 = vmatprep.subr.bf16.mxu0 %v14228_v22 }
 0x825   :  { %v1902_v3 = vpop.xlane.xlu1 %1901 }
 0x826   :  { %11133 = vrcp.f32 %v1902_v3 }
 0x82d   :  { %v1908_v30 = vpop.xlane.xlu1 %1907 }
 0x82e   :  { %11135 = vrcp.f32 %v1908_v30  ;;  %v2194_v30 = vsel %vm1072_vm11, %v2189_v28, 0 }
 0x831   :  { %v1911_v59 = vpop.xlane.xlu0 %1910 }
 0x832   :  { %11137 = vrcp.f32 %v1911_v59 }
 0x833   :  { %v11134_v39 = vpop.eup %11133 }
 0x834   :  { %v1932_v29 = vmul.f32 %v11134_v39, %v12128_v20 }
 0x835   :  { %v1914_v1 = vpop.xlane.xlu1 %1913 }
 0x836   :  { %11139 = vrcp.f32 %v1914_v1  ;;  %v1917_v4 = vpop.xlane.xlu0 %1916  ;;  %v1940_v40 = vpack.c.bf16 %v1932_v29, %v1932_v29 }
 0x837   :  { %11141 = vrcp.f32 %v1917_v4 }
 0x838   :  { %10185 = vmatmul.mubr.msk.bf16.vlgmr.msra.gmra.mxu1 %vm581_vm10, %v1940_v40 }
 0x839   :  { %10195 = vmatpush3.bf16.msra.mxu1 %v2050_v7  ;;  %10196 = vmatprep.mubr.msk.bf16.mxu1 %vm11443_vm9, %v14228_v22  ;;  %v2285_v29 = vpop.permute.xlu1 %2284 }
 0x83a   :  { %10206 = vmatprep.subr.bf16.mxu1 %v14228_v22  ;;  %v2237_v50 = vpop.permute.xlu0 %2236  ;;  %v2290_v28 = vsel %vm1072_vm11, %v2285_v29, 0 }
 0x83b   :  { %v11136_v8 = vpop.eup %11135  ;;  %v2242_v39 = vsel %vm1072_vm11, %v2237_v50, 0 }
 0x83c   :  { %v1934_v56 = vmul.f32 %v11136_v8, %v12132_v2 }
 0x83e   :  { %v1942_v20 = vpack.c.bf16 %v1934_v56, %v1934_v56 }
 0x83f   :  { %v11138_v11 = vpop.eup %11137 }
 0x840   :  { %10197 = vmatmul.mubr.msk.bf16.vlgmr.msra.gmra.mxu1 %vm581_vm10, %v1942_v20  ;;  %v1935_v15 = vmul.f32 %v11138_v11, %v12136_v24 }
 0x841   :  { %10207 = vmatpush3.bf16.msra.mxu1 %v2146_v36  ;;  %10208 = vmatprep.mubr.msk.bf16.mxu1 %vm11443_vm9, %v14228_v22 }
 0x842   :  { %v1943_v6 = vpack.c.bf16 %v1935_v15, %v1935_v15  ;;  %10218 = vmatprep.subr.bf16.mxu1 %v14228_v22 }
 0x843   :  { %v11140_v25 = vpop.eup %11139 }
 0x844   :  { %v11142_v3 = vpop.eup %11141  ;;  %10203 = vmatmul.mubr.msk.bf16.vlgmr.msra.gmra.mxu0 %vm581_vm10, %v1943_v6  ;;  %v1936_v2 = vmul.f32 %v11140_v25, %v12140_v14 }
 0x845   :  { %10213 = vmatpush3.bf16.msra.mxu0 %v2194_v30  ;;  %10214 = vmatprep.mubr.msk.bf16.mxu0 %vm11443_vm9, %v14228_v22  ;;  %v1937_v59 = vmul.f32 %v11142_v3, %v12142_v43 }
 0x846   :  { %v1944_v24 = vpack.c.bf16 %v1936_v2, %v1936_v2  ;;  %10224 = vmatprep.subr.bf16.mxu0 %v14228_v22 }
 0x847   :  { %v1945_v14 = vpack.c.bf16 %v1937_v59, %v1937_v59 }
 0x848   :  { %10209 = vmatmul.mubr.msk.bf16.vlgmr.msra.gmra.mxu1 %vm581_vm10, %v1944_v24 }
 0x849   :  { %10219 = vmatpush3.bf16.msra.mxu1 %v2242_v39  ;;  %10220 = vmatprep.mubr.msk.bf16.mxu1 %vm11443_vm9, %v14228_v22 }
 0x84a   :  { %10230 = vmatprep.subr.bf16.mxu1 %v14228_v22 }
 0x84c   :  { %10215 = vmatmul.mubr.msk.bf16.vlgmr.msra.gmra.mxu0 %vm581_vm10, %v1945_v14 }
 0x84d   :  { %10225 = vmatpush3.bf16.msra.mxu0 %v2290_v28  ;;  %10226 = vmatprep.mubr.msk.bf16.mxu0 %vm11443_vm9, %v14228_v22 }
 0x84e   :  { %10236 = vmatprep.subr.bf16.mxu0 %v14228_v22 }
 0x86a   :  { %v1920_v43 = vpop.xlane.xlu1 %1919 }
 0x86b   :  { %11143 = vrcp.f32 %v1920_v43  ;;  %v1923_v1 = vpop.xlane.xlu0 %1922 }
 0x86c   :  { %11145 = vrcp.f32 %v1923_v1 }
 0x86e   :  { %v2385_v4 = vpop.permute.xlu1 %2384 }
 0x86f   :  { %v2335_v40 = vpop.permute.xlu0 %2334  ;;  %v2390_v24 = vsel %vm581_vm10, %v2385_v4, 0 }
 0x870   :  { %v2340_v2 = vsel %vm581_vm10, %v2335_v40, 0 }
 0x872   :  { %v2383_v7 = vpop.permute.xlu1 %2382 }
 0x873   :  { %v2333_v8 = vpop.permute.xlu0 %2332 }
 0x876   :  { %v2485_v56 = vpop.permute.xlu1 %2484 }
 0x877   :  { %v2435_v20 = vpop.permute.xlu0 %2434  ;;  %v2490_v39 = vsel %vm581_vm10, %v2485_v56, 0 }
 0x878   :  { %v11144_v11 = vpop.eup %11143  ;;  %v2440_v59 = vsel %vm581_vm10, %v2435_v20, 0 }
 0x879   :  { %v11146_v36 = vpop.eup %11145  ;;  %v1938_v15 = vmul.f32 %v11144_v11, %v12153_v55 }
 0x87a   :  { %v1939_v6 = vmul.f32 %v11146_v36, %v12155_v63  ;;  %v2483_v3 = vpop.permute.xlu1 %2482 }
 0x87b   :  { %v1946_v25 = vpack.c.bf16 %v1938_v15, %v1938_v15  ;;  %v2433_v50 = vpop.permute.xlu0 %2432 }
 0x87c   :  { %v1947_v30 = vpack.c.bf16 %v1939_v6, %v1939_v6 }
 0x87d   :  { %10221 = vmatmul.mubr.msk.bf16.vlgmr.msra.gmra.mxu1 %vm581_vm10, %v1946_v25 }
 0x87e   :  { %10227 = vmatmul.mubr.msk.bf16.vlgmr.msra.gmra.mxu0 %vm581_vm10, %v1947_v30  ;;  %10231 = vmatpush3.bf16.xpose.msra.mxu1 %v2340_v2  ;;  %v2585_v55 = vpop.permute.xlu1 %2584 }
 0x87f   :  { %10237 = vmatpush3.bf16.xpose.msra.mxu0 %v2390_v24  ;;  %10232 = vmatprep.mubr.msk.bf16.mxu1 %vm11443_vm9, %v14228_v22  ;;  %v2535_v63 = vpop.permute.xlu0 %2534  ;;  %v2590_v43 = vsel %vm581_vm10, %v2585_v55, 0 }
 0x880   :  { %10238 = vmatprep.mubr.msk.bf16.mxu0 %vm11443_vm9, %v14228_v22  ;;  %10242 = vmatprep.subr.bf16.mxu1 %v14228_v22  ;;  %v2540_v28 = vsel %vm581_vm10, %v2535_v63, 0 }
 0x881   :  { %10248 = vmatprep.subr.bf16.mxu0 %v14228_v22 }
 0x882   :  { %v2583_v29 = vpop.permute.xlu1 %2582 }
 0x883   :  { %v2533_v14 = vpop.permute.xlu0 %2532 }
 0x885   :  { %10233 = vmatmul.mubr.msk.bf16.vlgmr.msra.gmra.mxu1 %vm581_vm10, %v2333_v8 }
 0x886   :  { %10239 = vmatmul.mubr.msk.bf16.vlgmr.msra.gmra.mxu0 %vm581_vm10, %v2383_v7  ;;  %10243 = vmatpush3.bf16.xpose.msra.mxu1 %v2440_v59  ;;  %v2685_v1 = vpop.permute.xlu1 %2684 }
 0x887   :  { %10249 = vmatpush3.bf16.xpose.msra.mxu0 %v2490_v39  ;;  %10244 = vmatprep.mubr.msk.bf16.mxu1 %vm11443_vm9, %v14228_v22  ;;  %v2635_v4 = vpop.permute.xlu0 %2634  ;;  %v2690_v56 = vsel %vm581_vm10, %v2685_v1, 0 }
 0x888   :  { %10250 = vmatprep.mubr.msk.bf16.mxu0 %vm11443_vm9, %v14228_v22  ;;  %10254 = vmatprep.subr.bf16.mxu1 %v14228_v22  ;;  %v2640_v7 = vsel %vm581_vm10, %v2635_v4, 0 }
 0x889   :  { %10260 = vmatprep.subr.bf16.mxu0 %v14228_v22 }
 0x88a   :  { %v2683_v40 = vpop.permute.xlu1 %2682 }
 0x88b   :  { %v2633_v8 = vpop.permute.xlu0 %2632 }
 0x88d   :  { %10245 = vmatmul.mubr.msk.bf16.vlgmr.msra.gmra.mxu1 %vm581_vm10, %v2433_v50 }
 0x88e   :  { %10251 = vmatmul.mubr.msk.bf16.vlgmr.msra.gmra.mxu0 %vm581_vm10, %v2483_v3  ;;  %10255 = vmatpush3.bf16.xpose.msra.mxu1 %v2540_v28  ;;  %v2829_v20 = vpop.permute.xlu1 %2828 }
 0x88f   :  { %10261 = vmatpush3.bf16.xpose.msra.mxu0 %v2590_v43  ;;  %10256 = vmatprep.mubr.msk.bf16.mxu1 %vm11443_vm9, %v14228_v22  ;;  %v2877_v11 = vpop.permute.xlu0 %2876  ;;  %v2834_v36 = vsel %vm1072_vm11, %v2829_v20, 0 }
 0x890   :  { %10262 = vmatprep.mubr.msk.bf16.mxu0 %vm11443_vm9, %v14228_v22  ;;  %10266 = vmatprep.subr.bf16.mxu1 %v14228_v22  ;;  %v2882_v15 = vsel %vm1072_vm11, %v2877_v11, 0 }
 0x891   :  { %10272 = vmatprep.subr.bf16.mxu0 %v14228_v22 }
 0x895   :  { %10257 = vmatmul.mubr.msk.bf16.vlgmr.msra.gmra.mxu1 %vm581_vm10, %v2533_v14 }
 0x896   :  { %10263 = vmatmul.mubr.msk.bf16.vlgmr.msra.gmra.mxu0 %vm581_vm10, %v2583_v29  ;;  %10267 = vmatpush3.bf16.xpose.msra.mxu1 %v2640_v7 }
 0x897   :  { %10273 = vmatpush3.bf16.xpose.msra.mxu0 %v2690_v56  ;;  %10268 = vmatprep.mubr.msk.bf16.mxu1 %vm11443_vm9, %v14228_v22 }
 0x898   :  { %10274 = vmatprep.mubr.msk.bf16.mxu0 %vm11443_vm9, %v14228_v22  ;;  %10278 = vmatprep.subr.bf16.mxu1 %v14228_v22 }
 0x899   :  { %10284 = vmatprep.subr.bf16.mxu0 %v14228_v22 }
 0x89d   :  { %10269 = vmatmul.mubr.msk.bf16.vlgmr.msra.gmra.mxu1 %vm581_vm10, %v2633_v8 }
 0x89e   :  { %10275 = vmatmul.mubr.msk.bf16.vlgmr.msra.gmra.mxu0 %vm581_vm10, %v2683_v40  ;;  %10279 = vmatpush3.bf16.msra.mxu1 %v2834_v36 }
 0x89f   :  { %10285 = vmatpush3.bf16.msra.mxu0 %v2882_v15  ;;  %10280 = vmatprep.mubr.msk.bf16.mxu1 %vm11443_vm9, %v14228_v22 }
 0x8a0   :  { %10286 = vmatprep.mubr.msk.bf16.mxu0 %vm11443_vm9, %v14228_v22  ;;  %10290 = vmatprep.subr.bf16.mxu1 %v14228_v22 }
 0x8a1   :  { %10296 = vmatprep.subr.bf16.mxu0 %v14228_v22 }
 0x8e2   :  { %v12291_v6 = vpop.f32.mrf.mxu0 }
 0x8e4   :  { %v10192_v25 = vpop.f32.mrf.mxu0 }
 0x8e6   :  { %v2041_v3 = vpop.f32.mrf.mxu0 }
 0x8e8   :  { %v10193_v30 = vpop.f32.mrf.mxu0 }
 0x8f8   :  { %v12293_v2 = vpop.f32.mrf.mxu1 }
 0x8fa   :  { %v10186_v24 = vpop.f32.mrf.mxu1 }
 0x8fc   :  { %v1993_v55 = vpop.f32.mrf.mxu1 }
 0x8fe   :  { %v10187_v63 = vpop.f32.mrf.mxu1 }
 0x900   :  { %v12297_v59 = vpop.f32.mrf.mxu1 }
 0x902   :  { %v10198_v39 = vpop.f32.mrf.mxu1 }
 0x904   :  { %v2089_v29 = vpop.f32.mrf.mxu1  ;;  %v12299_v14 = vpop.f32.mrf.mxu0 }
 0x906   :  { %v10199_v43 = vpop.f32.mrf.mxu1  ;;  %v10204_v1 = vpop.f32.mrf.mxu0 }
 0x908   :  { %v2137_v4 = vpop.f32.mrf.mxu0  ;;  %v12303_v40 = vpop.f32.mrf.mxu1 }
 0x90a   :  { %v10205_v7 = vpop.f32.mrf.mxu0  ;;  %v10210_v8 = vpop.f32.mrf.mxu1 }
 0x90c   :  { %v2185_v56 = vpop.f32.mrf.mxu1  ;;  %v12305_v20 = vpop.f32.mrf.mxu0 }
 0x90e   :  { %v10211_v36 = vpop.f32.mrf.mxu1  ;;  %v10216_v15 = vpop.f32.mrf.mxu0 }
 0x910   :  { %v2233_v25 = vpop.f32.mrf.mxu0 }
 0x912   :  { %v10217_v3 = vpop.f32.mrf.mxu0 }
 0x93d   :  { %v12309_v30 = vpop.f32.mrf.mxu1 }
 0x93e   :  { %v12311_v24 = vpop.f32.mrf.mxu0 }
 0x93f   :  { %v10222_v63 = vpop.f32.mrf.mxu1 }
 0x940   :  { %v10228_v39 = vpop.f32.mrf.mxu0 }
 0x941   :  { %v2281_v29 = vpop.f32.mrf.mxu1 }
 0x942   :  { %v2329_v43 = vpop.f32.mrf.mxu0 }
 0x943   :  { %v10223_v1 = vpop.f32.mrf.mxu1 }
 0x944   :  { %v10229_v4 = vpop.f32.mrf.mxu0 }
 0x945   :  { %v2376_v7 = vpop.f32.mrf.mxu1 }
 0x946   :  { %v12316_v8 = vadd.f32 %v2376_v7, %v11833_v44  ;;  %v2426_v56 = vpop.f32.mrf.mxu0 }
 0x947   :  { %v2427_v36 = vadd.f32 %v2426_v56, %v11843_v60  ;;  %v10234_v15 = vpop.f32.mrf.mxu1 }
 0x948   :  { %v10240_v25 = vpop.f32.mrf.mxu0  ;;  %v2732_v3 = vsel %vm581_vm10, %v12316_v8, -inf }
 0x949   :  { %v2735_v55 = vsel %vm581_vm10, %v2427_v36, -inf  ;;  %2733 = vmax.xlane.f32.xlu0 %v2732_v3  ;;  %v2379_v63 = vpop.f32.mrf.mxu1 }
 0x94a   :  { %2736 = vmax.xlane.f32.xlu1 %v2735_v55  ;;  %v2429_v39 = vpop.f32.mrf.mxu0 }
 0x94b   :  { %v10235_v29 = vpop.f32.mrf.mxu1 }
 0x94c   :  { %v10241_v43 = vpop.f32.mrf.mxu0 }
 0x94d   :  { %v2476_v1 = vpop.f32.mrf.mxu1 }
 0x94e   :  { %v2477_v4 = vadd.f32 %v2476_v1, %v11863_v31  ;;  %v2526_v7 = vpop.f32.mrf.mxu0 }
 0x94f   :  { %v10246_v11 = vpop.f32.mrf.mxu1  ;;  %v2527_v56 = vadd.f32 %v2526_v7, %v11846_v61 }
 0x950   :  { %v10252_v15 = vpop.f32.mrf.mxu0  ;;  %v2738_v25 = vsel %vm581_vm10, %v2477_v4, -inf }
 0x951   :  { %2739 = vmax.xlane.f32.xlu0 %v2738_v25  ;;  %v2479_v50 = vpop.f32.mrf.mxu1  ;;  %v2741_v55 = vsel %vm581_vm10, %v2527_v56, -inf }
 0x952   :  { %v2529_v28 = vpop.f32.mrf.mxu0 }
 0x953   :  { %v10247_v23 = vpop.f32.mrf.mxu1 }
 0x954   :  { %v10253_v3 = vpop.f32.mrf.mxu0 }
 0x955   :  { %2742 = vmax.xlane.f32.xlu0 %v2741_v55  ;;  %v2576_v63 = vpop.f32.mrf.mxu1 }
 0x956   :  { %v2626_v39 = vpop.f32.mrf.mxu0  ;;  %v2577_v29 = vadd.f32 %v2576_v63, %v11886_v46 }
 0x957   :  { %v2627_v43 = vadd.f32 %v2626_v39, %v11860_v27  ;;  %v10258_v11 = vpop.f32.mrf.mxu1 }
 0x958   :  { %v10264_v1 = vpop.f32.mrf.mxu0  ;;  %v2744_v7 = vsel %vm581_vm10, %v2577_v29, -inf }
 0x959   :  { %v2747_v15 = vsel %vm581_vm10, %v2627_v43, -inf  ;;  %2745 = vmax.xlane.f32.xlu1 %v2744_v7  ;;  %v2579_v50 = vpop.f32.mrf.mxu1 }
 0x95a   :  { %v2629_v28 = vpop.f32.mrf.mxu0  ;;  %2748 = vmax.xlane.f32.xlu0 %v2747_v15 }
 0x95b   :  { %v10259_v23 = vpop.f32.mrf.mxu1 }
 0x95c   :  { %v10265_v25 = vpop.f32.mrf.mxu0 }
 0x95d   :  { %v2676_v3 = vpop.f32.mrf.mxu1 }
 0x95e   :  { %v12331_v55 = vadd.f32 %v2676_v3, %v11890_v58  ;;  %v2726_v13 = vpop.f32.mrf.mxu0 }
 0x95f   :  { %v12334_v63 = vadd.f32 %v2726_v13, %v11871_v21  ;;  %v10270_v39 = vpop.f32.mrf.mxu1  ;;  %v12344_v13 = vpop.permute.xlu1 %2924 }
 0x960   :  { %v10276_v11 = vpop.f32.mrf.mxu0  ;;  %v2750_v1 = vsel %vm581_vm10, %v12331_v55, -inf }
 0x961   :  { %v2753_v7 = vsel %vm581_vm10, %v12334_v63, -inf  ;;  %2751 = vmax.xlane.f32.xlu1 %v2750_v1  ;;  %v2679_v15 = vpop.f32.mrf.mxu1 }
 0x962   :  { %v2729_v50 = vpop.f32.mrf.mxu0  ;;  %2754 = vmax.xlane.f32.xlu0 %v2753_v7 }
 0x963   :  { %v10271_v28 = vpop.f32.mrf.mxu1  ;;  %v12346_v25 = vpop.permute.xlu1 %2972 }
 0x964   :  { %v10277_v23 = vpop.f32.mrf.mxu0 }
 0x972   :  { %3068 = vrot.lane.b32.xlu1 %v11754_v17, %s11452_s23 }
 0x978   :  { %3020 = vrot.lane.b32.xlu0 %v11746_v47, %s11452_s23 }
 0x9d2   :  { %v2734_v3 = vpop.xlane.xlu0 %2733 }
 0x9d3   :  { %v2737_v39 = vpop.xlane.xlu1 %2736  ;;  %v2756_v11 = vsub.f32 %v12316_v8, %v2734_v3 }
 0x9d4   :  { %v2757_v1 = vsub.f32 %v2427_v36, %v2737_v39 }
 0x9d5   :  { %v2764_v15 = vmul.f32 1.442695, %v2756_v11 }
 0x9d6   :  { %v2766_v50 = vmul.f32 1.442695, %v2757_v1 }
 0x9d7   :  { %11147 = vpow2.f32 %v2764_v15 }
 0x9d8   :  { %11149 = vpow2.f32 %v2766_v50 }
 0x9da   :  { %v2740_v7 = vpop.xlane.xlu0 %2739 }
 0x9db   :  { %v2758_v28 = vsub.f32 %v2477_v4, %v2740_v7 }
 0x9dd   :  { %v2768_v23 = vmul.f32 1.442695, %v2758_v28 }
 0x9de   :  { %v2743_v26 = vpop.xlane.xlu0 %2742 }
 0x9df   :  { %11151 = vpow2.f32 %v2768_v23  ;;  %v2759_v19 = vsub.f32 %v2527_v56, %v2743_v26 }
 0x9e1   :  { %v2770_v5 = vmul.f32 1.442695, %v2759_v19 }
 0x9e2   :  { %v2746_v12 = vpop.xlane.xlu1 %2745 }
 0x9e3   :  { %11153 = vpow2.f32 %v2770_v5  ;;  %v2760_v48 = vsub.f32 %v2577_v29, %v2746_v12  ;;  %v2749_v49 = vpop.xlane.xlu0 %2748 }
 0x9e4   :  { %v12349_v9 = vpop.eup %11147  ;;  %v2761_v32 = vsub.f32 %v2627_v43, %v2749_v49 }
 0x9e5   :  { %v12351_v8 = vpop.eup %11149  ;;  %v2772_v36 = vmul.f32 1.442695, %v2760_v48  ;;  %v2780_v3 = vsel %vm581_vm10, %v12349_v9, 0.0 }
 0x9e6   :  { %v2774_v39 = vmul.f32 1.442695, %v2761_v32  ;;  %v2783_v4 = vsel %vm581_vm10, %v12351_v8, 0.0  ;;  %2781 = vadd.xlane.f32.xlu1 %v2780_v3 }
 0x9e7   :  { %11155 = vpow2.f32 %v2772_v36  ;;  %2784 = vadd.xlane.f32.xlu0 %v2783_v4 }
 0x9e8   :  { %11157 = vpow2.f32 %v2774_v39 }
 0x9ea   :  { %v2752_v29 = vpop.xlane.xlu1 %2751 }
 0x9eb   :  { %v2755_v43 = vpop.xlane.xlu0 %2754  ;;  %v2762_v11 = vsub.f32 %v12331_v55, %v2752_v29 }
 0x9ec   :  { %v12357_v5 = vpop.eup %11151  ;;  %v2763_v1 = vsub.f32 %v12334_v63, %v2755_v43 }
 0x9ed   :  { %v2786_v19 = vsel %vm581_vm10, %v12357_v5, 0.0  ;;  %v2776_v15 = vmul.f32 1.442695, %v2762_v11 }
 0x9ee   :  { %2787 = vadd.xlane.f32.xlu1 %v2786_v19  ;;  %v2778_v50 = vmul.f32 1.442695, %v2763_v1  ;;  %v3069_v55 = vpop.permute.xlu1 %3068 }
 0x9ef   :  { %11159 = vpow2.f32 %v2776_v15  ;;  %v3021_v63 = vpop.permute.xlu0 %3020  ;;  %v2930_v15 = vsel %vm1072_vm11, %v12344_v13, 0 }
 0x9f0   :  { %v12361_v26 = vpop.eup %11153  ;;  %11161 = vpow2.f32 %v2778_v50  ;;  %v2978_v50 = vsel %vm1072_vm11, %v12346_v25, 0  ;;  %v3026_v25 = vsel %vm1072_vm11, %v3021_v63, 0 }
 0x9f1   :  { %v2789_v48 = vsel %vm581_vm10, %v12361_v26, 0.0 }
 0x9f2   :  { %2790 = vadd.xlane.f32.xlu0 %v2789_v48 }
 0x9f4   :  { %v12365_v32 = vpop.eup %11155 }
 0x9f5   :  { %v12367_v49 = vpop.eup %11157  ;;  %v2792_v12 = vsel %vm581_vm10, %v12365_v32, 0.0 }
 0x9f6   :  { %2793 = vadd.xlane.f32.xlu1 %v2792_v12  ;;  %v2795_v56 = vsel %vm581_vm10, %v12367_v49, 0.0 }
 0x9f7   :  { %2796 = vadd.xlane.f32.xlu0 %v2795_v56 }
 0x9fc   :  { %v12379_v7 = vpop.eup %11159 }
 0x9fd   :  { %v12381_v28 = vpop.eup %11161  ;;  %v2798_v23 = vsel %vm581_vm10, %v12379_v7, 0.0 }
 0x9fe   :  { %v2801_v36 = vsel %vm581_vm10, %v12381_v28, 0.0 }
 0xa07   :  { %3164 = vrot.lane.b32.xlu1 %v11760_v57, %s11452_s23 }
 0xa0d   :  { %3116 = vrot.lane.b32.xlu0 %v11752_v52, %s11452_s23 }
 0xa2b   :  { %2799 = vadd.xlane.f32.xlu1 %v2798_v23 }
 0xa2c   :  { %2802 = vadd.xlane.f32.xlu0 %v2801_v36 }
 0xa3c   :  { %3264 = vrot.lane.b32.xlu1 %v11738_v41, %s11453_s24 }
 0xa40   :  { %3262 = vrot.lane.b32.xlu1 %v11738_v41, %s11454_s25 }
 0xa42   :  { %3214 = vrot.lane.b32.xlu0 %v11732_v33, %s11453_s24 }
 0xa44   :  { %3364 = vrot.lane.b32.xlu1 %v11744_v45, %s11453_s24 }
 0xa46   :  { %3212 = vrot.lane.b32.xlu0 %v11732_v33, %s11454_s25 }
 0xa48   :  { %3362 = vrot.lane.b32.xlu1 %v11744_v45, %s11454_s25 }
 0xa4a   :  { %3314 = vrot.lane.b32.xlu0 %v11736_v37, %s11453_s24 }
 0xa4c   :  { %3464 = vrot.lane.b32.xlu1 %v11754_v17, %s11453_s24 }
 0xa4e   :  { %3312 = vrot.lane.b32.xlu0 %v11736_v37, %s11454_s25 }
 0xa50   :  { %3462 = vrot.lane.b32.xlu1 %v11754_v17, %s11454_s25 }
 0xa52   :  { %3414 = vrot.lane.b32.xlu0 %v11746_v47, %s11453_s24 }
 0xa54   :  { %3564 = vrot.lane.b32.xlu1 %v11760_v57, %s11453_s24 }
 0xa56   :  { %3412 = vrot.lane.b32.xlu0 %v11746_v47, %s11454_s25 }
 0xa58   :  { %3562 = vrot.lane.b32.xlu1 %v11760_v57, %s11454_s25 }
 0xa5a   :  { %3514 = vrot.lane.b32.xlu0 %v11752_v52, %s11453_s24 }
 0xa5c   :  { %3708 = vrot.lane.b32.xlu1 %v11732_v33, %s11455_s26 }
 0xa5e   :  { %3512 = vrot.lane.b32.xlu0 %v11752_v52, %s11454_s25 }
 0xa6f   :  { %v2782_v3 = vpop.xlane.xlu1 %2781 }
 0xa70   :  { %11163 = vrcp.f32 %v2782_v3  ;;  %v2785_v39 = vpop.xlane.xlu0 %2784 }
 0xa71   :  { %11165 = vrcp.f32 %v2785_v39 }
 0xa77   :  { %v2788_v4 = vpop.xlane.xlu1 %2787 }
 0xa78   :  { %11167 = vrcp.f32 %v2788_v4 }
 0xa7b   :  { %v2791_v19 = vpop.xlane.xlu0 %2790 }
 0xa7c   :  { %11169 = vrcp.f32 %v2791_v19 }
 0xa7d   :  { %v11164_v48 = vpop.eup %11163 }
 0xa7e   :  { %v11166_v12 = vpop.eup %11165  ;;  %v2812_v56 = vmul.f32 %v11164_v48, %v12349_v9 }
 0xa7f   :  { %v2794_v29 = vpop.xlane.xlu1 %2793  ;;  %v2813_v33 = vmul.f32 %v11166_v12, %v12351_v8 }
 0xa80   :  { %11171 = vrcp.f32 %v2794_v29  ;;  %v2797_v43 = vpop.xlane.xlu0 %2796  ;;  %v2820_v11 = vpack.c.bf16 %v2812_v56, %v2812_v56 }
 0xa81   :  { %11173 = vrcp.f32 %v2797_v43  ;;  %v2821_v1 = vpack.c.bf16 %v2813_v33, %v2813_v33 }
 0xa82   :  { %10281 = vmatmul.mubr.msk.bf16.vlgmr.msra.gmra.mxu1 %vm581_vm10, %v2820_v11 }
 0xa83   :  { %10287 = vmatmul.mubr.msk.bf16.vlgmr.msra.gmra.mxu0 %vm581_vm10, %v2821_v1  ;;  %10291 = vmatpush3.bf16.msra.mxu1 %v2930_v15  ;;  %v3165_v56 = vpop.permute.xlu1 %3164 }
 0xa84   :  { %10297 = vmatpush3.bf16.msra.mxu0 %v2978_v50  ;;  %10292 = vmatprep.mubr.msk.bf16.mxu1 %vm11443_vm9, %v14228_v22  ;;  %v3117_v63 = vpop.permute.xlu0 %3116 }
 0xa85   :  { %v11168_v9 = vpop.eup %11167  ;;  %10302 = vmatprep.subr.bf16.mxu1 %v14228_v22  ;;  %10298 = vmatprep.mubr.msk.bf16.mxu0 %vm11443_vm9, %v14228_v22  ;;  %v3122_v12 = vsel %vm1072_vm11, %v3117_v63, 0 }
 0xa86   :  { %v2814_v13 = vmul.f32 %v11168_v9, %v12357_v5  ;;  %10308 = vmatprep.subr.bf16.mxu0 %v14228_v22  ;;  %v3074_v5 = vsel %vm1072_vm11, %v3069_v55, 0  ;;  %v3170_v55 = vsel %vm1072_vm11, %v3165_v56, 0 }
 0xa88   :  { %v2822_v8 = vpack.c.bf16 %v2814_v13, %v2814_v13 }
 0xa89   :  { %v11170_v23 = vpop.eup %11169 }
 0xa8a   :  { %10293 = vmatmul.mubr.msk.bf16.vlgmr.msra.gmra.mxu1 %vm581_vm10, %v2822_v8  ;;  %v2815_v36 = vmul.f32 %v11170_v23, %v12361_v26 }
 0xa8b   :  { %10303 = vmatpush3.bf16.msra.mxu1 %v3026_v25  ;;  %10304 = vmatprep.mubr.msk.bf16.mxu1 %vm11443_vm9, %v14228_v22 }
 0xa8c   :  { %v2823_v3 = vpack.c.bf16 %v2815_v36, %v2815_v36  ;;  %10314 = vmatprep.subr.bf16.mxu1 %v14228_v22 }
 0xa8d   :  { %v11172_v39 = vpop.eup %11171 }
 0xa8e   :  { %v11174_v4 = vpop.eup %11173  ;;  %10299 = vmatmul.mubr.msk.bf16.vlgmr.msra.gmra.mxu0 %vm581_vm10, %v2823_v3  ;;  %v2816_v19 = vmul.f32 %v11172_v39, %v12365_v32 }
 0xa8f   :  { %10309 = vmatpush3.bf16.msra.mxu0 %v3074_v5  ;;  %10310 = vmatprep.mubr.msk.bf16.mxu0 %vm11443_vm9, %v14228_v22  ;;  %v2817_v48 = vmul.f32 %v11174_v4, %v12367_v49 }
 0xa90   :  { %v2824_v26 = vpack.c.bf16 %v2816_v19, %v2816_v19  ;;  %10320 = vmatprep.subr.bf16.mxu0 %v14228_v22 }
 0xa91   :  { %v2825_v32 = vpack.c.bf16 %v2817_v48, %v2817_v48 }
 0xa92   :  { %10305 = vmatmul.mubr.msk.bf16.vlgmr.msra.gmra.mxu1 %vm581_vm10, %v2824_v26 }
 0xa93   :  { %10315 = vmatpush3.bf16.msra.mxu1 %v3122_v12  ;;  %10316 = vmatprep.mubr.msk.bf16.mxu1 %vm11443_vm9, %v14228_v22 }
 0xa94   :  { %10326 = vmatprep.subr.bf16.mxu1 %v14228_v22 }
 0xa96   :  { %10311 = vmatmul.mubr.msk.bf16.vlgmr.msra.gmra.mxu0 %vm581_vm10, %v2825_v32 }
 0xa97   :  { %10321 = vmatpush3.bf16.msra.mxu0 %v3170_v55  ;;  %10322 = vmatprep.mubr.msk.bf16.mxu0 %vm11443_vm9, %v14228_v22 }
 0xa98   :  { %10332 = vmatprep.subr.bf16.mxu0 %v14228_v22 }
 0xab4   :  { %v2800_v49 = vpop.xlane.xlu1 %2799 }
 0xab5   :  { %11175 = vrcp.f32 %v2800_v49  ;;  %v2803_v29 = vpop.xlane.xlu0 %2802 }
 0xab6   :  { %11177 = vrcp.f32 %v2803_v29 }
 0xab8   :  { %v3265_v33 = vpop.permute.xlu1 %3264 }
 0xab9   :  { %v3215_v43 = vpop.permute.xlu0 %3214  ;;  %v3270_v4 = vsel %vm581_vm10, %v3265_v33, 0 }
 0xaba   :  { %v3220_v39 = vsel %vm581_vm10, %v3215_v43, 0 }
 0xabc   :  { %v3263_v11 = vpop.permute.xlu1 %3262 }
 0xabd   :  { %v3213_v1 = vpop.permute.xlu0 %3212 }
 0xac0   :  { %v3365_v15 = vpop.permute.xlu1 %3364 }
 0xac1   :  { %v3315_v8 = vpop.permute.xlu0 %3314  ;;  %v3370_v19 = vsel %vm581_vm10, %v3365_v15, 0 }
 0xac2   :  { %v11176_v50 = vpop.eup %11175  ;;  %v3320_v5 = vsel %vm581_vm10, %v3315_v8, 0 }
 0xac3   :  { %v11178_v9 = vpop.eup %11177  ;;  %v2818_v13 = vmul.f32 %v11176_v50, %v12379_v7 }
 0xac4   :  { %v2819_v23 = vmul.f32 %v11178_v9, %v12381_v28  ;;  %v3363_v36 = vpop.permute.xlu1 %3362 }
 0xac5   :  { %v2826_v25 = vpack.c.bf16 %v2818_v13, %v2818_v13  ;;  %v3313_v7 = vpop.permute.xlu0 %3312 }
 0xac6   :  { %v2827_v3 = vpack.c.bf16 %v2819_v23, %v2819_v23 }
 0xac7   :  { %10317 = vmatmul.mubr.msk.bf16.vlgmr.msra.gmra.mxu1 %vm581_vm10, %v2826_v25 }
 0xac8   :  { %10323 = vmatmul.mubr.msk.bf16.vlgmr.msra.gmra.mxu0 %vm581_vm10, %v2827_v3  ;;  %10327 = vmatpush3.bf16.xpose.msra.mxu1 %v3220_v39  ;;  %v3465_v28 = vpop.permute.xlu1 %3464 }
 0xac9   :  { %10333 = vmatpush3.bf16.xpose.msra.mxu0 %v3270_v4  ;;  %10328 = vmatprep.mubr.msk.bf16.mxu1 %vm11443_vm9, %v14228_v22  ;;  %v3415_v63 = vpop.permute.xlu0 %3414  ;;  %v3470_v56 = vsel %vm581_vm10, %v3465_v28, 0 }
 0xaca   :  { %10334 = vmatprep.mubr.msk.bf16.mxu0 %vm11443_vm9, %v14228_v22  ;;  %10338 = vmatprep.subr.bf16.mxu1 %v14228_v22  ;;  %v3420_v12 = vsel %vm581_vm10, %v3415_v63, 0 }
 0xacb   :  { %10344 = vmatprep.subr.bf16.mxu0 %v14228_v22 }
 0xacc   :  { %v3463_v26 = vpop.permute.xlu1 %3462 }
 0xacd   :  { %v3413_v48 = vpop.permute.xlu0 %3412 }
 0xacf   :  { %10329 = vmatmul.mubr.msk.bf16.vlgmr.msra.gmra.mxu1 %vm581_vm10, %v3213_v1 }
 0xad0   :  { %10335 = vmatmul.mubr.msk.bf16.vlgmr.msra.gmra.mxu0 %vm581_vm10, %v3263_v11  ;;  %10339 = vmatpush3.bf16.xpose.msra.mxu1 %v3320_v5  ;;  %v3565_v32 = vpop.permute.xlu1 %3564 }
 0xad1   :  { %10345 = vmatpush3.bf16.xpose.msra.mxu0 %v3370_v19  ;;  %10340 = vmatprep.mubr.msk.bf16.mxu1 %vm11443_vm9, %v14228_v22  ;;  %v3515_v55 = vpop.permute.xlu0 %3514  ;;  %v3570_v33 = vsel %vm581_vm10, %v3565_v32, 0 }
 0xad2   :  { %10346 = vmatprep.mubr.msk.bf16.mxu0 %vm11443_vm9, %v14228_v22  ;;  %10350 = vmatprep.subr.bf16.mxu1 %v14228_v22  ;;  %v3520_v29 = vsel %vm581_vm10, %v3515_v55, 0 }
 0xad3   :  { %10356 = vmatprep.subr.bf16.mxu0 %v14228_v22 }
 0xad4   :  { %v3563_v49 = vpop.permute.xlu1 %3562 }
 0xad5   :  { %v3513_v11 = vpop.permute.xlu0 %3512 }
 0xad7   :  { %10341 = vmatmul.mubr.msk.bf16.vlgmr.msra.gmra.mxu1 %vm581_vm10, %v3313_v7 }
 0xad8   :  { %10347 = vmatmul.mubr.msk.bf16.vlgmr.msra.gmra.mxu0 %vm581_vm10, %v3363_v36  ;;  %10351 = vmatpush3.bf16.xpose.msra.mxu1 %v3420_v12  ;;  %v3709_v43 = vpop.permute.xlu1 %3708 }
 0xad9   :  { %10357 = vmatpush3.bf16.xpose.msra.mxu0 %v3470_v56  ;;  %10352 = vmatprep.mubr.msk.bf16.mxu1 %vm11443_vm9, %v14228_v22  ;;  %v3714_v1 = vsel %vm1072_vm11, %v3709_v43, 0 }
 0xada   :  { %10358 = vmatprep.mubr.msk.bf16.mxu0 %vm11443_vm9, %v14228_v22  ;;  %10362 = vmatprep.subr.bf16.mxu1 %v14228_v22 }
 0xadb   :  { %10368 = vmatprep.subr.bf16.mxu0 %v14228_v22 }
 0xadf   :  { %10353 = vmatmul.mubr.msk.bf16.vlgmr.msra.gmra.mxu1 %vm581_vm10, %v3413_v48 }
 0xae0   :  { %10359 = vmatmul.mubr.msk.bf16.vlgmr.msra.gmra.mxu0 %vm581_vm10, %v3463_v26  ;;  %10363 = vmatpush3.bf16.xpose.msra.mxu1 %v3520_v29 }
 0xae1   :  { %10369 = vmatpush3.bf16.xpose.msra.mxu0 %v3570_v33  ;;  %10364 = vmatprep.mubr.msk.bf16.mxu1 %vm11443_vm9, %v14228_v22 }
 0xae2   :  { %10370 = vmatprep.mubr.msk.bf16.mxu0 %vm11443_vm9, %v14228_v22  ;;  %10374 = vmatprep.subr.bf16.mxu1 %v14228_v22 }
 0xae3   :  { %10380 = vmatprep.subr.bf16.mxu0 %v14228_v22 }
 0xae7   :  { %10365 = vmatmul.mubr.msk.bf16.vlgmr.msra.gmra.mxu1 %vm581_vm10, %v3513_v11 }
 0xae8   :  { %10371 = vmatmul.mubr.msk.bf16.vlgmr.msra.gmra.mxu0 %vm581_vm10, %v3563_v49  ;;  %10375 = vmatpush3.bf16.msra.mxu1 %v3714_v1 }
 0xae9   :  { %10376 = vmatprep.mubr.msk.bf16.mxu1 %vm11443_vm9, %v14228_v22  ;;  %10382 = vmatprep.mubr.msk.bf16.mxu0 %vm11443_vm9, %v14228_v22 }
 0xaea   :  { %10386 = vmatprep.subr.bf16.mxu1 %v14228_v22 }
 0xb42   :  { %v12509_v15 = vpop.f32.mrf.mxu1 }
 0xb43   :  { %v12511_v50 = vpop.f32.mrf.mxu0 }
 0xb44   :  { %v10282_v13 = vpop.f32.mrf.mxu1 }
 0xb45   :  { %v10288_v8 = vpop.f32.mrf.mxu0 }
 0xb46   :  { %v2873_v23 = vpop.f32.mrf.mxu1 }
 0xb47   :  { %v2921_v25 = vpop.f32.mrf.mxu0 }
 0xb48   :  { %v10283_v36 = vpop.f32.mrf.mxu1 }
 0xb49   :  { %v10289_v3 = vpop.f32.mrf.mxu0 }
 0xb4a   :  { %v12515_v39 = vpop.f32.mrf.mxu1 }
 0xb4c   :  { %v10294_v4 = vpop.f32.mrf.mxu1 }
 0xb4e   :  { %v2969_v7 = vpop.f32.mrf.mxu1  ;;  %v12517_v28 = vpop.f32.mrf.mxu0 }
 0xb50   :  { %v10295_v19 = vpop.f32.mrf.mxu1  ;;  %v10300_v63 = vpop.f32.mrf.mxu0 }
 0xb52   :  { %v3017_v26 = vpop.f32.mrf.mxu0  ;;  %v12521_v48 = vpop.f32.mrf.mxu1 }
 0xb54   :  { %v10301_v12 = vpop.f32.mrf.mxu0  ;;  %v10306_v56 = vpop.f32.mrf.mxu1 }
 0xb56   :  { %v3065_v32 = vpop.f32.mrf.mxu1  ;;  %v12523_v55 = vpop.f32.mrf.mxu0 }
 0xb58   :  { %v10307_v29 = vpop.f32.mrf.mxu1  ;;  %v10312_v33 = vpop.f32.mrf.mxu0 }
 0xb5a   :  { %v3113_v43 = vpop.f32.mrf.mxu0 }
 0xb5c   :  { %v10313_v11 = vpop.f32.mrf.mxu0 }
 0xb87   :  { %v12527_v1 = vpop.f32.mrf.mxu1 }
 0xb88   :  { %v12529_v13 = vpop.f32.mrf.mxu0 }
 0xb89   :  { %v10318_v23 = vpop.f32.mrf.mxu1 }
 0xb8a   :  { %v10324_v25 = vpop.f32.mrf.mxu0 }
 0xb8b   :  { %v3161_v36 = vpop.f32.mrf.mxu1 }
 0xb8c   :  { %v3209_v3 = vpop.f32.mrf.mxu0 }
 0xb8d   :  { %v10319_v4 = vpop.f32.mrf.mxu1 }
 0xb8e   :  { %v10325_v7 = vpop.f32.mrf.mxu0 }
 0xb8f   :  { %v3256_v19 = vpop.f32.mrf.mxu1 }
 0xb90   :  { %v3257_v63 = vadd.f32 %v3256_v19, %v11833_v44  ;;  %v3306_v26 = vpop.f32.mrf.mxu0 }
 0xb91   :  { %v3307_v12 = vadd.f32 %v3306_v26, %v11843_v60  ;;  %v10330_v56 = vpop.f32.mrf.mxu1 }
 0xb92   :  { %v10336_v32 = vpop.f32.mrf.mxu0  ;;  %v3612_v29 = vsel %vm581_vm10, %v3257_v63, -inf }
 0xb93   :  { %v3615_v33 = vsel %vm581_vm10, %v3307_v12, -inf  ;;  %3613 = vmax.xlane.f32.xlu0 %v3612_v29  ;;  %v3259_v43 = vpop.f32.mrf.mxu1 }
 0xb94   :  { %3616 = vmax.xlane.f32.xlu1 %v3615_v33  ;;  %v3309_v11 = vpop.f32.mrf.mxu0 }
 0xb95   :  { %v10331_v23 = vpop.f32.mrf.mxu1 }
 0xb96   :  { %v10337_v25 = vpop.f32.mrf.mxu0 }
 0xb97   :  { %v3356_v36 = vpop.f32.mrf.mxu1 }
 0xb98   :  { %v3357_v3 = vadd.f32 %v3356_v36, %v11863_v31  ;;  %v3406_v4 = vpop.f32.mrf.mxu0 }
 0xb99   :  { %v10342_v7 = vpop.f32.mrf.mxu1  ;;  %v3407_v19 = vadd.f32 %v3406_v4, %v11846_v61 }
 0xb9a   :  { %v10348_v26 = vpop.f32.mrf.mxu0  ;;  %v3618_v56 = vsel %vm581_vm10, %v3357_v3, -inf }
 0xb9b   :  { %3619 = vmax.xlane.f32.xlu0 %v3618_v56  ;;  %v3359_v32 = vpop.f32.mrf.mxu1  ;;  %v3621_v33 = vsel %vm581_vm10, %v3407_v19, -inf }
 0xb9c   :  { %v3409_v8 = vpop.f32.mrf.mxu0 }
 0xb9d   :  { %v10343_v49 = vpop.f32.mrf.mxu1 }
 0xb9e   :  { %v10349_v29 = vpop.f32.mrf.mxu0 }
 0xb9f   :  { %3622 = vmax.xlane.f32.xlu0 %v3621_v33  ;;  %v3456_v43 = vpop.f32.mrf.mxu1 }
 0xba0   :  { %v3506_v11 = vpop.f32.mrf.mxu0  ;;  %v12542_v23 = vadd.f32 %v3456_v43, %v11886_v46 }
 0xba1   :  { %v12545_v25 = vadd.f32 %v3506_v11, %v11860_v27  ;;  %v10354_v36 = vpop.f32.mrf.mxu1 }
 0xba2   :  { %v10360_v4 = vpop.f32.mrf.mxu0  ;;  %v3624_v7 = vsel %vm581_vm10, %v12542_v23, -inf }
 0xba3   :  { %v3627_v49 = vsel %vm581_vm10, %v12545_v25, -inf  ;;  %3625 = vmax.xlane.f32.xlu1 %v3624_v7  ;;  %v3459_v8 = vpop.f32.mrf.mxu1 }
 0xba4   :  { %v3509_v26 = vpop.f32.mrf.mxu0  ;;  %3628 = vmax.xlane.f32.xlu0 %v3627_v49 }
 0xba5   :  { %v10355_v56 = vpop.f32.mrf.mxu1 }
 0xba6   :  { %v10361_v32 = vpop.f32.mrf.mxu0 }
 0xba7   :  { %v3556_v29 = vpop.f32.mrf.mxu1 }
 0xba8   :  { %v3557_v33 = vadd.f32 %v3556_v29, %v11890_v58  ;;  %v3606_v43 = vpop.f32.mrf.mxu0 }
 0xba9   :  { %v3607_v11 = vadd.f32 %v3606_v43, %v11871_v21  ;;  %v10366_v36 = vpop.f32.mrf.mxu1 }
 0xbaa   :  { %v10372_v4 = vpop.f32.mrf.mxu0  ;;  %v3630_v9 = vsel %vm581_vm10, %v3557_v33, -inf }
 0xbab   :  { %v3633_v5 = vsel %vm581_vm10, %v3607_v11, -inf  ;;  %3631 = vmax.xlane.f32.xlu1 %v3630_v9  ;;  %v3559_v27 = vpop.f32.mrf.mxu1 }
 0xbac   :  { %v3609_v7 = vpop.f32.mrf.mxu0  ;;  %3634 = vmax.xlane.f32.xlu0 %v3633_v5 }
 0xbad   :  { %v10367_v8 = vpop.f32.mrf.mxu1 }
 0xbae   :  { %v10373_v49 = vpop.f32.mrf.mxu0 }
 0xbbc   :  { %3804 = vrot.lane.b32.xlu1 %v11736_v37, %s11455_s26 }
 0xbc0   :  { %3852 = vrot.lane.b32.xlu1 %v11744_v45, %s11455_s26 }
 0xbc2   :  { %3756 = vrot.lane.b32.xlu0 %v11738_v41, %s11455_s26 }
 0xc1c   :  { %v3614_v26 = vpop.xlane.xlu0 %3613 }
 0xc1d   :  { %v3617_v56 = vpop.xlane.xlu1 %3616  ;;  %v3636_v32 = vsub.f32 %v3257_v63, %v3614_v26 }
 0xc1e   :  { %v3637_v29 = vsub.f32 %v3307_v12, %v3617_v56 }
 0xc1f   :  { %v3644_v43 = vmul.f32 1.442695, %v3636_v32 }
 0xc20   :  { %v3646_v9 = vmul.f32 1.442695, %v3637_v29 }
 0xc21   :  { %11179 = vpow2.f32 %v3644_v43 }
 0xc22   :  { %11181 = vpow2.f32 %v3646_v9 }
 0xc24   :  { %v3620_v27 = vpop.xlane.xlu0 %3619 }
 0xc25   :  { %v3638_v5 = vsub.f32 %v3357_v3, %v3620_v27 }
 0xc27   :  { %v3648_v36 = vmul.f32 1.442695, %v3638_v5 }
 0xc28   :  { %v3623_v4 = vpop.xlane.xlu0 %3622 }
 0xc29   :  { %11183 = vpow2.f32 %v3648_v36  ;;  %v3639_v37 = vsub.f32 %v3407_v19, %v3623_v4 }
 0xc2b   :  { %v3650_v7 = vmul.f32 1.442695, %v3639_v37 }
 0xc2c   :  { %v3626_v43 = vpop.xlane.xlu1 %3625 }
 0xc2d   :  { %11185 = vpow2.f32 %v3650_v7  ;;  %v3629_v12 = vpop.xlane.xlu0 %3628  ;;  %v3640_v9 = vsub.f32 %v12542_v23, %v3626_v43 }
 0xc2e   :  { %v12561_v45 = vpop.eup %11179  ;;  %v3641_v5 = vsub.f32 %v12545_v25, %v3629_v12 }
 0xc2f   :  { %v12563_v8 = vpop.eup %11181  ;;  %v3660_v41 = vsel %vm581_vm10, %v12561_v45, 0.0  ;;  %v3652_v36 = vmul.f32 1.442695, %v3640_v9 }
 0xc30   :  { %v3663_v63 = vsel %vm581_vm10, %v12563_v8, 0.0  ;;  %3661 = vadd.xlane.f32.xlu1 %v3660_v41  ;;  %v3654_v37 = vmul.f32 1.442695, %v3641_v5 }
 0xc31   :  { %3664 = vadd.xlane.f32.xlu0 %v3663_v63  ;;  %11187 = vpow2.f32 %v3652_v36 }
 0xc32   :  { %11189 = vpow2.f32 %v3654_v37 }
 0xc34   :  { %v3632_v27 = vpop.xlane.xlu1 %3631 }
 0xc35   :  { %v3635_v3 = vpop.xlane.xlu0 %3634  ;;  %v3642_v4 = vsub.f32 %v3557_v33, %v3632_v27 }
 0xc36   :  { %v12569_v49 = vpop.eup %11183  ;;  %v3643_v41 = vsub.f32 %v3607_v11, %v3635_v3  ;;  %v14229_v3 = vpack.i.bf16 %v12299_v14, %v12297_v59 }
 0xc37   :  { %v3666_v19 = vsel %vm581_vm10, %v12569_v49, 0.0  ;;  %v3656_v7 = vmul.f32 1.442695, %v3642_v4 }
 0xc38   :  { %3667 = vadd.xlane.f32.xlu1 %v3666_v19  ;;  %v3658_v63 = vmul.f32 1.442695, %v3643_v41  ;;  %v3805_v59 = vpop.permute.xlu1 %3804 }
 0xc39   :  { %v3757_v26 = vpop.permute.xlu0 %3756  ;;  %11191 = vpow2.f32 %v3656_v7 }
 0xc3a   :  { %v12573_v56 = vpop.eup %11185  ;;  %v3762_v32 = vsel %vm1072_vm11, %v3757_v26, 0  ;;  %11193 = vpow2.f32 %v3658_v63  ;;  %v14230_v26 = vpack.i.bf16 %v12517_v28, %v12515_v39 }
 0xc3b   :  { %10381 = vmatpush3.bf16.msra.mxu0 %v3762_v32  ;;  %v3669_v29 = vsel %vm581_vm10, %v12573_v56, 0.0  ;;  %v14231_v32 = vpack.i.bf16 %v12291_v6, %v12293_v2 }
 0xc3c   :  { %3670 = vadd.xlane.f32.xlu0 %v3669_v29  ;;  %10392 = vmatprep.subr.bf16.mxu0 %v14228_v22  ;;  %v3853_v14 = vpop.permute.xlu1 %3852 }
 0xc49   :  { %3948 = vrot.lane.b32.xlu1 %v11754_v17, %s11455_s26  ;;  %v12585_v17 = vpop.eup %11187 }
 0xc4a   :  { %v12587_v19 = vpop.eup %11189 }
 0xc4b   :  { %v12591_v23 = vpop.eup %11191  ;;  %v3675_v33 = vsel %vm581_vm10, %v12587_v19, 0.0 }
 0xc4c   :  { %v3678_v25 = vsel %vm581_vm10, %v12591_v23, 0.0  ;;  %v12597_v11 = vpop.eup %11193 }
 0xc4d   :  { %v3681_v12 = vsel %vm581_vm10, %v12597_v11, 0.0 }
 0xc52   :  { %3900 = vrot.lane.b32.xlu0 %v11746_v47, %s11455_s26  ;;  %v3672_v47 = vsel %vm581_vm10, %v12585_v17, 0.0 }
 0xc6d   :  { %3673 = vadd.xlane.f32.xlu1 %v3672_v47 }
 0xc71   :  { %3679 = vadd.xlane.f32.xlu1 %v3678_v25  ;;  %3676 = vadd.xlane.f32.xlu0 %v3675_v33 }
 0xc75   :  { %3682 = vadd.xlane.f32.xlu0 %v3681_v12 }
 0xc82   :  { %4044 = vrot.lane.b32.xlu1 %v11760_v57, %s11455_s26  ;;  %v14232_v57 = vpack.i.bf16 %v12511_v50, %v12509_v15  ;;  %v3810_v15 = vsel %vm1072_vm11, %v3805_v59, 0  ;;  %v3858_v50 = vsel %vm1072_vm11, %v3853_v14, 0 }
 0xc86   :  { %10933 = vrot.lane.b32.xlu1 %v14229_v3, %s11456_s2 }
 0xc8a   :  { %10943 = vrot.lane.b32.xlu1 %v14230_v26, %s11457_s27 }
 0xc8b   :  { %3996 = vrot.lane.b32.xlu0 %v11752_v52, %s11455_s26 }
 0xc8f   :  { %10928 = vrot.lane.b32.xlu0 %v14231_v32, %s11456_s2 }
 0xc93   :  { %10938 = vrot.lane.b32.xlu0 %v14232_v57, %s11457_s27 }
 0xcb9   :  { %v3662_v29 = vpop.xlane.xlu1 %3661 }
 0xcba   :  { %11195 = vrcp.f32 %v3662_v29  ;;  %v3665_v43 = vpop.xlane.xlu0 %3664 }
 0xcbb   :  { %11197 = vrcp.f32 %v3665_v43 }
 0xcc1   :  { %v3668_v39 = vpop.xlane.xlu1 %3667 }
 0xcc2   :  { %11199 = vrcp.f32 %v3668_v39 }
 0xcc5   :  { %v3671_v28 = vpop.xlane.xlu0 %3670  ;;  %v3949_v63 = vpop.permute.xlu1 %3948 }
 0xcc6   :  { %11201 = vrcp.f32 %v3671_v28 }
 0xcc7   :  { %v11196_v52 = vpop.eup %11195 }
 0xcc8   :  { %v11198_v9 = vpop.eup %11197  ;;  %v3692_v6 = vmul.f32 %v11196_v52, %v12561_v45 }
 0xcc9   :  { %v3693_v2 = vmul.f32 %v11198_v9, %v12563_v8  ;;  %v3901_v8 = vpop.permute.xlu0 %3900 }
 0xcca   :  { %v3700_v27 = vpack.c.bf16 %v3692_v6, %v3692_v6  ;;  %v3906_v41 = vsel %vm1072_vm11, %v3901_v8, 0 }
 0xccb   :  { %v3701_v5 = vpack.c.bf16 %v3693_v2, %v3693_v2 }
 0xccc   :  { %10377 = vmatmul.mubr.msk.bf16.vlgmr.msra.gmra.mxu1 %vm581_vm10, %v3700_v27 }
 0xccd   :  { %10383 = vmatmul.mubr.msk.bf16.vlgmr.msra.gmra.mxu0 %vm581_vm10, %v3701_v5  ;;  %10387 = vmatpush3.bf16.msra.mxu1 %v3810_v15 }
 0xcce   :  { %10393 = vmatpush3.bf16.msra.mxu0 %v3858_v50  ;;  %10388 = vmatprep.mubr.msk.bf16.mxu1 %vm11443_vm9, %v14228_v22 }
 0xccf   :  { %v11200_v36 = vpop.eup %11199  ;;  %10398 = vmatprep.subr.bf16.mxu1 %v14228_v22  ;;  %10394 = vmatprep.mubr.msk.bf16.mxu0 %vm11443_vm9, %v14228_v22 }
 0xcd0   :  { %v3694_v45 = vmul.f32 %v11200_v36, %v12569_v49  ;;  %10404 = vmatprep.subr.bf16.mxu0 %v14228_v22  ;;  %v3954_v49 = vsel %vm1072_vm11, %v3949_v63, 0 }
 0xcd2   :  { %v3702_v4 = vpack.c.bf16 %v3694_v45, %v3694_v45 }
 0xcd3   :  { %v11202_v37 = vpop.eup %11201 }
 0xcd4   :  { %v3695_v7 = vmul.f32 %v11202_v37, %v12573_v56  ;;  %10389 = vmatmul.mubr.msk.bf16.vlgmr.msra.gmra.mxu1 %vm581_vm10, %v3702_v4 }
 0xcd5   :  { %10399 = vmatpush3.bf16.msra.mxu1 %v3906_v41  ;;  %10400 = vmatprep.mubr.msk.bf16.mxu1 %vm11443_vm9, %v14228_v22 }
 0xcd6   :  { %v3703_v47 = vpack.c.bf16 %v3695_v7, %v3695_v7  ;;  %10410 = vmatprep.subr.bf16.mxu1 %v14228_v22  ;;  %v14233_v7 = vpack.i.bf16 %v12305_v20, %v12303_v40  ;;  %v14235_v40 = vpack.i.bf16 %v12311_v24, %v12309_v30  ;;  %v14236_v20 = vpack.i.bf16 %v12529_v13, %v12527_v1 }
 0xcd8   :  { %10395 = vmatmul.mubr.msk.bf16.vlgmr.msra.gmra.mxu0 %vm581_vm10, %v3703_v47  ;;  %v14234_v47 = vpack.i.bf16 %v12523_v55, %v12521_v48 }
 0xcd9   :  { %10405 = vmatpush3.bf16.msra.mxu0 %v3954_v49  ;;  %10406 = vmatprep.mubr.msk.bf16.mxu0 %vm11443_vm9, %v14228_v22 }
 0xcda   :  { %10416 = vmatprep.subr.bf16.mxu0 %v14228_v22 }
 0xcf6   :  { %v3674_v56 = vpop.xlane.xlu1 %3673 }
 0xcf7   :  { %11203 = vrcp.f32 %v3674_v56 }
 0xcfa   :  { %v3680_v25 = vpop.xlane.xlu1 %3679  ;;  %v3677_v33 = vpop.xlane.xlu0 %3676 }
 0xcfb   :  { %11205 = vrcp.f32 %v3680_v25 }
 0xcfc   :  { %11207 = vrcp.f32 %v3677_v33 }
 0xcfe   :  { %v3683_v12 = vpop.xlane.xlu0 %3682  ;;  %v4045_v28 = vpop.permute.xlu1 %4044 }
 0xcff   :  { %11209 = vrcp.f32 %v3683_v12 }
 0xd02   :  { %v3997_v32 = vpop.permute.xlu0 %3996 }
 0xd03   :  { %v4002_v29 = vsel %vm1072_vm11, %v3997_v32, 0 }
 0xd04   :  { %v11204_v3 = vpop.eup %11203 }
 0xd05   :  { %v3696_v26 = vmul.f32 %v11204_v3, %v12585_v17  ;;  %v4050_v17 = vsel %vm1072_vm11, %v4045_v28, 0 }
 0xd07   :  { %v3704_v57 = vpack.c.bf16 %v3696_v26, %v3696_v26 }
 0xd08   :  { %v11206_v59 = vpop.eup %11205 }
 0xd09   :  { %v11208_v14 = vpop.eup %11207  ;;  %10401 = vmatmul.mubr.msk.bf16.vlgmr.msra.gmra.mxu1 %vm581_vm10, %v3704_v57  ;;  %v3698_v39 = vmul.f32 %v11206_v59, %v12591_v23  ;;  %v11049_v23 = vld [vmem:[%s14180_s6 + $0x8] sm:$0xff]  }
 0xd0a   :  { %v3697_v43 = vmul.f32 %v11208_v14, %v12587_v19  ;;  %10411 = vmatpush3.bf16.msra.mxu1 %v4002_v29  ;;  %10412 = vmatprep.mubr.msk.bf16.mxu1 %vm11443_vm9, %v14228_v22 }
 0xd0b   :  { %v3706_v6 = vpack.c.bf16 %v3698_v39, %v3698_v39  ;;  %10422 = vmatprep.subr.bf16.mxu1 %v11049_v23 }
 0xd0c   :  { %v3705_v52 = vpack.c.bf16 %v3697_v43, %v3697_v43  ;;  %v11210_v9 = vpop.eup %11209 }
 0xd0d   :  { %v3699_v19 = vmul.f32 %v11210_v9, %v12597_v11  ;;  %v11050_v11 = vld [vmem:[%s14180_s6] sm:$0xff]  }
 0xd0e   :  { %10407 = vmatmul.mubr.msk.bf16.vlgmr.msra.gmra.mxu0 %vm581_vm10, %v3705_v52 }
 0xd0f   :  { %10417 = vmatpush3.bf16.msra.mxu0 %v4050_v17  ;;  %10418 = vmatprep.mubr.msk.bf16.mxu0 %vm11443_vm9, %v14228_v22  ;;  %v3707_v2 = vpack.c.bf16 %v3699_v19, %v3699_v19  ;;  %v10929_v19 = vpop.permute.xlu0 %10928 }
 0xd11   :  { %10413 = vmatmul.mubr.msk.bf16.vlgmr.msra.gmra.mxu1 %vm581_vm10, %v3706_v6 }
 0xd12   :  { %10423 = vmatpush3.bf16.msra.mxu1 %v11049_v23  ;;  %v10931_v23 = vunpack.i.h.bf16 %v10929_v19 }
 0xd13   :  { %10424 = vmatprep.subr.bf16.mxu1 %v11050_v11 }
 0xd16   :  { %10419 = vmatmul.mubr.msk.bf16.vlgmr.msra.gmra.mxu0 %vm581_vm10, %v3707_v2  ;;  %10425 = vmatpush3.bf16.msra.mxu1 %v11050_v11  ;;  %v10939_v2 = vpop.permute.xlu0 %10938  ;;  %v4189_v11 = vsel %vm581_vm10, %v12079_v34, %v10931_v23 }
 0xd8c   :  { %v3750_v27 = vpop.f32.mrf.mxu1 }
 0xd8d   :  { %v3798_v5 = vpop.f32.mrf.mxu0 }
 0xd8e   :  { %v10947_v15 = vpack.i.bf16 %v3798_v5, %v3750_v27  ;;  %v10378_v50 = vpop.f32.mrf.mxu1  ;;  %v10930_v27 = vunpack.i.l.bf16 %v10929_v19  ;;  %v10941_v5 = vunpack.i.h.bf16 %v10939_v2 }
 0xd8f   :  { %v10384_v36 = vpop.f32.mrf.mxu0  ;;  %v10934_v50 = vpop.permute.xlu1 %10933 }
 0xd90   :  { %10948 = vrot.lane.b32.xlu0 %v10947_v15, %s14207_s3  ;;  %v3753_v45 = vpop.f32.mrf.mxu1  ;;  %v10940_v15 = vunpack.i.l.bf16 %v10939_v2 }
 0xd91   :  { %v3801_v8 = vpop.f32.mrf.mxu0  ;;  %v4188_v45 = vsel %vm581_vm10, %v12077_v51, %v10930_v27 }
 0xd92   :  { %v10379_v4 = vpop.f32.mrf.mxu1 }
 0xd93   :  { %v10385_v37 = vpop.f32.mrf.mxu0 }
 0xd94   :  { %10958 = vrot.lane.b32.xlu0 %v14233_v7, %s11456_s2  ;;  %v3846_v41 = vpop.f32.mrf.mxu1  ;;  %v4197_v37 = vsel %vm4196_vm12, %v4188_v45, %v10940_v15  ;;  %v4198_v7 = vsel %vm4196_vm12, %v4189_v11, %v10941_v5 }
 0xd96   :  { %v10390_v63 = vpop.f32.mrf.mxu1 }
 0xd98   :  { %10968 = vrot.lane.b32.xlu0 %v14234_v47, %s11457_s27  ;;  %v3849_v49 = vpop.f32.mrf.mxu1  ;;  %v3894_v56 = vpop.f32.mrf.mxu0 }
 0xd99   :  { %v10952_v25 = vpack.i.bf16 %v3894_v56, %v3846_v41  ;;  %v10944_v49 = vpop.permute.xlu1 %10943  ;;  %v10936_v56 = vunpack.i.h.bf16 %v10934_v50 }
 0xd9a   :  { %v10391_v33 = vpop.f32.mrf.mxu1  ;;  %v10396_v12 = vpop.f32.mrf.mxu0  ;;  %v10946_v34 = vunpack.i.h.bf16 %v10944_v49 }
 0xd9b   :  { %10953 = vrot.lane.b32.xlu1 %v10952_v25, %s14207_s3  ;;  %v10935_v25 = vunpack.i.l.bf16 %v10934_v50  ;;  %v10945_v33 = vunpack.i.l.bf16 %v10944_v49  ;;  %v4191_v51 = vsel %vm581_vm10, %v12081_v35, %v10936_v56 }
 0xd9c   :  { %v3897_v3 = vpop.f32.mrf.mxu0 }
 0xd9d   :  { %v4190_v3 = vsel %vm581_vm10, %v12085_v10, %v10935_v25 }
 0xd9e   :  { %v10397_v26 = vpop.f32.mrf.mxu0 }
 0xd9f   :  { %10963 = vrot.lane.b32.xlu1 %v14235_v40, %s11456_s2 }
 0xda3   :  { %10973 = vrot.lane.b32.xlu1 %v14236_v20, %s11457_s27  ;;  %v4199_v20 = vsel %vm4196_vm12, %v4190_v3, %v10945_v33 }
 0xdc9   :  { %v3942_v48 = vpop.f32.mrf.mxu1 }
 0xdcb   :  { %v10402_v55 = vpop.f32.mrf.mxu1 }
 0xdcd   :  { %v3945_v32 = vpop.f32.mrf.mxu1 }
 0xdce   :  { %v3990_v57 = vpop.f32.mrf.mxu0 }
 0xdcf   :  { %v10977_v59 = vpack.i.bf16 %v3990_v57, %v3942_v48  ;;  %v10403_v14 = vpop.f32.mrf.mxu1  ;;  %v4200_v48 = vsel %vm4196_vm12, %v4191_v51, %v10946_v34 }
 0xdd0   :  { %v10408_v29 = vpop.f32.mrf.mxu0 }
 0xdd1   :  { %10978 = vrot.lane.b32.xlu0 %v10977_v59, %s14207_s3  ;;  %v4038_v43 = vpop.f32.mrf.mxu1 }
 0xdd2   :  { %v3993_v39 = vpop.f32.mrf.mxu0 }
 0xdd3   :  { %v10414_v28 = vpop.f32.mrf.mxu1 }
 0xdd4   :  { %v10409_v52 = vpop.f32.mrf.mxu0 }
 0xdd5   :  { %v4041_v30 = vpop.f32.mrf.mxu1 }
 0xdd6   :  { %v4086_v24 = vpop.f32.mrf.mxu0 }
 0xdd7   :  { %v10982_v9 = vpack.i.bf16 %v4086_v24, %v4038_v43  ;;  %v10415_v17 = vpop.f32.mrf.mxu1 }
 0xdd8   :  { %v10420_v6 = vpop.f32.mrf.mxu0 }
 0xdd9   :  { %10983 = vrot.lane.b32.xlu1 %v10982_v9, %s14207_s3 }
 0xdda   :  { %v4089_v1 = vpop.f32.mrf.mxu0 }
 0xddc   :  { %v10421_v13 = vpop.f32.mrf.mxu0 }
 0xe02   :  { %v10949_v36 = vpop.permute.xlu0 %10948 }
 0xe03   :  { %v10951_v8 = vunpack.i.h.bf16 %v10949_v36  ;;  %v10950_v4 = vunpack.i.l.bf16 %v10949_v36 }
 0xe05   :  { %v4206_v41 = vsel %vm4205_vm13, %v4197_v37, %v10950_v4  ;;  %v4207_v63 = vsel %vm4205_vm13, %v4198_v7, %v10951_v8 }
 0xe06   :  { %v4214_v47 = vpack.c.bf16 %v4207_v63, %v4206_v41  ;;  %v10959_v59 = vpop.permute.xlu0 %10958 }
 0xe07   :  { %v10961_v29 = vunpack.i.h.bf16 %v10959_v59  ;;  %v10960_v35 = vunpack.i.l.bf16 %v10959_v59 }
 0xe08   :  { %10426 = vmatprep.mubr.msk.bf16.mxu1 %vm242_vm8, %v4214_v47 }
 0xe09   :  { %v4193_v52 = vsel %vm581_vm10, %v12083_v38, %v10961_v29  ;;  %v4192_v30 = vsel %vm581_vm10, %v12087_v18, %v10960_v35 }
 0xe0a   :  { %v10969_v14 = vpop.permute.xlu0 %10968 }
 0xe0b   :  { %v10971_v39 = vunpack.i.h.bf16 %v10969_v14  ;;  %v10970_v10 = vunpack.i.l.bf16 %v10969_v14  ;;  %v14238_v14 = vld [vmem:[#allocation13_spill] sm:$0xff] }
 0xe0d   :  { %v10954_v12 = vpop.permute.xlu1 %10953  ;;  %v4201_v17 = vsel %vm4196_vm12, %v4192_v30, %v10970_v10  ;;  %v4202_v6 = vsel %vm4196_vm12, %v4193_v52, %v10971_v39  ;;  %v14240_v52 = vld [vmem:[#allocation14_spill] sm:$0xff] }
 0xe0e   :  { %v10956_v26 = vunpack.i.h.bf16 %v10954_v12  ;;  %v10955_v40 = vunpack.i.l.bf16 %v10954_v12 }
 0xe10   :  { %v4209_v55 = vsel %vm4205_vm13, %v4200_v48, %v10956_v26  ;;  %v4208_v32 = vsel %vm4205_vm13, %v4199_v20, %v10955_v40  ;;  %v14237_v40 = vld [vmem:[#allocation12_spill] sm:$0xff] }
 0xe11   :  { %v4215_v57 = vpack.c.bf16 %v4209_v55, %v4208_v32  ;;  %v10964_v43 = vpop.permute.xlu1 %10963 }
 0xe12   :  { %v10966_v23 = vunpack.i.h.bf16 %v10964_v43  ;;  %v10965_v27 = vunpack.i.l.bf16 %v10964_v43 }
 0xe13   :  { %10427 = vmatmul.mubr.msk.bf16.vlgmr.msra.gmra.mxu1 %vm242_vm8, %v4215_v57 }
 0xe14   :  { %v4195_v18 = vsel %vm581_vm10, %v12089_v42, %v10966_v23  ;;  %v4194_v50 = vsel %vm581_vm10, %v12096_v62, %v10965_v27  ;;  %v12724_v42 = vld [vmem:[%s14175_s10] sm:$0x3f] }
 0xe15   :  { %v10974_v1 = vpop.permute.xlu1 %10973  ;;  %v4225_v62 = vrot.slane %v12724_v42, %v11564_v16 }
 0xe16   :  { %v10976_v5 = vunpack.i.h.bf16 %v10974_v1  ;;  %v10975_v15 = vunpack.i.l.bf16 %v10974_v1 }
 0xe18   :  { %v4203_v45 = vsel %vm4196_vm12, %v4194_v50, %v10975_v15  ;;  %v4204_v8 = vsel %vm4196_vm12, %v4195_v18, %v10976_v5 }
 0xe43   :  { %v10979_v28 = vpop.permute.xlu0 %10978 }
 0xe44   :  { %v10981_v24 = vunpack.i.h.bf16 %v10979_v28  ;;  %v10980_v9 = vunpack.i.l.bf16 %v10979_v28 }
 0xe46   :  { %v4210_v13 = vsel %vm4205_vm13, %v4201_v17, %v10980_v9  ;;  %v4211_v19 = vsel %vm4205_vm13, %v4202_v6, %v10981_v24  ;;  %v14241_v24 = vld [vmem:[#allocation16_spill] sm:$0xff] }
 0xe47   :  { %v4216_v2 = vpack.c.bf16 %v4211_v19, %v4210_v13 }
 0xe49   :  { %10430 = vmatprep.mubr.msk.bf16.mxu1 %vm242_vm8, %v4216_v2 }
 0xe4b   :  { %v10984_v38 = vpop.permute.xlu1 %10983 }
 0xe4c   :  { %v10986_v36 = vunpack.i.h.bf16 %v10984_v38  ;;  %v10985_v11 = vunpack.i.l.bf16 %v10984_v38 }
 0xe4e   :  { %v4213_v4 = vsel %vm4205_vm13, %v4204_v8, %v10986_v36  ;;  %v4212_v37 = vsel %vm4205_vm13, %v4203_v45, %v10985_v11 }
 0xe4f   :  { %v4217_v7 = vpack.c.bf16 %v4213_v4, %v4212_v37 }
 0xe51   :  { %10431 = vmatmul.mubr.msk.bf16.gmra.mxu1 %vm242_vm8, %v4217_v7 }
 0xed3   :  { %v10428_v41 = vpop.f32.mrf.mxu1 }
 0xed4   :  { %v4293_v47 = vadd.f32 %v10428_v41, %v4225_v62 }
 0xed5   :  { %v4284_v63 = vpop.f32.mrf.mxu1 }
 0xed6   :  { %v4285_v49 = vadd.f32 %v4284_v63, %v4225_v62  ;;  %v4317_v33 = vadd.f32 %v4293_v47, %v11700_v0  ;;  %v11051_v47 = vld [vmem:[%s14181_s7 + $0x8] sm:$0xff]  }
 0xed7   :  { %v10429_v56 = vpop.f32.mrf.mxu1  ;;  %10434 = vmatprep.subr.bf16.mxu0 %v11051_v47 }
 0xed8   :  { %v4315_v25 = vadd.f32 %v4285_v49, %v11689_v53  ;;  %v4296_v12 = vadd.f32 %v10429_v56, %v4225_v62  ;;  %v4329_v48 = vsel %vm242_vm8, %v4317_v33, 0.0  ;;  %v11052_v49 = vld [vmem:[%s14181_s7] sm:$0xff]   ;;  %10435 = vmatpush3.bf16.msra.mxu0 %v11051_v47 }
 0xed9   :  { %v4287_v34 = vpop.f32.mrf.mxu1  ;;  %10436 = vmatprep.subr.bf16.mxu0 %v11052_v49 }
 0xeda   :  { %v4288_v51 = vadd.f32 %v4287_v34, %v4225_v62  ;;  %v4323_v3 = vsel %vm242_vm8, %v4315_v25, 0.0  ;;  %v4318_v20 = vadd.f32 %v4296_v12, %v14237_v40 }
 0xedb   :  { %4324 = vadd.xlane.f32.xlu0 %v4323_v3 }
 0xedc   :  { %v4316_v26 = vadd.f32 %v4288_v51, %v11691_v54  ;;  %v4332_v53 = vsel %vm242_vm8, %v4318_v20, 0.0  ;;  %v14239_v54 = vld [vmem:[#allocation15_spill] sm:$0xff]  ;;  %10437 = vmatpush3.bf16.msra.mxu0 %v11052_v49 }
 0xede   :  { %v4326_v16 = vsel %vm242_vm8, %v4316_v26, 0.0 }
 0xedf   :  { %4327 = vadd.xlane.f32.xlu1 %v4326_v16  ;;  %4330 = vadd.xlane.f32.xlu0 %v4329_v48 }
 0xee3   :  { %4333 = vadd.xlane.f32.xlu0 %v4332_v53 }
 0xf11   :  { %v10432_v55 = vpop.f32.mrf.mxu1 }
 0xf12   :  { %v4309_v32 = vadd.f32 %v10432_v55, %v4225_v62 }
 0xf13   :  { %v4300_v0 = vpop.f32.mrf.mxu1 }
 0xf14   :  { %v4301_v57 = vadd.f32 %v4300_v0, %v4225_v62  ;;  %v4321_v43 = vadd.f32 %v4309_v32, %v14239_v54 }
 0xf15   :  { %v10433_v59 = vpop.f32.mrf.mxu1 }
 0xf16   :  { %v4319_v29 = vadd.f32 %v4301_v57, %v14238_v14  ;;  %v4312_v39 = vadd.f32 %v10433_v59, %v4225_v62  ;;  %v4341_v17 = vsel %vm242_vm8, %v4321_v43, 0.0 }
 0xf17   :  { %v4303_v35 = vpop.f32.mrf.mxu1 }
 0xf18   :  { %v4304_v10 = vadd.f32 %v4303_v35, %v4225_v62  ;;  %v4335_v28 = vsel %vm242_vm8, %v4319_v29, 0.0  ;;  %v4322_v9 = vadd.f32 %v4312_v39, %v14241_v24 }
 0xf19   :  { %4336 = vadd.xlane.f32.xlu1 %v4335_v28 }
 0xf1a   :  { %v4320_v30 = vadd.f32 %v4304_v10, %v14240_v52  ;;  %v4344_v1 = vsel %vm242_vm8, %v4322_v9, 0.0 }
 0xf1c   :  { %v4338_v6 = vsel %vm242_vm8, %v4320_v30, 0.0 }
 0xf1d   :  { %4342 = vadd.xlane.f32.xlu1 %v4341_v17  ;;  %4339 = vadd.xlane.f32.xlu0 %v4338_v6 }
 0xf21   :  { %4345 = vadd.xlane.f32.xlu0 %v4344_v1 }
 0xf64   :  { %v4325_v13 = vpop.xlane.xlu0 %4324 }
 0xf65   :  { %v4347_v19 = vmul.f32 0.03125, %v4325_v13  ;;  %v14242_v13 = vld [vmem:[#allocation2_spill] sm:$0xff] }
 0xf67   :  { %v12744_v2 = vsub.f32 %v4315_v25, %v4347_v19  ;;  %v4430_v19 = vrot.slane %v12724_v42, %v14242_v13 }
 0xf68   :  { %v4328_v23 = vpop.xlane.xlu1 %4327  ;;  %v4331_v27 = vpop.xlane.xlu0 %4330 }
 0xf69   :  { %v4348_v5 = vmul.f32 0.03125, %v4328_v23  ;;  %v4349_v15 = vmul.f32 0.03125, %v4331_v27  ;;  %v4363_v38 = vmul.f32 %v12744_v2, %v12744_v2 }
 0xf6b   :  { %v12748_v18 = vsub.f32 %v4316_v26, %v4348_v5  ;;  %v12750_v50 = vsub.f32 %v4317_v33, %v4349_v15  ;;  %v4371_v36 = vsel %vm242_vm8, %v4363_v38, 0.0 }
 0xf6c   :  { %4372 = vadd.xlane.f32.xlu1 %v4371_v36  ;;  %v4334_v11 = vpop.xlane.xlu0 %4333 }
 0xf6d   :  { %v4350_v45 = vmul.f32 0.03125, %v4334_v11  ;;  %v4364_v8 = vmul.f32 %v12748_v18, %v12748_v18  ;;  %v4365_v4 = vmul.f32 %v12750_v50, %v12750_v50 }
 0xf6f   :  { %v12757_v37 = vsub.f32 %v4318_v20, %v4350_v45  ;;  %v4374_v7 = vsel %vm242_vm8, %v4364_v8, 0.0  ;;  %v4377_v62 = vsel %vm242_vm8, %v4365_v4, 0.0 }
 0xf70   :  { %4375 = vadd.xlane.f32.xlu0 %v4374_v7  ;;  %4378 = vadd.xlane.f32.xlu1 %v4377_v62  ;;  %v14243_v7 = vld [vmem:[#allocation5_spill] sm:$0xff] }
 0xf71   :  { %v4366_v41 = vmul.f32 %v12757_v37, %v12757_v37 }
 0xf73   :  { %v4380_v63 = vsel %vm242_vm8, %v4366_v41, 0.0 }
 0xf74   :  { %4381 = vadd.xlane.f32.xlu0 %v4380_v63 }
 0xfa2   :  { %v4337_v56 = vpop.xlane.xlu1 %4336 }
 0xfa3   :  { %v4351_v25 = vmul.f32 0.03125, %v4337_v56 }
 0xfa5   :  { %v12770_v34 = vsub.f32 %v4319_v29, %v4351_v25 }
 0xfa6   :  { %v4343_v33 = vpop.xlane.xlu1 %4342  ;;  %v4340_v12 = vpop.xlane.xlu0 %4339 }
 0xfa7   :  { %v4353_v51 = vmul.f32 0.03125, %v4343_v33  ;;  %v4352_v3 = vmul.f32 0.03125, %v4340_v12  ;;  %v4367_v26 = vmul.f32 %v12770_v34, %v12770_v34 }
 0xfa9   :  { %v12774_v40 = vsub.f32 %v4321_v43, %v4353_v51  ;;  %v12776_v20 = vsub.f32 %v4320_v30, %v4352_v3  ;;  %v4383_v16 = vsel %vm242_vm8, %v4367_v26, 0.0 }
 0xfaa   :  { %4384 = vadd.xlane.f32.xlu1 %v4383_v16  ;;  %v4346_v48 = vpop.xlane.xlu0 %4345 }
 0xfab   :  { %v4354_v53 = vmul.f32 0.03125, %v4346_v48  ;;  %v4369_v55 = vmul.f32 %v12774_v40, %v12774_v40  ;;  %v4368_v0 = vmul.f32 %v12776_v20, %v12776_v20 }
 0xfad   :  { %v12783_v32 = vsub.f32 %v4322_v9, %v4354_v53  ;;  %v4389_v57 = vsel %vm242_vm8, %v4369_v55, 0.0  ;;  %v4386_v59 = vsel %vm242_vm8, %v4368_v0, 0.0 }
 0xfae   :  { %4390 = vadd.xlane.f32.xlu1 %v4389_v57  ;;  %4387 = vadd.xlane.f32.xlu0 %v4386_v59 }
 0xfaf   :  { %v4370_v14 = vmul.f32 %v12783_v32, %v12783_v32 }
 0xfb1   :  { %v4392_v29 = vsel %vm242_vm8, %v4370_v14, 0.0 }
 0xfb2   :  { %4393 = vadd.xlane.f32.xlu0 %v4392_v29 }
 0xff5   :  { %v4373_v35 = vpop.xlane.xlu1 %4372 }
 0xff6   :  { %v4395_v54 = vmul.f32 0.03125, %v4373_v35 }
 0xff8   :  { %v4403_v43 = vadd.f32 1e-07, %v4395_v54 }
 0xff9   :  { %v4379_v39 = vpop.xlane.xlu1 %4378  ;;  %v4376_v10 = vpop.xlane.xlu0 %4375 }
 0xffa   :  { %11211 = vrsqrt.f32 %v4403_v43  ;;  %v4397_v28 = vmul.f32 0.03125, %v4379_v39  ;;  %v4396_v52 = vmul.f32 0.03125, %v4376_v10 }
 0xffc   :  { %v4405_v30 = vadd.f32 1e-07, %v4397_v28  ;;  %v4404_v24 = vadd.f32 1e-07, %v4396_v52 }
 0xffd   :  { %v4382_v9 = vpop.xlane.xlu0 %4381 }
 0xffe   :  { %11213 = vrsqrt.f32 %v4405_v30  ;;  %v4398_v17 = vmul.f32 0.03125, %v4382_v9  ;;  %v11053_v30 = vld [vmem:[%s14182_s9 + $0x18] sm:$0xff]   ;;  %v11055_v9 = vld [vmem:[%s14182_s9 + $0x8] sm:$0xff]  }
 0xfff   :  { %11215 = vrsqrt.f32 %v4404_v24  ;;  %10446 = vmatprep.subr.bf16.mxu1 %v11053_v30  ;;  %v11054_v24 = vld [vmem:[%s14182_s9 + $0x10] sm:$0xff]  }
0x1000   :  { %v4406_v6 = vadd.f32 1e-07, %v4398_v17  ;;  %10447 = vmatpush3.bf16.msra.mxu1 %v11053_v30  ;;  %v11056_v17 = vld [vmem:[%s14182_s9] sm:$0xff]  }
0x1001   :  { %10448 = vmatprep.subr.bf16.mxu1 %v11054_v24 }
0x1002   :  { %11217 = vrsqrt.f32 %v4406_v6  ;;  %v12852_v6 = vld [vmem:[%s14183_s8] ss:$0 sm:$0xff] }
0x1004   :  { %10449 = vmatpush3.bf16.msra.mxu1 %v11054_v24 }
0x1005   :  { %10450 = vmatprep.subr.bf16.mxu1 %v11055_v9 }
0x1007   :  { %v11212_v1 = vpop.eup %11211 }
0x1008   :  { %v4419_v23 = vmul.f32 %v11212_v1, %v12744_v2  ;;  %10451 = vmatpush3.bf16.msra.mxu1 %v11055_v9 }
0x1009   :  { %10452 = vmatprep.subr.bf16.mxu1 %v11056_v17 }
0x100a   :  { %v4431_v36 = vmul.f32 %v4430_v19, %v4419_v23 }
0x100b   :  { %v11214_v27 = vpop.eup %11213 }
0x100c   :  { %v11216_v5 = vpop.eup %11215  ;;  %v4421_v15 = vmul.f32 %v11214_v27, %v12750_v50  ;;  %v12797_v62 = vadd.f32 %v14243_v7, %v4431_v36  ;;  %10453 = vmatpush3.bf16.msra.mxu1 %v11056_v17 }
0x100d   :  { %v4420_v38 = vmul.f32 %v11216_v5, %v12748_v18  ;;  %10474 = vmatprep.subr.bf16.mxu1 %v14228_v22 }
0x100e   :  { %v4433_v8 = vmul.f32 %v4430_v19, %v4421_v15 }
0x100f   :  { %v11218_v11 = vpop.eup %11217  ;;  %v4432_v45 = vmul.f32 %v4430_v19, %v4420_v38 }
0x1010   :  { %v4422_v4 = vmul.f32 %v11218_v11, %v12757_v37  ;;  %v12805_v50 = vadd.f32 %v14243_v7, %v4433_v8 }
0x1011   :  { %v12800_v41 = vadd.f32 %v14243_v7, %v4432_v45 }
0x1012   :  { %v4434_v42 = vmul.f32 %v4430_v19, %v4422_v4 }
0x1013   :  { %v4451_v2 = vpack.c.bf16 %v12800_v41, %v12797_v62 }
0x1014   :  { %v12808_v18 = vadd.f32 %v14243_v7, %v4434_v42 }
0x1015   :  { %10438 = vmatprep.mubr.msk.bf16.mxu0 %vm242_vm8, %v4451_v2 }
0x1016   :  { %v4452_v37 = vpack.c.bf16 %v12808_v18, %v12805_v50 }
0x1018   :  { %10439 = vmatmul.mubr.msk.bf16.vlgmr.msra.gmra.mxu0 %vm242_vm8, %v4452_v37 }
0x1033   :  { %v4385_v63 = vpop.xlane.xlu1 %4384 }
0x1034   :  { %v4399_v47 = vmul.f32 0.03125, %v4385_v63 }
0x1036   :  { %v4407_v49 = vadd.f32 1e-07, %v4399_v47 }
0x1037   :  { %v4391_v56 = vpop.xlane.xlu1 %4390  ;;  %v4388_v25 = vpop.xlane.xlu0 %4387 }
0x1038   :  { %11219 = vrsqrt.f32 %v4407_v49  ;;  %v4401_v33 = vmul.f32 0.03125, %v4391_v56  ;;  %v4400_v12 = vmul.f32 0.03125, %v4388_v25 }
0x103a   :  { %v4409_v51 = vadd.f32 1e-07, %v4401_v33  ;;  %v4408_v3 = vadd.f32 1e-07, %v4400_v12 }
0x103b   :  { %v4394_v26 = vpop.xlane.xlu0 %4393 }
0x103c   :  { %11221 = vrsqrt.f32 %v4409_v51  ;;  %v4402_v16 = vmul.f32 0.03125, %v4394_v26 }
0x103d   :  { %11223 = vrsqrt.f32 %v4408_v3 }
0x103e   :  { %v4410_v48 = vadd.f32 1e-07, %v4402_v16 }
0x1040   :  { %11225 = vrsqrt.f32 %v4410_v48 }
0x1045   :  { %v11220_v53 = vpop.eup %11219 }
0x1046   :  { %v4423_v55 = vmul.f32 %v11220_v53, %v12770_v34 }
0x1048   :  { %v4435_v29 = vmul.f32 %v4430_v19, %v4423_v55 }
0x1049   :  { %v11222_v0 = vpop.eup %11221 }
0x104a   :  { %v11224_v57 = vpop.eup %11223  ;;  %v4425_v59 = vmul.f32 %v11222_v0, %v12774_v40  ;;  %v12819_v10 = vadd.f32 %v14243_v7, %v4435_v29 }
0x104b   :  { %v4424_v14 = vmul.f32 %v11224_v57, %v12776_v20 }
0x104c   :  { %v4437_v39 = vmul.f32 %v4430_v19, %v4425_v59 }
0x104d   :  { %v11226_v35 = vpop.eup %11225  ;;  %v4436_v54 = vmul.f32 %v4430_v19, %v4424_v14 }
0x104e   :  { %v4426_v43 = vmul.f32 %v11226_v35, %v12783_v32  ;;  %v12827_v40 = vadd.f32 %v14243_v7, %v4437_v39 }
0x104f   :  { %v12822_v28 = vadd.f32 %v14243_v7, %v4436_v54 }
0x1050   :  { %v4438_v52 = vmul.f32 %v4430_v19, %v4426_v43 }
0x1051   :  { %v4453_v34 = vpack.c.bf16 %v12822_v28, %v12819_v10 }
0x1052   :  { %v12830_v20 = vadd.f32 %v14243_v7, %v4438_v52 }
0x1053   :  { %10442 = vmatprep.mubr.msk.bf16.mxu0 %vm242_vm8, %v4453_v34 }
0x1054   :  { %v4454_v32 = vpack.c.bf16 %v12830_v20, %v12827_v40 }
0x1056   :  { %10443 = vmatmul.mubr.msk.bf16.gmra.mxu0 %vm242_vm8, %v4454_v32 }
0x10d8   :  { %v10440_v1 = vpop.f32.mrf.mxu0 }
0x10d9   :  { %v4533_v19 = vadd.f32 %v10440_v1, %v12852_v6 }
0x10da   :  { %v4524_v23 = vpop.f32.mrf.mxu0 }
0x10db   :  { %v4557_v27 = vmul.f32 %v4533_v19, %v4533_v19  ;;  %v4525_v5 = vadd.f32 %v12852_v6, %v4524_v23 }
0x10dc   :  { %v10441_v15 = vpop.f32.mrf.mxu0 }
0x10dd   :  { %v4565_v38 = vmul.f32 %v4557_v27, %v4533_v19  ;;  %v4555_v36 = vmul.f32 %v4525_v5, %v4525_v5  ;;  %v4536_v11 = vadd.f32 %v10441_v15, %v12852_v6 }
0x10de   :  { %v4527_v45 = vpop.f32.mrf.mxu0 }
0x10df   :  { %v4573_v8 = vmul.f32 0.044715, %v4565_v38  ;;  %v4563_v4 = vmul.f32 %v4555_v36, %v4525_v5  ;;  %v4558_v7 = vmul.f32 %v4536_v11, %v4536_v11  ;;  %v4528_v42 = vadd.f32 %v12852_v6, %v4527_v45 }
0x10e1   :  { %v4581_v2 = vadd.f32 %v4573_v8, %v4533_v19  ;;  %v4571_v37 = vmul.f32 0.044715, %v4563_v4  ;;  %v4566_v63 = vmul.f32 %v4558_v7, %v4536_v11  ;;  %v4556_v47 = vmul.f32 %v4528_v42, %v4528_v42 }
0x10e3   :  { %v4589_v49 = vmul.f32 0.7978846, %v4581_v2  ;;  %v4579_v56 = vadd.f32 %v4571_v37, %v4525_v5  ;;  %v4574_v25 = vmul.f32 0.044715, %v4566_v63  ;;  %v4564_v33 = vmul.f32 %v4556_v47, %v4528_v42 }
0x10e5   :  { %v4587_v12 = vmul.f32 0.7978846, %v4579_v56  ;;  %v4582_v51 = vadd.f32 %v4574_v25, %v4536_v11  ;;  %v4572_v3 = vmul.f32 0.044715, %v4564_v33  ;;  %11227 = vtanh.f32 %v4589_v49 }
0x10e7   :  { %11229 = vtanh.f32 %v4587_v12  ;;  %v4590_v26 = vmul.f32 0.7978846, %v4582_v51  ;;  %v4580_v16 = vadd.f32 %v4572_v3, %v4528_v42 }
0x10e9   :  { %11231 = vtanh.f32 %v4590_v26  ;;  %v4588_v48 = vmul.f32 0.7978846, %v4580_v16 }
0x10eb   :  { %11233 = vtanh.f32 %v4588_v48 }
0x10f2   :  { %v11228_v53 = vpop.eup %11227 }
0x10f3   :  { %v4605_v59 = vadd.f32 1.0, %v11228_v53 }
0x10f4   :  { %v11230_v55 = vpop.eup %11229 }
0x10f5   :  { %v4603_v0 = vadd.f32 1.0, %v11230_v55  ;;  %v4613_v39 = vmul.f32 0.5, %v4605_v59 }
0x10f6   :  { %v11232_v57 = vpop.eup %11231 }
0x10f7   :  { %v4606_v14 = vadd.f32 1.0, %v11232_v57  ;;  %v4611_v35 = vmul.f32 0.5, %v4603_v0  ;;  %v4621_v24 = vmul.f32 %v4613_v39, %v4533_v19 }
0x10f8   :  { %v11234_v29 = vpop.eup %11233 }
0x10f9   :  { %v4614_v54 = vmul.f32 0.5, %v4606_v14  ;;  %v4604_v43 = vadd.f32 1.0, %v11234_v29  ;;  %v4619_v32 = vmul.f32 %v4611_v35, %v4525_v5 }
0x10fb   :  { %v4612_v52 = vmul.f32 0.5, %v4604_v43  ;;  %v4622_v34 = vmul.f32 %v4614_v54, %v4536_v11 }
0x10fd   :  { %v4620_v30 = vmul.f32 %v4612_v52, %v4528_v42  ;;  %v4628_v17 = vpack.c.bf16 %v4622_v34, %v4621_v24 }
0x10ff   :  { %v4627_v9 = vpack.c.bf16 %v4620_v30, %v4619_v32 }
0x1101   :  { %10454 = vmatprep.mubr.msk.bf16.mxu1 %vm4667_vm14, %v4627_v9 }
0x1102   :  { %10455 = vmatmul.mubr.msk.bf16.vlgmr.msra.gmra.mxu1 %vm4667_vm14, %v4628_v17 }
0x1116   :  { %v10444_v1 = vpop.f32.mrf.mxu0 }
0x1117   :  { %v4549_v23 = vadd.f32 %v10444_v1, %v12852_v6 }
0x1118   :  { %v4540_v27 = vpop.f32.mrf.mxu0 }
0x1119   :  { %v4561_v15 = vmul.f32 %v4549_v23, %v4549_v23  ;;  %v4541_v38 = vadd.f32 %v12852_v6, %v4540_v27  ;;  %v14244_v27 = vld [vmem:[#allocation10_spill] sm:$0xff] }
0x111a   :  { %v10445_v36 = vpop.f32.mrf.mxu0 }
0x111b   :  { %v4569_v45 = vmul.f32 %v4561_v15, %v4549_v23  ;;  %v4559_v11 = vmul.f32 %v4541_v38, %v4541_v38  ;;  %v4552_v5 = vadd.f32 %v10445_v36, %v12852_v6 }
0x111c   :  { %v4543_v19 = vpop.f32.mrf.mxu0 }
0x111d   :  { %v4577_v8 = vmul.f32 0.044715, %v4569_v45  ;;  %v4567_v4 = vmul.f32 %v4559_v11, %v4541_v38  ;;  %v4562_v7 = vmul.f32 %v4552_v5, %v4552_v5  ;;  %v4544_v42 = vadd.f32 %v12852_v6, %v4543_v19 }
0x111f   :  { %v4585_v2 = vadd.f32 %v4577_v8, %v4549_v23  ;;  %v4575_v37 = vmul.f32 0.044715, %v4567_v4  ;;  %v4570_v63 = vmul.f32 %v4562_v7, %v4552_v5  ;;  %v4560_v47 = vmul.f32 %v4544_v42, %v4544_v42 }
0x1121   :  { %v4593_v49 = vmul.f32 0.7978846, %v4585_v2  ;;  %v4583_v56 = vadd.f32 %v4575_v37, %v4541_v38  ;;  %v4578_v25 = vmul.f32 0.044715, %v4570_v63  ;;  %v4568_v33 = vmul.f32 %v4560_v47, %v4544_v42 }
0x1123   :  { %v4591_v12 = vmul.f32 0.7978846, %v4583_v56  ;;  %v4586_v51 = vadd.f32 %v4578_v25, %v4552_v5  ;;  %v4576_v3 = vmul.f32 0.044715, %v4568_v33  ;;  %11235 = vtanh.f32 %v4593_v49 }
0x1125   :  { %11237 = vtanh.f32 %v4591_v12  ;;  %v4594_v26 = vmul.f32 0.7978846, %v4586_v51  ;;  %v4584_v16 = vadd.f32 %v4576_v3, %v4544_v42 }
0x1127   :  { %11239 = vtanh.f32 %v4594_v26  ;;  %v4592_v48 = vmul.f32 0.7978846, %v4584_v16 }
0x1129   :  { %11241 = vtanh.f32 %v4592_v48 }
0x1130   :  { %v11236_v53 = vpop.eup %11235 }
0x1131   :  { %v4609_v57 = vadd.f32 1.0, %v11236_v53 }
0x1132   :  { %v11238_v6 = vpop.eup %11237 }
0x1133   :  { %v4607_v55 = vadd.f32 1.0, %v11238_v6  ;;  %v4617_v43 = vmul.f32 0.5, %v4609_v57 }
0x1134   :  { %v11240_v0 = vpop.eup %11239 }
0x1135   :  { %v4610_v59 = vadd.f32 1.0, %v11240_v0  ;;  %v4615_v29 = vmul.f32 0.5, %v4607_v55  ;;  %v4625_v30 = vmul.f32 %v4617_v43, %v4549_v23 }
0x1136   :  { %v11242_v14 = vpop.eup %11241 }
0x1137   :  { %v4618_v35 = vmul.f32 0.5, %v4610_v59  ;;  %v4608_v54 = vadd.f32 1.0, %v11242_v14  ;;  %v4623_v34 = vmul.f32 %v4615_v29, %v4541_v38 }
0x1139   :  { %v4616_v39 = vmul.f32 0.5, %v4608_v54  ;;  %v4626_v52 = vmul.f32 %v4618_v35, %v4552_v5 }
0x113b   :  { %v4624_v32 = vmul.f32 %v4616_v39, %v4544_v42  ;;  %v4630_v9 = vpack.c.bf16 %v4626_v52, %v4625_v30 }
0x113d   :  { %v4629_v24 = vpack.c.bf16 %v4624_v32, %v4623_v34 }
0x113f   :  { %10458 = vmatprep.mubr.msk.bf16.mxu1 %vm4667_vm14, %v4629_v24  ;;  %v11057_v24 = vld [vmem:[%s14176_s4 + $0x18] sm:$0xff]  }
0x1140   :  { %10459 = vmatmul.mubr.msk.bf16.gmra.mxu1 %vm4667_vm14, %v4630_v9  ;;  %10462 = vmatprep.subr.bf16.mxu0 %v11057_v24  ;;  %v11058_v9 = vld [vmem:[%s14176_s4 + $0x10] sm:$0xff]  }
0x1141   :  { %10476 = vmatprep.mubr.msk.bf16.mxu1 %vm11443_vm9, %v14228_v22  ;;  %10463 = vmatpush3.bf16.msra.mxu0 %v11057_v24 }
0x1142   :  { %10464 = vmatprep.subr.bf16.mxu0 %v11058_v9 }
0x1145   :  { %10465 = vmatpush3.bf16.msra.mxu0 %v11058_v9 }
0x1146   :  { %10480 = vmatprep.subr.bf16.mxu0 %v14228_v22 }
0x11c2   :  { %v10456_v17 = vpop.f32.mrf.mxu1 }
0x11c3   :  { %v4723_v15 = vadd.f32 %v10456_v17, %v14244_v27 }
0x11c4   :  { %v4714_v1 = vpop.f32.mrf.mxu1 }
0x11c5   :  { %v4715_v36 = vadd.f32 %v4714_v1, %v14244_v27  ;;  %v4747_v23 = vadd.f32 %v4723_v15, %v12805_v50 }
0x11c6   :  { %v10457_v45 = vpop.f32.mrf.mxu1 }
0x11c7   :  { %v4745_v38 = vadd.f32 %v4715_v36, %v12797_v62  ;;  %v4726_v5 = vadd.f32 %v10457_v45, %v14244_v27  ;;  %v4759_v2 = vsel %vm242_vm8, %v4747_v23, 0.0 }
0x11c8   :  { %v4717_v11 = vpop.f32.mrf.mxu1 }
0x11c9   :  { %v4718_v19 = vadd.f32 %v4717_v11, %v14244_v27  ;;  %v4753_v8 = vsel %vm242_vm8, %v4745_v38, 0.0  ;;  %v4748_v7 = vadd.f32 %v4726_v5, %v12808_v18 }
0x11ca   :  { %4754 = vadd.xlane.f32.xlu1 %v4753_v8 }
0x11cb   :  { %v4746_v4 = vadd.f32 %v4718_v19, %v12800_v41  ;;  %v4762_v62 = vsel %vm242_vm8, %v4748_v7, 0.0 }
0x11cd   :  { %v4756_v42 = vsel %vm242_vm8, %v4746_v4, 0.0 }
0x11ce   :  { %4757 = vadd.xlane.f32.xlu0 %v4756_v42  ;;  %4760 = vadd.xlane.f32.xlu1 %v4759_v2 }
0x11d2   :  { %4763 = vadd.xlane.f32.xlu0 %v4762_v62 }
0x1200   :  { %v10460_v50 = vpop.f32.mrf.mxu1 }
0x1201   :  { %v4739_v63 = vadd.f32 %v10460_v50, %v14244_v27 }
0x1202   :  { %v4730_v37 = vpop.f32.mrf.mxu1 }
0x1203   :  { %v4731_v47 = vadd.f32 %v4730_v37, %v14244_v27  ;;  %v4751_v18 = vadd.f32 %v4739_v63, %v12827_v40 }
0x1204   :  { %v10461_v49 = vpop.f32.mrf.mxu1 }
0x1205   :  { %v4749_v41 = vadd.f32 %v4731_v47, %v12819_v10  ;;  %v4742_v25 = vadd.f32 %v10461_v49, %v14244_v27  ;;  %v4771_v16 = vsel %vm242_vm8, %v4751_v18, 0.0 }
0x1206   :  { %v4733_v56 = vpop.f32.mrf.mxu1 }
0x1207   :  { %v4734_v33 = vadd.f32 %v4733_v56, %v14244_v27  ;;  %v4765_v12 = vsel %vm242_vm8, %v4749_v41, 0.0  ;;  %v4752_v3 = vadd.f32 %v4742_v25, %v12830_v20 }
0x1208   :  { %4766 = vadd.xlane.f32.xlu1 %v4765_v12 }
0x1209   :  { %v4750_v51 = vadd.f32 %v4734_v33, %v12822_v28  ;;  %v4774_v10 = vsel %vm242_vm8, %v4752_v3, 0.0 }
0x120b   :  { %v4768_v26 = vsel %vm242_vm8, %v4750_v51, 0.0 }
0x120c   :  { %4769 = vadd.xlane.f32.xlu0 %v4768_v26  ;;  %4772 = vadd.xlane.f32.xlu1 %v4771_v16 }
0x1210   :  { %4775 = vadd.xlane.f32.xlu0 %v4774_v10 }
0x1253   :  { %v4755_v40 = vpop.xlane.xlu1 %4754 }
0x1254   :  { %v4777_v48 = vmul.f32 0.03125, %v4755_v40 }
0x1256   :  { %v12892_v53 = vsub.f32 %v4745_v38, %v4777_v48 }
0x1257   :  { %v4761_v6 = vpop.xlane.xlu1 %4760  ;;  %v4758_v55 = vpop.xlane.xlu0 %4757 }
0x1258   :  { %v4779_v0 = vmul.f32 0.03125, %v4761_v6  ;;  %v4778_v57 = vmul.f32 0.03125, %v4758_v55  ;;  %v4793_v28 = vmul.f32 %v12892_v53, %v12892_v53 }
0x125a   :  { %v12896_v20 = vsub.f32 %v4747_v23, %v4779_v0  ;;  %v12898_v59 = vsub.f32 %v4746_v4, %v4778_v57  ;;  %v4801_v14 = vsel %vm242_vm8, %v4793_v28, 0.0  ;;  %v14245_v57 = vld [vmem:[#allocation3_spill] sm:$0xff] }
0x125b   :  { %4802 = vadd.xlane.f32.xlu1 %v4801_v14  ;;  %v4764_v29 = vpop.xlane.xlu0 %4763 }
0x125c   :  { %v4780_v35 = vmul.f32 0.03125, %v4764_v29  ;;  %v4795_v54 = vmul.f32 %v12896_v20, %v12896_v20  ;;  %v4794_v43 = vmul.f32 %v12898_v59, %v12898_v59 }
0x125e   :  { %v12905_v39 = vsub.f32 %v4748_v7, %v4780_v35  ;;  %v4807_v52 = vsel %vm242_vm8, %v4795_v54, 0.0  ;;  %v4804_v34 = vsel %vm242_vm8, %v4794_v43, 0.0  ;;  %v14246_v43 = vld [vmem:[#allocation7_spill] sm:$0xff] }
0x125f   :  { %4808 = vadd.xlane.f32.xlu1 %v4807_v52  ;;  %4805 = vadd.xlane.f32.xlu0 %v4804_v34 }
0x1260   :  { %v4796_v32 = vmul.f32 %v12905_v39, %v12905_v39 }
0x1262   :  { %v4810_v30 = vsel %vm242_vm8, %v4796_v32, 0.0 }
0x1263   :  { %4811 = vadd.xlane.f32.xlu0 %v4810_v30 }
0x1291   :  { %v4767_v17 = vpop.xlane.xlu1 %4766 }
0x1292   :  { %v4781_v1 = vmul.f32 0.03125, %v4767_v17 }
0x1294   :  { %v12919_v27 = vsub.f32 %v4749_v41, %v4781_v1 }
0x1295   :  { %v4773_v15 = vpop.xlane.xlu1 %4772  ;;  %v4770_v36 = vpop.xlane.xlu0 %4769 }
0x1296   :  { %v4783_v45 = vmul.f32 0.03125, %v4773_v15  ;;  %v4782_v38 = vmul.f32 0.03125, %v4770_v36  ;;  %v4797_v11 = vmul.f32 %v12919_v27, %v12919_v27 }
0x1298   :  { %v12923_v23 = vsub.f32 %v4751_v18, %v4783_v45  ;;  %v12925_v5 = vsub.f32 %v4750_v51, %v4782_v38  ;;  %v4813_v19 = vsel %vm242_vm8, %v4797_v11, 0.0 }
0x1299   :  { %4814 = vadd.xlane.f32.xlu1 %v4813_v19  ;;  %v4776_v8 = vpop.xlane.xlu0 %4775 }
0x129a   :  { %v4784_v4 = vmul.f32 0.03125, %v4776_v8  ;;  %v4799_v7 = vmul.f32 %v12923_v23, %v12923_v23  ;;  %v4798_v42 = vmul.f32 %v12925_v5, %v12925_v5 }
0x129c   :  { %v12932_v2 = vsub.f32 %v4752_v3, %v4784_v4  ;;  %v4819_v62 = vsel %vm242_vm8, %v4799_v7, 0.0  ;;  %v4816_v50 = vsel %vm242_vm8, %v4798_v42, 0.0 }
0x129d   :  { %4820 = vadd.xlane.f32.xlu1 %v4819_v62  ;;  %4817 = vadd.xlane.f32.xlu0 %v4816_v50 }
0x129e   :  { %v4800_v37 = vmul.f32 %v12932_v2, %v12932_v2 }
0x12a0   :  { %v4822_v63 = vsel %vm242_vm8, %v4800_v37, 0.0 }
0x12a1   :  { %4823 = vadd.xlane.f32.xlu0 %v4822_v63 }
0x12e4   :  { %v4803_v47 = vpop.xlane.xlu1 %4802 }
0x12e5   :  { %v4825_v49 = vmul.f32 0.03125, %v4803_v47 }
0x12e7   :  { %v4833_v41 = vadd.f32 1e-07, %v4825_v49 }
0x12e8   :  { %v4809_v56 = vpop.xlane.xlu1 %4808  ;;  %v4806_v18 = vpop.xlane.xlu0 %4805 }
0x12e9   :  { %11243 = vrsqrt.f32 %v4833_v41  ;;  %v4827_v25 = vmul.f32 0.03125, %v4809_v56  ;;  %v4826_v33 = vmul.f32 0.03125, %v4806_v18 }
0x12eb   :  { %v4835_v12 = vadd.f32 1e-07, %v4827_v25  ;;  %v4834_v51 = vadd.f32 1e-07, %v4826_v33 }
0x12ec   :  { %v4812_v3 = vpop.xlane.xlu0 %4811 }
0x12ed   :  { %11245 = vrsqrt.f32 %v4835_v12  ;;  %v4828_v26 = vmul.f32 0.03125, %v4812_v3 }
0x12ee   :  { %11247 = vrsqrt.f32 %v4834_v51  ;;  %v9534_v51 = vld [vmem:[%s14178_s5 + $0x1] ss:$0 sm:$0xff] }
0x12ef   :  { %v4836_v16 = vadd.f32 1e-07, %v4828_v26 }
0x12f1   :  { %11249 = vrsqrt.f32 %v4836_v16 }
0x12f6   :  { %v11244_v10 = vpop.eup %11243 }
0x12f7   :  { %v4849_v40 = vmul.f32 %v11244_v10, %v12892_v53 }
0x12f9   :  { %v4861_v28 = vmul.f32 %v14245_v57, %v4849_v40 }
0x12fa   :  { %v11246_v48 = vpop.eup %11245 }
0x12fb   :  { %v11248_v6 = vpop.eup %11247  ;;  %v4851_v55 = vmul.f32 %v11246_v48, %v12896_v20  ;;  %v12947_v52 = vadd.f32 %v14246_v43, %v4861_v28 }
0x12fc   :  { %v4850_v0 = vmul.f32 %v11248_v6, %v12898_v59 }
0x12fd   :  { %v4863_v35 = vmul.f32 %v14245_v57, %v4851_v55 }
0x12fe   :  { %v11250_v14 = vpop.eup %11249  ;;  %v4862_v29 = vmul.f32 %v14245_v57, %v4850_v0 }
0x12ff   :  { %v4852_v54 = vmul.f32 %v11250_v14, %v12905_v39  ;;  %v12956_v59 = vadd.f32 %v14246_v43, %v4863_v35 }
0x1300   :  { %v12950_v53 = vadd.f32 %v14246_v43, %v4862_v29 }
0x1301   :  { %v4864_v34 = vmul.f32 %v14245_v57, %v4852_v54 }
0x1302   :  { %v4883_v20 = vpack.c.bf16 %v12950_v53, %v12947_v52 }
0x1303   :  { %v12959_v32 = vadd.f32 %v14246_v43, %v4864_v34 }
0x1304   :  { %10466 = vmatprep.mubr.msk.bf16.mxu0 %vm242_vm8, %v4883_v20 }
0x1305   :  { %v4884_v39 = vpack.c.bf16 %v12959_v32, %v12956_v59 }
0x1307   :  { %10467 = vmatmul.mubr.msk.bf16.vlgmr.msra.gmra.mxu0 %vm242_vm8, %v4884_v39 }
0x1322   :  { %v4815_v30 = vpop.xlane.xlu1 %4814 }
0x1323   :  { %v4829_v24 = vmul.f32 0.03125, %v4815_v30 }
0x1325   :  { %v4837_v9 = vadd.f32 1e-07, %v4829_v24 }
0x1326   :  { %v4821_v17 = vpop.xlane.xlu1 %4820  ;;  %v4818_v1 = vpop.xlane.xlu0 %4817 }
0x1327   :  { %11251 = vrsqrt.f32 %v4837_v9  ;;  %v4831_v15 = vmul.f32 0.03125, %v4821_v17  ;;  %v4830_v36 = vmul.f32 0.03125, %v4818_v1 }
0x1329   :  { %v4839_v45 = vadd.f32 1e-07, %v4831_v15  ;;  %v4838_v38 = vadd.f32 1e-07, %v4830_v36 }
0x132a   :  { %v4824_v11 = vpop.xlane.xlu0 %4823 }
0x132b   :  { %11253 = vrsqrt.f32 %v4839_v45  ;;  %v4832_v19 = vmul.f32 0.03125, %v4824_v11 }
0x132c   :  { %11255 = vrsqrt.f32 %v4838_v38 }
0x132d   :  { %v4840_v8 = vadd.f32 1e-07, %v4832_v19 }
0x132f   :  { %11257 = vrsqrt.f32 %v4840_v8 }
0x1334   :  { %v11252_v4 = vpop.eup %11251 }
0x1335   :  { %v4853_v7 = vmul.f32 %v11252_v4, %v12919_v27 }
0x1337   :  { %v4865_v63 = vmul.f32 %v14245_v57, %v4853_v7 }
0x1338   :  { %v11254_v42 = vpop.eup %11253 }
0x1339   :  { %v11256_v62 = vpop.eup %11255  ;;  %v4855_v50 = vmul.f32 %v11254_v42, %v12923_v23  ;;  %v12973_v18 = vadd.f32 %v14246_v43, %v4865_v63 }
0x133a   :  { %v4854_v37 = vmul.f32 %v11256_v62, %v12925_v5 }
0x133b   :  { %v4867_v56 = vmul.f32 %v14245_v57, %v4855_v50 }
0x133c   :  { %v11258_v47 = vpop.eup %11257  ;;  %v4866_v49 = vmul.f32 %v14245_v57, %v4854_v37 }
0x133d   :  { %v4856_v41 = vmul.f32 %v11258_v47, %v12932_v2  ;;  %v12982_v5 = vadd.f32 %v14246_v43, %v4867_v56 }
0x133e   :  { %v12976_v27 = vadd.f32 %v14246_v43, %v4866_v49 }
0x133f   :  { %v4868_v25 = vmul.f32 %v14245_v57, %v4856_v41  ;;  %14248 = vst [vmem:[#allocation13_spill] sm:$0xff] %v12982_v5 }
0x1340   :  { %14247 = vst [vmem:[#allocation12_spill] sm:$0xff] %v12976_v27  ;;  %v4885_v23 = vpack.c.bf16 %v12976_v27, %v12973_v18 }
0x1341   :  { %v12985_v33 = vadd.f32 %v14246_v43, %v4868_v25 }
0x1342   :  { %10470 = vmatprep.mubr.msk.bf16.mxu0 %vm242_vm8, %v4885_v23 }
0x1343   :  { %14249 = vst [vmem:[#allocation15_spill] sm:$0xff] %v12985_v33  ;;  %v4886_v2 = vpack.c.bf16 %v12985_v33, %v12982_v5 }
0x1345   :  { %10471 = vmatmul.mubr.msk.bf16.gmra.mxu0 %vm242_vm8, %v4886_v2 }
0x1346   :  { %10482 = vmatprep.mubr.msk.bf16.mxu0 %vm11443_vm9, %v14228_v22 }
0x13c7   :  { %v10468_v12 = vpop.f32.mrf.mxu0 }
0x13c8   :  { %v4967_v10 = vadd.f32 %v10468_v12, %v9534_v51 }
0x13c9   :  { %v4958_v3 = vpop.f32.mrf.mxu0 }
0x13ca   :  { %v4959_v26 = vadd.f32 %v9534_v51, %v4958_v3  ;;  %v13000_v55 = vpack.c.bf16 %v4967_v10, %v4967_v10 }
0x13cb   :  { %v10469_v16 = vpop.f32.mrf.mxu0 }
0x13cc   :  { %v12996_v40 = vpack.c.bf16 %v4959_v26, %v4959_v26  ;;  %v4970_v0 = vadd.f32 %v10469_v16, %v9534_v51 }
0x13cd   :  { %v4961_v48 = vpop.f32.mrf.mxu0 }
0x13ce   :  { %v4962_v6 = vadd.f32 %v9534_v51, %v4961_v48  ;;  %4998 = vrot.lane.b32.xlu1 %v12996_v40, %s11444_s16  ;;  %v13008_v28 = vpack.c.bf16 %v4970_v0, %v4970_v0 }
0x13d0   :  { %v13002_v57 = vpack.c.bf16 %v4962_v6, %v4962_v6 }
0x13d2   :  { %5047 = vrot.lane.b32.xlu0 %v13002_v57, %s11444_s16  ;;  %5096 = vrot.lane.b32.xlu1 %v13000_v55, %s11444_s16 }
0x13d6   :  { %5145 = vrot.lane.b32.xlu1 %v13008_v28, %s11444_s16 }
0x1405   :  { %v10472_v14 = vpop.f32.mrf.mxu0 }
0x1406   :  { %v4983_v43 = vadd.f32 %v10472_v14, %v9534_v51 }
0x1407   :  { %v4974_v29 = vpop.f32.mrf.mxu0 }
0x1408   :  { %v4975_v35 = vadd.f32 %v9534_v51, %v4974_v29  ;;  %v13016_v30 = vpack.c.bf16 %v4983_v43, %v4983_v43 }
0x1409   :  { %v10473_v54 = vpop.f32.mrf.mxu0 }
0x140a   :  { %v13012_v34 = vpack.c.bf16 %v4975_v35, %v4975_v35  ;;  %v4986_v24 = vadd.f32 %v10473_v54, %v9534_v51 }
0x140b   :  { %v4977_v20 = vpop.f32.mrf.mxu0 }
0x140c   :  { %v4978_v39 = vadd.f32 %v9534_v51, %v4977_v20  ;;  %5194 = vrot.lane.b32.xlu0 %v13012_v34, %s11444_s16  ;;  %v13024_v17 = vpack.c.bf16 %v4986_v24, %v4986_v24 }
0x140e   :  { %v13018_v9 = vpack.c.bf16 %v4978_v39, %v4978_v39 }
0x1410   :  { %5243 = vrot.lane.b32.xlu1 %v13018_v9, %s11444_s16  ;;  %5292 = vrot.lane.b32.xlu0 %v13016_v30, %s11444_s16 }
0x1414   :  { %5341 = vrot.lane.b32.xlu1 %v13024_v17, %s11444_s16  ;;  %5533 = vrot.lane.b32.xlu0 %v13002_v57, %s11445_s17 }
0x1418   :  { %5485 = vrot.lane.b32.xlu1 %v12996_v40, %s11445_s17 }
0x141c   :  { %5581 = vrot.lane.b32.xlu1 %v13000_v55, %s11445_s17 }
0x1420   :  { %5629 = vrot.lane.b32.xlu1 %v13008_v28, %s11445_s17 }
0x1440   :  { %v4999_v1 = vpop.permute.xlu1 %4998 }
0x1441   :  { %v5004_v15 = vsel %vm581_vm10, %v4999_v1, 0 }
0x1442   :  { %10475 = vmatpush3.bf16.xpose.msra.mxu1 %v5004_v15 }
0x1443   :  { %10486 = vmatprep.subr.bf16.mxu1 %v14228_v22 }
0x1444   :  { %v5097_v36 = vpop.permute.xlu1 %5096  ;;  %v5048_v45 = vpop.permute.xlu0 %5047 }
0x1445   :  { %v5053_v38 = vsel %vm581_vm10, %v5048_v45, 0  ;;  %v5102_v11 = vsel %vm581_vm10, %v5097_v36, 0 }
0x1446   :  { %10481 = vmatpush3.bf16.xpose.msra.mxu0 %v5053_v38 }
0x1447   :  { %10492 = vmatprep.subr.bf16.mxu0 %v14228_v22 }
0x1448   :  { %v5146_v19 = vpop.permute.xlu1 %5145 }
0x1449   :  { %10477 = vmatmul.mubr.msk.bf16.vlgmr.msra.gmra.mxu1 %vm581_vm10, %v12996_v40  ;;  %v5151_v8 = vsel %vm581_vm10, %v5146_v19, 0 }
0x144a   :  { %10487 = vmatpush3.bf16.xpose.msra.mxu1 %v5102_v11  ;;  %10488 = vmatprep.mubr.msk.bf16.mxu1 %vm11443_vm9, %v14228_v22 }
0x144b   :  { %10498 = vmatprep.subr.bf16.mxu1 %v14228_v22 }
0x144d   :  { %10483 = vmatmul.mubr.msk.bf16.vlgmr.msra.gmra.mxu0 %vm581_vm10, %v13002_v57 }
0x144e   :  { %10493 = vmatpush3.bf16.xpose.msra.mxu0 %v5151_v8  ;;  %10494 = vmatprep.mubr.msk.bf16.mxu0 %vm11443_vm9, %v14228_v22 }
0x144f   :  { %10504 = vmatprep.subr.bf16.mxu0 %v14228_v22 }
0x1451   :  { %10489 = vmatmul.mubr.msk.bf16.vlgmr.msra.gmra.mxu1 %vm581_vm10, %v13000_v55 }
0x1452   :  { %10500 = vmatprep.mubr.msk.bf16.mxu1 %vm11443_vm9, %v14228_v22 }
0x1455   :  { %10495 = vmatmul.mubr.msk.bf16.vlgmr.msra.gmra.mxu0 %vm581_vm10, %v13008_v28 }
0x1456   :  { %10506 = vmatprep.mubr.msk.bf16.mxu0 %vm11443_vm9, %v14228_v22 }
0x147e   :  { %v5195_v4 = vpop.permute.xlu0 %5194 }
0x147f   :  { %v5200_v7 = vsel %vm581_vm10, %v5195_v4, 0 }
0x1480   :  { %10499 = vmatpush3.bf16.xpose.msra.mxu1 %v5200_v7 }
0x1481   :  { %10510 = vmatprep.subr.bf16.mxu1 %v14228_v22 }
0x1482   :  { %v5244_v42 = vpop.permute.xlu1 %5243  ;;  %v5293_v50 = vpop.permute.xlu0 %5292 }
0x1483   :  { %v5249_v62 = vsel %vm581_vm10, %v5244_v42, 0  ;;  %v5298_v63 = vsel %vm581_vm10, %v5293_v50, 0 }
0x1484   :  { %10505 = vmatpush3.bf16.xpose.msra.mxu0 %v5249_v62  ;;  %v14250_v62 = vld [vmem:[#allocation17_spill] sm:$0xff] }
0x1485   :  { %10516 = vmatprep.subr.bf16.mxu0 %v14228_v22 }
0x1486   :  { %v5342_v37 = vpop.permute.xlu1 %5341  ;;  %v5534_v56 = vpop.permute.xlu0 %5533 }
0x1487   :  { %10501 = vmatmul.mubr.msk.bf16.vlgmr.msra.gmra.mxu1 %vm581_vm10, %v13012_v34  ;;  %v5347_v47 = vsel %vm581_vm10, %v5342_v37, 0  ;;  %v5539_v25 = vsel %vm1072_vm11, %v5534_v56, 0 }
0x1488   :  { %10511 = vmatpush3.bf16.xpose.msra.mxu1 %v5298_v63  ;;  %10512 = vmatprep.mubr.msk.bf16.mxu1 %vm11443_vm9, %v14228_v22 }
0x1489   :  { %10522 = vmatprep.subr.bf16.mxu1 %v14228_v22 }
0x148a   :  { %v5486_v49 = vpop.permute.xlu1 %5485 }
0x148b   :  { %10507 = vmatmul.mubr.msk.bf16.vlgmr.msra.gmra.mxu0 %vm581_vm10, %v13018_v9  ;;  %v5491_v41 = vsel %vm1072_vm11, %v5486_v49, 0 }
0x148c   :  { %10517 = vmatpush3.bf16.xpose.msra.mxu0 %v5347_v47  ;;  %10518 = vmatprep.mubr.msk.bf16.mxu0 %vm11443_vm9, %v14228_v22 }
0x148d   :  { %10528 = vmatprep.subr.bf16.mxu0 %v14228_v22 }
0x148f   :  { %10513 = vmatmul.mubr.msk.bf16.vlgmr.msra.gmra.mxu1 %vm581_vm10, %v13016_v30 }
0x1490   :  { %10523 = vmatpush3.bf16.msra.mxu1 %v5491_v41  ;;  %10524 = vmatprep.mubr.msk.bf16.mxu1 %vm11443_vm9, %v14228_v22 }
0x1491   :  { %10534 = vmatprep.subr.bf16.mxu1 %v14228_v22 }
0x1493   :  { %10519 = vmatmul.mubr.msk.bf16.vlgmr.msra.gmra.mxu0 %vm581_vm10, %v13024_v17 }
0x1494   :  { %10529 = vmatpush3.bf16.msra.mxu0 %v5539_v25  ;;  %10530 = vmatprep.mubr.msk.bf16.mxu0 %vm11443_vm9, %v14228_v22 }
0x1495   :  { %10540 = vmatprep.subr.bf16.mxu0 %v14228_v22 }
0x1509   :  { %v5040_v23 = vpop.f32.mrf.mxu1 }
0x150a   :  { %v5041_v2 = vadd.f32 %v5040_v23, %v11833_v44 }
0x150b   :  { %v10478_v12 = vpop.f32.mrf.mxu1 }
0x150c   :  { %v5389_v51 = vsel %vm581_vm10, %v5041_v2, -inf }
0x150d   :  { %v5043_v3 = vpop.f32.mrf.mxu1  ;;  %5390 = vmax.xlane.f32.xlu0 %v5389_v51  ;;  %v5089_v26 = vpop.f32.mrf.mxu0 }
0x150e   :  { %v5090_v16 = vadd.f32 %v5089_v26, %v11843_v60 }
0x150f   :  { %v10479_v10 = vpop.f32.mrf.mxu1  ;;  %v10484_v48 = vpop.f32.mrf.mxu0 }
0x1510   :  { %v5392_v6 = vsel %vm581_vm10, %v5090_v16, -inf }
0x1511   :  { %v5138_v0 = vpop.f32.mrf.mxu1  ;;  %5393 = vmax.xlane.f32.xlu1 %v5392_v6  ;;  %v5092_v14 = vpop.f32.mrf.mxu0 }
0x1512   :  { %v5139_v29 = vadd.f32 %v5138_v0, %v11863_v31 }
0x1513   :  { %v10485_v35 = vpop.f32.mrf.mxu0  ;;  %v10490_v54 = vpop.f32.mrf.mxu1 }
0x1514   :  { %v5395_v43 = vsel %vm581_vm10, %v5139_v29, -inf  ;;  %v13111_v35 = vpop.permute.xlu1 %5581 }
0x1515   :  { %v5141_v20 = vpop.f32.mrf.mxu1  ;;  %5396 = vmax.xlane.f32.xlu0 %v5395_v43  ;;  %v5187_v39 = vpop.f32.mrf.mxu0 }
0x1516   :  { %v5188_v24 = vadd.f32 %v5187_v39, %v11846_v61 }
0x1517   :  { %v10491_v1 = vpop.f32.mrf.mxu1  ;;  %v10496_v15 = vpop.f32.mrf.mxu0 }
0x1518   :  { %v5398_v36 = vsel %vm581_vm10, %v5188_v24, -inf  ;;  %v13113_v54 = vpop.permute.xlu1 %5629 }
0x1519   :  { %5399 = vmax.xlane.f32.xlu0 %v5398_v36  ;;  %v5190_v45 = vpop.f32.mrf.mxu0 }
0x151b   :  { %v10497_v38 = vpop.f32.mrf.mxu0 }
0x1547   :  { %v5236_v11 = vpop.f32.mrf.mxu1 }
0x1548   :  { %v5237_v19 = vadd.f32 %v5236_v11, %v11886_v46 }
0x1549   :  { %v10502_v8 = vpop.f32.mrf.mxu1 }
0x154a   :  { %v5401_v4 = vsel %vm581_vm10, %v5237_v19, -inf }
0x154b   :  { %v5285_v7 = vpop.f32.mrf.mxu0  ;;  %5402 = vmax.xlane.f32.xlu1 %v5401_v4  ;;  %v5239_v42 = vpop.f32.mrf.mxu1 }
0x154c   :  { %v5286_v50 = vadd.f32 %v5285_v7, %v14250_v62 }
0x154d   :  { %v10503_v37 = vpop.f32.mrf.mxu1  ;;  %v10508_v63 = vpop.f32.mrf.mxu0 }
0x154e   :  { %v5404_v47 = vsel %vm581_vm10, %v5286_v50, -inf }
0x154f   :  { %5405 = vmax.xlane.f32.xlu0 %v5404_v47  ;;  %v5288_v49 = vpop.f32.mrf.mxu0  ;;  %v5334_v41 = vpop.f32.mrf.mxu1 }
0x1550   :  { %v13101_v56 = vadd.f32 %v5334_v41, %v11890_v58 }
0x1551   :  { %v10509_v25 = vpop.f32.mrf.mxu0  ;;  %v10514_v23 = vpop.f32.mrf.mxu1 }
0x1552   :  { %v5407_v12 = vsel %vm581_vm10, %v13101_v56, -inf }
0x1553   :  { %v5383_v51 = vpop.f32.mrf.mxu0  ;;  %5408 = vmax.xlane.f32.xlu1 %v5407_v12  ;;  %v5337_v3 = vpop.f32.mrf.mxu1 }
0x1554   :  { %v5384_v26 = vadd.f32 %v5383_v51, %v11871_v21 }
0x1555   :  { %v10515_v10 = vpop.f32.mrf.mxu1  ;;  %v10520_v48 = vpop.f32.mrf.mxu0 }
0x1556   :  { %v5410_v6 = vsel %vm581_vm10, %v5384_v26, -inf }
0x1557   :  { %5411 = vmax.xlane.f32.xlu0 %v5410_v6  ;;  %v5386_v0 = vpop.f32.mrf.mxu0 }
0x1559   :  { %v10521_v14 = vpop.f32.mrf.mxu0 }
0x1564   :  { %5725 = vrot.lane.b32.xlu1 %v13018_v9, %s11445_s17 }
0x156d   :  { %5677 = vrot.lane.b32.xlu0 %v13012_v34, %s11445_s17 }
0x1596   :  { %v5391_v43 = vpop.xlane.xlu0 %5390 }
0x1597   :  { %v5413_v20 = vsub.f32 %v5041_v2, %v5391_v43 }
0x1599   :  { %v5421_v39 = vmul.f32 1.442695, %v5413_v20 }
0x159a   :  { %v5394_v1 = vpop.xlane.xlu1 %5393 }
0x159b   :  { %11259 = vpow2.f32 %v5421_v39  ;;  %v5414_v15 = vsub.f32 %v5090_v16, %v5394_v1 }
0x159d   :  { %v5423_v36 = vmul.f32 1.442695, %v5414_v15 }
0x159e   :  { %v5397_v45 = vpop.xlane.xlu0 %5396 }
0x159f   :  { %11261 = vpow2.f32 %v5423_v36  ;;  %v5415_v38 = vsub.f32 %v5139_v29, %v5397_v45 }
0x15a1   :  { %v5425_v11 = vmul.f32 1.442695, %v5415_v38 }
0x15a2   :  { %v5400_v8 = vpop.xlane.xlu0 %5399 }
0x15a3   :  { %11263 = vpow2.f32 %v5425_v11  ;;  %v5416_v4 = vsub.f32 %v5188_v24, %v5400_v8 }
0x15a5   :  { %v5427_v7 = vmul.f32 1.442695, %v5416_v4 }
0x15a7   :  { %11265 = vpow2.f32 %v5427_v7 }
0x15a8   :  { %v11260_v42 = vpop.eup %11259 }
0x15a9   :  { %v5437_v37 = vsel %vm581_vm10, %v11260_v42, 0.0 }
0x15aa   :  { %5438 = vadd.xlane.f32.xlu1 %v5437_v37 }
0x15ac   :  { %v13116_v63 = vpop.eup %11261 }
0x15ad   :  { %v5440_v2 = vsel %vm581_vm10, %v13116_v63, 0.0 }
0x15ae   :  { %5441 = vadd.xlane.f32.xlu0 %v5440_v2 }
0x15b0   :  { %v13120_v16 = vpop.eup %11263 }
0x15b1   :  { %v5443_v29 = vsel %vm581_vm10, %v13120_v16, 0.0 }
0x15b2   :  { %5444 = vadd.xlane.f32.xlu1 %v5443_v29  ;;  %v5587_v29 = vsel %vm1072_vm11, %v13111_v35, 0  ;;  %v5635_v35 = vsel %vm1072_vm11, %v13113_v54, 0 }
0x15b4   :  { %v13124_v47 = vpop.eup %11265 }
0x15b5   :  { %v5446_v24 = vsel %vm581_vm10, %v13124_v47, 0.0 }
0x15b6   :  { %5447 = vadd.xlane.f32.xlu0 %v5446_v24 }
0x15d4   :  { %v5403_v49 = vpop.xlane.xlu1 %5402 }
0x15d5   :  { %v5417_v41 = vsub.f32 %v5237_v19, %v5403_v49 }
0x15d7   :  { %v5429_v25 = vmul.f32 1.442695, %v5417_v41 }
0x15d8   :  { %v5406_v23 = vpop.xlane.xlu0 %5405 }
0x15d9   :  { %11267 = vpow2.f32 %v5429_v25  ;;  %v5418_v12 = vsub.f32 %v5286_v50, %v5406_v23 }
0x15db   :  { %v5431_v51 = vmul.f32 1.442695, %v5418_v12 }
0x15dc   :  { %v5409_v19 = vpop.xlane.xlu1 %5408 }
0x15dd   :  { %11269 = vpow2.f32 %v5431_v51  ;;  %v5419_v50 = vsub.f32 %v13101_v56, %v5409_v19 }
0x15df   :  { %v5433_v14 = vmul.f32 1.442695, %v5419_v50 }
0x15e0   :  { %v5412_v0 = vpop.xlane.xlu0 %5411  ;;  %v5726_v56 = vpop.permute.xlu1 %5725 }
0x15e1   :  { %v5420_v43 = vsub.f32 %v5384_v26, %v5412_v0  ;;  %11271 = vpow2.f32 %v5433_v14  ;;  %v5731_v12 = vsel %vm1072_vm11, %v5726_v56, 0 }
0x15e3   :  { %v5435_v20 = vmul.f32 1.442695, %v5420_v43 }
0x15e4   :  { %v5678_v26 = vpop.permute.xlu0 %5677 }
0x15e5   :  { %11273 = vpow2.f32 %v5435_v20  ;;  %v5683_v54 = vsel %vm1072_vm11, %v5678_v26, 0 }
0x15e6   :  { %v13128_v3 = vpop.eup %11267 }
0x15e7   :  { %v5449_v10 = vsel %vm581_vm10, %v13128_v3, 0.0 }
0x15e8   :  { %5450 = vadd.xlane.f32.xlu1 %v5449_v10 }
0x15ea   :  { %v13132_v48 = vpop.eup %11269 }
0x15eb   :  { %v5452_v6 = vsel %vm581_vm10, %v13132_v48, 0.0 }
0x15ec   :  { %5453 = vadd.xlane.f32.xlu0 %v5452_v6 }
0x15ee   :  { %v13141_v39 = vpop.eup %11271 }
0x15ef   :  { %v5455_v1 = vsel %vm581_vm10, %v13141_v39, 0.0 }
0x15f2   :  { %v13145_v15 = vpop.eup %11273 }
0x15f3   :  { %v5458_v36 = vsel %vm581_vm10, %v13145_v15, 0.0 }
0x15f9   :  { %5821 = vrot.lane.b32.xlu1 %v13024_v17, %s11445_s17 }
0x1602   :  { %5773 = vrot.lane.b32.xlu0 %v13016_v30, %s11445_s17 }
0x161d   :  { %5456 = vadd.xlane.f32.xlu1 %v5455_v1 }
0x1621   :  { %5459 = vadd.xlane.f32.xlu0 %v5458_v36 }
0x162e   :  { %5921 = vrot.lane.b32.xlu1 %v13002_v57, %s11447_s1 }
0x1632   :  { %5919 = vrot.lane.b32.xlu1 %v13002_v57, %s11448_s19 }
0x1633   :  { %v5439_v45 = vpop.xlane.xlu1 %5438 }
0x1634   :  { %11275 = vrcp.f32 %v5439_v45 }
0x1636   :  { %6021 = vrot.lane.b32.xlu1 %v13008_v28, %s11447_s1 }
0x1637   :  { %5871 = vrot.lane.b32.xlu0 %v12996_v40, %s11447_s1  ;;  %v5442_v38 = vpop.xlane.xlu0 %5441 }
0x1638   :  { %11277 = vrcp.f32 %v5442_v38 }
0x163a   :  { %6019 = vrot.lane.b32.xlu1 %v13008_v28, %s11448_s19 }
0x163b   :  { %5869 = vrot.lane.b32.xlu0 %v12996_v40, %s11448_s19  ;;  %v5445_v11 = vpop.xlane.xlu1 %5444 }
0x163c   :  { %11279 = vrcp.f32 %v5445_v11 }
0x163e   :  { %6121 = vrot.lane.b32.xlu1 %v13018_v9, %s11447_s1 }
0x163f   :  { %5971 = vrot.lane.b32.xlu0 %v13000_v55, %s11447_s1  ;;  %v5448_v8 = vpop.xlane.xlu0 %5447 }
0x1640   :  { %11281 = vrcp.f32 %v5448_v8 }
0x1641   :  { %v11276_v4 = vpop.eup %11275 }
0x1642   :  { %v5469_v7 = vmul.f32 %v11276_v4, %v11260_v42  ;;  %6119 = vrot.lane.b32.xlu1 %v13018_v9, %s11448_s19 }
0x1643   :  { %5969 = vrot.lane.b32.xlu0 %v13000_v55, %s11448_s19 }
0x1644   :  { %v5477_v37 = vpack.c.bf16 %v5469_v7, %v5469_v7 }
0x1645   :  { %v11278_v2 = vpop.eup %11277 }
0x1646   :  { %v5470_v24 = vmul.f32 %v11278_v2, %v13116_v63  ;;  %6221 = vrot.lane.b32.xlu1 %v13024_v17, %s11447_s1  ;;  %10525 = vmatmul.mubr.msk.bf16.vlgmr.msra.gmra.mxu1 %vm581_vm10, %v5477_v37 }
0x1647   :  { %10535 = vmatpush3.bf16.msra.mxu1 %v5587_v29  ;;  %6071 = vrot.lane.b32.xlu0 %v13012_v34, %s11447_s1 }
0x1648   :  { %v5478_v42 = vpack.c.bf16 %v5470_v24, %v5470_v24  ;;  %10536 = vmatprep.mubr.msk.bf16.mxu1 %vm11443_vm9, %v14228_v22  ;;  %10546 = vmatprep.subr.bf16.mxu1 %v14228_v22 }
0x1649   :  { %v11280_v49 = vpop.eup %11279 }
0x164a   :  { %v5471_v63 = vmul.f32 %v11280_v49, %v13120_v16  ;;  %6219 = vrot.lane.b32.xlu1 %v13024_v17, %s11448_s19  ;;  %10531 = vmatmul.mubr.msk.bf16.vlgmr.msra.gmra.mxu0 %vm581_vm10, %v5478_v42 }
0x164b   :  { %6069 = vrot.lane.b32.xlu0 %v13012_v34, %s11448_s19  ;;  %10541 = vmatpush3.bf16.msra.mxu0 %v5635_v35 }
0x164c   :  { %v5479_v41 = vpack.c.bf16 %v5471_v63, %v5471_v63  ;;  %10542 = vmatprep.mubr.msk.bf16.mxu0 %vm11443_vm9, %v14228_v22  ;;  %10552 = vmatprep.subr.bf16.mxu0 %v14228_v22 }
0x164d   :  { %v11282_v25 = vpop.eup %11281 }
0x164e   :  { %v5472_v16 = vmul.f32 %v11282_v25, %v13124_v47  ;;  %6365 = vrot.lane.b32.xlu1 %v12996_v40, %s11449_s20  ;;  %10537 = vmatmul.mubr.msk.bf16.vlgmr.msra.gmra.mxu1 %vm581_vm10, %v5479_v41 }
0x164f   :  { %6171 = vrot.lane.b32.xlu0 %v13016_v30, %s11447_s1  ;;  %10547 = vmatpush3.bf16.msra.mxu1 %v5683_v54 }
0x1650   :  { %v5480_v23 = vpack.c.bf16 %v5472_v16, %v5472_v16  ;;  %10548 = vmatprep.mubr.msk.bf16.mxu1 %vm11443_vm9, %v14228_v22  ;;  %10558 = vmatprep.subr.bf16.mxu1 %v14228_v22 }
0x1652   :  { %6461 = vrot.lane.b32.xlu1 %v13000_v55, %s11449_s20  ;;  %10543 = vmatmul.mubr.msk.bf16.vlgmr.msra.gmra.mxu0 %vm581_vm10, %v5480_v23 }
0x1653   :  { %6169 = vrot.lane.b32.xlu0 %v13016_v30, %s11448_s19  ;;  %10553 = vmatpush3.bf16.msra.mxu0 %v5731_v12  ;;  %s14255_s19 = smov 24  }
0x1654   :  { %10554 = vmatprep.mubr.msk.bf16.mxu0 %vm11443_vm9, %v14228_v22  ;;  %10564 = vmatprep.subr.bf16.mxu0 %v14228_v22 }
0x1656   :  { %6509 = vrot.lane.b32.xlu1 %v13008_v28, %s11449_s20 }
0x1657   :  { %6413 = vrot.lane.b32.xlu0 %v13002_v57, %s11449_s20 }
0x1671   :  { %v5451_v47 = vpop.xlane.xlu1 %5450 }
0x1672   :  { %11283 = vrcp.f32 %v5451_v47 }
0x1675   :  { %v5454_v51 = vpop.xlane.xlu0 %5453  ;;  %v5822_v20 = vpop.permute.xlu1 %5821 }
0x1676   :  { %11285 = vrcp.f32 %v5454_v51  ;;  %v5827_v36 = vsel %vm1072_vm11, %v5822_v20, 0 }
0x1679   :  { %v5774_v19 = vpop.permute.xlu0 %5773 }
0x167a   :  { %v5779_v43 = vsel %vm1072_vm11, %v5774_v19, 0 }
0x167f   :  { %v11284_v10 = vpop.eup %11283 }
0x1680   :  { %v5473_v6 = vmul.f32 %v11284_v10, %v13128_v3 }
0x1682   :  { %v5481_v50 = vpack.c.bf16 %v5473_v6, %v5473_v6 }
0x1683   :  { %v11286_v0 = vpop.eup %11285 }
0x1684   :  { %v5474_v14 = vmul.f32 %v11286_v0, %v13132_v48  ;;  %10549 = vmatmul.mubr.msk.bf16.vlgmr.msra.gmra.mxu1 %vm581_vm10, %v5481_v50 }
0x1685   :  { %10559 = vmatpush3.bf16.msra.mxu1 %v5779_v43  ;;  %10560 = vmatprep.mubr.msk.bf16.mxu1 %vm11443_vm9, %v14228_v22 }
0x1686   :  { %v5482_v1 = vpack.c.bf16 %v5474_v14, %v5474_v14  ;;  %10570 = vmatprep.subr.bf16.mxu1 %v14228_v22 }
0x1688   :  { %10555 = vmatmul.mubr.msk.bf16.vlgmr.msra.gmra.mxu0 %vm581_vm10, %v5482_v1 }
0x1689   :  { %10565 = vmatpush3.bf16.msra.mxu0 %v5827_v36  ;;  %10566 = vmatprep.mubr.msk.bf16.mxu0 %vm11443_vm9, %v14228_v22 }
0x168a   :  { %10576 = vmatprep.subr.bf16.mxu0 %v14228_v22 }
0x16a6   :  { %v5457_v3 = vpop.xlane.xlu1 %5456 }
0x16a7   :  { %11287 = vrcp.f32 %v5457_v3 }
0x16aa   :  { %v5922_v48 = vpop.permute.xlu1 %5921  ;;  %v5460_v56 = vpop.xlane.xlu0 %5459 }
0x16ab   :  { %11289 = vrcp.f32 %v5460_v56 }
0x16ae   :  { %v5920_v26 = vpop.permute.xlu1 %5919  ;;  %v5872_v45 = vpop.permute.xlu0 %5871 }
0x16af   :  { %v5877_v42 = vsel %vm581_vm10, %v5872_v45, 0 }
0x16b2   :  { %v6022_v38 = vpop.permute.xlu1 %6021  ;;  %v5870_v11 = vpop.permute.xlu0 %5869 }
0x16b3   :  { %v6027_v54 = vsel %vm581_vm10, %v6022_v38, 0 }
0x16b4   :  { %v11288_v8 = vpop.eup %11287 }
0x16b5   :  { %v5475_v4 = vmul.f32 %v11288_v8, %v13141_v39  ;;  %v5927_v39 = vsel %vm581_vm10, %v5922_v48, 0 }
0x16b6   :  { %v5972_v7 = vpop.permute.xlu0 %5971  ;;  %v6020_v29 = vpop.permute.xlu1 %6019 }
0x16b7   :  { %v5483_v37 = vpack.c.bf16 %v5475_v4, %v5475_v4 }
0x16b8   :  { %v11290_v2 = vpop.eup %11289 }
0x16b9   :  { %v5476_v24 = vmul.f32 %v11290_v2, %v13145_v15  ;;  %10561 = vmatmul.mubr.msk.bf16.vlgmr.msra.gmra.mxu1 %vm581_vm10, %v5483_v37  ;;  %v5977_v15 = vsel %vm581_vm10, %v5972_v7, 0 }
0x16ba   :  { %10571 = vmatpush3.bf16.xpose.msra.mxu1 %v5877_v42  ;;  %10572 = vmatprep.mubr.msk.bf16.mxu1 %vm11443_vm9, %v14228_v22  ;;  %v5970_v35 = vpop.permute.xlu0 %5969  ;;  %v6122_v63 = vpop.permute.xlu1 %6121 }
0x16bb   :  { %v5484_v49 = vpack.c.bf16 %v5476_v24, %v5476_v24  ;;  %10582 = vmatprep.subr.bf16.mxu1 %v14228_v22  ;;  %v6127_v47 = vsel %vm581_vm10, %v6122_v63, 0 }
0x16bd   :  { %10567 = vmatmul.mubr.msk.bf16.vlgmr.msra.gmra.mxu0 %vm581_vm10, %v5484_v49 }
0x16be   :  { %10577 = vmatpush3.bf16.xpose.msra.mxu0 %v5927_v39  ;;  %10578 = vmatprep.mubr.msk.bf16.mxu0 %vm11443_vm9, %v14228_v22  ;;  %v6072_v41 = vpop.permute.xlu0 %6071  ;;  %v6120_v25 = vpop.permute.xlu1 %6119 }
0x16bf   :  { %10588 = vmatprep.subr.bf16.mxu0 %v14228_v22  ;;  %v6077_v23 = vsel %vm581_vm10, %v6072_v41, 0 }
0x16c1   :  { %10573 = vmatmul.mubr.msk.bf16.vlgmr.msra.gmra.mxu1 %vm581_vm10, %v5870_v11 }
0x16c2   :  { %10583 = vmatpush3.bf16.xpose.msra.mxu1 %v5977_v15  ;;  %10584 = vmatprep.mubr.msk.bf16.mxu1 %vm11443_vm9, %v14228_v22  ;;  %v6070_v16 = vpop.permute.xlu0 %6069  ;;  %v6222_v12 = vpop.permute.xlu1 %6221 }
0x16c3   :  { %10594 = vmatprep.subr.bf16.mxu1 %v14228_v22  ;;  %v6227_v50 = vsel %vm581_vm10, %v6222_v12, 0 }
0x16c5   :  { %10579 = vmatmul.mubr.msk.bf16.vlgmr.msra.gmra.mxu0 %vm581_vm10, %v5920_v26 }
0x16c6   :  { %10589 = vmatpush3.bf16.xpose.msra.mxu0 %v6027_v54  ;;  %10590 = vmatprep.mubr.msk.bf16.mxu0 %vm11443_vm9, %v14228_v22  ;;  %v6172_v51 = vpop.permute.xlu0 %6171  ;;  %v6220_v10 = vpop.permute.xlu1 %6219 }
0x16c7   :  { %10600 = vmatprep.subr.bf16.mxu0 %v14228_v22  ;;  %v6177_v6 = vsel %vm581_vm10, %v6172_v51, 0 }
0x16c9   :  { %10585 = vmatmul.mubr.msk.bf16.vlgmr.msra.gmra.mxu1 %vm581_vm10, %v5970_v35 }
0x16ca   :  { %10595 = vmatpush3.bf16.xpose.msra.mxu1 %v6077_v23  ;;  %10596 = vmatprep.mubr.msk.bf16.mxu1 %vm11443_vm9, %v14228_v22  ;;  %v6170_v19 = vpop.permute.xlu0 %6169  ;;  %v6366_v0 = vpop.permute.xlu1 %6365 }
0x16cb   :  { %10606 = vmatprep.subr.bf16.mxu1 %v14228_v22  ;;  %v6371_v14 = vsel %vm1072_vm11, %v6366_v0, 0 }
0x16cd   :  { %10591 = vmatmul.mubr.msk.bf16.vlgmr.msra.gmra.mxu0 %vm581_vm10, %v6020_v29 }
0x16ce   :  { %10601 = vmatpush3.bf16.xpose.msra.mxu0 %v6127_v47  ;;  %10602 = vmatprep.mubr.msk.bf16.mxu0 %vm11443_vm9, %v14228_v22  ;;  %v6414_v43 = vpop.permute.xlu0 %6413 }
0x16cf   :  { %10612 = vmatprep.subr.bf16.mxu0 %v14228_v22  ;;  %v6419_v20 = vsel %vm1072_vm11, %v6414_v43, 0 }
0x16d1   :  { %10597 = vmatmul.mubr.msk.bf16.vlgmr.msra.gmra.mxu1 %vm581_vm10, %v6070_v16 }
0x16d2   :  { %10607 = vmatpush3.bf16.xpose.msra.mxu1 %v6177_v6  ;;  %10608 = vmatprep.mubr.msk.bf16.mxu1 %vm11443_vm9, %v14228_v22 }
0x16d3   :  { %10618 = vmatprep.subr.bf16.mxu1 %v14228_v22 }
0x16d5   :  { %10603 = vmatmul.mubr.msk.bf16.vlgmr.msra.gmra.mxu0 %vm581_vm10, %v6120_v25 }
0x16d6   :  { %10613 = vmatpush3.bf16.xpose.msra.mxu0 %v6227_v50  ;;  %10614 = vmatprep.mubr.msk.bf16.mxu0 %vm11443_vm9, %v14228_v22 }
0x16d7   :  { %10624 = vmatprep.subr.bf16.mxu0 %v14228_v22 }
0x16d9   :  { %10609 = vmatmul.mubr.msk.bf16.vlgmr.msra.gmra.mxu1 %vm581_vm10, %v6170_v19 }
0x16da   :  { %10619 = vmatpush3.bf16.msra.mxu1 %v6371_v14  ;;  %10620 = vmatprep.mubr.msk.bf16.mxu1 %vm11443_vm9, %v14228_v22 }
0x16db   :  { %10630 = vmatprep.subr.bf16.mxu1 %v14228_v22 }
0x16dd   :  { %10615 = vmatmul.mubr.msk.bf16.vlgmr.msra.gmra.mxu0 %vm581_vm10, %v6220_v10 }
0x16de   :  { %10625 = vmatpush3.bf16.msra.mxu0 %v6419_v20  ;;  %10626 = vmatprep.mubr.msk.bf16.mxu0 %vm11443_vm9, %v14228_v22 }
0x16df   :  { %10636 = vmatprep.subr.bf16.mxu0 %v14228_v22 }
0x1706   :  { %v13278_v1 = vpop.f32.mrf.mxu1 }
0x1708   :  { %v10526_v36 = vpop.f32.mrf.mxu1 }
0x170a   :  { %v5530_v3 = vpop.f32.mrf.mxu1  ;;  %v13280_v48 = vpop.f32.mrf.mxu0 }
0x170c   :  { %v10527_v56 = vpop.f32.mrf.mxu1  ;;  %v10532_v26 = vpop.f32.mrf.mxu0 }
0x170e   :  { %v5578_v45 = vpop.f32.mrf.mxu0  ;;  %v13282_v38 = vpop.f32.mrf.mxu1 }
0x1710   :  { %v10533_v11 = vpop.f32.mrf.mxu0  ;;  %v10538_v8 = vpop.f32.mrf.mxu1 }
0x1712   :  { %v5626_v4 = vpop.f32.mrf.mxu1  ;;  %v13284_v7 = vpop.f32.mrf.mxu0 }
0x1714   :  { %v10539_v37 = vpop.f32.mrf.mxu1  ;;  %v10544_v2 = vpop.f32.mrf.mxu0 }
0x1716   :  { %v5674_v29 = vpop.f32.mrf.mxu0 }
0x1718   :  { %v10545_v24 = vpop.f32.mrf.mxu0 }
0x1744   :  { %v13286_v42 = vpop.f32.mrf.mxu1 }
0x1746   :  { %v10550_v49 = vpop.f32.mrf.mxu1 }
0x1748   :  { %v5722_v35 = vpop.f32.mrf.mxu1  ;;  %v13288_v39 = vpop.f32.mrf.mxu0 }
0x174a   :  { %v10551_v63 = vpop.f32.mrf.mxu1  ;;  %v10556_v15 = vpop.f32.mrf.mxu0 }
0x174c   :  { %v5770_v41 = vpop.f32.mrf.mxu0 }
0x174e   :  { %v10557_v25 = vpop.f32.mrf.mxu0 }
0x1779   :  { %v13290_v54 = vpop.f32.mrf.mxu1 }
0x177b   :  { %v10562_v16 = vpop.f32.mrf.mxu1 }
0x177d   :  { %v5818_v23 = vpop.f32.mrf.mxu1  ;;  %v13292_v12 = vpop.f32.mrf.mxu0 }
0x177f   :  { %v10563_v47 = vpop.f32.mrf.mxu1  ;;  %v10568_v51 = vpop.f32.mrf.mxu0 }
0x1781   :  { %v5866_v10 = vpop.f32.mrf.mxu0  ;;  %v5913_v6 = vpop.f32.mrf.mxu1 }
0x1782   :  { %v5914_v19 = vadd.f32 %v5913_v6, %v11833_v44 }
0x1783   :  { %v10569_v50 = vpop.f32.mrf.mxu0  ;;  %v10574_v0 = vpop.f32.mrf.mxu1 }
0x1784   :  { %v6269_v14 = vsel %vm581_vm10, %v5914_v19, -inf }
0x1785   :  { %v5963_v43 = vpop.f32.mrf.mxu0  ;;  %6270 = vmax.xlane.f32.xlu0 %v6269_v14  ;;  %v5916_v20 = vpop.f32.mrf.mxu1 }
0x1786   :  { %v5964_v36 = vadd.f32 %v5963_v43, %v11843_v60 }
0x1787   :  { %v10575_v3 = vpop.f32.mrf.mxu1  ;;  %v10580_v56 = vpop.f32.mrf.mxu0 }
0x1788   :  { %v6272_v26 = vsel %vm581_vm10, %v5964_v36, -inf }
0x1789   :  { %6273 = vmax.xlane.f32.xlu1 %v6272_v26  ;;  %v5966_v45 = vpop.f32.mrf.mxu0  ;;  %v6013_v11 = vpop.f32.mrf.mxu1 }
0x178a   :  { %v6014_v8 = vadd.f32 %v6013_v11, %v11863_v31 }
0x178b   :  { %v10581_v4 = vpop.f32.mrf.mxu0  ;;  %v10586_v37 = vpop.f32.mrf.mxu1 }
0x178c   :  { %v6275_v2 = vsel %vm581_vm10, %v6014_v8, -inf }
0x178d   :  { %v6063_v29 = vpop.f32.mrf.mxu0  ;;  %6276 = vmax.xlane.f32.xlu0 %v6275_v2  ;;  %v6016_v24 = vpop.f32.mrf.mxu1 }
0x178e   :  { %v6064_v49 = vadd.f32 %v6063_v29, %v11846_v61 }
0x178f   :  { %v10587_v35 = vpop.f32.mrf.mxu1  ;;  %v10592_v63 = vpop.f32.mrf.mxu0 }
0x1790   :  { %v6278_v15 = vsel %vm581_vm10, %v6064_v49, -inf }
0x1791   :  { %v6066_v41 = vpop.f32.mrf.mxu0  ;;  %6279 = vmax.xlane.f32.xlu0 %v6278_v15  ;;  %v6113_v25 = vpop.f32.mrf.mxu1 }
0x1792   :  { %v6114_v16 = vadd.f32 %v6113_v25, %v11886_v46  ;;  %v13317_v41 = vpop.permute.xlu1 %6461 }
0x1793   :  { %v10593_v23 = vpop.f32.mrf.mxu0  ;;  %v10598_v47 = vpop.f32.mrf.mxu1 }
0x1794   :  { %v6281_v51 = vsel %vm581_vm10, %v6114_v16, -inf }
0x1795   :  { %v6163_v10 = vpop.f32.mrf.mxu0  ;;  %6282 = vmax.xlane.f32.xlu1 %v6281_v51  ;;  %v6116_v6 = vpop.f32.mrf.mxu1 }
0x1796   :  { %v6164_v50 = vadd.f32 %v6163_v10, %v14250_v62  ;;  %v13319_v25 = vpop.permute.xlu1 %6509 }
0x1797   :  { %v10599_v0 = vpop.f32.mrf.mxu1  ;;  %v10604_v14 = vpop.f32.mrf.mxu0 }
0x1798   :  { %v6284_v43 = vsel %vm581_vm10, %v6164_v50, -inf }
0x1799   :  { %v6166_v20 = vpop.f32.mrf.mxu0  ;;  %6285 = vmax.xlane.f32.xlu0 %v6284_v43  ;;  %v6213_v3 = vpop.f32.mrf.mxu1 }
0x179a   :  { %v13307_v56 = vadd.f32 %v6213_v3, %v11890_v58 }
0x179b   :  { %v10605_v26 = vpop.f32.mrf.mxu0  ;;  %v10610_v45 = vpop.f32.mrf.mxu1 }
0x179c   :  { %v6287_v11 = vsel %vm581_vm10, %v13307_v56, -inf }
0x179d   :  { %v6263_v4 = vpop.f32.mrf.mxu0  ;;  %6288 = vmax.xlane.f32.xlu1 %v6287_v11  ;;  %v6216_v37 = vpop.f32.mrf.mxu1 }
0x179e   :  { %v6264_v2 = vadd.f32 %v6263_v4, %v11871_v21 }
0x179f   :  { %v10611_v29 = vpop.f32.mrf.mxu1  ;;  %v10616_v24 = vpop.f32.mrf.mxu0 }
0x17a0   :  { %v6290_v35 = vsel %vm581_vm10, %v6264_v2, -inf }
0x17a1   :  { %v6266_v63 = vpop.f32.mrf.mxu0  ;;  %6291 = vmax.xlane.f32.xlu0 %v6290_v35 }
0x17a3   :  { %v10617_v15 = vpop.f32.mrf.mxu0 }
0x17ae   :  { %6605 = vrot.lane.b32.xlu1 %v13018_v9, %s11449_s20 }
0x17b7   :  { %6557 = vrot.lane.b32.xlu0 %v13012_v34, %s11449_s20 }
0x180e   :  { %v6271_v23 = vpop.xlane.xlu0 %6270 }
0x180f   :  { %v6293_v47 = vsub.f32 %v5914_v19, %v6271_v23 }
0x1811   :  { %v6301_v51 = vmul.f32 1.442695, %v6293_v47 }
0x1812   :  { %v6274_v10 = vpop.xlane.xlu1 %6273 }
0x1813   :  { %11291 = vpow2.f32 %v6301_v51  ;;  %v6294_v6 = vsub.f32 %v5964_v36, %v6274_v10 }
0x1815   :  { %v6303_v0 = vmul.f32 1.442695, %v6294_v6 }
0x1816   :  { %v6277_v14 = vpop.xlane.xlu0 %6276 }
0x1817   :  { %11293 = vpow2.f32 %v6303_v0  ;;  %v6295_v43 = vsub.f32 %v6014_v8, %v6277_v14 }
0x1819   :  { %v6305_v20 = vmul.f32 1.442695, %v6295_v43 }
0x181a   :  { %v6280_v3 = vpop.xlane.xlu0 %6279 }
0x181b   :  { %11295 = vpow2.f32 %v6305_v20  ;;  %v6296_v26 = vsub.f32 %v6064_v49, %v6280_v3 }
0x181d   :  { %v6307_v45 = vmul.f32 1.442695, %v6296_v26 }
0x181e   :  { %v6283_v11 = vpop.xlane.xlu1 %6282 }
0x181f   :  { %11297 = vpow2.f32 %v6307_v45  ;;  %v6297_v4 = vsub.f32 %v6114_v16, %v6283_v11 }
0x1820   :  { %v13321_v37 = vpop.eup %11291 }
0x1821   :  { %v6309_v29 = vmul.f32 1.442695, %v6297_v4  ;;  %v6317_v19 = vsel %vm581_vm10, %v13321_v37, 0.0 }
0x1822   :  { %6318 = vadd.xlane.f32.xlu1 %v6317_v19  ;;  %v6286_v36 = vpop.xlane.xlu0 %6285 }
0x1823   :  { %11299 = vpow2.f32 %v6309_v29  ;;  %v6298_v24 = vsub.f32 %v6164_v50, %v6286_v36 }
0x1824   :  { %v13325_v35 = vpop.eup %11293 }
0x1825   :  { %v6311_v8 = vmul.f32 1.442695, %v6298_v24  ;;  %v6320_v49 = vsel %vm581_vm10, %v13325_v35, 0.0 }
0x1826   :  { %6321 = vadd.xlane.f32.xlu0 %v6320_v49  ;;  %v6289_v6 = vpop.xlane.xlu1 %6288 }
0x1827   :  { %11301 = vpow2.f32 %v6311_v8  ;;  %v6299_v0 = vsub.f32 %v13307_v56, %v6289_v6 }
0x1828   :  { %v13329_v63 = vpop.eup %11295 }
0x1829   :  { %v6323_v16 = vsel %vm581_vm10, %v13329_v63, 0.0  ;;  %v6313_v43 = vmul.f32 1.442695, %v6299_v0 }
0x182a   :  { %6324 = vadd.xlane.f32.xlu1 %v6323_v16  ;;  %v6292_v14 = vpop.xlane.xlu0 %6291  ;;  %v6606_v56 = vpop.permute.xlu1 %6605 }
0x182b   :  { %v6300_v20 = vsub.f32 %v6264_v2, %v6292_v14  ;;  %11303 = vpow2.f32 %v6313_v43  ;;  %v6515_v43 = vsel %vm1072_vm11, %v13319_v25, 0 }
0x182c   :  { %v13333_v15 = vpop.eup %11297 }
0x182d   :  { %v6326_v23 = vsel %vm581_vm10, %v13333_v15, 0.0  ;;  %v6315_v3 = vmul.f32 1.442695, %v6300_v20 }
0x182e   :  { %6327 = vadd.xlane.f32.xlu0 %v6326_v23  ;;  %v6558_v2 = vpop.permute.xlu0 %6557 }
0x182f   :  { %11305 = vpow2.f32 %v6315_v3  ;;  %v6563_v3 = vsel %vm1072_vm11, %v6558_v2, 0 }
0x1830   :  { %v13337_v50 = vpop.eup %11299 }
0x1831   :  { %v6329_v47 = vsel %vm581_vm10, %v13337_v50, 0.0 }
0x1832   :  { %6330 = vadd.xlane.f32.xlu1 %v6329_v47 }
0x1834   :  { %v13341_v51 = vpop.eup %11301 }
0x1835   :  { %v6332_v10 = vsel %vm581_vm10, %v13341_v51, 0.0 }
0x1836   :  { %6333 = vadd.xlane.f32.xlu0 %v6332_v10  ;;  %v6467_v10 = vsel %vm1072_vm11, %v13317_v41, 0 }
0x1838   :  { %v13350_v26 = vpop.eup %11303 }
0x1839   :  { %v6335_v45 = vsel %vm581_vm10, %v13350_v26, 0.0 }
0x183c   :  { %v13354_v11 = vpop.eup %11305 }
0x183d   :  { %v6338_v4 = vsel %vm581_vm10, %v13354_v11, 0.0 }
0x1843   :  { %6701 = vrot.lane.b32.xlu1 %v13024_v17, %s11449_s20 }
0x184c   :  { %6653 = vrot.lane.b32.xlu0 %v13016_v30, %s11449_s20 }
0x1867   :  { %6336 = vadd.xlane.f32.xlu1 %v6335_v45 }
0x186b   :  { %6339 = vadd.xlane.f32.xlu0 %v6338_v4  ;;  %v6611_v4 = vsel %vm1072_vm11, %v6606_v56, 0 }
0x1878   :  { %6801 = vrot.lane.b32.xlu1 %v13002_v57, %s11450_s21 }
0x187c   :  { %6799 = vrot.lane.b32.xlu1 %v13002_v57, %s11451_s22 }
0x1880   :  { %6901 = vrot.lane.b32.xlu1 %v13008_v28, %s11450_s21 }
0x1881   :  { %6751 = vrot.lane.b32.xlu0 %v12996_v40, %s11450_s21 }
0x1884   :  { %6899 = vrot.lane.b32.xlu1 %v13008_v28, %s11451_s22 }
0x1885   :  { %6749 = vrot.lane.b32.xlu0 %v12996_v40, %s11451_s22 }
0x1888   :  { %7001 = vrot.lane.b32.xlu1 %v13018_v9, %s11450_s21 }
0x1889   :  { %6851 = vrot.lane.b32.xlu0 %v13000_v55, %s11450_s21 }
0x188c   :  { %6999 = vrot.lane.b32.xlu1 %v13018_v9, %s11451_s22 }
0x188d   :  { %6849 = vrot.lane.b32.xlu0 %v13000_v55, %s11451_s22 }
0x1890   :  { %7101 = vrot.lane.b32.xlu1 %v13024_v17, %s11450_s21 }
0x1891   :  { %6951 = vrot.lane.b32.xlu0 %v13012_v34, %s11450_s21 }
0x1894   :  { %7099 = vrot.lane.b32.xlu1 %v13024_v17, %s11451_s22 }
0x1895   :  { %6949 = vrot.lane.b32.xlu0 %v13012_v34, %s11451_s22 }
0x1898   :  { %7245 = vrot.lane.b32.xlu1 %v12996_v40, %s11452_s23 }
0x1899   :  { %7051 = vrot.lane.b32.xlu0 %v13016_v30, %s11450_s21 }
0x189c   :  { %7341 = vrot.lane.b32.xlu1 %v13000_v55, %s11452_s23 }
0x189d   :  { %7049 = vrot.lane.b32.xlu0 %v13016_v30, %s11451_s22 }
0x18a0   :  { %7389 = vrot.lane.b32.xlu1 %v13008_v28, %s11452_s23 }
0x18a1   :  { %7293 = vrot.lane.b32.xlu0 %v13002_v57, %s11452_s23 }
0x18ab   :  { %v6319_v29 = vpop.xlane.xlu1 %6318 }
0x18ac   :  { %11307 = vrcp.f32 %v6319_v29 }
0x18af   :  { %v6322_v19 = vpop.xlane.xlu0 %6321 }
0x18b0   :  { %11309 = vrcp.f32 %v6322_v19 }
0x18b3   :  { %v6325_v36 = vpop.xlane.xlu1 %6324 }
0x18b4   :  { %11311 = vrcp.f32 %v6325_v36 }
0x18b7   :  { %v6328_v24 = vpop.xlane.xlu0 %6327 }
0x18b8   :  { %11313 = vrcp.f32 %v6328_v24 }
0x18b9   :  { %v11308_v8 = vpop.eup %11307 }
0x18ba   :  { %v6349_v49 = vmul.f32 %v11308_v8, %v13321_v37 }
0x18bb   :  { %v6331_v16 = vpop.xlane.xlu1 %6330 }
0x18bc   :  { %v6357_v23 = vpack.c.bf16 %v6349_v49, %v6349_v49  ;;  %11315 = vrcp.f32 %v6331_v16 }
0x18bd   :  { %v11310_v47 = vpop.eup %11309 }
0x18be   :  { %v6350_v6 = vmul.f32 %v11310_v47, %v13325_v35  ;;  %10621 = vmatmul.mubr.msk.bf16.vlgmr.msra.gmra.mxu1 %vm581_vm10, %v6357_v23 }
0x18bf   :  { %10631 = vmatpush3.bf16.msra.mxu1 %v6467_v10  ;;  %v6334_v0 = vpop.xlane.xlu0 %6333  ;;  %10632 = vmatprep.mubr.msk.bf16.mxu1 %vm11443_vm9, %v14228_v22  ;;  %v6702_v56 = vpop.permute.xlu1 %6701 }
0x18c0   :  { %v6358_v14 = vpack.c.bf16 %v6350_v6, %v6350_v6  ;;  %11317 = vrcp.f32 %v6334_v0  ;;  %10642 = vmatprep.subr.bf16.mxu1 %v14228_v22  ;;  %v6707_v8 = vsel %vm1072_vm11, %v6702_v56, 0 }
0x18c1   :  { %v11312_v37 = vpop.eup %11311 }
0x18c2   :  { %v6351_v20 = vmul.f32 %v11312_v37, %v13329_v63  ;;  %10627 = vmatmul.mubr.msk.bf16.vlgmr.msra.gmra.mxu0 %vm581_vm10, %v6358_v14 }
0x18c3   :  { %10637 = vmatpush3.bf16.msra.mxu0 %v6515_v43  ;;  %10638 = vmatprep.mubr.msk.bf16.mxu0 %vm11443_vm9, %v14228_v22  ;;  %v6654_v19 = vpop.permute.xlu0 %6653 }
0x18c4   :  { %v6359_v41 = vpack.c.bf16 %v6351_v20, %v6351_v20  ;;  %10648 = vmatprep.subr.bf16.mxu0 %v14228_v22  ;;  %v6659_v24 = vsel %vm1072_vm11, %v6654_v19, 0 }
0x18c5   :  { %v11314_v35 = vpop.eup %11313 }
0x18c6   :  { %v6352_v45 = vmul.f32 %v11314_v35, %v13333_v15  ;;  %10633 = vmatmul.mubr.msk.bf16.vlgmr.msra.gmra.mxu1 %vm581_vm10, %v6359_v41 }
0x18c7   :  { %10643 = vmatpush3.bf16.msra.mxu1 %v6563_v3  ;;  %10644 = vmatprep.mubr.msk.bf16.mxu1 %vm11443_vm9, %v14228_v22 }
0x18c8   :  { %v6360_v25 = vpack.c.bf16 %v6352_v45, %v6352_v45  ;;  %10654 = vmatprep.subr.bf16.mxu1 %v14228_v22 }
0x18c9   :  { %v11316_v63 = vpop.eup %11315 }
0x18ca   :  { %v6353_v29 = vmul.f32 %v11316_v63, %v13337_v50  ;;  %10639 = vmatmul.mubr.msk.bf16.vlgmr.msra.gmra.mxu0 %vm581_vm10, %v6360_v25 }
0x18cb   :  { %10649 = vmatpush3.bf16.msra.mxu0 %v6611_v4  ;;  %10650 = vmatprep.mubr.msk.bf16.mxu0 %vm11443_vm9, %v14228_v22 }
0x18cc   :  { %v6361_v15 = vpack.c.bf16 %v6353_v29, %v6353_v29  ;;  %10660 = vmatprep.subr.bf16.mxu0 %v14228_v22 }
0x18cd   :  { %v11318_v2 = vpop.eup %11317 }
0x18ce   :  { %v6354_v36 = vmul.f32 %v11318_v2, %v13341_v51  ;;  %10645 = vmatmul.mubr.msk.bf16.vlgmr.msra.gmra.mxu1 %vm581_vm10, %v6361_v15 }
0x18cf   :  { %10655 = vmatpush3.bf16.msra.mxu1 %v6659_v24  ;;  %10656 = vmatprep.mubr.msk.bf16.mxu1 %vm11443_vm9, %v14228_v22 }
0x18d0   :  { %v6362_v50 = vpack.c.bf16 %v6354_v36, %v6354_v36  ;;  %10666 = vmatprep.subr.bf16.mxu1 %v14228_v22 }
0x18d2   :  { %10651 = vmatmul.mubr.msk.bf16.vlgmr.msra.gmra.mxu0 %vm581_vm10, %v6362_v50 }
0x18d3   :  { %10661 = vmatpush3.bf16.msra.mxu0 %v6707_v8  ;;  %10662 = vmatprep.mubr.msk.bf16.mxu0 %vm11443_vm9, %v14228_v22 }
0x18d4   :  { %10672 = vmatprep.subr.bf16.mxu0 %v14228_v22 }
0x18f0   :  { %v6337_v51 = vpop.xlane.xlu1 %6336 }
0x18f1   :  { %11319 = vrcp.f32 %v6337_v51 }
0x18f4   :  { %v6802_v49 = vpop.permute.xlu1 %6801  ;;  %v6340_v16 = vpop.xlane.xlu0 %6339 }
0x18f5   :  { %11321 = vrcp.f32 %v6340_v16 }
0x18f8   :  { %v6800_v23 = vpop.permute.xlu1 %6799  ;;  %v6752_v47 = vpop.permute.xlu0 %6751 }
0x18f9   :  { %v6757_v3 = vsel %vm581_vm10, %v6752_v47, 0 }
0x18fc   :  { %v6902_v10 = vpop.permute.xlu1 %6901  ;;  %v6750_v6 = vpop.permute.xlu0 %6749 }
0x18fd   :  { %v6907_v19 = vsel %vm581_vm10, %v6902_v10, 0 }
0x18fe   :  { %v11320_v0 = vpop.eup %11319 }
0x18ff   :  { %v6355_v14 = vmul.f32 %v11320_v0, %v13350_v26  ;;  %v6807_v26 = vsel %vm581_vm10, %v6802_v49, 0 }
0x1900   :  { %v6852_v37 = vpop.permute.xlu0 %6851  ;;  %v6900_v41 = vpop.permute.xlu1 %6899 }
0x1901   :  { %v6363_v43 = vpack.c.bf16 %v6355_v14, %v6355_v14 }
0x1902   :  { %v11322_v20 = vpop.eup %11321 }
0x1903   :  { %v6356_v35 = vmul.f32 %v11322_v20, %v13354_v11  ;;  %10657 = vmatmul.mubr.msk.bf16.vlgmr.msra.gmra.mxu1 %vm581_vm10, %v6363_v43  ;;  %v6857_v11 = vsel %vm581_vm10, %v6852_v37, 0 }
0x1904   :  { %10667 = vmatpush3.bf16.xpose.msra.mxu1 %v6757_v3  ;;  %10668 = vmatprep.mubr.msk.bf16.mxu1 %vm11443_vm9, %v14228_v22  ;;  %v6850_v25 = vpop.permute.xlu0 %6849  ;;  %v7002_v63 = vpop.permute.xlu1 %7001 }
0x1905   :  { %v6364_v45 = vpack.c.bf16 %v6356_v35, %v6356_v35  ;;  %10678 = vmatprep.subr.bf16.mxu1 %v14228_v22  ;;  %v7007_v24 = vsel %vm581_vm10, %v7002_v63, 0 }
0x1907   :  { %10663 = vmatmul.mubr.msk.bf16.vlgmr.msra.gmra.mxu0 %vm581_vm10, %v6364_v45 }
0x1908   :  { %10673 = vmatpush3.bf16.xpose.msra.mxu0 %v6807_v26  ;;  %10674 = vmatprep.mubr.msk.bf16.mxu0 %vm11443_vm9, %v14228_v22  ;;  %v6952_v4 = vpop.permute.xlu0 %6951  ;;  %v7000_v29 = vpop.permute.xlu1 %6999 }
0x1909   :  { %10684 = vmatprep.subr.bf16.mxu0 %v14228_v22  ;;  %v6957_v2 = vsel %vm581_vm10, %v6952_v4, 0 }
0x190b   :  { %10669 = vmatmul.mubr.msk.bf16.vlgmr.msra.gmra.mxu1 %vm581_vm10, %v6750_v6 }
0x190c   :  { %10679 = vmatpush3.bf16.xpose.msra.mxu1 %v6857_v11  ;;  %10680 = vmatprep.mubr.msk.bf16.mxu1 %vm11443_vm9, %v14228_v22  ;;  %v6950_v15 = vpop.permute.xlu0 %6949  ;;  %v7102_v36 = vpop.permute.xlu1 %7101 }
0x190d   :  { %10690 = vmatprep.subr.bf16.mxu1 %v14228_v22  ;;  %v7107_v49 = vsel %vm581_vm10, %v7102_v36, 0 }
0x190f   :  { %10675 = vmatmul.mubr.msk.bf16.vlgmr.msra.gmra.mxu0 %vm581_vm10, %v6800_v23 }
0x1910   :  { %10685 = vmatpush3.bf16.xpose.msra.mxu0 %v6907_v19  ;;  %10686 = vmatprep.mubr.msk.bf16.mxu0 %vm11443_vm9, %v14228_v22  ;;  %v7052_v56 = vpop.permute.xlu0 %7051  ;;  %v7100_v50 = vpop.permute.xlu1 %7099 }
0x1911   :  { %10696 = vmatprep.subr.bf16.mxu0 %v14228_v22  ;;  %v7057_v8 = vsel %vm581_vm10, %v7052_v56, 0 }
0x1913   :  { %10681 = vmatmul.mubr.msk.bf16.vlgmr.msra.gmra.mxu1 %vm581_vm10, %v6850_v25 }
0x1914   :  { %10691 = vmatpush3.bf16.xpose.msra.mxu1 %v6957_v2  ;;  %10692 = vmatprep.mubr.msk.bf16.mxu1 %vm11443_vm9, %v14228_v22  ;;  %v7050_v51 = vpop.permute.xlu0 %7049  ;;  %v7246_v16 = vpop.permute.xlu1 %7245 }
0x1915   :  { %10702 = vmatprep.subr.bf16.mxu1 %v14228_v22  ;;  %v7251_v23 = vsel %vm1072_vm11, %v7246_v16, 0 }
0x1917   :  { %10687 = vmatmul.mubr.msk.bf16.vlgmr.msra.gmra.mxu0 %vm581_vm10, %v6900_v41 }
0x1918   :  { %10697 = vmatpush3.bf16.xpose.msra.mxu0 %v7007_v24  ;;  %10698 = vmatprep.mubr.msk.bf16.mxu0 %vm11443_vm9, %v14228_v22  ;;  %v7294_v47 = vpop.permute.xlu0 %7293 }
0x1919   :  { %10708 = vmatprep.subr.bf16.mxu0 %v14228_v22  ;;  %v7299_v10 = vsel %vm1072_vm11, %v7294_v47, 0 }
0x191b   :  { %10693 = vmatmul.mubr.msk.bf16.vlgmr.msra.gmra.mxu1 %vm581_vm10, %v6950_v15 }
0x191c   :  { %10703 = vmatpush3.bf16.xpose.msra.mxu1 %v7057_v8  ;;  %10704 = vmatprep.mubr.msk.bf16.mxu1 %vm11443_vm9, %v14228_v22 }
0x191d   :  { %10714 = vmatprep.subr.bf16.mxu1 %v14228_v22 }
0x191f   :  { %10699 = vmatmul.mubr.msk.bf16.vlgmr.msra.gmra.mxu0 %vm581_vm10, %v7000_v29 }
0x1920   :  { %10709 = vmatpush3.bf16.xpose.msra.mxu0 %v7107_v49  ;;  %10710 = vmatprep.mubr.msk.bf16.mxu0 %vm11443_vm9, %v14228_v22 }
0x1921   :  { %10720 = vmatprep.subr.bf16.mxu0 %v14228_v22 }
0x1923   :  { %10705 = vmatmul.mubr.msk.bf16.vlgmr.msra.gmra.mxu1 %vm581_vm10, %v7050_v51 }
0x1924   :  { %10715 = vmatpush3.bf16.msra.mxu1 %v7251_v23  ;;  %10716 = vmatprep.mubr.msk.bf16.mxu1 %vm11443_vm9, %v14228_v22 }
0x1925   :  { %10726 = vmatprep.subr.bf16.mxu1 %v14228_v22 }
0x1927   :  { %10711 = vmatmul.mubr.msk.bf16.vlgmr.msra.gmra.mxu0 %vm581_vm10, %v7100_v50 }
0x1928   :  { %10721 = vmatpush3.bf16.msra.mxu0 %v7299_v10  ;;  %10722 = vmatprep.mubr.msk.bf16.mxu0 %vm11443_vm9, %v14228_v22 }
0x1929   :  { %10732 = vmatprep.subr.bf16.mxu0 %v14228_v22 }
0x197e   :  { %v13488_v6 = vpop.f32.mrf.mxu1 }
0x1980   :  { %v10622_v0 = vpop.f32.mrf.mxu1 }
0x1982   :  { %v6410_v14 = vpop.f32.mrf.mxu1  ;;  %v13490_v37 = vpop.f32.mrf.mxu0 }
0x1984   :  { %v10623_v20 = vpop.f32.mrf.mxu1  ;;  %v10628_v41 = vpop.f32.mrf.mxu0 }
0x1986   :  { %v6458_v35 = vpop.f32.mrf.mxu0  ;;  %v13494_v3 = vpop.f32.mrf.mxu1 }
0x1988   :  { %v10629_v45 = vpop.f32.mrf.mxu0  ;;  %v10634_v25 = vpop.f32.mrf.mxu1 }
0x198a   :  { %v6506_v26 = vpop.f32.mrf.mxu1  ;;  %v13496_v63 = vpop.f32.mrf.mxu0 }
0x198c   :  { %v10635_v4 = vpop.f32.mrf.mxu1  ;;  %v10640_v29 = vpop.f32.mrf.mxu0 }
0x198e   :  { %v6554_v19 = vpop.f32.mrf.mxu0  ;;  %v13500_v15 = vpop.f32.mrf.mxu1 }
0x1990   :  { %v10641_v2 = vpop.f32.mrf.mxu0  ;;  %v10646_v36 = vpop.f32.mrf.mxu1 }
0x1992   :  { %v6602_v24 = vpop.f32.mrf.mxu1  ;;  %v13502_v56 = vpop.f32.mrf.mxu0 }
0x1994   :  { %v10647_v8 = vpop.f32.mrf.mxu1  ;;  %v10652_v51 = vpop.f32.mrf.mxu0 }
0x1996   :  { %v6650_v49 = vpop.f32.mrf.mxu0 }
0x1998   :  { %v10653_v16 = vpop.f32.mrf.mxu0 }
0x19c3   :  { %v13506_v23 = vpop.f32.mrf.mxu1 }
0x19c5   :  { %v10658_v47 = vpop.f32.mrf.mxu1 }
0x19c7   :  { %v6698_v10 = vpop.f32.mrf.mxu1  ;;  %v13508_v0 = vpop.f32.mrf.mxu0 }
0x19c9   :  { %v10659_v20 = vpop.f32.mrf.mxu1  ;;  %v10664_v41 = vpop.f32.mrf.mxu0 }
0x19cb   :  { %v6746_v35 = vpop.f32.mrf.mxu0  ;;  %v6793_v45 = vpop.f32.mrf.mxu1 }
0x19cc   :  { %v6794_v25 = vadd.f32 %v6793_v45, %v11833_v44 }
0x19cd   :  { %v10665_v26 = vpop.f32.mrf.mxu0  ;;  %v10670_v4 = vpop.f32.mrf.mxu1 }
0x19ce   :  { %v7149_v29 = vsel %vm581_vm10, %v6794_v25, -inf }
0x19cf   :  { %v6843_v19 = vpop.f32.mrf.mxu0  ;;  %7150 = vmax.xlane.f32.xlu0 %v7149_v29  ;;  %v6796_v2 = vpop.f32.mrf.mxu1 }
0x19d0   :  { %v6844_v36 = vadd.f32 %v6843_v19, %v11843_v60 }
0x19d1   :  { %v10671_v24 = vpop.f32.mrf.mxu1  ;;  %v10676_v8 = vpop.f32.mrf.mxu0 }
0x19d2   :  { %v7152_v51 = vsel %vm581_vm10, %v6844_v36, -inf }
0x19d3   :  { %7153 = vmax.xlane.f32.xlu1 %v7152_v51  ;;  %v6846_v49 = vpop.f32.mrf.mxu0  ;;  %v6893_v16 = vpop.f32.mrf.mxu1 }
0x19d4   :  { %v6894_v47 = vadd.f32 %v6893_v16, %v11863_v31 }
0x19d5   :  { %v10677_v10 = vpop.f32.mrf.mxu0  ;;  %v10682_v20 = vpop.f32.mrf.mxu1 }
0x19d6   :  { %v7155_v41 = vsel %vm581_vm10, %v6894_v47, -inf }
0x19d7   :  { %v6943_v35 = vpop.f32.mrf.mxu0  ;;  %7156 = vmax.xlane.f32.xlu0 %v7155_v41  ;;  %v6896_v45 = vpop.f32.mrf.mxu1 }
0x19d8   :  { %v6944_v26 = vadd.f32 %v6943_v35, %v11846_v61 }
0x19d9   :  { %v10683_v4 = vpop.f32.mrf.mxu1  ;;  %v10688_v29 = vpop.f32.mrf.mxu0 }
0x19da   :  { %v7158_v19 = vsel %vm581_vm10, %v6944_v26, -inf }
0x19db   :  { %v6946_v2 = vpop.f32.mrf.mxu0  ;;  %7159 = vmax.xlane.f32.xlu0 %v7158_v19  ;;  %v6993_v24 = vpop.f32.mrf.mxu1 }
0x19dc   :  { %v6994_v8 = vadd.f32 %v6993_v24, %v11886_v46 }
0x19dd   :  { %v10689_v51 = vpop.f32.mrf.mxu0  ;;  %v10694_v49 = vpop.f32.mrf.mxu1 }
0x19de   :  { %v7161_v16 = vsel %vm581_vm10, %v6994_v8, -inf }
0x19df   :  { %v7043_v10 = vpop.f32.mrf.mxu0  ;;  %7162 = vmax.xlane.f32.xlu1 %v7161_v16  ;;  %v6996_v20 = vpop.f32.mrf.mxu1 }
0x19e0   :  { %v7044_v41 = vadd.f32 %v7043_v10, %v14250_v62 }
0x19e1   :  { %v10695_v45 = vpop.f32.mrf.mxu1  ;;  %v10700_v35 = vpop.f32.mrf.mxu0 }
0x19e2   :  { %v7164_v4 = vsel %vm581_vm10, %v7044_v41, -inf }
0x19e3   :  { %v7046_v29 = vpop.f32.mrf.mxu0  ;;  %7165 = vmax.xlane.f32.xlu0 %v7164_v4  ;;  %v7093_v2 = vpop.f32.mrf.mxu1 }
0x19e4   :  { %v13525_v19 = vadd.f32 %v7093_v2, %v11890_v58  ;;  %v13535_v2 = vpop.permute.xlu1 %7341 }
0x19e5   :  { %v10701_v24 = vpop.f32.mrf.mxu0  ;;  %v10706_v51 = vpop.f32.mrf.mxu1 }
0x19e6   :  { %v7167_v49 = vsel %vm581_vm10, %v13525_v19, -inf }
0x19e7   :  { %v7143_v50 = vpop.f32.mrf.mxu0  ;;  %7168 = vmax.xlane.f32.xlu1 %v7167_v49  ;;  %v7096_v16 = vpop.f32.mrf.mxu1 }
0x19e8   :  { %v7144_v10 = vadd.f32 %v7143_v50, %v11871_v21  ;;  %v13537_v24 = vpop.permute.xlu1 %7389 }
0x19e9   :  { %v10707_v20 = vpop.f32.mrf.mxu1  ;;  %v10712_v45 = vpop.f32.mrf.mxu0 }
0x19ea   :  { %v7170_v35 = vsel %vm581_vm10, %v7144_v10, -inf }
0x19eb   :  { %v7146_v29 = vpop.f32.mrf.mxu0  ;;  %7171 = vmax.xlane.f32.xlu0 %v7170_v35 }
0x19ed   :  { %v10713_v4 = vpop.f32.mrf.mxu0 }
0x19f8   :  { %7485 = vrot.lane.b32.xlu1 %v13018_v9, %s11452_s23 }
0x1a01   :  { %7437 = vrot.lane.b32.xlu0 %v13012_v34, %s11452_s23 }
0x1a58   :  { %v7151_v51 = vpop.xlane.xlu0 %7150 }
0x1a59   :  { %v7173_v49 = vsub.f32 %v6794_v25, %v7151_v51 }
0x1a5b   :  { %v7181_v50 = vmul.f32 1.442695, %v7173_v49 }
0x1a5c   :  { %v7154_v16 = vpop.xlane.xlu1 %7153 }
0x1a5d   :  { %11323 = vpow2.f32 %v7181_v50  ;;  %v7174_v20 = vsub.f32 %v6844_v36, %v7154_v16 }
0x1a5f   :  { %v7183_v45 = vmul.f32 1.442695, %v7174_v20 }
0x1a60   :  { %v7157_v29 = vpop.xlane.xlu0 %7156 }
0x1a61   :  { %11325 = vpow2.f32 %v7183_v45  ;;  %v7175_v35 = vsub.f32 %v6894_v47, %v7157_v29 }
0x1a63   :  { %v7185_v4 = vmul.f32 1.442695, %v7175_v35 }
0x1a64   :  { %v7160_v43 = vpop.xlane.xlu0 %7159 }
0x1a65   :  { %11327 = vpow2.f32 %v7185_v4  ;;  %v7176_v14 = vsub.f32 %v6944_v26, %v7160_v43 }
0x1a67   :  { %v7187_v11 = vmul.f32 1.442695, %v7176_v14 }
0x1a68   :  { %v7163_v13 = vpop.xlane.xlu1 %7162 }
0x1a69   :  { %11329 = vpow2.f32 %v7187_v11  ;;  %v7177_v33 = vsub.f32 %v6994_v8, %v7163_v13 }
0x1a6a   :  { %v13539_v27 = vpop.eup %11323 }
0x1a6b   :  { %v7189_v5 = vmul.f32 1.442695, %v7177_v33  ;;  %v7197_v25 = vsel %vm581_vm10, %v13539_v27, 0.0 }
0x1a6c   :  { %7198 = vadd.xlane.f32.xlu1 %v7197_v25  ;;  %v7166_v36 = vpop.xlane.xlu0 %7165 }
0x1a6d   :  { %11331 = vpow2.f32 %v7189_v5  ;;  %v7178_v51 = vsub.f32 %v7044_v41, %v7166_v36 }
0x1a6e   :  { %v13543_v49 = vpop.eup %11325 }
0x1a6f   :  { %v7191_v47 = vmul.f32 1.442695, %v7178_v51  ;;  %v7200_v43 = vsel %vm581_vm10, %v13543_v49, 0.0 }
0x1a70   :  { %7201 = vadd.xlane.f32.xlu0 %v7200_v43  ;;  %v7169_v50 = vpop.xlane.xlu1 %7168 }
0x1a71   :  { %11333 = vpow2.f32 %v7191_v47  ;;  %v7179_v16 = vsub.f32 %v13525_v19, %v7169_v50 }
0x1a72   :  { %v13547_v11 = vpop.eup %11327 }
0x1a73   :  { %v7203_v13 = vsel %vm581_vm10, %v13547_v11, 0.0  ;;  %v7193_v45 = vmul.f32 1.442695, %v7179_v16 }
0x1a74   :  { %7204 = vadd.xlane.f32.xlu1 %v7203_v13  ;;  %v7172_v20 = vpop.xlane.xlu0 %7171  ;;  %v7486_v19 = vpop.permute.xlu1 %7485 }
0x1a75   :  { %v7180_v29 = vsub.f32 %v7144_v10, %v7172_v20  ;;  %11335 = vpow2.f32 %v7193_v45  ;;  %v7347_v20 = vsel %vm1072_vm11, %v13535_v2, 0 }
0x1a76   :  { %v13551_v33 = vpop.eup %11329 }
0x1a77   :  { %v7206_v5 = vsel %vm581_vm10, %v13551_v33, 0.0  ;;  %v7195_v35 = vmul.f32 1.442695, %v7180_v29 }
0x1a78   :  { %7207 = vadd.xlane.f32.xlu0 %v7206_v5  ;;  %v7438_v10 = vpop.permute.xlu0 %7437 }
0x1a79   :  { %11337 = vpow2.f32 %v7195_v35 }
0x1a7a   :  { %v13555_v14 = vpop.eup %11331 }
0x1a7b   :  { %v7209_v26 = vsel %vm581_vm10, %v13555_v14, 0.0 }
0x1a7c   :  { %7210 = vadd.xlane.f32.xlu1 %v7209_v26 }
0x1a7e   :  { %v13559_v8 = vpop.eup %11333 }
0x1a7f   :  { %v7212_v41 = vsel %vm581_vm10, %v13559_v8, 0.0 }
0x1a80   :  { %7213 = vadd.xlane.f32.xlu0 %v7212_v41 }
0x1a82   :  { %v13568_v4 = vpop.eup %11335 }
0x1a83   :  { %v7215_v25 = vsel %vm581_vm10, %v13568_v4, 0.0 }
0x1a86   :  { %v13572_v36 = vpop.eup %11337 }
0x1a87   :  { %v7218_v51 = vsel %vm581_vm10, %v13572_v36, 0.0 }
0x1a8d   :  { %7581 = vrot.lane.b32.xlu1 %v13024_v17, %s11452_s23 }
0x1a96   :  { %7533 = vrot.lane.b32.xlu0 %v13016_v30, %s11452_s23 }
0x1ab1   :  { %7216 = vadd.xlane.f32.xlu1 %v7215_v25  ;;  %v7395_v25 = vsel %vm1072_vm11, %v13537_v24, 0 }
0x1ab5   :  { %7219 = vadd.xlane.f32.xlu0 %v7218_v51 }
0x1ac2   :  { %7681 = vrot.lane.b32.xlu1 %v13002_v57, %s11453_s24 }
0x1ac6   :  { %7679 = vrot.lane.b32.xlu1 %v13002_v57, %s11454_s25 }
0x1aca   :  { %7781 = vrot.lane.b32.xlu1 %v13008_v28, %s11453_s24 }
0x1acb   :  { %7631 = vrot.lane.b32.xlu0 %v12996_v40, %s11453_s24 }
0x1ace   :  { %7779 = vrot.lane.b32.xlu1 %v13008_v28, %s11454_s25 }
0x1acf   :  { %7629 = vrot.lane.b32.xlu0 %v12996_v40, %s11454_s25 }
0x1ad2   :  { %7881 = vrot.lane.b32.xlu1 %v13018_v9, %s11453_s24 }
0x1ad3   :  { %7731 = vrot.lane.b32.xlu0 %v13000_v55, %s11453_s24 }
0x1ad6   :  { %7879 = vrot.lane.b32.xlu1 %v13018_v9, %s11454_s25 }
0x1ad7   :  { %7729 = vrot.lane.b32.xlu0 %v13000_v55, %s11454_s25 }
0x1ada   :  { %7981 = vrot.lane.b32.xlu1 %v13024_v17, %s11453_s24 }
0x1adb   :  { %7831 = vrot.lane.b32.xlu0 %v13012_v34, %s11453_s24 }
0x1ade   :  { %7979 = vrot.lane.b32.xlu1 %v13024_v17, %s11454_s25 }
0x1adf   :  { %7829 = vrot.lane.b32.xlu0 %v13012_v34, %s11454_s25 }
0x1ae2   :  { %8125 = vrot.lane.b32.xlu1 %v12996_v40, %s11455_s26 }
0x1ae3   :  { %7931 = vrot.lane.b32.xlu0 %v13016_v30, %s11453_s24 }
0x1ae7   :  { %7929 = vrot.lane.b32.xlu0 %v13016_v30, %s11454_s25 }
0x1af5   :  { %v7199_v47 = vpop.xlane.xlu1 %7198 }
0x1af6   :  { %11339 = vrcp.f32 %v7199_v47  ;;  %v7443_v47 = vsel %vm1072_vm11, %v7438_v10, 0 }
0x1af9   :  { %v7202_v43 = vpop.xlane.xlu0 %7201 }
0x1afa   :  { %11341 = vrcp.f32 %v7202_v43 }
0x1afd   :  { %v7205_v13 = vpop.xlane.xlu1 %7204 }
0x1afe   :  { %11343 = vrcp.f32 %v7205_v13  ;;  %v7491_v13 = vsel %vm1072_vm11, %v7486_v19, 0 }
0x1b01   :  { %v7208_v5 = vpop.xlane.xlu0 %7207 }
0x1b02   :  { %11345 = vrcp.f32 %v7208_v5 }
0x1b03   :  { %v11340_v26 = vpop.eup %11339 }
0x1b04   :  { %v7229_v41 = vmul.f32 %v11340_v26, %v13539_v27 }
0x1b05   :  { %v7211_v40 = vpop.xlane.xlu1 %7210 }
0x1b06   :  { %v7237_v50 = vpack.c.bf16 %v7229_v41, %v7229_v41  ;;  %11347 = vrcp.f32 %v7211_v40 }
0x1b07   :  { %v11342_v16 = vpop.eup %11341 }
0x1b08   :  { %v7230_v45 = vmul.f32 %v11342_v16, %v13543_v49  ;;  %10717 = vmatmul.mubr.msk.bf16.vlgmr.msra.gmra.mxu1 %vm581_vm10, %v7237_v50 }
0x1b09   :  { %10727 = vmatpush3.bf16.msra.mxu1 %v7347_v20  ;;  %v7214_v29 = vpop.xlane.xlu0 %7213  ;;  %10728 = vmatprep.mubr.msk.bf16.mxu1 %vm11443_vm9, %v14228_v22  ;;  %v7582_v19 = vpop.permute.xlu1 %7581 }
0x1b0a   :  { %v7238_v35 = vpack.c.bf16 %v7230_v45, %v7230_v45  ;;  %11349 = vrcp.f32 %v7214_v29  ;;  %10738 = vmatprep.subr.bf16.mxu1 %v14228_v22  ;;  %v7587_v50 = vsel %vm1072_vm11, %v7582_v19, 0 }
0x1b0b   :  { %v11344_v27 = vpop.eup %11343 }
0x1b0c   :  { %v7231_v51 = vmul.f32 %v11344_v27, %v13547_v11  ;;  %10723 = vmatmul.mubr.msk.bf16.vlgmr.msra.gmra.mxu0 %vm581_vm10, %v7238_v35 }
0x1b0d   :  { %10733 = vmatpush3.bf16.msra.mxu0 %v7395_v25  ;;  %10734 = vmatprep.mubr.msk.bf16.mxu0 %vm11443_vm9, %v14228_v22  ;;  %v7534_v26 = vpop.permute.xlu0 %7533 }
0x1b0e   :  { %v7239_v2 = vpack.c.bf16 %v7231_v51, %v7231_v51  ;;  %10744 = vmatprep.subr.bf16.mxu0 %v14228_v22  ;;  %v7539_v40 = vsel %vm1072_vm11, %v7534_v26, 0 }
0x1b0f   :  { %v11346_v49 = vpop.eup %11345 }
0x1b10   :  { %v7232_v43 = vmul.f32 %v11346_v49, %v13551_v33  ;;  %10729 = vmatmul.mubr.msk.bf16.vlgmr.msra.gmra.mxu1 %vm581_vm10, %v7239_v2 }
0x1b11   :  { %10739 = vmatpush3.bf16.msra.mxu1 %v7443_v47  ;;  %10740 = vmatprep.mubr.msk.bf16.mxu1 %vm11443_vm9, %v14228_v22 }
0x1b12   :  { %v7240_v24 = vpack.c.bf16 %v7232_v43, %v7232_v43  ;;  %10750 = vmatprep.subr.bf16.mxu1 %v14228_v22 }
0x1b13   :  { %v11348_v11 = vpop.eup %11347 }
0x1b14   :  { %v7233_v5 = vmul.f32 %v11348_v11, %v13555_v14  ;;  %10735 = vmatmul.mubr.msk.bf16.vlgmr.msra.gmra.mxu0 %vm581_vm10, %v7240_v24 }
0x1b15   :  { %10745 = vmatpush3.bf16.msra.mxu0 %v7491_v13  ;;  %10746 = vmatprep.mubr.msk.bf16.mxu0 %vm11443_vm9, %v14228_v22 }
0x1b16   :  { %v7241_v33 = vpack.c.bf16 %v7233_v5, %v7233_v5  ;;  %10756 = vmatprep.subr.bf16.mxu0 %v14228_v22 }
0x1b17   :  { %v11350_v10 = vpop.eup %11349 }
0x1b18   :  { %v7234_v41 = vmul.f32 %v11350_v10, %v13559_v8  ;;  %10741 = vmatmul.mubr.msk.bf16.vlgmr.msra.gmra.mxu1 %vm581_vm10, %v7241_v33 }
0x1b19   :  { %10751 = vmatpush3.bf16.msra.mxu1 %v7539_v40  ;;  %10752 = vmatprep.mubr.msk.bf16.mxu1 %vm11443_vm9, %v14228_v22 }
0x1b1a   :  { %v7242_v14 = vpack.c.bf16 %v7234_v41, %v7234_v41  ;;  %10762 = vmatprep.subr.bf16.mxu1 %v14228_v22 }
0x1b1c   :  { %10747 = vmatmul.mubr.msk.bf16.vlgmr.msra.gmra.mxu0 %vm581_vm10, %v7242_v14 }
0x1b1d   :  { %10757 = vmatpush3.bf16.msra.mxu0 %v7587_v50  ;;  %10758 = vmatprep.mubr.msk.bf16.mxu0 %vm11443_vm9, %v14228_v22 }
0x1b1e   :  { %10768 = vmatprep.subr.bf16.mxu0 %v14228_v22 }
0x1b3a   :  { %v7217_v8 = vpop.xlane.xlu1 %7216 }
0x1b3b   :  { %11351 = vrcp.f32 %v7217_v8 }
0x1b3e   :  { %v7682_v16 = vpop.permute.xlu1 %7681  ;;  %v7220_v20 = vpop.xlane.xlu0 %7219 }
0x1b3f   :  { %11353 = vrcp.f32 %v7220_v20 }
0x1b42   :  { %v7680_v45 = vpop.permute.xlu1 %7679  ;;  %v7632_v29 = vpop.permute.xlu0 %7631 }
0x1b43   :  { %v7637_v11 = vsel %vm581_vm10, %v7632_v29, 0 }
0x1b46   :  { %v7782_v35 = vpop.permute.xlu1 %7781  ;;  %v7630_v27 = vpop.permute.xlu0 %7629 }
0x1b47   :  { %v7787_v41 = vsel %vm581_vm10, %v7782_v35, 0 }
0x1b48   :  { %v11352_v25 = vpop.eup %11351 }
0x1b49   :  { %v7235_v51 = vmul.f32 %v11352_v25, %v13568_v4  ;;  %v7687_v4 = vsel %vm581_vm10, %v7682_v16, 0 }
0x1b4a   :  { %v7732_v2 = vpop.permute.xlu0 %7731  ;;  %v7780_v43 = vpop.permute.xlu1 %7779 }
0x1b4b   :  { %v7243_v49 = vpack.c.bf16 %v7235_v51, %v7235_v51 }
0x1b4c   :  { %v11354_v47 = vpop.eup %11353 }
0x1b4d   :  { %v7236_v24 = vmul.f32 %v11354_v47, %v13572_v36  ;;  %10753 = vmatmul.mubr.msk.bf16.vlgmr.msra.gmra.mxu1 %vm581_vm10, %v7243_v49  ;;  %v7737_v36 = vsel %vm581_vm10, %v7732_v2, 0 }
0x1b4e   :  { %10763 = vmatpush3.bf16.xpose.msra.mxu1 %v7637_v11  ;;  %10764 = vmatprep.mubr.msk.bf16.mxu1 %vm11443_vm9, %v14228_v22  ;;  %v7730_v5 = vpop.permute.xlu0 %7729  ;;  %v7882_v26 = vpop.permute.xlu1 %7881 }
0x1b4f   :  { %v7244_v13 = vpack.c.bf16 %v7236_v24, %v7236_v24  ;;  %10774 = vmatprep.subr.bf16.mxu1 %v14228_v22  ;;  %v7887_v50 = vsel %vm581_vm10, %v7882_v26, 0 }
0x1b51   :  { %10759 = vmatmul.mubr.msk.bf16.vlgmr.msra.gmra.mxu0 %vm581_vm10, %v7244_v13 }
0x1b52   :  { %10769 = vmatpush3.bf16.xpose.msra.mxu0 %v7687_v4  ;;  %10770 = vmatprep.mubr.msk.bf16.mxu0 %vm11443_vm9, %v14228_v22  ;;  %v7832_v33 = vpop.permute.xlu0 %7831  ;;  %v7880_v10 = vpop.permute.xlu1 %7879 }
0x1b53   :  { %10780 = vmatprep.subr.bf16.mxu0 %v14228_v22  ;;  %v7837_v19 = vsel %vm581_vm10, %v7832_v33, 0 }
0x1b55   :  { %10765 = vmatmul.mubr.msk.bf16.vlgmr.msra.gmra.mxu1 %vm581_vm10, %v7630_v27 }
0x1b56   :  { %10775 = vmatpush3.bf16.xpose.msra.mxu1 %v7737_v36  ;;  %10776 = vmatprep.mubr.msk.bf16.mxu1 %vm11443_vm9, %v14228_v22  ;;  %v7830_v40 = vpop.permute.xlu0 %7829  ;;  %v7982_v14 = vpop.permute.xlu1 %7981 }
0x1b57   :  { %10786 = vmatprep.subr.bf16.mxu1 %v14228_v22 }
0x1b59   :  { %10771 = vmatmul.mubr.msk.bf16.vlgmr.msra.gmra.mxu0 %vm581_vm10, %v7680_v45  ;;  %v7987_v45 = vsel %vm581_vm10, %v7982_v14, 0 }
0x1b5a   :  { %10781 = vmatpush3.bf16.xpose.msra.mxu0 %v7787_v41  ;;  %10782 = vmatprep.mubr.msk.bf16.mxu0 %vm11443_vm9, %v14228_v22  ;;  %v7932_v8 = vpop.permute.xlu0 %7931  ;;  %v7980_v16 = vpop.permute.xlu1 %7979 }
0x1b5b   :  { %10792 = vmatprep.subr.bf16.mxu0 %v14228_v22  ;;  %v7937_v20 = vsel %vm581_vm10, %v7932_v8, 0 }
0x1b5d   :  { %10777 = vmatmul.mubr.msk.bf16.vlgmr.msra.gmra.mxu1 %vm581_vm10, %v7730_v5 }
0x1b5e   :  { %10787 = vmatpush3.bf16.xpose.msra.mxu1 %v7837_v19  ;;  %10788 = vmatprep.mubr.msk.bf16.mxu1 %vm11443_vm9, %v14228_v22  ;;  %v8126_v29 = vpop.permute.xlu1 %8125  ;;  %v7930_v35 = vpop.permute.xlu0 %7929 }
0x1b5f   :  { %10798 = vmatprep.subr.bf16.mxu1 %v14228_v22  ;;  %v8131_v27 = vsel %vm1072_vm11, %v8126_v29, 0 }
0x1b61   :  { %10783 = vmatmul.mubr.msk.bf16.vlgmr.msra.gmra.mxu0 %vm581_vm10, %v7780_v43 }
0x1b62   :  { %10793 = vmatpush3.bf16.xpose.msra.mxu0 %v7887_v50  ;;  %10794 = vmatprep.mubr.msk.bf16.mxu0 %vm11443_vm9, %v14228_v22 }
0x1b63   :  { %10804 = vmatprep.subr.bf16.mxu0 %v14228_v22 }
0x1b65   :  { %10789 = vmatmul.mubr.msk.bf16.vlgmr.msra.gmra.mxu1 %vm581_vm10, %v7830_v40 }
0x1b66   :  { %10799 = vmatpush3.bf16.xpose.msra.mxu1 %v7937_v20  ;;  %10800 = vmatprep.mubr.msk.bf16.mxu1 %vm11443_vm9, %v14228_v22 }
0x1b67   :  { %10810 = vmatprep.subr.bf16.mxu1 %v14228_v22 }
0x1b69   :  { %10795 = vmatmul.mubr.msk.bf16.vlgmr.msra.gmra.mxu0 %vm581_vm10, %v7880_v10 }
0x1b6a   :  { %10805 = vmatpush3.bf16.xpose.msra.mxu0 %v7987_v45  ;;  %10806 = vmatprep.mubr.msk.bf16.mxu0 %vm11443_vm9, %v14228_v22 }
0x1b6b   :  { %10816 = vmatprep.subr.bf16.mxu0 %v14228_v22 }
0x1b6d   :  { %10801 = vmatmul.mubr.msk.bf16.vlgmr.msra.gmra.mxu1 %vm581_vm10, %v7930_v35 }
0x1b6e   :  { %10811 = vmatpush3.bf16.msra.mxu1 %v8131_v27  ;;  %10812 = vmatprep.mubr.msk.bf16.mxu1 %vm11443_vm9, %v14228_v22 }
0x1b6f   :  { %10822 = vmatprep.subr.bf16.mxu1 %v14228_v22 }
0x1b71   :  { %10807 = vmatmul.mubr.msk.bf16.vlgmr.msra.gmra.mxu0 %vm581_vm10, %v7980_v16 }
0x1b72   :  { %10818 = vmatprep.mubr.msk.bf16.mxu0 %vm11443_vm9, %v14228_v22 }
0x1bc8   :  { %v13698_v25 = vpop.f32.mrf.mxu1 }
0x1bca   :  { %v10718_v51 = vpop.f32.mrf.mxu1 }
0x1bcc   :  { %v7290_v2 = vpop.f32.mrf.mxu1  ;;  %v13700_v49 = vpop.f32.mrf.mxu0 }
0x1bcd   :  { %v10997_v47 = vpack.i.bf16 %v13700_v49, %v13698_v25 }
0x1bce   :  { %v10719_v43 = vpop.f32.mrf.mxu1  ;;  %v10724_v24 = vpop.f32.mrf.mxu0 }
0x1bd0   :  { %v7338_v11 = vpop.f32.mrf.mxu0  ;;  %v13704_v13 = vpop.f32.mrf.mxu1 }
0x1bd2   :  { %v10725_v5 = vpop.f32.mrf.mxu0  ;;  %v10730_v4 = vpop.f32.mrf.mxu1 }
0x1bd4   :  { %v7386_v26 = vpop.f32.mrf.mxu1  ;;  %v13706_v36 = vpop.f32.mrf.mxu0 }
0x1bd5   :  { %v11002_v33 = vpack.i.bf16 %v13706_v36, %v13704_v13 }
0x1bd6   :  { %v10731_v10 = vpop.f32.mrf.mxu1  ;;  %v10736_v41 = vpop.f32.mrf.mxu0 }
0x1bd8   :  { %v7434_v40 = vpop.f32.mrf.mxu0  ;;  %v13710_v19 = vpop.f32.mrf.mxu1 }
0x1bda   :  { %v10737_v14 = vpop.f32.mrf.mxu0  ;;  %v10742_v50 = vpop.f32.mrf.mxu1 }
0x1bdc   :  { %v7482_v8 = vpop.f32.mrf.mxu1  ;;  %v13712_v16 = vpop.f32.mrf.mxu0 }
0x1bdd   :  { %v11022_v20 = vpack.i.bf16 %v13712_v16, %v13710_v19 }
0x1bde   :  { %v10743_v45 = vpop.f32.mrf.mxu1  ;;  %v10748_v29 = vpop.f32.mrf.mxu0 }
0x1be0   :  { %v7530_v35 = vpop.f32.mrf.mxu0 }
0x1be2   :  { %v10749_v27 = vpop.f32.mrf.mxu0 }
0x1c0d   :  { %v13716_v51 = vpop.f32.mrf.mxu1 }
0x1c0f   :  { %v10754_v2 = vpop.f32.mrf.mxu1 }
0x1c11   :  { %v7578_v43 = vpop.f32.mrf.mxu1  ;;  %v13718_v24 = vpop.f32.mrf.mxu0 }
0x1c12   :  { %v11032_v11 = vpack.i.bf16 %v13718_v24, %v13716_v51 }
0x1c13   :  { %v10755_v5 = vpop.f32.mrf.mxu1  ;;  %v10760_v4 = vpop.f32.mrf.mxu0 }
0x1c15   :  { %v7626_v26 = vpop.f32.mrf.mxu0  ;;  %v7673_v10 = vpop.f32.mrf.mxu1 }
0x1c16   :  { %v7674_v41 = vadd.f32 %v7673_v10, %v11833_v44 }
0x1c17   :  { %v10761_v40 = vpop.f32.mrf.mxu0  ;;  %v10766_v14 = vpop.f32.mrf.mxu1 }
0x1c18   :  { %v8029_v50 = vsel %vm581_vm10, %v7674_v41, -inf }
0x1c19   :  { %v7723_v8 = vpop.f32.mrf.mxu0  ;;  %8030 = vmax.xlane.f32.xlu0 %v8029_v50  ;;  %v7676_v45 = vpop.f32.mrf.mxu1 }
0x1c1a   :  { %v7724_v29 = vadd.f32 %v7723_v8, %v11843_v60 }
0x1c1b   :  { %v10767_v35 = vpop.f32.mrf.mxu1  ;;  %v10772_v27 = vpop.f32.mrf.mxu0 }
0x1c1c   :  { %v8032_v2 = vsel %vm581_vm10, %v7724_v29, -inf }
0x1c1d   :  { %8033 = vmax.xlane.f32.xlu1 %v8032_v2  ;;  %v7726_v43 = vpop.f32.mrf.mxu0  ;;  %v7773_v5 = vpop.f32.mrf.mxu1 }
0x1c1e   :  { %v7774_v4 = vadd.f32 %v7773_v5, %v11863_v31 }
0x1c1f   :  { %v10773_v26 = vpop.f32.mrf.mxu0  ;;  %v10778_v44 = vpop.f32.mrf.mxu1 }
0x1c20   :  { %v8035_v10 = vsel %vm581_vm10, %v7774_v4, -inf }
0x1c21   :  { %v7823_v40 = vpop.f32.mrf.mxu0  ;;  %8036 = vmax.xlane.f32.xlu0 %v8035_v10  ;;  %v7776_v14 = vpop.f32.mrf.mxu1 }
0x1c22   :  { %v7824_v50 = vadd.f32 %v7823_v40, %v11846_v61 }
0x1c23   :  { %v10779_v45 = vpop.f32.mrf.mxu1  ;;  %v10784_v60 = vpop.f32.mrf.mxu0 }
0x1c24   :  { %v8038_v8 = vsel %vm581_vm10, %v7824_v50, -inf }
0x1c25   :  { %v7826_v35 = vpop.f32.mrf.mxu0  ;;  %8039 = vmax.xlane.f32.xlu0 %v8038_v8  ;;  %v7873_v27 = vpop.f32.mrf.mxu1 }
0x1c26   :  { %v13731_v2 = vadd.f32 %v7873_v27, %v11886_v46 }
0x1c27   :  { %v10785_v31 = vpop.f32.mrf.mxu0  ;;  %v10790_v43 = vpop.f32.mrf.mxu1 }
0x1c28   :  { %v8041_v5 = vsel %vm581_vm10, %v13731_v2, -inf }
0x1c29   :  { %v7923_v26 = vpop.f32.mrf.mxu0  ;;  %8042 = vmax.xlane.f32.xlu1 %v8041_v5  ;;  %v7876_v44 = vpop.f32.mrf.mxu1 }
0x1c2a   :  { %v13736_v61 = vadd.f32 %v7923_v26, %v14250_v62 }
0x1c2b   :  { %v10791_v10 = vpop.f32.mrf.mxu1  ;;  %v10796_v40 = vpop.f32.mrf.mxu0 }
0x1c2c   :  { %v8044_v14 = vsel %vm581_vm10, %v13736_v61, -inf }
0x1c2d   :  { %v7926_v45 = vpop.f32.mrf.mxu0  ;;  %8045 = vmax.xlane.f32.xlu0 %v8044_v14  ;;  %v7973_v46 = vpop.f32.mrf.mxu1 }
0x1c2e   :  { %v7974_v60 = vadd.f32 %v7973_v46, %v11890_v58 }
0x1c2f   :  { %v10797_v8 = vpop.f32.mrf.mxu0  ;;  %v10802_v35 = vpop.f32.mrf.mxu1 }
0x1c30   :  { %v8047_v27 = vsel %vm581_vm10, %v7974_v60, -inf }
0x1c31   :  { %v8023_v31 = vpop.f32.mrf.mxu0  ;;  %8048 = vmax.xlane.f32.xlu1 %v8047_v27  ;;  %v7976_v43 = vpop.f32.mrf.mxu1 }
0x1c32   :  { %v8024_v62 = vadd.f32 %v8023_v31, %v11871_v21 }
0x1c33   :  { %v10803_v5 = vpop.f32.mrf.mxu1  ;;  %v10808_v26 = vpop.f32.mrf.mxu0 }
0x1c34   :  { %v8050_v44 = vsel %vm581_vm10, %v8024_v62, -inf }
0x1c35   :  { %v8026_v10 = vpop.f32.mrf.mxu0  ;;  %8051 = vmax.xlane.f32.xlu0 %v8050_v44 }
0x1c37   :  { %v10809_v40 = vpop.f32.mrf.mxu0 }
0x1c42   :  { %8221 = vrot.lane.b32.xlu1 %v13000_v55, %s11455_s26 }
0x1c46   :  { %8269 = vrot.lane.b32.xlu1 %v13008_v28, %s11455_s26 }
0x1c4b   :  { %8173 = vrot.lane.b32.xlu0 %v13002_v57, %s11455_s26 }
0x1ca2   :  { %v8031_v58 = vpop.xlane.xlu0 %8030 }
0x1ca3   :  { %v8053_v14 = vsub.f32 %v7674_v41, %v8031_v58 }
0x1ca5   :  { %v8061_v45 = vmul.f32 1.442695, %v8053_v14 }
0x1ca6   :  { %v8034_v21 = vpop.xlane.xlu1 %8033 }
0x1ca7   :  { %11355 = vpow2.f32 %v8061_v45  ;;  %v8054_v46 = vsub.f32 %v7724_v29, %v8034_v21 }
0x1ca9   :  { %v8063_v8 = vmul.f32 1.442695, %v8054_v46 }
0x1caa   :  { %v8037_v35 = vpop.xlane.xlu0 %8036 }
0x1cab   :  { %11357 = vpow2.f32 %v8063_v8  ;;  %v8055_v27 = vsub.f32 %v7774_v4, %v8037_v35 }
0x1cad   :  { %v8065_v31 = vmul.f32 1.442695, %v8055_v27 }
0x1cae   :  { %v8040_v43 = vpop.xlane.xlu0 %8039 }
0x1caf   :  { %11359 = vpow2.f32 %v8065_v31  ;;  %v8056_v55 = vsub.f32 %v7824_v50, %v8040_v43 }
0x1cb1   :  { %v8067_v5 = vmul.f32 1.442695, %v8056_v55 }
0x1cb2   :  { %v8043_v45 = vpop.xlane.xlu1 %8042 }
0x1cb3   :  { %11361 = vpow2.f32 %v8067_v5  ;;  %v8057_v21 = vsub.f32 %v13731_v2, %v8043_v45 }
0x1cb4   :  { %v13750_v28 = vpop.eup %11355 }
0x1cb5   :  { %v8077_v57 = vsel %vm581_vm10, %v13750_v28, 0.0  ;;  %v8069_v35 = vmul.f32 1.442695, %v8057_v21 }
0x1cb6   :  { %8078 = vadd.xlane.f32.xlu1 %v8077_v57  ;;  %v8046_v26 = vpop.xlane.xlu0 %8045 }
0x1cb7   :  { %v8058_v8 = vsub.f32 %v13736_v61, %v8046_v26  ;;  %11363 = vpow2.f32 %v8069_v35  ;;  %v14251_v26 = vpack.i.bf16 %v13496_v63, %v13494_v3  ;;  %v14254_v3 = vpack.i.bf16 %v13502_v56, %v13500_v15 }
0x1cb8   :  { %v13754_v41 = vpop.eup %11357 }
0x1cb9   :  { %v8080_v29 = vsel %vm581_vm10, %v13754_v41, 0.0  ;;  %v8071_v31 = vmul.f32 1.442695, %v8058_v8 }
0x1cba   :  { %8081 = vadd.xlane.f32.xlu0 %v8080_v29  ;;  %v8049_v46 = vpop.xlane.xlu1 %8048 }
0x1cbb   :  { %v8059_v27 = vsub.f32 %v7974_v60, %v8049_v46  ;;  %11365 = vpow2.f32 %v8071_v31 }
0x1cbc   :  { %v13758_v4 = vpop.eup %11359 }
0x1cbd   :  { %v8083_v50 = vsel %vm581_vm10, %v13758_v4, 0.0  ;;  %v8073_v43 = vmul.f32 1.442695, %v8059_v27 }
0x1cbe   :  { %8084 = vadd.xlane.f32.xlu1 %v8083_v50  ;;  %v8052_v44 = vpop.xlane.xlu0 %8051  ;;  %v14252_v50 = vpack.i.bf16 %v13508_v0, %v13506_v23 }
0x1cbf   :  { %v8060_v55 = vsub.f32 %v8024_v62, %v8052_v44  ;;  %11367 = vpow2.f32 %v8073_v43 }
0x1cc0   :  { %v13762_v10 = vpop.eup %11361 }
0x1cc1   :  { %v8086_v40 = vsel %vm581_vm10, %v13762_v10, 0.0  ;;  %v8075_v5 = vmul.f32 1.442695, %v8060_v55 }
0x1cc2   :  { %8087 = vadd.xlane.f32.xlu0 %v8086_v40  ;;  %v8174_v58 = vpop.permute.xlu0 %8173 }
0x1cc3   :  { %v8179_v14 = vsel %vm1072_vm11, %v8174_v58, 0  ;;  %11369 = vpow2.f32 %v8075_v5 }
0x1cc4   :  { %10817 = vmatpush3.bf16.msra.mxu0 %v8179_v14 }
0x1cc5   :  { %10828 = vmatprep.subr.bf16.mxu0 %v14228_v22 }
0x1ccf   :  { %8365 = vrot.lane.b32.xlu1 %v13018_v9, %s11455_s26  ;;  %v13774_v9 = vpop.eup %11363 }
0x1cd0   :  { %v13776_v57 = vpop.eup %11365 }
0x1cd1   :  { %v13780_v2 = vpop.eup %11367  ;;  %v8092_v60 = vsel %vm581_vm10, %v13776_v57, 0.0 }
0x1cd2   :  { %v8095_v61 = vsel %vm581_vm10, %v13780_v2, 0.0  ;;  %v13786_v62 = vpop.eup %11369 }
0x1cd3   :  { %v8098_v29 = vsel %vm581_vm10, %v13786_v62, 0.0 }
0x1cd8   :  { %8317 = vrot.lane.b32.xlu0 %v13012_v34, %s11455_s26  ;;  %v8089_v34 = vsel %vm581_vm10, %v13774_v9, 0.0 }
0x1cf3   :  { %8090 = vadd.xlane.f32.xlu1 %v8089_v34 }
0x1cf7   :  { %8096 = vadd.xlane.f32.xlu1 %v8095_v61  ;;  %8093 = vadd.xlane.f32.xlu0 %v8092_v60 }
0x1cfb   :  { %8099 = vadd.xlane.f32.xlu0 %v8098_v29 }
0x1d08   :  { %8461 = vrot.lane.b32.xlu1 %v13024_v17, %s11455_s26  ;;  %v14253_v17 = vpack.i.bf16 %v13490_v37, %v13488_v6 }
0x1d0c   :  { %10993 = vrot.lane.b32.xlu1 %v14251_v26, %s11456_s2 }
0x1d10   :  { %11003 = vrot.lane.b32.xlu1 %v11002_v33, %s11457_s27 }
0x1d11   :  { %8413 = vrot.lane.b32.xlu0 %v13016_v30, %s11455_s26  ;;  %v8222_v30 = vpop.permute.xlu1 %8221 }
0x1d14   :  { %11013 = vrot.lane.b32.xlu1 %v14252_v50, %s11456_s2 }
0x1d15   :  { %10988 = vrot.lane.b32.xlu0 %v14253_v17, %s11456_s2  ;;  %v8270_v63 = vpop.permute.xlu1 %8269 }
0x1d16   :  { %v8275_v44 = vsel %vm1072_vm11, %v8270_v63, 0 }
0x1d19   :  { %10998 = vrot.lane.b32.xlu0 %v10997_v47, %s11457_s27  ;;  %v8227_v47 = vsel %vm1072_vm11, %v8222_v30, 0 }
0x1d1d   :  { %11008 = vrot.lane.b32.xlu0 %v14254_v3, %s11456_s2 }
0x1d3f   :  { %v8079_v13 = vpop.xlane.xlu1 %8078 }
0x1d40   :  { %11371 = vrcp.f32 %v8079_v13 }
0x1d43   :  { %v8082_v23 = vpop.xlane.xlu0 %8081 }
0x1d44   :  { %11373 = vrcp.f32 %v8082_v23 }
0x1d47   :  { %v8085_v0 = vpop.xlane.xlu1 %8084 }
0x1d48   :  { %11375 = vrcp.f32 %v8085_v0  ;;  %v11060_v0 = vld [vmem:[%s14180_s6 + $0x10] sm:$0xff]  }
0x1d4b   :  { %v8088_v6 = vpop.xlane.xlu0 %8087  ;;  %v8366_v21 = vpop.permute.xlu1 %8365 }
0x1d4c   :  { %11377 = vrcp.f32 %v8088_v6  ;;  %v8371_v46 = vsel %vm1072_vm11, %v8366_v21, 0 }
0x1d4d   :  { %v11372_v37 = vpop.eup %11371 }
0x1d4e   :  { %v8109_v36 = vmul.f32 %v11372_v37, %v13750_v28 }
0x1d4f   :  { %v8318_v40 = vpop.permute.xlu0 %8317 }
0x1d50   :  { %v8117_v25 = vpack.c.bf16 %v8109_v36, %v8109_v36  ;;  %v8323_v45 = vsel %vm1072_vm11, %v8318_v40, 0 }
0x1d51   :  { %v11374_v49 = vpop.eup %11373 }
0x1d52   :  { %v8110_v15 = vmul.f32 %v11374_v49, %v13754_v41  ;;  %10813 = vmatmul.mubr.msk.bf16.vlgmr.msra.gmra.mxu1 %vm581_vm10, %v8117_v25 }
0x1d53   :  { %10823 = vmatpush3.bf16.msra.mxu1 %v8227_v47  ;;  %10824 = vmatprep.mubr.msk.bf16.mxu1 %vm11443_vm9, %v14228_v22 }
0x1d54   :  { %v8118_v56 = vpack.c.bf16 %v8110_v15, %v8110_v15  ;;  %10834 = vmatprep.subr.bf16.mxu1 %v14228_v22 }
0x1d55   :  { %v11376_v33 = vpop.eup %11375 }
0x1d56   :  { %v8111_v28 = vmul.f32 %v11376_v33, %v13758_v4  ;;  %10819 = vmatmul.mubr.msk.bf16.vlgmr.msra.gmra.mxu0 %vm581_vm10, %v8118_v56 }
0x1d57   :  { %10829 = vmatpush3.bf16.msra.mxu0 %v8275_v44  ;;  %10830 = vmatprep.mubr.msk.bf16.mxu0 %vm11443_vm9, %v14228_v22 }
0x1d58   :  { %v8119_v41 = vpack.c.bf16 %v8111_v28, %v8111_v28  ;;  %10840 = vmatprep.subr.bf16.mxu0 %v14228_v22 }
0x1d59   :  { %v11378_v58 = vpop.eup %11377 }
0x1d5a   :  { %v8112_v14 = vmul.f32 %v11378_v58, %v13762_v10  ;;  %10825 = vmatmul.mubr.msk.bf16.vlgmr.msra.gmra.mxu1 %vm581_vm10, %v8119_v41 }
0x1d5b   :  { %10835 = vmatpush3.bf16.msra.mxu1 %v8323_v45  ;;  %10836 = vmatprep.mubr.msk.bf16.mxu1 %vm11443_vm9, %v14228_v22 }
0x1d5c   :  { %v8120_v4 = vpack.c.bf16 %v8112_v14, %v8112_v14  ;;  %10846 = vmatprep.subr.bf16.mxu1 %v14228_v22 }
0x1d5e   :  { %10831 = vmatmul.mubr.msk.bf16.vlgmr.msra.gmra.mxu0 %vm581_vm10, %v8120_v4 }
0x1d5f   :  { %10841 = vmatpush3.bf16.msra.mxu0 %v8371_v46  ;;  %10842 = vmatprep.mubr.msk.bf16.mxu0 %vm11443_vm9, %v14228_v22 }
0x1d60   :  { %10852 = vmatprep.subr.bf16.mxu0 %v14228_v22 }
0x1d7c   :  { %v8091_v10 = vpop.xlane.xlu1 %8090 }
0x1d7d   :  { %11379 = vrcp.f32 %v8091_v10 }
0x1d80   :  { %v8097_v8 = vpop.xlane.xlu1 %8096  ;;  %v8094_v35 = vpop.xlane.xlu0 %8093 }
0x1d81   :  { %11381 = vrcp.f32 %v8097_v8 }
0x1d82   :  { %11383 = vrcp.f32 %v8094_v35 }
0x1d84   :  { %v8100_v27 = vpop.xlane.xlu0 %8099  ;;  %v8462_v50 = vpop.permute.xlu1 %8461 }
0x1d85   :  { %11385 = vrcp.f32 %v8100_v27 }
0x1d88   :  { %v8414_v55 = vpop.permute.xlu0 %8413 }
0x1d89   :  { %v8419_v60 = vsel %vm1072_vm11, %v8414_v55, 0 }
0x1d8a   :  { %v11380_v31 = vpop.eup %11379 }
0x1d8b   :  { %v8113_v43 = vmul.f32 %v11380_v31, %v13774_v9  ;;  %v8467_v9 = vsel %vm1072_vm11, %v8462_v50, 0 }
0x1d8d   :  { %v8121_v5 = vpack.c.bf16 %v8113_v43, %v8113_v43 }
0x1d8e   :  { %v11382_v34 = vpop.eup %11381 }
0x1d8f   :  { %v11384_v61 = vpop.eup %11383  ;;  %10837 = vmatmul.mubr.msk.bf16.vlgmr.msra.gmra.mxu1 %vm581_vm10, %v8121_v5  ;;  %v8115_v26 = vmul.f32 %v11382_v34, %v13780_v2  ;;  %v11059_v2 = vld [vmem:[%s14180_s6 + $0x18] sm:$0xff]  }
0x1d90   :  { %v8114_v29 = vmul.f32 %v11384_v61, %v13776_v57  ;;  %10847 = vmatpush3.bf16.msra.mxu1 %v8419_v60  ;;  %10848 = vmatprep.mubr.msk.bf16.mxu1 %vm11443_vm9, %v14228_v22  ;;  %v10994_v60 = vpop.permute.xlu1 %10993 }
0x1d91   :  { %v8123_v30 = vpack.c.bf16 %v8115_v26, %v8115_v26  ;;  %10858 = vmatprep.subr.bf16.mxu1 %v11059_v2 }
0x1d92   :  { %v8122_v17 = vpack.c.bf16 %v8114_v29, %v8114_v29  ;;  %v11386_v3 = vpop.eup %11385 }
0x1d93   :  { %v8116_v57 = vmul.f32 %v11386_v3, %v13786_v62 }
0x1d94   :  { %10843 = vmatmul.mubr.msk.bf16.vlgmr.msra.gmra.mxu0 %vm581_vm10, %v8122_v17  ;;  %v11004_v17 = vpop.permute.xlu1 %11003 }
0x1d95   :  { %10853 = vmatpush3.bf16.msra.mxu0 %v8467_v9  ;;  %10854 = vmatprep.mubr.msk.bf16.mxu0 %vm11443_vm9, %v14228_v22  ;;  %v8124_v63 = vpack.c.bf16 %v8116_v57, %v8116_v57 }
0x1d97   :  { %10849 = vmatmul.mubr.msk.bf16.vlgmr.msra.gmra.mxu1 %vm581_vm10, %v8123_v30 }
0x1d98   :  { %10859 = vmatpush3.bf16.msra.mxu1 %v11059_v2 }
0x1d99   :  { %10860 = vmatprep.subr.bf16.mxu1 %v11060_v0 }
0x1d9c   :  { %10855 = vmatmul.mubr.msk.bf16.vlgmr.msra.gmra.mxu0 %vm581_vm10, %v8124_v63  ;;  %10861 = vmatpush3.bf16.msra.mxu1 %v11060_v0 }
0x1e12   :  { %v8167_v13 = vpop.f32.mrf.mxu1 }
0x1e14   :  { %v10814_v23 = vpop.f32.mrf.mxu1 }
0x1e16   :  { %v8170_v6 = vpop.f32.mrf.mxu1  ;;  %v8215_v37 = vpop.f32.mrf.mxu0 }
0x1e17   :  { %v11017_v62 = vpack.i.bf16 %v8215_v37, %v8167_v13 }
0x1e18   :  { %v10815_v36 = vpop.f32.mrf.mxu1  ;;  %v10820_v25 = vpop.f32.mrf.mxu0 }
0x1e19   :  { %11018 = vrot.lane.b32.xlu0 %v11017_v62, %s14255_s19  ;;  %v11014_v62 = vpop.permute.xlu1 %11013  ;;  %v10996_v25 = vunpack.i.h.bf16 %v10994_v60 }
0x1e1a   :  { %v8218_v49 = vpop.f32.mrf.mxu0  ;;  %v8263_v47 = vpop.f32.mrf.mxu1 }
0x1e1b   :  { %v10995_v49 = vunpack.i.l.bf16 %v10994_v60 }
0x1e1c   :  { %v10821_v15 = vpop.f32.mrf.mxu0  ;;  %v10826_v56 = vpop.f32.mrf.mxu1 }
0x1e1d   :  { %11023 = vrot.lane.b32.xlu0 %v11022_v20, %s11457_s27  ;;  %v11005_v15 = vunpack.i.l.bf16 %v11004_v17  ;;  %v8607_v56 = vsel %vm581_vm10, %v13282_v38, %v10995_v49 }
0x1e1e   :  { %v8266_v33 = vpop.f32.mrf.mxu1  ;;  %v8311_v44 = vpop.f32.mrf.mxu0 }
0x1e1f   :  { %v11027_v28 = vpack.i.bf16 %v8311_v44, %v8263_v47  ;;  %v11006_v47 = vunpack.i.h.bf16 %v11004_v17 }
0x1e20   :  { %v10827_v40 = vpop.f32.mrf.mxu1  ;;  %v10832_v41 = vpop.f32.mrf.mxu0 }
0x1e21   :  { %11028 = vrot.lane.b32.xlu1 %v11027_v28, %s14255_s19  ;;  %v8615_v28 = vsel %vm4196_vm12, %v8607_v56, %v11005_v15 }
0x1e22   :  { %v8314_v58 = vpop.f32.mrf.mxu0 }
0x1e24   :  { %v10833_v14 = vpop.f32.mrf.mxu0 }
0x1e25   :  { %11033 = vrot.lane.b32.xlu1 %v11032_v11, %s11457_s27  ;;  %v10989_v11 = vpop.permute.xlu0 %10988 }
0x1e26   :  { %v10991_v26 = vunpack.i.h.bf16 %v10989_v11  ;;  %v10990_v50 = vunpack.i.l.bf16 %v10989_v11 }
0x1e28   :  { %v8606_v57 = vsel %vm581_vm10, %v13280_v48, %v10991_v26  ;;  %v8605_v63 = vsel %vm581_vm10, %v13278_v1, %v10990_v50  ;;  %v8608_v1 = vsel %vm581_vm10, %v13284_v7, %v10996_v25 }
0x1e29   :  { %v10999_v61 = vpop.permute.xlu0 %10998  ;;  %v8616_v40 = vsel %vm4196_vm12, %v8608_v1, %v11006_v47 }
0x1e2a   :  { %v11001_v3 = vunpack.i.h.bf16 %v10999_v61  ;;  %v11000_v9 = vunpack.i.l.bf16 %v10999_v61 }
0x1e2c   :  { %v8613_v23 = vsel %vm4196_vm12, %v8605_v63, %v11000_v9  ;;  %v8614_v0 = vsel %vm4196_vm12, %v8606_v57, %v11001_v3  ;;  %v14256_v57 = vld [vmem:[#allocation9_spill] sm:$0xff] }
0x1e2d   :  { %v11009_v29 = vpop.permute.xlu0 %11008 }
0x1e4f   :  { %v8359_v45 = vpop.f32.mrf.mxu1 }
0x1e51   :  { %v10838_v21 = vpop.f32.mrf.mxu1 }
0x1e52   :  { %v11011_v21 = vunpack.i.h.bf16 %v11009_v29 }
0x1e53   :  { %v8362_v4 = vpop.f32.mrf.mxu1 }
0x1e54   :  { %v8407_v46 = vpop.f32.mrf.mxu0  ;;  %v11010_v4 = vunpack.i.l.bf16 %v11009_v29  ;;  %v8610_v38 = vsel %vm581_vm10, %v13288_v39, %v11011_v21 }
0x1e55   :  { %v11037_v19 = vpack.i.bf16 %v8407_v46, %v8359_v45  ;;  %v10839_v16 = vpop.f32.mrf.mxu1 }
0x1e56   :  { %v10844_v20 = vpop.f32.mrf.mxu0  ;;  %v8609_v16 = vsel %vm581_vm10, %v13286_v42, %v11010_v4 }
0x1e57   :  { %11038 = vrot.lane.b32.xlu0 %v11037_v19, %s14255_s19  ;;  %v8455_v10 = vpop.f32.mrf.mxu1 }
0x1e58   :  { %v8410_v8 = vpop.f32.mrf.mxu0 }
0x1e59   :  { %v10850_v35 = vpop.f32.mrf.mxu1 }
0x1e5a   :  { %v10845_v27 = vpop.f32.mrf.mxu0 }
0x1e5b   :  { %v8458_v31 = vpop.f32.mrf.mxu1 }
0x1e5c   :  { %v8503_v43 = vpop.f32.mrf.mxu0 }
0x1e5d   :  { %v11042_v55 = vpack.i.bf16 %v8503_v43, %v8455_v10  ;;  %v10851_v5 = vpop.f32.mrf.mxu1 }
0x1e5e   :  { %v10856_v34 = vpop.f32.mrf.mxu0  ;;  %v11016_v5 = vunpack.i.h.bf16 %v11014_v62 }
0x1e5f   :  { %11043 = vrot.lane.b32.xlu1 %v11042_v55, %s14255_s19  ;;  %v11015_v34 = vunpack.i.l.bf16 %v11014_v62 }
0x1e60   :  { %v8506_v51 = vpop.f32.mrf.mxu0  ;;  %v8612_v42 = vsel %vm581_vm10, %v13292_v12, %v11016_v5 }
0x1e61   :  { %v8611_v11 = vsel %vm581_vm10, %v13290_v54, %v11015_v34 }
0x1e62   :  { %v10857_v24 = vpop.f32.mrf.mxu0 }
0x1e8b   :  { %v11019_v30 = vpop.permute.xlu0 %11018 }
0x1e8c   :  { %v11021_v2 = vunpack.i.h.bf16 %v11019_v30  ;;  %v11020_v13 = vunpack.i.l.bf16 %v11019_v30 }
0x1e8e   :  { %v8621_v6 = vsel %vm4205_vm13, %v8613_v23, %v11020_v13  ;;  %v8622_v37 = vsel %vm4205_vm13, %v8614_v0, %v11021_v2 }
0x1e8f   :  { %v8629_v36 = vpack.c.bf16 %v8622_v37, %v8621_v6  ;;  %v11024_v45 = vpop.permute.xlu0 %11023 }
0x1e90   :  { %v11026_v7 = vunpack.i.h.bf16 %v11024_v45  ;;  %v11025_v46 = vunpack.i.l.bf16 %v11024_v45 }
0x1e91   :  { %10862 = vmatprep.mubr.msk.bf16.mxu1 %vm242_vm8, %v8629_v36 }
0x1e92   :  { %v8617_v8 = vsel %vm4196_vm12, %v8609_v16, %v11025_v46  ;;  %v8618_v35 = vsel %vm4196_vm12, %v8610_v38, %v11026_v7 }
0x1e93   :  { %v11029_v48 = vpop.permute.xlu1 %11028 }
0x1e94   :  { %v11031_v33 = vunpack.i.h.bf16 %v11029_v48  ;;  %v11030_v44 = vunpack.i.l.bf16 %v11029_v48 }
0x1e96   :  { %v8624_v41 = vsel %vm4205_vm13, %v8616_v40, %v11031_v33  ;;  %v8623_v58 = vsel %vm4205_vm13, %v8615_v28, %v11030_v44 }
0x1e97   :  { %v8630_v14 = vpack.c.bf16 %v8624_v41, %v8623_v58  ;;  %v11034_v27 = vpop.permute.xlu1 %11033  ;;  %v14258_v41 = vld [vmem:[#allocation12_spill] sm:$0xff] }
0x1e98   :  { %v11036_v51 = vunpack.i.h.bf16 %v11034_v27  ;;  %v11035_v24 = vunpack.i.l.bf16 %v11034_v27 }
0x1e99   :  { %10863 = vmatmul.mubr.msk.bf16.vlgmr.msra.gmra.mxu1 %vm242_vm8, %v8630_v14  ;;  %v14259_v14 = vld [vmem:[#allocation15_spill] sm:$0xff] }
0x1e9a   :  { %v8620_v29 = vsel %vm4196_vm12, %v8612_v42, %v11036_v51  ;;  %v8619_v26 = vsel %vm4196_vm12, %v8611_v11, %v11035_v24 }
0x1ec9   :  { %v11039_v19 = vpop.permute.xlu0 %11038 }
0x1eca   :  { %v11041_v20 = vunpack.i.h.bf16 %v11039_v19  ;;  %v11040_v10 = vunpack.i.l.bf16 %v11039_v19 }
0x1ecc   :  { %v8625_v31 = vsel %vm4205_vm13, %v8617_v8, %v11040_v10  ;;  %v8626_v43 = vsel %vm4205_vm13, %v8618_v35, %v11041_v20 }
0x1ecd   :  { %v8631_v55 = vpack.c.bf16 %v8626_v43, %v8625_v31 }
0x1ecf   :  { %10866 = vmatprep.mubr.msk.bf16.mxu1 %vm242_vm8, %v8631_v55 }
0x1ed1   :  { %v11044_v39 = vpop.permute.xlu1 %11043 }
0x1ed2   :  { %v11046_v61 = vunpack.i.h.bf16 %v11044_v39  ;;  %v11045_v60 = vunpack.i.l.bf16 %v11044_v39 }
0x1ed4   :  { %v8628_v50 = vsel %vm4205_vm13, %v8620_v29, %v11046_v61  ;;  %v8627_v17 = vsel %vm4205_vm13, %v8619_v26, %v11045_v60  ;;  %v11061_v61 = vld [vmem:[%s14181_s7 + $0x18] sm:$0xff]   ;;  %v11062_v60 = vld [vmem:[%s14181_s7 + $0x10] sm:$0xff]  }
0x1ed5   :  { %v8632_v3 = vpack.c.bf16 %v8628_v50, %v8627_v17  ;;  %10870 = vmatprep.subr.bf16.mxu0 %v11061_v61 }
0x1ed6   :  { %10871 = vmatpush3.bf16.msra.mxu0 %v11061_v61 }
0x1ed7   :  { %10867 = vmatmul.mubr.msk.bf16.gmra.mxu1 %vm242_vm8, %v8632_v3  ;;  %10872 = vmatprep.subr.bf16.mxu0 %v11062_v60 }
0x1eda   :  { %10873 = vmatpush3.bf16.msra.mxu0 %v11062_v60 }
0x1edb   :  { %10898 = vmatprep.subr.mxu0 %v14228_v22 }
0x1f59   :  { %v10864_v9 = vpop.f32.mrf.mxu1 }
0x1f5a   :  { %v8709_v12 = vadd.f32 %v10864_v9, %v14256_v57 }
0x1f5b   :  { %v8700_v30 = vpop.f32.mrf.mxu1 }
0x1f5c   :  { %v8701_v63 = vadd.f32 %v8700_v30, %v14256_v57  ;;  %v8733_v23 = vadd.f32 %v8709_v12, %v12956_v59 }
0x1f5d   :  { %v10865_v54 = vpop.f32.mrf.mxu1 }
0x1f5e   :  { %v8731_v2 = vadd.f32 %v8701_v63, %v12947_v52  ;;  %v8712_v0 = vadd.f32 %v10865_v54, %v14256_v57  ;;  %v8745_v49 = vsel %vm242_vm8, %v8733_v23, 0.0 }
0x1f5f   :  { %v8703_v13 = vpop.f32.mrf.mxu1 }
0x1f60   :  { %v8704_v6 = vadd.f32 %v8703_v13, %v14256_v57  ;;  %v8739_v37 = vsel %vm242_vm8, %v8731_v2, 0.0  ;;  %v8734_v36 = vadd.f32 %v8712_v0, %v12959_v32  ;;  %v14257_v32 = vld [vmem:[#allocation13_spill] sm:$0xff] }
0x1f61   :  { %8740 = vadd.xlane.f32.xlu0 %v8739_v37 }
0x1f62   :  { %v8732_v62 = vadd.f32 %v8704_v6, %v12950_v53  ;;  %v8748_v52 = vsel %vm242_vm8, %v8734_v36, 0.0 }
0x1f64   :  { %v8742_v25 = vsel %vm242_vm8, %v8732_v62, 0.0 }
0x1f65   :  { %8743 = vadd.xlane.f32.xlu1 %v8742_v25  ;;  %8746 = vadd.xlane.f32.xlu0 %v8745_v49 }
0x1f69   :  { %8749 = vadd.xlane.f32.xlu0 %v8748_v52 }
0x1f97   :  { %v10868_v59 = vpop.f32.mrf.mxu1 }
0x1f98   :  { %v8725_v15 = vadd.f32 %v10868_v59, %v14256_v57 }
0x1f99   :  { %v8716_v47 = vpop.f32.mrf.mxu1 }
0x1f9a   :  { %v8717_v48 = vadd.f32 %v8716_v47, %v14256_v57  ;;  %v8737_v33 = vadd.f32 %v8725_v15, %v14257_v32 }
0x1f9b   :  { %v10869_v1 = vpop.f32.mrf.mxu1 }
0x1f9c   :  { %v8735_v53 = vadd.f32 %v8717_v48, %v12973_v18  ;;  %v8728_v44 = vadd.f32 %v10869_v1, %v14256_v57  ;;  %v8757_v21 = vsel %vm242_vm8, %v8737_v33, 0.0 }
0x1f9d   :  { %v8719_v56 = vpop.f32.mrf.mxu1 }
0x1f9e   :  { %v8720_v28 = vadd.f32 %v8719_v56, %v14256_v57  ;;  %v8751_v40 = vsel %vm242_vm8, %v8735_v53, 0.0  ;;  %v8738_v45 = vadd.f32 %v8728_v44, %v14259_v14 }
0x1f9f   :  { %8752 = vadd.xlane.f32.xlu1 %v8751_v40  ;;  %v11440_v40 = vld [vmem:[%s14175_s10 + $0x8] sm:$0x3f] }
0x1fa0   :  { %v8736_v58 = vadd.f32 %v8720_v28, %v14258_v41  ;;  %v8760_v18 = vsel %vm242_vm8, %v8738_v45, 0.0  ;;  %v14260_v41 = vld [vmem:[#allocation2_spill] sm:$0xff] }
0x1fa2   :  { %v8754_v4 = vsel %vm242_vm8, %v8736_v58, 0.0 }
0x1fa3   :  { %8758 = vadd.xlane.f32.xlu1 %v8757_v21  ;;  %8755 = vadd.xlane.f32.xlu0 %v8754_v4 }
0x1fa7   :  { %8761 = vadd.xlane.f32.xlu0 %v8760_v18 }
0x1fea   :  { %v8741_v7 = vpop.xlane.xlu0 %8740 }
0x1feb   :  { %v8763_v46 = vmul.f32 0.03125, %v8741_v7 }
0x1fed   :  { %v13934_v19 = vsub.f32 %v8731_v2, %v8763_v46 }
0x1fee   :  { %v8744_v38 = vpop.xlane.xlu1 %8743  ;;  %v8747_v16 = vpop.xlane.xlu0 %8746 }
0x1fef   :  { %v8764_v20 = vmul.f32 0.03125, %v8744_v38  ;;  %v8765_v10 = vmul.f32 0.03125, %v8747_v16  ;;  %v8779_v8 = vmul.f32 %v13934_v19, %v13934_v19 }
0x1ff1   :  { %v13938_v35 = vsub.f32 %v8732_v62, %v8764_v20  ;;  %v13940_v27 = vsub.f32 %v8733_v23, %v8765_v10  ;;  %v8787_v31 = vsel %vm242_vm8, %v8779_v8, 0.0  ;;  %v14261_v10 = vld [vmem:[#allocation6_spill] sm:$0xff] }
0x1ff2   :  { %8788 = vadd.xlane.f32.xlu1 %v8787_v31  ;;  %v8750_v43 = vpop.xlane.xlu0 %8749 }
0x1ff3   :  { %v8766_v55 = vmul.f32 0.03125, %v8750_v43  ;;  %v8780_v5 = vmul.f32 %v13938_v35, %v13938_v35  ;;  %v8781_v34 = vmul.f32 %v13940_v27, %v13940_v27 }
0x1ff5   :  { %v13947_v51 = vsub.f32 %v8734_v36, %v8766_v55  ;;  %v8790_v24 = vsel %vm242_vm8, %v8780_v5, 0.0  ;;  %v8793_v39 = vsel %vm242_vm8, %v8781_v34, 0.0 }
0x1ff6   :  { %8791 = vadd.xlane.f32.xlu0 %v8790_v24  ;;  %8794 = vadd.xlane.f32.xlu1 %v8793_v39 }
0x1ff7   :  { %v8782_v42 = vmul.f32 %v13947_v51, %v13947_v51 }
0x1ff9   :  { %v8796_v11 = vsel %vm242_vm8, %v8782_v42, 0.0 }
0x1ffa   :  { %8797 = vadd.xlane.f32.xlu0 %v8796_v11 }
0x2028   :  { %v8753_v29 = vpop.xlane.xlu1 %8752 }
0x2029   :  { %v8767_v26 = vmul.f32 0.03125, %v8753_v29 }
0x202b   :  { %v13961_v50 = vsub.f32 %v8735_v53, %v8767_v26 }
0x202c   :  { %v8759_v17 = vpop.xlane.xlu1 %8758  ;;  %v8756_v3 = vpop.xlane.xlu0 %8755 }
0x202d   :  { %v8769_v9 = vmul.f32 0.03125, %v8759_v17  ;;  %v8768_v30 = vmul.f32 0.03125, %v8756_v3  ;;  %v8783_v57 = vmul.f32 %v13961_v50, %v13961_v50 }
0x202f   :  { %v13965_v12 = vsub.f32 %v8737_v33, %v8769_v9  ;;  %v13967_v63 = vsub.f32 %v8736_v58, %v8768_v30  ;;  %v8799_v54 = vsel %vm242_vm8, %v8783_v57, 0.0  ;;  %v8846_v58 = vrot.slane %v11440_v40, %v14260_v41 }
0x2030   :  { %8800 = vadd.xlane.f32.xlu1 %v8799_v54  ;;  %v8762_v2 = vpop.xlane.xlu0 %8761 }
0x2031   :  { %v8770_v13 = vmul.f32 0.03125, %v8762_v2  ;;  %v8785_v23 = vmul.f32 %v13965_v12, %v13965_v12  ;;  %v8784_v0 = vmul.f32 %v13967_v63, %v13967_v63 }
0x2033   :  { %v13974_v6 = vsub.f32 %v8738_v45, %v8770_v13  ;;  %v8805_v37 = vsel %vm242_vm8, %v8785_v23, 0.0  ;;  %v8802_v62 = vsel %vm242_vm8, %v8784_v0, 0.0 }
0x2034   :  { %8806 = vadd.xlane.f32.xlu1 %v8805_v37  ;;  %8803 = vadd.xlane.f32.xlu0 %v8802_v62 }
0x2035   :  { %v8786_v36 = vmul.f32 %v13974_v6, %v13974_v6 }
0x2037   :  { %v8808_v25 = vsel %vm242_vm8, %v8786_v36, 0.0 }
0x2038   :  { %8809 = vadd.xlane.f32.xlu0 %v8808_v25 }
0x207b   :  { %v8789_v49 = vpop.xlane.xlu1 %8788 }
0x207c   :  { %v8811_v52 = vmul.f32 0.03125, %v8789_v49 }
0x207e   :  { %v8819_v59 = vadd.f32 1e-07, %v8811_v52  ;;  %v11063_v52 = vld [vmem:[%s14182_s9 + $0x38] sm:$0xff]  }
0x207f   :  { %v8795_v47 = vpop.xlane.xlu1 %8794  ;;  %v8792_v15 = vpop.xlane.xlu0 %8791  ;;  %10882 = vmatprep.subr.bf16.mxu1 %v11063_v52 }
0x2080   :  { %11387 = vrsqrt.f32 %v8819_v59  ;;  %v8813_v48 = vmul.f32 0.03125, %v8795_v47  ;;  %v8812_v1 = vmul.f32 0.03125, %v8792_v15  ;;  %10883 = vmatpush3.bf16.msra.mxu1 %v11063_v52  ;;  %v11064_v59 = vld [vmem:[%s14182_s9 + $0x30] sm:$0xff]   ;;  %v11065_v47 = vld [vmem:[%s14182_s9 + $0x28] sm:$0xff]   ;;  %v11066_v15 = vld [vmem:[%s14182_s9 + $0x20] sm:$0xff]  }
0x2081   :  { %10884 = vmatprep.subr.bf16.mxu1 %v11064_v59 }
0x2082   :  { %v8821_v53 = vadd.f32 1e-07, %v8813_v48  ;;  %v8820_v56 = vadd.f32 1e-07, %v8812_v1  ;;  %v14046_v48 = vld [vmem:[%s14183_s8 + $0x1] ss:$0 sm:$0xff] }
0x2083   :  { %v8798_v32 = vpop.xlane.xlu0 %8797 }
0x2084   :  { %11389 = vrsqrt.f32 %v8821_v53  ;;  %v8814_v33 = vmul.f32 0.03125, %v8798_v32  ;;  %10885 = vmatpush3.bf16.msra.mxu1 %v11064_v59 }
0x2085   :  { %11391 = vrsqrt.f32 %v8820_v56  ;;  %10886 = vmatprep.subr.bf16.mxu1 %v11065_v47 }
0x2086   :  { %v8822_v44 = vadd.f32 1e-07, %v8814_v33 }
0x2088   :  { %11393 = vrsqrt.f32 %v8822_v44  ;;  %10887 = vmatpush3.bf16.msra.mxu1 %v11065_v47 }
0x2089   :  { %10888 = vmatprep.subr.bf16.mxu1 %v11066_v15 }
0x208c   :  { %10889 = vmatpush3.bf16.msra.mxu1 %v11066_v15 }
0x208d   :  { %v11388_v28 = vpop.eup %11387 }
0x208e   :  { %v8835_v14 = vmul.f32 %v11388_v28, %v13934_v19 }
0x2090   :  { %v8847_v7 = vmul.f32 %v8846_v58, %v8835_v14 }
0x2091   :  { %v11390_v45 = vpop.eup %11389 }
0x2092   :  { %v11392_v21 = vpop.eup %11391  ;;  %v8837_v4 = vmul.f32 %v11390_v45, %v13940_v27  ;;  %v13990_v8 = vadd.f32 %v14261_v10, %v8847_v7 }
0x2093   :  { %v8836_v18 = vmul.f32 %v11392_v21, %v13938_v35 }
0x2094   :  { %v8849_v16 = vmul.f32 %v8846_v58, %v8837_v4 }
0x2095   :  { %v11394_v46 = vpop.eup %11393  ;;  %v8848_v38 = vmul.f32 %v8846_v58, %v8836_v18 }
0x2096   :  { %v8838_v20 = vmul.f32 %v11394_v46, %v13947_v51  ;;  %v13998_v27 = vadd.f32 %v14261_v10, %v8849_v16 }
0x2097   :  { %v13993_v31 = vadd.f32 %v14261_v10, %v8848_v38 }
0x2098   :  { %v8850_v43 = vmul.f32 %v8846_v58, %v8838_v20 }
0x2099   :  { %v8867_v19 = vpack.c.bf16 %v13993_v31, %v13990_v8 }
0x209a   :  { %v14001_v35 = vadd.f32 %v14261_v10, %v8850_v43 }
0x209b   :  { %10874 = vmatprep.mubr.msk.bf16.mxu0 %vm242_vm8, %v8867_v19 }
0x209c   :  { %v8868_v55 = vpack.c.bf16 %v14001_v35, %v13998_v27 }
0x209e   :  { %10875 = vmatmul.mubr.msk.bf16.vlgmr.msra.gmra.mxu0 %vm242_vm8, %v8868_v55 }
0x20b9   :  { %v8801_v5 = vpop.xlane.xlu1 %8800 }
0x20ba   :  { %v8815_v34 = vmul.f32 0.03125, %v8801_v5 }
0x20bc   :  { %v8823_v51 = vadd.f32 1e-07, %v8815_v34 }
0x20bd   :  { %v8807_v24 = vpop.xlane.xlu1 %8806  ;;  %v8804_v39 = vpop.xlane.xlu0 %8803 }
0x20be   :  { %11395 = vrsqrt.f32 %v8823_v51  ;;  %v8817_v42 = vmul.f32 0.03125, %v8807_v24  ;;  %v8816_v11 = vmul.f32 0.03125, %v8804_v39 }
0x20c0   :  { %v8825_v61 = vadd.f32 1e-07, %v8817_v42  ;;  %v8824_v60 = vadd.f32 1e-07, %v8816_v11 }
0x20c1   :  { %v8810_v29 = vpop.xlane.xlu0 %8809 }
0x20c2   :  { %11397 = vrsqrt.f32 %v8825_v61  ;;  %v8818_v26 = vmul.f32 0.03125, %v8810_v29 }
0x20c3   :  { %11399 = vrsqrt.f32 %v8824_v60 }
0x20c4   :  { %v8826_v17 = vadd.f32 1e-07, %v8818_v26 }
0x20c6   :  { %11401 = vrsqrt.f32 %v8826_v17 }
0x20cb   :  { %v11396_v3 = vpop.eup %11395 }
0x20cc   :  { %v8839_v9 = vmul.f32 %v11396_v3, %v13961_v50 }
0x20ce   :  { %v8851_v13 = vmul.f32 %v8846_v58, %v8839_v9 }
0x20cf   :  { %v11398_v30 = vpop.eup %11397 }
0x20d0   :  { %v11400_v57 = vpop.eup %11399  ;;  %v8841_v54 = vmul.f32 %v11398_v30, %v13965_v12  ;;  %v14012_v36 = vadd.f32 %v14261_v10, %v8851_v13 }
0x20d1   :  { %v8840_v2 = vmul.f32 %v11400_v57, %v13967_v63 }
0x20d2   :  { %v8853_v62 = vmul.f32 %v8846_v58, %v8841_v54 }
0x20d3   :  { %v11402_v23 = vpop.eup %11401  ;;  %v8852_v0 = vmul.f32 %v8846_v58, %v8840_v2 }
0x20d4   :  { %v8842_v37 = vmul.f32 %v11402_v23, %v13974_v6  ;;  %v14020_v12 = vadd.f32 %v14261_v10, %v8853_v62 }
0x20d5   :  { %v14015_v25 = vadd.f32 %v14261_v10, %v8852_v0 }
0x20d6   :  { %v8854_v49 = vmul.f32 %v8846_v58, %v8842_v37 }
0x20d7   :  { %v8869_v50 = vpack.c.bf16 %v14015_v25, %v14012_v36 }
0x20d8   :  { %v14023_v63 = vadd.f32 %v14261_v10, %v8854_v49 }
0x20d9   :  { %10878 = vmatprep.mubr.msk.bf16.mxu0 %vm242_vm8, %v8869_v50 }
0x20da   :  { %v8870_v6 = vpack.c.bf16 %v14023_v63, %v14020_v12 }
0x20dc   :  { %10879 = vmatmul.mubr.msk.bf16.gmra.mxu0 %vm242_vm8, %v8870_v6 }
0x20dd   :  { %10906 = vmatprep.mubr.msk.f32.mxu0 %vm11443_vm9, %v14228_v22 }
0x215e   :  { %v10876_v1 = vpop.f32.mrf.mxu0 }
0x215f   :  { %v8951_v53 = vadd.f32 %v10876_v1, %v14046_v48 }
0x2160   :  { %v8942_v56 = vpop.f32.mrf.mxu0 }
0x2161   :  { %v8975_v32 = vmul.f32 %v8951_v53, %v8951_v53  ;;  %v8943_v33 = vadd.f32 %v14046_v48, %v8942_v56 }
0x2162   :  { %v10877_v44 = vpop.f32.mrf.mxu0 }
0x2163   :  { %v8983_v28 = vmul.f32 %v8975_v32, %v8951_v53  ;;  %v8973_v40 = vmul.f32 %v8943_v33, %v8943_v33  ;;  %v8954_v41 = vadd.f32 %v10877_v44, %v14046_v48 }
0x2164   :  { %v8945_v58 = vpop.f32.mrf.mxu0 }
0x2165   :  { %v8991_v14 = vmul.f32 0.044715, %v8983_v28  ;;  %v8981_v45 = vmul.f32 %v8973_v40, %v8943_v33  ;;  %v8976_v21 = vmul.f32 %v8954_v41, %v8954_v41  ;;  %v8946_v4 = vadd.f32 %v14046_v48, %v8945_v58 }
0x2167   :  { %v8999_v18 = vadd.f32 %v8991_v14, %v8951_v53  ;;  %v8989_v7 = vmul.f32 0.044715, %v8981_v45  ;;  %v8984_v46 = vmul.f32 %v8976_v21, %v8954_v41  ;;  %v8974_v38 = vmul.f32 %v8946_v4, %v8946_v4 }
0x2169   :  { %v9007_v16 = vmul.f32 0.7978846, %v8999_v18  ;;  %v8997_v20 = vadd.f32 %v8989_v7, %v8943_v33  ;;  %v8992_v10 = vmul.f32 0.044715, %v8984_v46  ;;  %v8982_v43 = vmul.f32 %v8974_v38, %v8946_v4 }
0x216b   :  { %v9005_v19 = vmul.f32 0.7978846, %v8997_v20  ;;  %v9000_v55 = vadd.f32 %v8992_v10, %v8954_v41  ;;  %v8990_v5 = vmul.f32 0.044715, %v8982_v43  ;;  %11403 = vtanh.f32 %v9007_v16 }
0x216d   :  { %11405 = vtanh.f32 %v9005_v19  ;;  %v9008_v34 = vmul.f32 0.7978846, %v9000_v55  ;;  %v8998_v51 = vadd.f32 %v8990_v5, %v8946_v4 }
0x216f   :  { %11407 = vtanh.f32 %v9008_v34  ;;  %v9006_v24 = vmul.f32 0.7978846, %v8998_v51 }
0x2171   :  { %11409 = vtanh.f32 %v9006_v24 }
0x2178   :  { %v11404_v39 = vpop.eup %11403 }
0x2179   :  { %v9023_v60 = vadd.f32 1.0, %v11404_v39 }
0x217a   :  { %v11406_v42 = vpop.eup %11405 }
0x217b   :  { %v9021_v11 = vadd.f32 1.0, %v11406_v42  ;;  %v9031_v30 = vmul.f32 0.5, %v9023_v60 }
0x217c   :  { %v11408_v61 = vpop.eup %11407 }
0x217d   :  { %v9024_v29 = vadd.f32 1.0, %v11408_v61  ;;  %v9029_v17 = vmul.f32 0.5, %v9021_v11  ;;  %v9039_v23 = vmul.f32 %v9031_v30, %v8951_v53  ;;  %v14262_v30 = vld [vmem:[#allocation11_spill] sm:$0xff] }
0x217e   :  { %v11410_v26 = vpop.eup %11409 }
0x217f   :  { %v9032_v3 = vmul.f32 0.5, %v9024_v29  ;;  %v9022_v9 = vadd.f32 1.0, %v11410_v26  ;;  %v9037_v2 = vmul.f32 %v9029_v17, %v8943_v33 }
0x2181   :  { %v9030_v57 = vmul.f32 0.5, %v9022_v9  ;;  %v9040_v54 = vmul.f32 %v9032_v3, %v8954_v41 }
0x2183   :  { %v9038_v13 = vmul.f32 %v9030_v57, %v8946_v4  ;;  %v9046_v37 = vpack.c.bf16 %v9040_v54, %v9039_v23 }
0x2185   :  { %v9045_v0 = vpack.c.bf16 %v9038_v13, %v9037_v2 }
0x2187   :  { %10890 = vmatprep.mubr.msk.bf16.mxu1 %vm4667_vm14, %v9045_v0 }
0x2188   :  { %10891 = vmatmul.mubr.msk.bf16.vlgmr.msra.gmra.mxu1 %vm4667_vm14, %v9046_v37 }
0x219c   :  { %v10880_v62 = vpop.f32.mrf.mxu0 }
0x219d   :  { %v8967_v49 = vadd.f32 %v10880_v62, %v14046_v48 }
0x219e   :  { %v8958_v50 = vpop.f32.mrf.mxu0 }
0x219f   :  { %v8979_v6 = vmul.f32 %v8967_v49, %v8967_v49  ;;  %v8959_v52 = vadd.f32 %v14046_v48, %v8958_v50 }
0x21a0   :  { %v10881_v59 = vpop.f32.mrf.mxu0 }
0x21a1   :  { %v8987_v47 = vmul.f32 %v8979_v6, %v8967_v49  ;;  %v8977_v15 = vmul.f32 %v8959_v52, %v8959_v52  ;;  %v8970_v1 = vadd.f32 %v10881_v59, %v14046_v48 }
0x21a2   :  { %v8961_v56 = vpop.f32.mrf.mxu0 }
0x21a3   :  { %v8995_v53 = vmul.f32 0.044715, %v8987_v47  ;;  %v8985_v32 = vmul.f32 %v8977_v15, %v8959_v52  ;;  %v8980_v33 = vmul.f32 %v8970_v1, %v8970_v1  ;;  %v8962_v44 = vadd.f32 %v14046_v48, %v8961_v56 }
0x21a5   :  { %v9003_v28 = vadd.f32 %v8995_v53, %v8967_v49  ;;  %v8993_v40 = vmul.f32 0.044715, %v8985_v32  ;;  %v8988_v41 = vmul.f32 %v8980_v33, %v8970_v1  ;;  %v8978_v58 = vmul.f32 %v8962_v44, %v8962_v44 }
0x21a7   :  { %v9011_v14 = vmul.f32 0.7978846, %v9003_v28  ;;  %v9001_v45 = vadd.f32 %v8993_v40, %v8959_v52  ;;  %v8996_v21 = vmul.f32 0.044715, %v8988_v41  ;;  %v8986_v4 = vmul.f32 %v8978_v58, %v8962_v44 }
0x21a9   :  { %v9009_v18 = vmul.f32 0.7978846, %v9001_v45  ;;  %v9004_v7 = vadd.f32 %v8996_v21, %v8970_v1  ;;  %v8994_v46 = vmul.f32 0.044715, %v8986_v4  ;;  %11411 = vtanh.f32 %v9011_v14 }
0x21ab   :  { %11413 = vtanh.f32 %v9009_v18  ;;  %v9012_v38 = vmul.f32 0.7978846, %v9004_v7  ;;  %v9002_v16 = vadd.f32 %v8994_v46, %v8962_v44 }
0x21ad   :  { %11415 = vtanh.f32 %v9012_v38  ;;  %v9010_v20 = vmul.f32 0.7978846, %v9002_v16 }
0x21af   :  { %11417 = vtanh.f32 %v9010_v20 }
0x21b6   :  { %v11412_v10 = vpop.eup %11411 }
0x21b7   :  { %v9027_v55 = vadd.f32 1.0, %v11412_v10 }
0x21b8   :  { %v11414_v48 = vpop.eup %11413 }
0x21b9   :  { %v9025_v43 = vadd.f32 1.0, %v11414_v48  ;;  %v9035_v42 = vmul.f32 0.5, %v9027_v55 }
0x21ba   :  { %v11416_v19 = vpop.eup %11415 }
0x21bb   :  { %v9028_v5 = vadd.f32 1.0, %v11416_v19  ;;  %v9033_v51 = vmul.f32 0.5, %v9025_v43  ;;  %v9043_v26 = vmul.f32 %v9035_v42, %v8967_v49 }
0x21bc   :  { %v11418_v34 = vpop.eup %11417 }
0x21bd   :  { %v9036_v24 = vmul.f32 0.5, %v9028_v5  ;;  %v9026_v39 = vadd.f32 1.0, %v11418_v34  ;;  %v9041_v60 = vmul.f32 %v9033_v51, %v8959_v52 }
0x21bf   :  { %v9034_v11 = vmul.f32 0.5, %v9026_v39  ;;  %v9044_v61 = vmul.f32 %v9036_v24, %v8970_v1 }
0x21c1   :  { %v9042_v29 = vmul.f32 %v9034_v11, %v8962_v44  ;;  %v9048_v3 = vpack.c.bf16 %v9044_v61, %v9043_v26 }
0x21c3   :  { %v9047_v17 = vpack.c.bf16 %v9042_v29, %v9041_v60 }
0x21c5   :  { %10894 = vmatprep.mubr.msk.bf16.mxu1 %vm4667_vm14, %v9047_v17 }
0x21c6   :  { %10895 = vmatmul.mubr.msk.bf16.gmra.mxu1 %vm4667_vm14, %v9048_v3 }
0x2248   :  { %v10892_v9 = vpop.f32.mrf.mxu1 }
0x2249   :  { %v9141_v57 = vadd.f32 %v10892_v9, %v14262_v30 }
0x224a   :  { %v9132_v54 = vpop.f32.mrf.mxu1 }
0x224b   :  { %v9165_v2 = vadd.f32 %v9141_v57, %v13998_v27  ;;  %v9133_v13 = vadd.f32 %v9132_v54, %v14262_v30 }
0x224c   :  { %v10893_v23 = vpop.f32.mrf.mxu1 }
0x224d   :  { %v9163_v0 = vadd.f32 %v9133_v13, %v13990_v8  ;;  %v9144_v37 = vadd.f32 %v10893_v23, %v14262_v30  ;;  %v9177_v62 = vsel %vm242_vm8, %v9165_v2, 0.0 }
0x224e   :  { %9178 = vadd.xlane.f32.xlu0 %v9177_v62  ;;  %v9135_v49 = vpop.f32.mrf.mxu1 }
0x224f   :  { %v9166_v50 = vadd.f32 %v9144_v37, %v14001_v35  ;;  %v9136_v6 = vadd.f32 %v9135_v49, %v14262_v30  ;;  %v9171_v52 = vsel %vm242_vm8, %v9163_v0, 0.0  ;;  %v9302_v49 = vld [vmem:[%s14184_s11 + $0x18] sm:$0xff] }
0x2250   :  { %9172 = vadd.xlane.f32.xlu1 %v9171_v52  ;;  %10899 = vmatpush3.msra.mxu0 %v9302_v49  ;;  %v9299_v52 = vld [vmem:[%s14184_s11] sm:$0xff] }
0x2251   :  { %v9164_v27 = vadd.f32 %v9136_v6, %v13993_v31  ;;  %v9180_v59 = vsel %vm242_vm8, %v9166_v50, 0.0  ;;  %10900 = vmatprep.subr.mxu0 %v14228_v22  ;;  %v9300_v6 = vld [vmem:[%s14184_s11 + $0x8] sm:$0xff] }
0x2252   :  { %9181 = vadd.xlane.f32.xlu0 %v9180_v59 }
0x2253   :  { %v9174_v8 = vsel %vm242_vm8, %v9164_v27, 0.0 }
0x2254   :  { %9175 = vadd.xlane.f32.xlu1 %v9174_v8 }
0x2286   :  { %v10896_v47 = vpop.f32.mrf.mxu1 }
0x2287   :  { %v9157_v1 = vadd.f32 %v10896_v47, %v14262_v30 }
0x2288   :  { %v9148_v15 = vpop.f32.mrf.mxu1 }
0x2289   :  { %v9149_v56 = vadd.f32 %v9148_v15, %v14262_v30  ;;  %v9169_v33 = vadd.f32 %v9157_v1, %v14020_v12 }
0x228a   :  { %v10897_v35 = vpop.f32.mrf.mxu1 }
0x228b   :  { %v9167_v53 = vadd.f32 %v9149_v56, %v14012_v36  ;;  %v9160_v31 = vadd.f32 %v10897_v35, %v14262_v30  ;;  %v9189_v14 = vsel %vm242_vm8, %v9169_v33, 0.0 }
0x228c   :  { %v9151_v32 = vpop.f32.mrf.mxu1 }
0x228d   :  { %v9152_v44 = vadd.f32 %v9151_v32, %v14262_v30  ;;  %v9183_v28 = vsel %vm242_vm8, %v9167_v53, 0.0  ;;  %v9170_v41 = vadd.f32 %v9160_v31, %v14023_v63 }
0x228e   :  { %9184 = vadd.xlane.f32.xlu1 %v9183_v28 }
0x228f   :  { %v9168_v40 = vadd.f32 %v9152_v44, %v14015_v25  ;;  %v9192_v36 = vsel %vm242_vm8, %v9170_v41, 0.0 }
0x2291   :  { %v9186_v58 = vsel %vm242_vm8, %v9168_v40, 0.0 }
0x2292   :  { %9187 = vadd.xlane.f32.xlu0 %v9186_v58  ;;  %9190 = vadd.xlane.f32.xlu1 %v9189_v14 }
0x2296   :  { %9193 = vadd.xlane.f32.xlu0 %v9192_v36  ;;  %v14264_v36 = vld [vmem:[#allocation8_spill] sm:$0xff] }
0x22d7   :  { %v9179_v12 = vpop.xlane.xlu0 %9178 }
0x22d8   :  { %v9197_v45 = vmul.f32 0.03125, %v9179_v12 }
0x22d9   :  { %v9173_v21 = vpop.xlane.xlu1 %9172 }
0x22da   :  { %v14084_v4 = vsub.f32 %v9165_v2, %v9197_v45  ;;  %v9195_v18 = vmul.f32 0.03125, %v9173_v21 }
0x22db   :  { %v9182_v7 = vpop.xlane.xlu0 %9181 }
0x22dc   :  { %v14086_v46 = vsub.f32 %v9163_v0, %v9195_v18  ;;  %v9198_v25 = vmul.f32 0.03125, %v9182_v7  ;;  %v9213_v63 = vmul.f32 %v14084_v4, %v14084_v4 }
0x22dd   :  { %v9176_v38 = vpop.xlane.xlu1 %9175 }
0x22de   :  { %v14090_v16 = vsub.f32 %v9166_v50, %v9198_v25  ;;  %v9196_v20 = vmul.f32 0.03125, %v9176_v38  ;;  %v9225_v10 = vsel %vm242_vm8, %v9213_v63, 0.0  ;;  %v9211_v48 = vmul.f32 %v14086_v46, %v14086_v46  ;;  %v9301_v50 = vld [vmem:[%s14184_s11 + $0x10] sm:$0xff] }
0x22df   :  { %9226 = vadd.xlane.f32.xlu0 %v9225_v10  ;;  %10901 = vmatpush3.msra.mxu0 %v9301_v50 }
0x22e0   :  { %v14095_v43 = vsub.f32 %v9164_v27, %v9196_v20  ;;  %v9219_v19 = vsel %vm242_vm8, %v9211_v48, 0.0  ;;  %v9214_v55 = vmul.f32 %v14090_v16, %v14090_v16  ;;  %10902 = vmatprep.subr.mxu0 %v14228_v22 }
0x22e1   :  { %9220 = vadd.xlane.f32.xlu1 %v9219_v19  ;;  %10903 = vmatpush3.msra.mxu0 %v9300_v6 }
0x22e2   :  { %v9228_v5 = vsel %vm242_vm8, %v9214_v55, 0.0  ;;  %v9212_v34 = vmul.f32 %v14095_v43, %v14095_v43  ;;  %10904 = vmatprep.subr.mxu0 %v14228_v22 }
0x22e3   :  { %9229 = vadd.xlane.f32.xlu0 %v9228_v5  ;;  %10905 = vmatpush3.msra.mxu0 %v9299_v52 }
0x22e4   :  { %v9222_v51 = vsel %vm242_vm8, %v9212_v34, 0.0 }
0x22e5   :  { %9223 = vadd.xlane.f32.xlu1 %v9222_v51 }
0x2317   :  { %v9185_v24 = vpop.xlane.xlu1 %9184 }
0x2318   :  { %v9199_v39 = vmul.f32 0.03125, %v9185_v24 }
0x231a   :  { %v14104_v42 = vsub.f32 %v9167_v53, %v9199_v39 }
0x231b   :  { %v9191_v11 = vpop.xlane.xlu1 %9190  ;;  %v9188_v61 = vpop.xlane.xlu0 %9187 }
0x231c   :  { %v9201_v60 = vmul.f32 0.03125, %v9191_v11  ;;  %v9200_v29 = vmul.f32 0.03125, %v9188_v61  ;;  %v9215_v26 = vmul.f32 %v14104_v42, %v14104_v42 }
0x231e   :  { %v14108_v17 = vsub.f32 %v9169_v33, %v9201_v60  ;;  %v14110_v3 = vsub.f32 %v9168_v40, %v9200_v29  ;;  %v9231_v9 = vsel %vm242_vm8, %v9215_v26, 0.0  ;;  %v14263_v40 = vld [vmem:[#allocation4_spill] sm:$0xff] }
0x231f   :  { %9232 = vadd.xlane.f32.xlu1 %v9231_v9  ;;  %v9194_v30 = vpop.xlane.xlu0 %9193 }
0x2320   :  { %v9202_v57 = vmul.f32 0.03125, %v9194_v30  ;;  %v9217_v54 = vmul.f32 %v14108_v17, %v14108_v17  ;;  %v9216_v2 = vmul.f32 %v14110_v3, %v14110_v3 }
0x2322   :  { %v14117_v13 = vsub.f32 %v9170_v41, %v9202_v57  ;;  %v9237_v23 = vsel %vm242_vm8, %v9217_v54, 0.0  ;;  %v9234_v0 = vsel %vm242_vm8, %v9216_v2, 0.0 }
0x2323   :  { %9238 = vadd.xlane.f32.xlu1 %v9237_v23  ;;  %9235 = vadd.xlane.f32.xlu0 %v9234_v0 }
0x2324   :  { %v9218_v37 = vmul.f32 %v14117_v13, %v14117_v13 }
0x2326   :  { %v9240_v62 = vsel %vm242_vm8, %v9218_v37, 0.0 }
0x2327   :  { %9241 = vadd.xlane.f32.xlu0 %v9240_v62 }
0x2368   :  { %v9227_v27 = vpop.xlane.xlu0 %9226 }
0x2369   :  { %v9245_v59 = vmul.f32 0.03125, %v9227_v27 }
0x236a   :  { %v9221_v8 = vpop.xlane.xlu1 %9220 }
0x236b   :  { %v9253_v47 = vadd.f32 1e-07, %v9245_v59  ;;  %v9243_v15 = vmul.f32 0.03125, %v9221_v8 }
0x236c   :  { %v9230_v1 = vpop.xlane.xlu0 %9229 }
0x236d   :  { %11419 = vrsqrt.f32 %v9253_v47  ;;  %v9251_v56 = vadd.f32 1e-07, %v9243_v15  ;;  %v9246_v35 = vmul.f32 0.03125, %v9230_v1 }
0x236e   :  { %v9224_v53 = vpop.xlane.xlu1 %9223 }
0x236f   :  { %11421 = vrsqrt.f32 %v9251_v56  ;;  %v9254_v32 = vadd.f32 1e-07, %v9246_v35  ;;  %v9244_v33 = vmul.f32 0.03125, %v9224_v53 }
0x2371   :  { %11423 = vrsqrt.f32 %v9254_v32  ;;  %v9252_v31 = vadd.f32 1e-07, %v9244_v33 }
0x2373   :  { %11425 = vrsqrt.f32 %v9252_v31 }
0x237a   :  { %v11420_v44 = vpop.eup %11419 }
0x237b   :  { %v9269_v22 = vmul.f32 %v11420_v44, %v14084_v4 }
0x237c   :  { %v11422_v28 = vpop.eup %11421 }
0x237d   :  { %v9281_v41 = vmul.f32 %v14263_v40, %v9269_v22  ;;  %v9267_v58 = vmul.f32 %v11422_v28, %v14086_v46 }
0x237e   :  { %v11424_v14 = vpop.eup %11423 }
0x237f   :  { %v9293_v12 = vadd.f32 %v14264_v36, %v9281_v41  ;;  %v9279_v45 = vmul.f32 %v14263_v40, %v9267_v58  ;;  %v9270_v21 = vmul.f32 %v11424_v14, %v14090_v16 }
0x2380   :  { %v11426_v18 = vpop.eup %11425 }
0x2381   :  { %v9291_v7 = vadd.f32 %v14264_v36, %v9279_v45  ;;  %v9282_v25 = vmul.f32 %v14263_v40, %v9270_v21  ;;  %v9268_v63 = vmul.f32 %v11426_v18, %v14095_v43  ;;  %v9321_v10 = vrot.slane %v9293_v12, 6 }
0x2383   :  { %v9294_v4 = vadd.f32 %v14264_v36, %v9282_v25  ;;  %v9280_v38 = vmul.f32 %v14263_v40, %v9268_v63 }
0x2385   :  { %v9292_v46 = vadd.f32 %v14264_v36, %v9280_v38  ;;  %v9324_v48 = vrot.slane %v9294_v4, 5 }
0x2387   :  { %v9318_v20 = vrot.slane %v9292_v46, 7 }
0x2389   :  { %v9320_v16 = vsel %vm9319_vm15, %v9318_v20, %v9291_v7 }
0x238a   :  { %v9323_v19 = vsel %vm9322_vm0, %v9321_v10, %v9320_v16 }
0x238b   :  { %v9326_v55 = vsel %vm9325_vm1, %v9324_v48, %v9323_v19 }
0x23a8   :  { %v9233_v5 = vpop.xlane.xlu1 %9232 }
0x23a9   :  { %v9247_v34 = vmul.f32 0.03125, %v9233_v5 }
0x23ab   :  { %v9255_v51 = vadd.f32 1e-07, %v9247_v34 }
0x23ac   :  { %v9239_v24 = vpop.xlane.xlu1 %9238  ;;  %v9236_v43 = vpop.xlane.xlu0 %9235 }
0x23ad   :  { %11427 = vrsqrt.f32 %v9255_v51  ;;  %v9249_v39 = vmul.f32 0.03125, %v9239_v24  ;;  %v9248_v11 = vmul.f32 0.03125, %v9236_v43 }
0x23af   :  { %v9257_v61 = vadd.f32 1e-07, %v9249_v39  ;;  %v9256_v60 = vadd.f32 1e-07, %v9248_v11 }
0x23b0   :  { %v9242_v29 = vpop.xlane.xlu0 %9241 }
0x23b1   :  { %11429 = vrsqrt.f32 %v9257_v61  ;;  %v9250_v26 = vmul.f32 0.03125, %v9242_v29 }
0x23b2   :  { %11431 = vrsqrt.f32 %v9256_v60 }
0x23b3   :  { %v9258_v9 = vadd.f32 1e-07, %v9250_v26 }
0x23b5   :  { %11433 = vrsqrt.f32 %v9258_v9 }
0x23ba   :  { %v11428_v30 = vpop.eup %11427 }
0x23bb   :  { %v9271_v57 = vmul.f32 %v11428_v30, %v14104_v42 }
0x23bd   :  { %v9283_v54 = vmul.f32 %v14263_v40, %v9271_v57 }
0x23be   :  { %v11430_v2 = vpop.eup %11429 }
0x23bf   :  { %v11432_v23 = vpop.eup %11431  ;;  %v9295_v0 = vadd.f32 %v14264_v36, %v9283_v54  ;;  %v9273_v37 = vmul.f32 %v11430_v2, %v14108_v17 }
0x23c0   :  { %v9272_v62 = vmul.f32 %v11432_v23, %v14110_v3 }
0x23c1   :  { %v9327_v49 = vrot.slane %v9295_v0, 4  ;;  %v9285_v50 = vmul.f32 %v14263_v40, %v9273_v37 }
0x23c2   :  { %v11434_v6 = vpop.eup %11433  ;;  %v9284_v52 = vmul.f32 %v14263_v40, %v9272_v62 }
0x23c3   :  { %v9274_v27 = vmul.f32 %v11434_v6, %v14117_v13  ;;  %v9297_v42 = vadd.f32 %v14264_v36, %v9285_v50  ;;  %v9329_v59 = vsel %vm9328_vm2, %v9327_v49, %v9326_v55  ;;  %v9643_v13 = vld [vmem:[%s14185_s12] ss:$0 sm:$0xff] }
0x23c4   :  { %v9296_v8 = vadd.f32 %v14264_v36, %v9284_v52 }
0x23c5   :  { %v9286_v47 = vmul.f32 %v14263_v40, %v9274_v27  ;;  %v9333_v17 = vrot.slane %v9297_v42, 2 }
0x23c6   :  { %v9330_v15 = vrot.slane %v9296_v8, 3 }
0x23c7   :  { %v9298_v3 = vadd.f32 %v14264_v36, %v9286_v47 }
0x23c8   :  { %v9332_v1 = vsel %vm9331_vm3, %v9330_v15, %v9329_v59 }
0x23c9   :  { %v9335_v56 = vsel %vm9334_vm4, %v9333_v17, %v9332_v1  ;;  %v9336_v35 = vrot.slane %v9298_v3, 1 }
0x23cb   :  { %v9338_v53 = vsel %vm9337_vm5, %v9336_v35, %v9335_v56 }
0x23cc   :  { %10907 = vmatmul.mubr.msk.f32.vlgmr.msra.gmra.mxu0 %vm242_vm8, %v9338_v53 }
0x248c   :  { %v9407_v32 = vpop.f32.mrf.mxu0 }
0x248d   :  { %v9408_v33 = vadd.f32 %v9643_v13, %v9407_v32 }
0x248e   :  { %v10908_v31 = vpop.f32.mrf.mxu0 }
0x248f   :  { %v9412_v44 = vsel %vm9411_vm6, %v9408_v33, -inf }
0x2490   :  { %9413 = vmax.xlane.f32.xlu1 %v9412_v44 }
0x2519   :  { %v9414_v22 = vpop.xlane.xlu1 %9413 }
0x251a   :  { %v9415_v28 = vsub.f32 %v9408_v33, %v9414_v22 }
0x251c   :  { %v9416_v40 = vmul.f32 1.442695, %v9415_v28 }
0x251e   :  { %11435 = vpow2.f32 %v9416_v40 }
0x252b   :  { %v11436_v41 = vpop.eup %11435 }
0x252c   :  { %v9418_v58 = vsel %vm9411_vm6, %v11436_v41, 0.0 }
0x252d   :  { %9419 = vadd.xlane.f32.xlu0 %v9418_v58 }
0x25b6   :  { %v9420_v14 = vpop.xlane.xlu0 %9419 }
0x25b7   :  { %11437 = vrcp.f32 %v9420_v14 }
0x25c4   :  { %v11438_v36 = vpop.eup %11437 }
0x25c5   :  { %v9422_v12 = vmul.f32 %v11438_v36, %v11436_v41 }
0x25c7   :  { %9423 = vst.msk [vmem:[%s14186_s13] sm:$0xff] %vm9411_vm6, %v9422_v12 }

</bundles_post_ra>
